<compile_context>
chip_gen: v7x
topology: tpu7x:2x2x1
jax: 0.10.0
libtpu: 0.0.40
codegen_flags: <defaults>
</compile_context>

<pallas_src>
import jax
import jax.numpy as jnp
from jax import lax
from jax.experimental import pallas as pl
from jax.experimental.pallas import tpu as pltpu
import numpy as np


# ----------------------------- Pallas kernel --------------------------------

def _make_kernel(seq, bp, hp, in_dim, ncp):
    """seq: time steps (W); bp: padded batch rows for this program (mult of 8);
    hp: per-gate lane-padded hidden size (mult of 128); in_dim: GRU input size
    (H); ncp: lane-padded num_classes."""
    H3 = 3 * hp

    def kernel(x_ref,
               wih0_ref, whh0_ref, bi0_ref, bhn0_ref,
               wih1_ref, whh1_ref, bi1_ref, bhn1_ref,
               wfc_ref, bfc_ref,
               o_ref,
               g_scr, h_scr):
        # g_scr: (seq, bp, 3*hp)  layer-0 input->hidden gate pre-activations
        # h_scr: (seq, bp, hp)    layer-1 hidden-state history (FC input)

        # --- batched layer-0 input gates: one wide matmul over all steps ----
        x_rows = x_ref[...].reshape(seq * bp, in_dim)
        g0 = (jnp.dot(x_rows, wih0_ref[...],
                      preferred_element_type=jnp.float32) + bi0_ref[...])
        g_scr[...] = g0.reshape(seq, bp, H3)

        # Loop-invariant operands, hoisted (JAX does not CSE broadcast_in_dim,
        # so a per-step broadcast would be re-emitted in every unrolled step).
        whh0 = whh0_ref[...]
        whh1 = whh1_ref[...]
        wih1 = wih1_ref[...]
        bi1_b = jnp.broadcast_to(bi1_ref[...], (bp, H3))
        bhn0_b = jnp.broadcast_to(bhn0_ref[...], (bp, hp))
        bhn1_b = jnp.broadcast_to(bhn1_ref[...], (bp, hp))

        def cell(gi, gh, h, bhn_b):
            # r and z share one fused sigmoid over the first 2*hp lanes; every
            # slice lands on a 128-lane boundary (no XLU lane rotations).
            rz = jax.nn.sigmoid(gi[:, :2 * hp] + gh[:, :2 * hp])
            r = rz[:, :hp]
            z = rz[:, hp:]
            n = jnp.tanh(gi[:, 2 * hp:] + r * (gh[:, 2 * hp:] + bhn_b))
            return n + z * (h - n)                  # == (1 - z) * n + z * h

        def l0_step(t, h0):
            gh0 = jnp.dot(h0, whh0, preferred_element_type=jnp.float32)
            return cell(g_scr[t], gh0, h0, bhn0_b)

        def l1_step(h0_in, h1):
            gi1 = jnp.dot(h0_in, wih1,
                          preferred_element_type=jnp.float32) + bi1_b
            gh1 = jnp.dot(h1, whh1, preferred_element_type=jnp.float32)
            return cell(gi1, gh1, h1, bhn1_b)

        zeros_h = jnp.zeros((bp, hp), jnp.float32)

        # --- fused two-layer recurrence with a one-step skew ----------------
        # Iteration t produces h0_t and h1_{t-1}; the two cells inside an
        # iteration are data-independent, so their serial chains overlap.
        h0_0 = l0_step(0, zeros_h)                  # h0_0  (h_0 = zeros)

        def fused_step(t, carry):
            h0_prev, h1_prev = carry                # h0_{t-1}, h1_{t-2}
            h1_new = l1_step(h0_prev, h1_prev)      # h1_{t-1}
            h_scr[t - 1] = h1_new
            h0_new = l0_step(t, h0_prev)            # h0_t
            return (h0_new, h1_new)

        unroll = True if seq <= 33 else 8           # cap code size at long W
        h0_last, h1_prev = lax.fori_loop(1, seq, fused_step,
                                         (h0_0, zeros_h), unroll=unroll)

        # epilogue: layer-1 step for the final timestep
        h1_last = l1_step(h0_last, h1_prev)
        h_scr[seq - 1] = h1_last

        # --- FC head: one dense, lane-aligned matmul over the full history --
        hist = h_scr[...].reshape(seq * bp, hp)
        o = (jnp.dot(hist, wfc_ref[...],
                     preferred_element_type=jnp.float32) + bfc_ref[...])
        o_ref[...] = o.reshape(seq, bp, ncp).astype(o_ref.dtype)

    return kernel


# ----------------------------- wrapper ---------------------------------------

def _restack_params(params, hp, ncp):
    """[r,z,n]-stacked params -> fused, 128-lane-aligned layout.

    Each gate occupies its own hp-wide (>=128) lane block; r/z hidden biases
    are folded into the input-gate bias; FC weights padded to (hp, ncp).
    Padding is exact: padded rows/cols are zero so they never contribute to
    real lanes, and padded hidden lanes stay identically zero."""
    (wih0, whh0, bih0, bhh0, wih1, whh1, bih1, bhh1, wfc, bfc) = params
    hh = whh0.shape[-1]
    nc = wfc.shape[-1]

    def stack(wih, whh, bih, bhh, pad_in):
        wih_p = jnp.pad(wih, ((0, 0), (0, pad_in), (0, hp - hh)))
        whh_p = jnp.pad(whh, ((0, 0), (0, hp - hh), (0, hp - hh)))
        bih_p = jnp.pad(bih, ((0, 0), (0, 0), (0, hp - hh)))
        bhh_p = jnp.pad(bhh, ((0, 0), (0, 0), (0, hp - hh)))
        wih_all = jnp.concatenate([wih_p[0], wih_p[1], wih_p[2]], axis=1)
        whh_all = jnp.concatenate([whh_p[0], whh_p[1], whh_p[2]], axis=1)
        # r/z input and hidden biases always appear summed -> fold b_hh_{r,z}
        # into the input-gate bias; only b_hh_n stays separate (gated by r).
        bi_all = jnp.concatenate(
            [bih_p[0] + bhh_p[0], bih_p[1] + bhh_p[1], bih_p[2]], axis=1)
        return wih_all, whh_all, bi_all, bhh_p[2]

    l0 = stack(wih0, whh0, bih0, bhh0, pad_in=0)          # layer-0 input = H
    l1 = stack(wih1, whh1, bih1, bhh1, pad_in=hp - hh)    # layer-1 input = hp
    wfc_p = jnp.pad(wfc, ((0, hp - hh), (0, ncp - nc)))
    bfc_p = jnp.pad(bfc, ((0, 0), (0, ncp - nc)))
    return l0 + l1 + (wfc_p, bfc_p)


def gru_sequence_predictor(x_nchw, params, batch_shards=1):
    """x_nchw: (B, 1, H, W) float32.  Returns (W, B, num_classes).

    batch_shards > 1 splits the padded batch across a 'parallel' grid axis
    (use 2 on multi-TensorCore parts such as v7x when padded batch >= 16)."""
    B, C, H, W = x_nchw.shape
    assert C == 1
    hh = params[1].shape[-1]          # hidden size
    nc = params[8].shape[-1]          # num_classes
    hp = -(-hh // 128) * 128          # per-gate lane width (>= 128)
    ncp = -(-nc // 128) * 128         # lane-dense output width

    (wih0a, whh0a, bi0, bhn0,
     wih1a, whh1a, bi1, bhn1, wfc_p, bfc_p) = _restack_params(params, hp, ncp)
    weights = (wih0a, whh0a, bi0, bhn0, wih1a, whh1a, bi1, bhn1, wfc_p, bfc_p)

    # Padded batch rows per shard (multiple of 8 sublanes).  Padded rows evolve
    # independently (row-wise math only) and are sliced away below.
    per_shard = -(-B // batch_shards)
    bps = max(8, -(-per_shard // 8) * 8)
    bp = bps * batch_shards

    # _prepare_features_: squeeze(1) -> (B, H, W); permute(2, 0, 1) -> (W, B, H).
    # TODO(synk): for large CRNN feature maps fold this permute into the kernel
    #             (dot_general over the (B, H, W) layout) to avoid an extra HBM
    #             materialization of the transposed input.
    x_seq = jnp.transpose(jnp.squeeze(x_nchw, axis=1), (2, 0, 1))
    x_pad = jnp.pad(x_seq, ((0, 0), (0, bp - B), (0, 0))).astype(jnp.float32)

    # Explicit VMEM budget (keeps the whole-sequence-resident design inside
    # v7x's 64 MiB physical VMEM): double-buffered blocks + scratch + headroom.
    fbytes = lambda shape: int(np.prod(shape)) * 4
    need = (2 * (fbytes((W, bps, H)) + fbytes((W, bps, ncp)))
            + 2 * sum(fbytes(w.shape) for w in weights)
            + fbytes((W, bps, 3 * hp)) + fbytes((W, bps, hp)))
    vmem_limit = int(min(max(2 * need + (8 << 20), 32 << 20), 64 << 20))

    out = pl.pallas_call(
        _make_kernel(W, bps, hp, H, ncp),
        out_shape=jax.ShapeDtypeStruct((W, bp, ncp), jnp.float32),
        grid=(batch_shards,),
        in_specs=[pl.BlockSpec((W, bps, H), lambda i: (0, i, 0))]
                 + [pl.BlockSpec(w.shape, lambda i: (0, 0)) for w in weights],
        out_specs=pl.BlockSpec((W, bps, ncp), lambda i: (0, i, 0)),
        scratch_shapes=[pltpu.VMEM((W, bps, 3 * hp), jnp.float32),
                        pltpu.VMEM((W, bps, hp), jnp.float32)],
        compiler_params=pltpu.CompilerParams(
            dimension_semantics=("parallel",),
            vmem_limit_bytes=vmem_limit),
    )(x_pad, *weights)

    # (W, bp, ncp) -> drop padded batch rows and padded class lanes.
    return out[:, :B, :nc]


# ----------------------------- pure-JAX reference ----------------------------

def _ref_cell(x, h, wih, whh, bih, bhh):
    r = jax.nn.sigmoid(x @ wih[0] + bih[0] + h @ whh[0] + bhh[0])
    z = jax.nn.sigmoid(x @ wih[1] + bih[1] + h @ whh[1] + bhh[1])
    n = jnp.tanh(x @ wih[2] + bih[2] + r * (h @ whh[2] + bhh[2]))
    return (1.0 - z) * n + z * h


def gru_sequence_predictor_ref(x_nchw, params):
    (wih0, whh0, bih0, bhh0, wih1, whh1, bih1, bhh1, wfc, bfc) = params
    B = x_nchw.shape[0]
    Hh = whh0.shape[-1]
    x_seq = jnp.transpose(jnp.squeeze(x_nchw, axis=1), (2, 0, 1))

    def step(carry, x_t):
        h0, h1 = carry
        h0 = _ref_cell(x_t, h0, wih0, whh0, bih0, bhh0)
        h1 = _ref_cell(h0, h1, wih1, whh1, bih1, bhh1)
        return (h0, h1), h1

    init = (jnp.zeros((B, Hh), jnp.float32), jnp.zeros((B, Hh), jnp.float32))
    _, hs = lax.scan(step, init, x_seq)
    return hs @ wfc + bfc


# ----------------------------- driver ----------------------------------------

def make_params(key, input_size, hidden_size, num_classes):
    """Deterministic synthetic params (PyTorch-style uniform(-k, k), k=1/sqrt(H))."""
    k = 1.0 / np.sqrt(hidden_size)
    keys = jax.random.split(key, 10)
    u = lambda kk, shape: jax.random.uniform(kk, shape, jnp.float32, -k, k)
    wih0 = u(keys[0], (3, input_size, hidden_size))
    whh0 = u(keys[1], (3, hidden_size, hidden_size))
    bih0 = u(keys[2], (3, 1, hidden_size))
    bhh0 = u(keys[3], (3, 1, hidden_size))
    wih1 = u(keys[4], (3, hidden_size, hidden_size))
    whh1 = u(keys[5], (3, hidden_size, hidden_size))
    bih1 = u(keys[6], (3, 1, hidden_size))
    bhh1 = u(keys[7], (3, 1, hidden_size))
    kf = 1.0 / np.sqrt(hidden_size)
    wfc = jax.random.uniform(keys[8], (hidden_size, num_classes), jnp.float32, -kf, kf)
    bfc = jax.random.uniform(keys[9], (1, num_classes), jnp.float32, -kf, kf)
    return (wih0, whh0, bih0, bhh0, wih1, whh1, bih1, bhh1, wfc, bfc)


if __name__ == "__main__":
    # Small shapes consistent with the module: B=2, C=1, H=input_size=16, W=seq=16
    B, Cc, H, W = 2, 1, 16, 16
    hidden_size, num_layers, num_classes = 32, 2, 8

    key = jax.random.PRNGKey(0)
    kx, kp = jax.random.split(key)
    x = jax.random.normal(kx, (B, Cc, H, W), jnp.float32)
    params = make_params(kp, H, hidden_size, num_classes)

    out = gru_sequence_predictor(x, params)
    out = jax.block_until_ready(out)

    ref = jax.block_until_ready(gru_sequence_predictor_ref(x, params))
    assert out.shape == (W, B, num_classes), out.shape
    np.testing.assert_allclose(np.asarray(out), np.asarray(ref), atol=1e-4, rtol=1e-4)

    print("KERNEL_OK")
</pallas_src>

<mosaic_0001>
module attributes {stable_mosaic.version = 11 : i64} {
  func.func @kernel(%arg0: i32, %arg1: memref<16x8x16xf32, #tpu.memory_space<vmem>>, %arg2: memref<16x384xf32, #tpu.memory_space<vmem>>, %arg3: memref<128x384xf32, #tpu.memory_space<vmem>>, %arg4: memref<1x384xf32, #tpu.memory_space<vmem>>, %arg5: memref<1x128xf32, #tpu.memory_space<vmem>>, %arg6: memref<128x384xf32, #tpu.memory_space<vmem>>, %arg7: memref<128x384xf32, #tpu.memory_space<vmem>>, %arg8: memref<1x384xf32, #tpu.memory_space<vmem>>, %arg9: memref<1x128xf32, #tpu.memory_space<vmem>>, %arg10: memref<128x128xf32, #tpu.memory_space<vmem>>, %arg11: memref<1x128xf32, #tpu.memory_space<vmem>>, %arg12: memref<16x8x128xf32, #tpu.memory_space<vmem>>, %arg13: memref<16x8x384xf32, #tpu.memory_space<vmem>>, %arg14: memref<16x8x128xf32, #tpu.memory_space<vmem>>) attributes {dimension_semantics = [#tpu.dimension_semantics<parallel>], iteration_bounds = array<i64: 1>, scalar_prefetch = 0 : i64, scratch_operands = 2 : i64, tpu.core_type = #tpu.core_type<tc>, window_params = [{transform_indices = @transform_0, window_bounds = array<i64: 16, 8, 16>}, {pipeline_mode = #tpu.pipeline_mode<synchronous>, transform_indices = @transform_1, window_bounds = array<i64: 16, 384>}, {pipeline_mode = #tpu.pipeline_mode<synchronous>, transform_indices = @transform_2, window_bounds = array<i64: 128, 384>}, {pipeline_mode = #tpu.pipeline_mode<synchronous>, transform_indices = @transform_3, window_bounds = array<i64: 1, 384>}, {pipeline_mode = #tpu.pipeline_mode<synchronous>, transform_indices = @transform_4, window_bounds = array<i64: 1, 128>}, {pipeline_mode = #tpu.pipeline_mode<synchronous>, transform_indices = @transform_5, window_bounds = array<i64: 128, 384>}, {pipeline_mode = #tpu.pipeline_mode<synchronous>, transform_indices = @transform_6, window_bounds = array<i64: 128, 384>}, {pipeline_mode = #tpu.pipeline_mode<synchronous>, transform_indices = @transform_7, window_bounds = array<i64: 1, 384>}, {pipeline_mode = #tpu.pipeline_mode<synchronous>, transform_indices = @transform_8, window_bounds = array<i64: 1, 128>}, {pipeline_mode = #tpu.pipeline_mode<synchronous>, transform_indices = @transform_9, window_bounds = array<i64: 128, 128>}, {pipeline_mode = #tpu.pipeline_mode<synchronous>, transform_indices = @transform_10, window_bounds = array<i64: 1, 128>}, {transform_indices = @transform_11, window_bounds = array<i64: 16, 8, 128>}]} {
    %c0 = arith.constant 0 : index
    %c0_0 = arith.constant 0 : index
    %c0_1 = arith.constant 0 : index
    %0 = vector.load %arg1[%c0, %c0_0, %c0_1] : memref<16x8x16xf32, #tpu.memory_space<vmem>>, vector<16x8x16xf32>
    %1 = vector.shape_cast %0 : vector<16x8x16xf32> to vector<128x16xf32>
    %c0_2 = arith.constant 0 : index
    %c0_3 = arith.constant 0 : index
    %2 = vector.load %arg2[%c0_2, %c0_3] : memref<16x384xf32, #tpu.memory_space<vmem>>, vector<16x384xf32>
    %cst = arith.constant dense<0.000000e+00> : vector<128x384xf32>
    %3 = tpu.matmul %1, %2, %cst {dimension_numbers = #tpu.dot_dimension_numbers<[1], [0], [0], [1], [0, 0, 1, 1], [], []>} : vector<128x16xf32>, vector<16x384xf32>, vector<128x384xf32> -> vector<128x384xf32>
    %c0_4 = arith.constant 0 : index
    %c0_5 = arith.constant 0 : index
    %4 = vector.load %arg4[%c0_4, %c0_5] : memref<1x384xf32, #tpu.memory_space<vmem>>, vector<1x384xf32>
    %5 = vector.broadcast %4 : vector<1x384xf32> to vector<128x384xf32>
    %6 = arith.addf %3, %5 : vector<128x384xf32>
    %7 = vector.shape_cast %6 : vector<128x384xf32> to vector<16x8x384xf32>
    %c0_6 = arith.constant 0 : index
    %c0_7 = arith.constant 0 : index
    %c0_8 = arith.constant 0 : index
    %8 = vector.load %arg13[%c0_6, %c0_7, %c0_8] : memref<16x8x384xf32, #tpu.memory_space<vmem>>, vector<16x8x384xf32>
    tpu.vector_store %arg13[%c0_6, %c0_7, %c0_8], %7 {strides = array<i32>} : memref<16x8x384xf32, #tpu.memory_space<vmem>>, vector<16x8x384xf32>,
    %c0_9 = arith.constant 0 : index
    %c0_10 = arith.constant 0 : index
    %9 = vector.load %arg3[%c0_9, %c0_10] : memref<128x384xf32, #tpu.memory_space<vmem>>, vector<128x384xf32>
    %c0_11 = arith.constant 0 : index
    %c0_12 = arith.constant 0 : index
    %10 = vector.load %arg7[%c0_11, %c0_12] : memref<128x384xf32, #tpu.memory_space<vmem>>, vector<128x384xf32>
    %c0_13 = arith.constant 0 : index
    %c0_14 = arith.constant 0 : index
    %11 = vector.load %arg6[%c0_13, %c0_14] : memref<128x384xf32, #tpu.memory_space<vmem>>, vector<128x384xf32>
    %c0_15 = arith.constant 0 : index
    %c0_16 = arith.constant 0 : index
    %12 = vector.load %arg8[%c0_15, %c0_16] : memref<1x384xf32, #tpu.memory_space<vmem>>, vector<1x384xf32>
    %13 = vector.shape_cast %12 : vector<1x384xf32> to vector<1x384xf32>
    %14 = vector.broadcast %13 : vector<1x384xf32> to vector<8x384xf32>
    %c0_17 = arith.constant 0 : index
    %c0_18 = arith.constant 0 : index
    %15 = vector.load %arg5[%c0_17, %c0_18] : memref<1x128xf32, #tpu.memory_space<vmem>>, vector<1x128xf32>
    %16 = vector.shape_cast %15 : vector<1x128xf32> to vector<1x128xf32>
    %17 = vector.broadcast %16 : vector<1x128xf32> to vector<8x128xf32>
    %c0_19 = arith.constant 0 : index
    %c0_20 = arith.constant 0 : index
    %18 = vector.load %arg9[%c0_19, %c0_20] : memref<1x128xf32, #tpu.memory_space<vmem>>, vector<1x128xf32>
    %19 = vector.shape_cast %18 : vector<1x128xf32> to vector<1x128xf32>
    %20 = vector.broadcast %19 : vector<1x128xf32> to vector<8x128xf32>
    %cst_21 = arith.constant 0.000000e+00 : f32
    %21 = vector.broadcast %cst_21 : f32 to vector<8x128xf32>
    %cst_22 = arith.constant dense<0.000000e+00> : vector<8x384xf32>
    %22 = tpu.matmul %21, %9, %cst_22 {dimension_numbers = #tpu.dot_dimension_numbers<[1], [0], [0], [1], [0, 0, 1, 1], [], []>} : vector<8x128xf32>, vector<128x384xf32>, vector<8x384xf32> -> vector<8x384xf32>
    %c0_23 = arith.constant 0 : index
    %c0_24 = arith.constant 0 : index
    %c0_25 = arith.constant 0 : index
    %23 = vector.load %arg13[%c0_23, %c0_24, %c0_25] : memref<16x8x384xf32, #tpu.memory_space<vmem>>, vector<1x8x384xf32>
    %24 = vector.shape_cast %23 : vector<1x8x384xf32> to vector<8x384xf32>
    %25 = vector.extract_strided_slice %24 {offsets = [0, 0], sizes = [8, 256], strides = [1, 1]} : vector<8x384xf32> to vector<8x256xf32>
    %26 = vector.extract_strided_slice %22 {offsets = [0, 0], sizes = [8, 256], strides = [1, 1]} : vector<8x384xf32> to vector<8x256xf32>
    %27 = arith.addf %25, %26 : vector<8x256xf32>
    %28 = arith.negf %27 : vector<8x256xf32>
    %29 = math.exp %28 : vector<8x256xf32>
    %cst_26 = arith.constant 1.000000e+00 : f32
    %30 = vector.broadcast %cst_26 : f32 to vector<8x256xf32>
    %31 = arith.addf %30, %29 : vector<8x256xf32>
    %32 = arith.divf %30, %31 : vector<8x256xf32>
    %33 = vector.extract_strided_slice %32 {offsets = [0, 0], sizes = [8, 128], strides = [1, 1]} : vector<8x256xf32> to vector<8x128xf32>
    %34 = vector.extract_strided_slice %32 {offsets = [0, 128], sizes = [8, 128], strides = [1, 1]} : vector<8x256xf32> to vector<8x128xf32>
    %35 = vector.extract_strided_slice %24 {offsets = [0, 256], sizes = [8, 128], strides = [1, 1]} : vector<8x384xf32> to vector<8x128xf32>
    %36 = vector.extract_strided_slice %22 {offsets = [0, 256], sizes = [8, 128], strides = [1, 1]} : vector<8x384xf32> to vector<8x128xf32>
    %37 = arith.addf %36, %17 : vector<8x128xf32>
    %38 = arith.mulf %33, %37 : vector<8x128xf32>
    %39 = arith.addf %35, %38 : vector<8x128xf32>
    %40 = math.tanh %39 : vector<8x128xf32>
    %41 = arith.subf %21, %40 : vector<8x128xf32>
    %42 = arith.mulf %34, %41 : vector<8x128xf32>
    %43 = arith.addf %40, %42 : vector<8x128xf32>
    %c1_i32 = arith.constant 1 : i32
    %cst_27 = arith.constant dense<0.000000e+00> : vector<8x384xf32>
    %44 = tpu.matmul %43, %11, %cst_27 {dimension_numbers = #tpu.dot_dimension_numbers<[1], [0], [0], [1], [0, 0, 1, 1], [], []>} : vector<8x128xf32>, vector<128x384xf32>, vector<8x384xf32> -> vector<8x384xf32>
    %45 = arith.addf %44, %14 : vector<8x384xf32>
    %cst_28 = arith.constant dense<0.000000e+00> : vector<8x384xf32>
    %46 = tpu.matmul %21, %10, %cst_28 {dimension_numbers = #tpu.dot_dimension_numbers<[1], [0], [0], [1], [0, 0, 1, 1], [], []>} : vector<8x128xf32>, vector<128x384xf32>, vector<8x384xf32> -> vector<8x384xf32>
    %47 = vector.extract_strided_slice %45 {offsets = [0, 0], sizes = [8, 256], strides = [1, 1]} : vector<8x384xf32> to vector<8x256xf32>
    %48 = vector.extract_strided_slice %46 {offsets = [0, 0], sizes = [8, 256], strides = [1, 1]} : vector<8x384xf32> to vector<8x256xf32>
    %49 = arith.addf %47, %48 : vector<8x256xf32>
    %50 = arith.negf %49 : vector<8x256xf32>
    %51 = math.exp %50 : vector<8x256xf32>
    %cst_29 = arith.constant 1.000000e+00 : f32
    %52 = vector.broadcast %cst_29 : f32 to vector<8x256xf32>
    %53 = arith.addf %52, %51 : vector<8x256xf32>
    %54 = arith.divf %52, %53 : vector<8x256xf32>
    %55 = vector.extract_strided_slice %54 {offsets = [0, 0], sizes = [8, 128], strides = [1, 1]} : vector<8x256xf32> to vector<8x128xf32>
    %56 = vector.extract_strided_slice %54 {offsets = [0, 128], sizes = [8, 128], strides = [1, 1]} : vector<8x256xf32> to vector<8x128xf32>
    %57 = vector.extract_strided_slice %45 {offsets = [0, 256], sizes = [8, 128], strides = [1, 1]} : vector<8x384xf32> to vector<8x128xf32>
    %58 = vector.extract_strided_slice %46 {offsets = [0, 256], sizes = [8, 128], strides = [1, 1]} : vector<8x384xf32> to vector<8x128xf32>
    %59 = arith.addf %58, %20 : vector<8x128xf32>
    %60 = arith.mulf %55, %59 : vector<8x128xf32>
    %61 = arith.addf %57, %60 : vector<8x128xf32>
    %62 = math.tanh %61 : vector<8x128xf32>
    %63 = arith.subf %21, %62 : vector<8x128xf32>
    %64 = arith.mulf %56, %63 : vector<8x128xf32>
    %65 = arith.addf %62, %64 : vector<8x128xf32>
    %c1_i32_30 = arith.constant 1 : i32
    %66 = arith.subi %c1_i32, %c1_i32_30 : i32
    %67 = arith.index_cast %66 : i32 to index
    %c0_31 = arith.constant 0 : index
    %c0_32 = arith.constant 0 : index
    %68 = vector.load %arg14[%67, %c0_31, %c0_32] : memref<16x8x128xf32, #tpu.memory_space<vmem>>, vector<1x8x128xf32>
    %69 = vector.shape_cast %68 : vector<1x8x128xf32> to vector<8x128xf32>
    %70 = vector.shape_cast %65 : vector<8x128xf32> to vector<1x8x128xf32>
    tpu.vector_store %arg14[%67, %c0_31, %c0_32], %70 {strides = array<i32>} : memref<16x8x128xf32, #tpu.memory_space<vmem>>, vector<1x8x128xf32>,
    %cst_33 = arith.constant dense<0.000000e+00> : vector<8x384xf32>
    %71 = tpu.matmul %43, %9, %cst_33 {dimension_numbers = #tpu.dot_dimension_numbers<[1], [0], [0], [1], [0, 0, 1, 1], [], []>} : vector<8x128xf32>, vector<128x384xf32>, vector<8x384xf32> -> vector<8x384xf32>
    %72 = arith.index_cast %c1_i32 : i32 to index
    %c0_34 = arith.constant 0 : index
    %c0_35 = arith.constant 0 : index
    %73 = vector.load %arg13[%72, %c0_34, %c0_35] : memref<16x8x384xf32, #tpu.memory_space<vmem>>, vector<1x8x384xf32>
    %74 = vector.shape_cast %73 : vector<1x8x384xf32> to vector<8x384xf32>
    %75 = vector.extract_strided_slice %74 {offsets = [0, 0], sizes = [8, 256], strides = [1, 1]} : vector<8x384xf32> to vector<8x256xf32>
    %76 = vector.extract_strided_slice %71 {offsets = [0, 0], sizes = [8, 256], strides = [1, 1]} : vector<8x384xf32> to vector<8x256xf32>
    %77 = arith.addf %75, %76 : vector<8x256xf32>
    %78 = arith.negf %77 : vector<8x256xf32>
    %79 = math.exp %78 : vector<8x256xf32>
    %cst_36 = arith.constant 1.000000e+00 : f32
    %80 = vector.broadcast %cst_36 : f32 to vector<8x256xf32>
    %81 = arith.addf %80, %79 : vector<8x256xf32>
    %82 = arith.divf %80, %81 : vector<8x256xf32>
    %83 = vector.extract_strided_slice %82 {offsets = [0, 0], sizes = [8, 128], strides = [1, 1]} : vector<8x256xf32> to vector<8x128xf32>
    %84 = vector.extract_strided_slice %82 {offsets = [0, 128], sizes = [8, 128], strides = [1, 1]} : vector<8x256xf32> to vector<8x128xf32>
    %85 = vector.extract_strided_slice %74 {offsets = [0, 256], sizes = [8, 128], strides = [1, 1]} : vector<8x384xf32> to vector<8x128xf32>
    %86 = vector.extract_strided_slice %71 {offsets = [0, 256], sizes = [8, 128], strides = [1, 1]} : vector<8x384xf32> to vector<8x128xf32>
    %87 = arith.addf %86, %17 : vector<8x128xf32>
    %88 = arith.mulf %83, %87 : vector<8x128xf32>
    %89 = arith.addf %85, %88 : vector<8x128xf32>
    %90 = math.tanh %89 : vector<8x128xf32>
    %91 = arith.subf %43, %90 : vector<8x128xf32>
    %92 = arith.mulf %84, %91 : vector<8x128xf32>
    %93 = arith.addf %90, %92 : vector<8x128xf32>
    %c2_i32 = arith.constant 2 : i32
    %cst_37 = arith.constant dense<0.000000e+00> : vector<8x384xf32>
    %94 = tpu.matmul %93, %11, %cst_37 {dimension_numbers = #tpu.dot_dimension_numbers<[1], [0], [0], [1], [0, 0, 1, 1], [], []>} : vector<8x128xf32>, vector<128x384xf32>, vector<8x384xf32> -> vector<8x384xf32>
    %95 = arith.addf %94, %14 : vector<8x384xf32>
    %cst_38 = arith.constant dense<0.000000e+00> : vector<8x384xf32>
    %96 = tpu.matmul %65, %10, %cst_38 {dimension_numbers = #tpu.dot_dimension_numbers<[1], [0], [0], [1], [0, 0, 1, 1], [], []>} : vector<8x128xf32>, vector<128x384xf32>, vector<8x384xf32> -> vector<8x384xf32>
    %97 = vector.extract_strided_slice %95 {offsets = [0, 0], sizes = [8, 256], strides = [1, 1]} : vector<8x384xf32> to vector<8x256xf32>
    %98 = vector.extract_strided_slice %96 {offsets = [0, 0], sizes = [8, 256], strides = [1, 1]} : vector<8x384xf32> to vector<8x256xf32>
    %99 = arith.addf %97, %98 : vector<8x256xf32>
    %100 = arith.negf %99 : vector<8x256xf32>
    %101 = math.exp %100 : vector<8x256xf32>
    %cst_39 = arith.constant 1.000000e+00 : f32
    %102 = vector.broadcast %cst_39 : f32 to vector<8x256xf32>
    %103 = arith.addf %102, %101 : vector<8x256xf32>
    %104 = arith.divf %102, %103 : vector<8x256xf32>
    %105 = vector.extract_strided_slice %104 {offsets = [0, 0], sizes = [8, 128], strides = [1, 1]} : vector<8x256xf32> to vector<8x128xf32>
    %106 = vector.extract_strided_slice %104 {offsets = [0, 128], sizes = [8, 128], strides = [1, 1]} : vector<8x256xf32> to vector<8x128xf32>
    %107 = vector.extract_strided_slice %95 {offsets = [0, 256], sizes = [8, 128], strides = [1, 1]} : vector<8x384xf32> to vector<8x128xf32>
    %108 = vector.extract_strided_slice %96 {offsets = [0, 256], sizes = [8, 128], strides = [1, 1]} : vector<8x384xf32> to vector<8x128xf32>
    %109 = arith.addf %108, %20 : vector<8x128xf32>
    %110 = arith.mulf %105, %109 : vector<8x128xf32>
    %111 = arith.addf %107, %110 : vector<8x128xf32>
    %112 = math.tanh %111 : vector<8x128xf32>
    %113 = arith.subf %65, %112 : vector<8x128xf32>
    %114 = arith.mulf %106, %113 : vector<8x128xf32>
    %115 = arith.addf %112, %114 : vector<8x128xf32>
    %c1_i32_40 = arith.constant 1 : i32
    %116 = arith.subi %c2_i32, %c1_i32_40 : i32
    %117 = arith.index_cast %116 : i32 to index
    %c0_41 = arith.constant 0 : index
    %c0_42 = arith.constant 0 : index
    %118 = vector.load %arg14[%117, %c0_41, %c0_42] : memref<16x8x128xf32, #tpu.memory_space<vmem>>, vector<1x8x128xf32>
    %119 = vector.shape_cast %118 : vector<1x8x128xf32> to vector<8x128xf32>
    %120 = vector.shape_cast %115 : vector<8x128xf32> to vector<1x8x128xf32>
    tpu.vector_store %arg14[%117, %c0_41, %c0_42], %120 {strides = array<i32>} : memref<16x8x128xf32, #tpu.memory_space<vmem>>, vector<1x8x128xf32>,
    %cst_43 = arith.constant dense<0.000000e+00> : vector<8x384xf32>
    %121 = tpu.matmul %93, %9, %cst_43 {dimension_numbers = #tpu.dot_dimension_numbers<[1], [0], [0], [1], [0, 0, 1, 1], [], []>} : vector<8x128xf32>, vector<128x384xf32>, vector<8x384xf32> -> vector<8x384xf32>
    %122 = arith.index_cast %c2_i32 : i32 to index
    %c0_44 = arith.constant 0 : index
    %c0_45 = arith.constant 0 : index
    %123 = vector.load %arg13[%122, %c0_44, %c0_45] : memref<16x8x384xf32, #tpu.memory_space<vmem>>, vector<1x8x384xf32>
    %124 = vector.shape_cast %123 : vector<1x8x384xf32> to vector<8x384xf32>
    %125 = vector.extract_strided_slice %124 {offsets = [0, 0], sizes = [8, 256], strides = [1, 1]} : vector<8x384xf32> to vector<8x256xf32>
    %126 = vector.extract_strided_slice %121 {offsets = [0, 0], sizes = [8, 256], strides = [1, 1]} : vector<8x384xf32> to vector<8x256xf32>
    %127 = arith.addf %125, %126 : vector<8x256xf32>
    %128 = arith.negf %127 : vector<8x256xf32>
    %129 = math.exp %128 : vector<8x256xf32>
    %cst_46 = arith.constant 1.000000e+00 : f32
    %130 = vector.broadcast %cst_46 : f32 to vector<8x256xf32>
    %131 = arith.addf %130, %129 : vector<8x256xf32>
    %132 = arith.divf %130, %131 : vector<8x256xf32>
    %133 = vector.extract_strided_slice %132 {offsets = [0, 0], sizes = [8, 128], strides = [1, 1]} : vector<8x256xf32> to vector<8x128xf32>
    %134 = vector.extract_strided_slice %132 {offsets = [0, 128], sizes = [8, 128], strides = [1, 1]} : vector<8x256xf32> to vector<8x128xf32>
    %135 = vector.extract_strided_slice %124 {offsets = [0, 256], sizes = [8, 128], strides = [1, 1]} : vector<8x384xf32> to vector<8x128xf32>
    %136 = vector.extract_strided_slice %121 {offsets = [0, 256], sizes = [8, 128], strides = [1, 1]} : vector<8x384xf32> to vector<8x128xf32>
    %137 = arith.addf %136, %17 : vector<8x128xf32>
    %138 = arith.mulf %133, %137 : vector<8x128xf32>
    %139 = arith.addf %135, %138 : vector<8x128xf32>
    %140 = math.tanh %139 : vector<8x128xf32>
    %141 = arith.subf %93, %140 : vector<8x128xf32>
    %142 = arith.mulf %134, %141 : vector<8x128xf32>
    %143 = arith.addf %140, %142 : vector<8x128xf32>
    %c3_i32 = arith.constant 3 : i32
    %cst_47 = arith.constant dense<0.000000e+00> : vector<8x384xf32>
    %144 = tpu.matmul %143, %11, %cst_47 {dimension_numbers = #tpu.dot_dimension_numbers<[1], [0], [0], [1], [0, 0, 1, 1], [], []>} : vector<8x128xf32>, vector<128x384xf32>, vector<8x384xf32> -> vector<8x384xf32>
    %145 = arith.addf %144, %14 : vector<8x384xf32>
    %cst_48 = arith.constant dense<0.000000e+00> : vector<8x384xf32>
    %146 = tpu.matmul %115, %10, %cst_48 {dimension_numbers = #tpu.dot_dimension_numbers<[1], [0], [0], [1], [0, 0, 1, 1], [], []>} : vector<8x128xf32>, vector<128x384xf32>, vector<8x384xf32> -> vector<8x384xf32>
    %147 = vector.extract_strided_slice %145 {offsets = [0, 0], sizes = [8, 256], strides = [1, 1]} : vector<8x384xf32> to vector<8x256xf32>
    %148 = vector.extract_strided_slice %146 {offsets = [0, 0], sizes = [8, 256], strides = [1, 1]} : vector<8x384xf32> to vector<8x256xf32>
    %149 = arith.addf %147, %148 : vector<8x256xf32>
    %150 = arith.negf %149 : vector<8x256xf32>
    %151 = math.exp %150 : vector<8x256xf32>
    %cst_49 = arith.constant 1.000000e+00 : f32
    %152 = vector.broadcast %cst_49 : f32 to vector<8x256xf32>
    %153 = arith.addf %152, %151 : vector<8x256xf32>
    %154 = arith.divf %152, %153 : vector<8x256xf32>
    %155 = vector.extract_strided_slice %154 {offsets = [0, 0], sizes = [8, 128], strides = [1, 1]} : vector<8x256xf32> to vector<8x128xf32>
    %156 = vector.extract_strided_slice %154 {offsets = [0, 128], sizes = [8, 128], strides = [1, 1]} : vector<8x256xf32> to vector<8x128xf32>
    %157 = vector.extract_strided_slice %145 {offsets = [0, 256], sizes = [8, 128], strides = [1, 1]} : vector<8x384xf32> to vector<8x128xf32>
    %158 = vector.extract_strided_slice %146 {offsets = [0, 256], sizes = [8, 128], strides = [1, 1]} : vector<8x384xf32> to vector<8x128xf32>
    %159 = arith.addf %158, %20 : vector<8x128xf32>
    %160 = arith.mulf %155, %159 : vector<8x128xf32>
    %161 = arith.addf %157, %160 : vector<8x128xf32>
    %162 = math.tanh %161 : vector<8x128xf32>
    %163 = arith.subf %115, %162 : vector<8x128xf32>
    %164 = arith.mulf %156, %163 : vector<8x128xf32>
    %165 = arith.addf %162, %164 : vector<8x128xf32>
    %c1_i32_50 = arith.constant 1 : i32
    %166 = arith.subi %c3_i32, %c1_i32_50 : i32
    %167 = arith.index_cast %166 : i32 to index
    %c0_51 = arith.constant 0 : index
    %c0_52 = arith.constant 0 : index
    %168 = vector.load %arg14[%167, %c0_51, %c0_52] : memref<16x8x128xf32, #tpu.memory_space<vmem>>, vector<1x8x128xf32>
    %169 = vector.shape_cast %168 : vector<1x8x128xf32> to vector<8x128xf32>
    %170 = vector.shape_cast %165 : vector<8x128xf32> to vector<1x8x128xf32>
    tpu.vector_store %arg14[%167, %c0_51, %c0_52], %170 {strides = array<i32>} : memref<16x8x128xf32, #tpu.memory_space<vmem>>, vector<1x8x128xf32>,
    %cst_53 = arith.constant dense<0.000000e+00> : vector<8x384xf32>
    %171 = tpu.matmul %143, %9, %cst_53 {dimension_numbers = #tpu.dot_dimension_numbers<[1], [0], [0], [1], [0, 0, 1, 1], [], []>} : vector<8x128xf32>, vector<128x384xf32>, vector<8x384xf32> -> vector<8x384xf32>
    %172 = arith.index_cast %c3_i32 : i32 to index
    %c0_54 = arith.constant 0 : index
    %c0_55 = arith.constant 0 : index
    %173 = vector.load %arg13[%172, %c0_54, %c0_55] : memref<16x8x384xf32, #tpu.memory_space<vmem>>, vector<1x8x384xf32>
    %174 = vector.shape_cast %173 : vector<1x8x384xf32> to vector<8x384xf32>
    %175 = vector.extract_strided_slice %174 {offsets = [0, 0], sizes = [8, 256], strides = [1, 1]} : vector<8x384xf32> to vector<8x256xf32>
    %176 = vector.extract_strided_slice %171 {offsets = [0, 0], sizes = [8, 256], strides = [1, 1]} : vector<8x384xf32> to vector<8x256xf32>
    %177 = arith.addf %175, %176 : vector<8x256xf32>
    %178 = arith.negf %177 : vector<8x256xf32>
    %179 = math.exp %178 : vector<8x256xf32>
    %cst_56 = arith.constant 1.000000e+00 : f32
    %180 = vector.broadcast %cst_56 : f32 to vector<8x256xf32>
    %181 = arith.addf %180, %179 : vector<8x256xf32>
    %182 = arith.divf %180, %181 : vector<8x256xf32>
    %183 = vector.extract_strided_slice %182 {offsets = [0, 0], sizes = [8, 128], strides = [1, 1]} : vector<8x256xf32> to vector<8x128xf32>
    %184 = vector.extract_strided_slice %182 {offsets = [0, 128], sizes = [8, 128], strides = [1, 1]} : vector<8x256xf32> to vector<8x128xf32>
    %185 = vector.extract_strided_slice %174 {offsets = [0, 256], sizes = [8, 128], strides = [1, 1]} : vector<8x384xf32> to vector<8x128xf32>
    %186 = vector.extract_strided_slice %171 {offsets = [0, 256], sizes = [8, 128], strides = [1, 1]} : vector<8x384xf32> to vector<8x128xf32>
    %187 = arith.addf %186, %17 : vector<8x128xf32>
    %188 = arith.mulf %183, %187 : vector<8x128xf32>
    %189 = arith.addf %185, %188 : vector<8x128xf32>
    %190 = math.tanh %189 : vector<8x128xf32>
    %191 = arith.subf %143, %190 : vector<8x128xf32>
    %192 = arith.mulf %184, %191 : vector<8x128xf32>
    %193 = arith.addf %190, %192 : vector<8x128xf32>
    %c4_i32 = arith.constant 4 : i32
    %cst_57 = arith.constant dense<0.000000e+00> : vector<8x384xf32>
    %194 = tpu.matmul %193, %11, %cst_57 {dimension_numbers = #tpu.dot_dimension_numbers<[1], [0], [0], [1], [0, 0, 1, 1], [], []>} : vector<8x128xf32>, vector<128x384xf32>, vector<8x384xf32> -> vector<8x384xf32>
    %195 = arith.addf %194, %14 : vector<8x384xf32>
    %cst_58 = arith.constant dense<0.000000e+00> : vector<8x384xf32>
    %196 = tpu.matmul %165, %10, %cst_58 {dimension_numbers = #tpu.dot_dimension_numbers<[1], [0], [0], [1], [0, 0, 1, 1], [], []>} : vector<8x128xf32>, vector<128x384xf32>, vector<8x384xf32> -> vector<8x384xf32>
    %197 = vector.extract_strided_slice %195 {offsets = [0, 0], sizes = [8, 256], strides = [1, 1]} : vector<8x384xf32> to vector<8x256xf32>
    %198 = vector.extract_strided_slice %196 {offsets = [0, 0], sizes = [8, 256], strides = [1, 1]} : vector<8x384xf32> to vector<8x256xf32>
    %199 = arith.addf %197, %198 : vector<8x256xf32>
    %200 = arith.negf %199 : vector<8x256xf32>
    %201 = math.exp %200 : vector<8x256xf32>
    %cst_59 = arith.constant 1.000000e+00 : f32
    %202 = vector.broadcast %cst_59 : f32 to vector<8x256xf32>
    %203 = arith.addf %202, %201 : vector<8x256xf32>
    %204 = arith.divf %202, %203 : vector<8x256xf32>
    %205 = vector.extract_strided_slice %204 {offsets = [0, 0], sizes = [8, 128], strides = [1, 1]} : vector<8x256xf32> to vector<8x128xf32>
    %206 = vector.extract_strided_slice %204 {offsets = [0, 128], sizes = [8, 128], strides = [1, 1]} : vector<8x256xf32> to vector<8x128xf32>
    %207 = vector.extract_strided_slice %195 {offsets = [0, 256], sizes = [8, 128], strides = [1, 1]} : vector<8x384xf32> to vector<8x128xf32>
    %208 = vector.extract_strided_slice %196 {offsets = [0, 256], sizes = [8, 128], strides = [1, 1]} : vector<8x384xf32> to vector<8x128xf32>
    %209 = arith.addf %208, %20 : vector<8x128xf32>
    %210 = arith.mulf %205, %209 : vector<8x128xf32>
    %211 = arith.addf %207, %210 : vector<8x128xf32>
    %212 = math.tanh %211 : vector<8x128xf32>
    %213 = arith.subf %165, %212 : vector<8x128xf32>
    %214 = arith.mulf %206, %213 : vector<8x128xf32>
    %215 = arith.addf %212, %214 : vector<8x128xf32>
    %c1_i32_60 = arith.constant 1 : i32
    %216 = arith.subi %c4_i32, %c1_i32_60 : i32
    %217 = arith.index_cast %216 : i32 to index
    %c0_61 = arith.constant 0 : index
    %c0_62 = arith.constant 0 : index
    %218 = vector.load %arg14[%217, %c0_61, %c0_62] : memref<16x8x128xf32, #tpu.memory_space<vmem>>, vector<1x8x128xf32>
    %219 = vector.shape_cast %218 : vector<1x8x128xf32> to vector<8x128xf32>
    %220 = vector.shape_cast %215 : vector<8x128xf32> to vector<1x8x128xf32>
    tpu.vector_store %arg14[%217, %c0_61, %c0_62], %220 {strides = array<i32>} : memref<16x8x128xf32, #tpu.memory_space<vmem>>, vector<1x8x128xf32>,
    %cst_63 = arith.constant dense<0.000000e+00> : vector<8x384xf32>
    %221 = tpu.matmul %193, %9, %cst_63 {dimension_numbers = #tpu.dot_dimension_numbers<[1], [0], [0], [1], [0, 0, 1, 1], [], []>} : vector<8x128xf32>, vector<128x384xf32>, vector<8x384xf32> -> vector<8x384xf32>
    %222 = arith.index_cast %c4_i32 : i32 to index
    %c0_64 = arith.constant 0 : index
    %c0_65 = arith.constant 0 : index
    %223 = vector.load %arg13[%222, %c0_64, %c0_65] : memref<16x8x384xf32, #tpu.memory_space<vmem>>, vector<1x8x384xf32>
    %224 = vector.shape_cast %223 : vector<1x8x384xf32> to vector<8x384xf32>
    %225 = vector.extract_strided_slice %224 {offsets = [0, 0], sizes = [8, 256], strides = [1, 1]} : vector<8x384xf32> to vector<8x256xf32>
    %226 = vector.extract_strided_slice %221 {offsets = [0, 0], sizes = [8, 256], strides = [1, 1]} : vector<8x384xf32> to vector<8x256xf32>
    %227 = arith.addf %225, %226 : vector<8x256xf32>
    %228 = arith.negf %227 : vector<8x256xf32>
    %229 = math.exp %228 : vector<8x256xf32>
    %cst_66 = arith.constant 1.000000e+00 : f32
    %230 = vector.broadcast %cst_66 : f32 to vector<8x256xf32>
    %231 = arith.addf %230, %229 : vector<8x256xf32>
    %232 = arith.divf %230, %231 : vector<8x256xf32>
    %233 = vector.extract_strided_slice %232 {offsets = [0, 0], sizes = [8, 128], strides = [1, 1]} : vector<8x256xf32> to vector<8x128xf32>
    %234 = vector.extract_strided_slice %232 {offsets = [0, 128], sizes = [8, 128], strides = [1, 1]} : vector<8x256xf32> to vector<8x128xf32>
    %235 = vector.extract_strided_slice %224 {offsets = [0, 256], sizes = [8, 128], strides = [1, 1]} : vector<8x384xf32> to vector<8x128xf32>
    %236 = vector.extract_strided_slice %221 {offsets = [0, 256], sizes = [8, 128], strides = [1, 1]} : vector<8x384xf32> to vector<8x128xf32>
    %237 = arith.addf %236, %17 : vector<8x128xf32>
    %238 = arith.mulf %233, %237 : vector<8x128xf32>
    %239 = arith.addf %235, %238 : vector<8x128xf32>
    %240 = math.tanh %239 : vector<8x128xf32>
    %241 = arith.subf %193, %240 : vector<8x128xf32>
    %242 = arith.mulf %234, %241 : vector<8x128xf32>
    %243 = arith.addf %240, %242 : vector<8x128xf32>
    %c5_i32 = arith.constant 5 : i32
    %cst_67 = arith.constant dense<0.000000e+00> : vector<8x384xf32>
    %244 = tpu.matmul %243, %11, %cst_67 {dimension_numbers = #tpu.dot_dimension_numbers<[1], [0], [0], [1], [0, 0, 1, 1], [], []>} : vector<8x128xf32>, vector<128x384xf32>, vector<8x384xf32> -> vector<8x384xf32>
    %245 = arith.addf %244, %14 : vector<8x384xf32>
    %cst_68 = arith.constant dense<0.000000e+00> : vector<8x384xf32>
    %246 = tpu.matmul %215, %10, %cst_68 {dimension_numbers = #tpu.dot_dimension_numbers<[1], [0], [0], [1], [0, 0, 1, 1], [], []>} : vector<8x128xf32>, vector<128x384xf32>, vector<8x384xf32> -> vector<8x384xf32>
    %247 = vector.extract_strided_slice %245 {offsets = [0, 0], sizes = [8, 256], strides = [1, 1]} : vector<8x384xf32> to vector<8x256xf32>
    %248 = vector.extract_strided_slice %246 {offsets = [0, 0], sizes = [8, 256], strides = [1, 1]} : vector<8x384xf32> to vector<8x256xf32>
    %249 = arith.addf %247, %248 : vector<8x256xf32>
    %250 = arith.negf %249 : vector<8x256xf32>
    %251 = math.exp %250 : vector<8x256xf32>
    %cst_69 = arith.constant 1.000000e+00 : f32
    %252 = vector.broadcast %cst_69 : f32 to vector<8x256xf32>
    %253 = arith.addf %252, %251 : vector<8x256xf32>
    %254 = arith.divf %252, %253 : vector<8x256xf32>
    %255 = vector.extract_strided_slice %254 {offsets = [0, 0], sizes = [8, 128], strides = [1, 1]} : vector<8x256xf32> to vector<8x128xf32>
    %256 = vector.extract_strided_slice %254 {offsets = [0, 128], sizes = [8, 128], strides = [1, 1]} : vector<8x256xf32> to vector<8x128xf32>
    %257 = vector.extract_strided_slice %245 {offsets = [0, 256], sizes = [8, 128], strides = [1, 1]} : vector<8x384xf32> to vector<8x128xf32>
    %258 = vector.extract_strided_slice %246 {offsets = [0, 256], sizes = [8, 128], strides = [1, 1]} : vector<8x384xf32> to vector<8x128xf32>
    %259 = arith.addf %258, %20 : vector<8x128xf32>
    %260 = arith.mulf %255, %259 : vector<8x128xf32>
    %261 = arith.addf %257, %260 : vector<8x128xf32>
    %262 = math.tanh %261 : vector<8x128xf32>
    %263 = arith.subf %215, %262 : vector<8x128xf32>
    %264 = arith.mulf %256, %263 : vector<8x128xf32>
    %265 = arith.addf %262, %264 : vector<8x128xf32>
    %c1_i32_70 = arith.constant 1 : i32
    %266 = arith.subi %c5_i32, %c1_i32_70 : i32
    %267 = arith.index_cast %266 : i32 to index
    %c0_71 = arith.constant 0 : index
    %c0_72 = arith.constant 0 : index
    %268 = vector.load %arg14[%267, %c0_71, %c0_72] : memref<16x8x128xf32, #tpu.memory_space<vmem>>, vector<1x8x128xf32>
    %269 = vector.shape_cast %268 : vector<1x8x128xf32> to vector<8x128xf32>
    %270 = vector.shape_cast %265 : vector<8x128xf32> to vector<1x8x128xf32>
    tpu.vector_store %arg14[%267, %c0_71, %c0_72], %270 {strides = array<i32>} : memref<16x8x128xf32, #tpu.memory_space<vmem>>, vector<1x8x128xf32>,
    %cst_73 = arith.constant dense<0.000000e+00> : vector<8x384xf32>
    %271 = tpu.matmul %243, %9, %cst_73 {dimension_numbers = #tpu.dot_dimension_numbers<[1], [0], [0], [1], [0, 0, 1, 1], [], []>} : vector<8x128xf32>, vector<128x384xf32>, vector<8x384xf32> -> vector<8x384xf32>
    %272 = arith.index_cast %c5_i32 : i32 to index
    %c0_74 = arith.constant 0 : index
    %c0_75 = arith.constant 0 : index
    %273 = vector.load %arg13[%272, %c0_74, %c0_75] : memref<16x8x384xf32, #tpu.memory_space<vmem>>, vector<1x8x384xf32>
    %274 = vector.shape_cast %273 : vector<1x8x384xf32> to vector<8x384xf32>
    %275 = vector.extract_strided_slice %274 {offsets = [0, 0], sizes = [8, 256], strides = [1, 1]} : vector<8x384xf32> to vector<8x256xf32>
    %276 = vector.extract_strided_slice %271 {offsets = [0, 0], sizes = [8, 256], strides = [1, 1]} : vector<8x384xf32> to vector<8x256xf32>
    %277 = arith.addf %275, %276 : vector<8x256xf32>
    %278 = arith.negf %277 : vector<8x256xf32>
    %279 = math.exp %278 : vector<8x256xf32>
    %cst_76 = arith.constant 1.000000e+00 : f32
    %280 = vector.broadcast %cst_76 : f32 to vector<8x256xf32>
    %281 = arith.addf %280, %279 : vector<8x256xf32>
    %282 = arith.divf %280, %281 : vector<8x256xf32>
    %283 = vector.extract_strided_slice %282 {offsets = [0, 0], sizes = [8, 128], strides = [1, 1]} : vector<8x256xf32> to vector<8x128xf32>
    %284 = vector.extract_strided_slice %282 {offsets = [0, 128], sizes = [8, 128], strides = [1, 1]} : vector<8x256xf32> to vector<8x128xf32>
    %285 = vector.extract_strided_slice %274 {offsets = [0, 256], sizes = [8, 128], strides = [1, 1]} : vector<8x384xf32> to vector<8x128xf32>
    %286 = vector.extract_strided_slice %271 {offsets = [0, 256], sizes = [8, 128], strides = [1, 1]} : vector<8x384xf32> to vector<8x128xf32>
    %287 = arith.addf %286, %17 : vector<8x128xf32>
    %288 = arith.mulf %283, %287 : vector<8x128xf32>
    %289 = arith.addf %285, %288 : vector<8x128xf32>
    %290 = math.tanh %289 : vector<8x128xf32>
    %291 = arith.subf %243, %290 : vector<8x128xf32>
    %292 = arith.mulf %284, %291 : vector<8x128xf32>
    %293 = arith.addf %290, %292 : vector<8x128xf32>
    %c6_i32 = arith.constant 6 : i32
    %cst_77 = arith.constant dense<0.000000e+00> : vector<8x384xf32>
    %294 = tpu.matmul %293, %11, %cst_77 {dimension_numbers = #tpu.dot_dimension_numbers<[1], [0], [0], [1], [0, 0, 1, 1], [], []>} : vector<8x128xf32>, vector<128x384xf32>, vector<8x384xf32> -> vector<8x384xf32>
    %295 = arith.addf %294, %14 : vector<8x384xf32>
    %cst_78 = arith.constant dense<0.000000e+00> : vector<8x384xf32>
    %296 = tpu.matmul %265, %10, %cst_78 {dimension_numbers = #tpu.dot_dimension_numbers<[1], [0], [0], [1], [0, 0, 1, 1], [], []>} : vector<8x128xf32>, vector<128x384xf32>, vector<8x384xf32> -> vector<8x384xf32>
    %297 = vector.extract_strided_slice %295 {offsets = [0, 0], sizes = [8, 256], strides = [1, 1]} : vector<8x384xf32> to vector<8x256xf32>
    %298 = vector.extract_strided_slice %296 {offsets = [0, 0], sizes = [8, 256], strides = [1, 1]} : vector<8x384xf32> to vector<8x256xf32>
    %299 = arith.addf %297, %298 : vector<8x256xf32>
    %300 = arith.negf %299 : vector<8x256xf32>
    %301 = math.exp %300 : vector<8x256xf32>
    %cst_79 = arith.constant 1.000000e+00 : f32
    %302 = vector.broadcast %cst_79 : f32 to vector<8x256xf32>
    %303 = arith.addf %302, %301 : vector<8x256xf32>
    %304 = arith.divf %302, %303 : vector<8x256xf32>
    %305 = vector.extract_strided_slice %304 {offsets = [0, 0], sizes = [8, 128], strides = [1, 1]} : vector<8x256xf32> to vector<8x128xf32>
    %306 = vector.extract_strided_slice %304 {offsets = [0, 128], sizes = [8, 128], strides = [1, 1]} : vector<8x256xf32> to vector<8x128xf32>
    %307 = vector.extract_strided_slice %295 {offsets = [0, 256], sizes = [8, 128], strides = [1, 1]} : vector<8x384xf32> to vector<8x128xf32>
    %308 = vector.extract_strided_slice %296 {offsets = [0, 256], sizes = [8, 128], strides = [1, 1]} : vector<8x384xf32> to vector<8x128xf32>
    %309 = arith.addf %308, %20 : vector<8x128xf32>
    %310 = arith.mulf %305, %309 : vector<8x128xf32>
    %311 = arith.addf %307, %310 : vector<8x128xf32>
    %312 = math.tanh %311 : vector<8x128xf32>
    %313 = arith.subf %265, %312 : vector<8x128xf32>
    %314 = arith.mulf %306, %313 : vector<8x128xf32>
    %315 = arith.addf %312, %314 : vector<8x128xf32>
    %c1_i32_80 = arith.constant 1 : i32
    %316 = arith.subi %c6_i32, %c1_i32_80 : i32
    %317 = arith.index_cast %316 : i32 to index
    %c0_81 = arith.constant 0 : index
    %c0_82 = arith.constant 0 : index
    %318 = vector.load %arg14[%317, %c0_81, %c0_82] : memref<16x8x128xf32, #tpu.memory_space<vmem>>, vector<1x8x128xf32>
    %319 = vector.shape_cast %318 : vector<1x8x128xf32> to vector<8x128xf32>
    %320 = vector.shape_cast %315 : vector<8x128xf32> to vector<1x8x128xf32>
    tpu.vector_store %arg14[%317, %c0_81, %c0_82], %320 {strides = array<i32>} : memref<16x8x128xf32, #tpu.memory_space<vmem>>, vector<1x8x128xf32>,
    %cst_83 = arith.constant dense<0.000000e+00> : vector<8x384xf32>
    %321 = tpu.matmul %293, %9, %cst_83 {dimension_numbers = #tpu.dot_dimension_numbers<[1], [0], [0], [1], [0, 0, 1, 1], [], []>} : vector<8x128xf32>, vector<128x384xf32>, vector<8x384xf32> -> vector<8x384xf32>
    %322 = arith.index_cast %c6_i32 : i32 to index
    %c0_84 = arith.constant 0 : index
    %c0_85 = arith.constant 0 : index
    %323 = vector.load %arg13[%322, %c0_84, %c0_85] : memref<16x8x384xf32, #tpu.memory_space<vmem>>, vector<1x8x384xf32>
    %324 = vector.shape_cast %323 : vector<1x8x384xf32> to vector<8x384xf32>
    %325 = vector.extract_strided_slice %324 {offsets = [0, 0], sizes = [8, 256], strides = [1, 1]} : vector<8x384xf32> to vector<8x256xf32>
    %326 = vector.extract_strided_slice %321 {offsets = [0, 0], sizes = [8, 256], strides = [1, 1]} : vector<8x384xf32> to vector<8x256xf32>
    %327 = arith.addf %325, %326 : vector<8x256xf32>
    %328 = arith.negf %327 : vector<8x256xf32>
    %329 = math.exp %328 : vector<8x256xf32>
    %cst_86 = arith.constant 1.000000e+00 : f32
    %330 = vector.broadcast %cst_86 : f32 to vector<8x256xf32>
    %331 = arith.addf %330, %329 : vector<8x256xf32>
    %332 = arith.divf %330, %331 : vector<8x256xf32>
    %333 = vector.extract_strided_slice %332 {offsets = [0, 0], sizes = [8, 128], strides = [1, 1]} : vector<8x256xf32> to vector<8x128xf32>
    %334 = vector.extract_strided_slice %332 {offsets = [0, 128], sizes = [8, 128], strides = [1, 1]} : vector<8x256xf32> to vector<8x128xf32>
    %335 = vector.extract_strided_slice %324 {offsets = [0, 256], sizes = [8, 128], strides = [1, 1]} : vector<8x384xf32> to vector<8x128xf32>
    %336 = vector.extract_strided_slice %321 {offsets = [0, 256], sizes = [8, 128], strides = [1, 1]} : vector<8x384xf32> to vector<8x128xf32>
    %337 = arith.addf %336, %17 : vector<8x128xf32>
    %338 = arith.mulf %333, %337 : vector<8x128xf32>
    %339 = arith.addf %335, %338 : vector<8x128xf32>
    %340 = math.tanh %339 : vector<8x128xf32>
    %341 = arith.subf %293, %340 : vector<8x128xf32>
    %342 = arith.mulf %334, %341 : vector<8x128xf32>
    %343 = arith.addf %340, %342 : vector<8x128xf32>
    %c7_i32 = arith.constant 7 : i32
    %cst_87 = arith.constant dense<0.000000e+00> : vector<8x384xf32>
    %344 = tpu.matmul %343, %11, %cst_87 {dimension_numbers = #tpu.dot_dimension_numbers<[1], [0], [0], [1], [0, 0, 1, 1], [], []>} : vector<8x128xf32>, vector<128x384xf32>, vector<8x384xf32> -> vector<8x384xf32>
    %345 = arith.addf %344, %14 : vector<8x384xf32>
    %cst_88 = arith.constant dense<0.000000e+00> : vector<8x384xf32>
    %346 = tpu.matmul %315, %10, %cst_88 {dimension_numbers = #tpu.dot_dimension_numbers<[1], [0], [0], [1], [0, 0, 1, 1], [], []>} : vector<8x128xf32>, vector<128x384xf32>, vector<8x384xf32> -> vector<8x384xf32>
    %347 = vector.extract_strided_slice %345 {offsets = [0, 0], sizes = [8, 256], strides = [1, 1]} : vector<8x384xf32> to vector<8x256xf32>
    %348 = vector.extract_strided_slice %346 {offsets = [0, 0], sizes = [8, 256], strides = [1, 1]} : vector<8x384xf32> to vector<8x256xf32>
    %349 = arith.addf %347, %348 : vector<8x256xf32>
    %350 = arith.negf %349 : vector<8x256xf32>
    %351 = math.exp %350 : vector<8x256xf32>
    %cst_89 = arith.constant 1.000000e+00 : f32
    %352 = vector.broadcast %cst_89 : f32 to vector<8x256xf32>
    %353 = arith.addf %352, %351 : vector<8x256xf32>
    %354 = arith.divf %352, %353 : vector<8x256xf32>
    %355 = vector.extract_strided_slice %354 {offsets = [0, 0], sizes = [8, 128], strides = [1, 1]} : vector<8x256xf32> to vector<8x128xf32>
    %356 = vector.extract_strided_slice %354 {offsets = [0, 128], sizes = [8, 128], strides = [1, 1]} : vector<8x256xf32> to vector<8x128xf32>
    %357 = vector.extract_strided_slice %345 {offsets = [0, 256], sizes = [8, 128], strides = [1, 1]} : vector<8x384xf32> to vector<8x128xf32>
    %358 = vector.extract_strided_slice %346 {offsets = [0, 256], sizes = [8, 128], strides = [1, 1]} : vector<8x384xf32> to vector<8x128xf32>
    %359 = arith.addf %358, %20 : vector<8x128xf32>
    %360 = arith.mulf %355, %359 : vector<8x128xf32>
    %361 = arith.addf %357, %360 : vector<8x128xf32>
    %362 = math.tanh %361 : vector<8x128xf32>
    %363 = arith.subf %315, %362 : vector<8x128xf32>
    %364 = arith.mulf %356, %363 : vector<8x128xf32>
    %365 = arith.addf %362, %364 : vector<8x128xf32>
    %c1_i32_90 = arith.constant 1 : i32
    %366 = arith.subi %c7_i32, %c1_i32_90 : i32
    %367 = arith.index_cast %366 : i32 to index
    %c0_91 = arith.constant 0 : index
    %c0_92 = arith.constant 0 : index
    %368 = vector.load %arg14[%367, %c0_91, %c0_92] : memref<16x8x128xf32, #tpu.memory_space<vmem>>, vector<1x8x128xf32>
    %369 = vector.shape_cast %368 : vector<1x8x128xf32> to vector<8x128xf32>
    %370 = vector.shape_cast %365 : vector<8x128xf32> to vector<1x8x128xf32>
    tpu.vector_store %arg14[%367, %c0_91, %c0_92], %370 {strides = array<i32>} : memref<16x8x128xf32, #tpu.memory_space<vmem>>, vector<1x8x128xf32>,
    %cst_93 = arith.constant dense<0.000000e+00> : vector<8x384xf32>
    %371 = tpu.matmul %343, %9, %cst_93 {dimension_numbers = #tpu.dot_dimension_numbers<[1], [0], [0], [1], [0, 0, 1, 1], [], []>} : vector<8x128xf32>, vector<128x384xf32>, vector<8x384xf32> -> vector<8x384xf32>
    %372 = arith.index_cast %c7_i32 : i32 to index
    %c0_94 = arith.constant 0 : index
    %c0_95 = arith.constant 0 : index
    %373 = vector.load %arg13[%372, %c0_94, %c0_95] : memref<16x8x384xf32, #tpu.memory_space<vmem>>, vector<1x8x384xf32>
    %374 = vector.shape_cast %373 : vector<1x8x384xf32> to vector<8x384xf32>
    %375 = vector.extract_strided_slice %374 {offsets = [0, 0], sizes = [8, 256], strides = [1, 1]} : vector<8x384xf32> to vector<8x256xf32>
    %376 = vector.extract_strided_slice %371 {offsets = [0, 0], sizes = [8, 256], strides = [1, 1]} : vector<8x384xf32> to vector<8x256xf32>
    %377 = arith.addf %375, %376 : vector<8x256xf32>
    %378 = arith.negf %377 : vector<8x256xf32>
    %379 = math.exp %378 : vector<8x256xf32>
    %cst_96 = arith.constant 1.000000e+00 : f32
    %380 = vector.broadcast %cst_96 : f32 to vector<8x256xf32>
    %381 = arith.addf %380, %379 : vector<8x256xf32>
    %382 = arith.divf %380, %381 : vector<8x256xf32>
    %383 = vector.extract_strided_slice %382 {offsets = [0, 0], sizes = [8, 128], strides = [1, 1]} : vector<8x256xf32> to vector<8x128xf32>
    %384 = vector.extract_strided_slice %382 {offsets = [0, 128], sizes = [8, 128], strides = [1, 1]} : vector<8x256xf32> to vector<8x128xf32>
    %385 = vector.extract_strided_slice %374 {offsets = [0, 256], sizes = [8, 128], strides = [1, 1]} : vector<8x384xf32> to vector<8x128xf32>
    %386 = vector.extract_strided_slice %371 {offsets = [0, 256], sizes = [8, 128], strides = [1, 1]} : vector<8x384xf32> to vector<8x128xf32>
    %387 = arith.addf %386, %17 : vector<8x128xf32>
    %388 = arith.mulf %383, %387 : vector<8x128xf32>
    %389 = arith.addf %385, %388 : vector<8x128xf32>
    %390 = math.tanh %389 : vector<8x128xf32>
    %391 = arith.subf %343, %390 : vector<8x128xf32>
    %392 = arith.mulf %384, %391 : vector<8x128xf32>
    %393 = arith.addf %390, %392 : vector<8x128xf32>
    %c8_i32 = arith.constant 8 : i32
    %cst_97 = arith.constant dense<0.000000e+00> : vector<8x384xf32>
    %394 = tpu.matmul %393, %11, %cst_97 {dimension_numbers = #tpu.dot_dimension_numbers<[1], [0], [0], [1], [0, 0, 1, 1], [], []>} : vector<8x128xf32>, vector<128x384xf32>, vector<8x384xf32> -> vector<8x384xf32>
    %395 = arith.addf %394, %14 : vector<8x384xf32>
    %cst_98 = arith.constant dense<0.000000e+00> : vector<8x384xf32>
    %396 = tpu.matmul %365, %10, %cst_98 {dimension_numbers = #tpu.dot_dimension_numbers<[1], [0], [0], [1], [0, 0, 1, 1], [], []>} : vector<8x128xf32>, vector<128x384xf32>, vector<8x384xf32> -> vector<8x384xf32>
    %397 = vector.extract_strided_slice %395 {offsets = [0, 0], sizes = [8, 256], strides = [1, 1]} : vector<8x384xf32> to vector<8x256xf32>
    %398 = vector.extract_strided_slice %396 {offsets = [0, 0], sizes = [8, 256], strides = [1, 1]} : vector<8x384xf32> to vector<8x256xf32>
    %399 = arith.addf %397, %398 : vector<8x256xf32>
    %400 = arith.negf %399 : vector<8x256xf32>
    %401 = math.exp %400 : vector<8x256xf32>
    %cst_99 = arith.constant 1.000000e+00 : f32
    %402 = vector.broadcast %cst_99 : f32 to vector<8x256xf32>
    %403 = arith.addf %402, %401 : vector<8x256xf32>
    %404 = arith.divf %402, %403 : vector<8x256xf32>
    %405 = vector.extract_strided_slice %404 {offsets = [0, 0], sizes = [8, 128], strides = [1, 1]} : vector<8x256xf32> to vector<8x128xf32>
    %406 = vector.extract_strided_slice %404 {offsets = [0, 128], sizes = [8, 128], strides = [1, 1]} : vector<8x256xf32> to vector<8x128xf32>
    %407 = vector.extract_strided_slice %395 {offsets = [0, 256], sizes = [8, 128], strides = [1, 1]} : vector<8x384xf32> to vector<8x128xf32>
    %408 = vector.extract_strided_slice %396 {offsets = [0, 256], sizes = [8, 128], strides = [1, 1]} : vector<8x384xf32> to vector<8x128xf32>
    %409 = arith.addf %408, %20 : vector<8x128xf32>
    %410 = arith.mulf %405, %409 : vector<8x128xf32>
    %411 = arith.addf %407, %410 : vector<8x128xf32>
    %412 = math.tanh %411 : vector<8x128xf32>
    %413 = arith.subf %365, %412 : vector<8x128xf32>
    %414 = arith.mulf %406, %413 : vector<8x128xf32>
    %415 = arith.addf %412, %414 : vector<8x128xf32>
    %c1_i32_100 = arith.constant 1 : i32
    %416 = arith.subi %c8_i32, %c1_i32_100 : i32
    %417 = arith.index_cast %416 : i32 to index
    %c0_101 = arith.constant 0 : index
    %c0_102 = arith.constant 0 : index
    %418 = vector.load %arg14[%417, %c0_101, %c0_102] : memref<16x8x128xf32, #tpu.memory_space<vmem>>, vector<1x8x128xf32>
    %419 = vector.shape_cast %418 : vector<1x8x128xf32> to vector<8x128xf32>
    %420 = vector.shape_cast %415 : vector<8x128xf32> to vector<1x8x128xf32>
    tpu.vector_store %arg14[%417, %c0_101, %c0_102], %420 {strides = array<i32>} : memref<16x8x128xf32, #tpu.memory_space<vmem>>, vector<1x8x128xf32>,
    %cst_103 = arith.constant dense<0.000000e+00> : vector<8x384xf32>
    %421 = tpu.matmul %393, %9, %cst_103 {dimension_numbers = #tpu.dot_dimension_numbers<[1], [0], [0], [1], [0, 0, 1, 1], [], []>} : vector<8x128xf32>, vector<128x384xf32>, vector<8x384xf32> -> vector<8x384xf32>
    %422 = arith.index_cast %c8_i32 : i32 to index
    %c0_104 = arith.constant 0 : index
    %c0_105 = arith.constant 0 : index
    %423 = vector.load %arg13[%422, %c0_104, %c0_105] : memref<16x8x384xf32, #tpu.memory_space<vmem>>, vector<1x8x384xf32>
    %424 = vector.shape_cast %423 : vector<1x8x384xf32> to vector<8x384xf32>
    %425 = vector.extract_strided_slice %424 {offsets = [0, 0], sizes = [8, 256], strides = [1, 1]} : vector<8x384xf32> to vector<8x256xf32>
    %426 = vector.extract_strided_slice %421 {offsets = [0, 0], sizes = [8, 256], strides = [1, 1]} : vector<8x384xf32> to vector<8x256xf32>
    %427 = arith.addf %425, %426 : vector<8x256xf32>
    %428 = arith.negf %427 : vector<8x256xf32>
    %429 = math.exp %428 : vector<8x256xf32>
    %cst_106 = arith.constant 1.000000e+00 : f32
    %430 = vector.broadcast %cst_106 : f32 to vector<8x256xf32>
    %431 = arith.addf %430, %429 : vector<8x256xf32>
    %432 = arith.divf %430, %431 : vector<8x256xf32>
    %433 = vector.extract_strided_slice %432 {offsets = [0, 0], sizes = [8, 128], strides = [1, 1]} : vector<8x256xf32> to vector<8x128xf32>
    %434 = vector.extract_strided_slice %432 {offsets = [0, 128], sizes = [8, 128], strides = [1, 1]} : vector<8x256xf32> to vector<8x128xf32>
    %435 = vector.extract_strided_slice %424 {offsets = [0, 256], sizes = [8, 128], strides = [1, 1]} : vector<8x384xf32> to vector<8x128xf32>
    %436 = vector.extract_strided_slice %421 {offsets = [0, 256], sizes = [8, 128], strides = [1, 1]} : vector<8x384xf32> to vector<8x128xf32>
    %437 = arith.addf %436, %17 : vector<8x128xf32>
    %438 = arith.mulf %433, %437 : vector<8x128xf32>
    %439 = arith.addf %435, %438 : vector<8x128xf32>
    %440 = math.tanh %439 : vector<8x128xf32>
    %441 = arith.subf %393, %440 : vector<8x128xf32>
    %442 = arith.mulf %434, %441 : vector<8x128xf32>
    %443 = arith.addf %440, %442 : vector<8x128xf32>
    %c9_i32 = arith.constant 9 : i32
    %cst_107 = arith.constant dense<0.000000e+00> : vector<8x384xf32>
    %444 = tpu.matmul %443, %11, %cst_107 {dimension_numbers = #tpu.dot_dimension_numbers<[1], [0], [0], [1], [0, 0, 1, 1], [], []>} : vector<8x128xf32>, vector<128x384xf32>, vector<8x384xf32> -> vector<8x384xf32>
    %445 = arith.addf %444, %14 : vector<8x384xf32>
    %cst_108 = arith.constant dense<0.000000e+00> : vector<8x384xf32>
    %446 = tpu.matmul %415, %10, %cst_108 {dimension_numbers = #tpu.dot_dimension_numbers<[1], [0], [0], [1], [0, 0, 1, 1], [], []>} : vector<8x128xf32>, vector<128x384xf32>, vector<8x384xf32> -> vector<8x384xf32>
    %447 = vector.extract_strided_slice %445 {offsets = [0, 0], sizes = [8, 256], strides = [1, 1]} : vector<8x384xf32> to vector<8x256xf32>
    %448 = vector.extract_strided_slice %446 {offsets = [0, 0], sizes = [8, 256], strides = [1, 1]} : vector<8x384xf32> to vector<8x256xf32>
    %449 = arith.addf %447, %448 : vector<8x256xf32>
    %450 = arith.negf %449 : vector<8x256xf32>
    %451 = math.exp %450 : vector<8x256xf32>
    %cst_109 = arith.constant 1.000000e+00 : f32
    %452 = vector.broadcast %cst_109 : f32 to vector<8x256xf32>
    %453 = arith.addf %452, %451 : vector<8x256xf32>
    %454 = arith.divf %452, %453 : vector<8x256xf32>
    %455 = vector.extract_strided_slice %454 {offsets = [0, 0], sizes = [8, 128], strides = [1, 1]} : vector<8x256xf32> to vector<8x128xf32>
    %456 = vector.extract_strided_slice %454 {offsets = [0, 128], sizes = [8, 128], strides = [1, 1]} : vector<8x256xf32> to vector<8x128xf32>
    %457 = vector.extract_strided_slice %445 {offsets = [0, 256], sizes = [8, 128], strides = [1, 1]} : vector<8x384xf32> to vector<8x128xf32>
    %458 = vector.extract_strided_slice %446 {offsets = [0, 256], sizes = [8, 128], strides = [1, 1]} : vector<8x384xf32> to vector<8x128xf32>
    %459 = arith.addf %458, %20 : vector<8x128xf32>
    %460 = arith.mulf %455, %459 : vector<8x128xf32>
    %461 = arith.addf %457, %460 : vector<8x128xf32>
    %462 = math.tanh %461 : vector<8x128xf32>
    %463 = arith.subf %415, %462 : vector<8x128xf32>
    %464 = arith.mulf %456, %463 : vector<8x128xf32>
    %465 = arith.addf %462, %464 : vector<8x128xf32>
    %c1_i32_110 = arith.constant 1 : i32
    %466 = arith.subi %c9_i32, %c1_i32_110 : i32
    %467 = arith.index_cast %466 : i32 to index
    %c0_111 = arith.constant 0 : index
    %c0_112 = arith.constant 0 : index
    %468 = vector.load %arg14[%467, %c0_111, %c0_112] : memref<16x8x128xf32, #tpu.memory_space<vmem>>, vector<1x8x128xf32>
    %469 = vector.shape_cast %468 : vector<1x8x128xf32> to vector<8x128xf32>
    %470 = vector.shape_cast %465 : vector<8x128xf32> to vector<1x8x128xf32>
    tpu.vector_store %arg14[%467, %c0_111, %c0_112], %470 {strides = array<i32>} : memref<16x8x128xf32, #tpu.memory_space<vmem>>, vector<1x8x128xf32>,
    %cst_113 = arith.constant dense<0.000000e+00> : vector<8x384xf32>
    %471 = tpu.matmul %443, %9, %cst_113 {dimension_numbers = #tpu.dot_dimension_numbers<[1], [0], [0], [1], [0, 0, 1, 1], [], []>} : vector<8x128xf32>, vector<128x384xf32>, vector<8x384xf32> -> vector<8x384xf32>
    %472 = arith.index_cast %c9_i32 : i32 to index
    %c0_114 = arith.constant 0 : index
    %c0_115 = arith.constant 0 : index
    %473 = vector.load %arg13[%472, %c0_114, %c0_115] : memref<16x8x384xf32, #tpu.memory_space<vmem>>, vector<1x8x384xf32>
    %474 = vector.shape_cast %473 : vector<1x8x384xf32> to vector<8x384xf32>
    %475 = vector.extract_strided_slice %474 {offsets = [0, 0], sizes = [8, 256], strides = [1, 1]} : vector<8x384xf32> to vector<8x256xf32>
    %476 = vector.extract_strided_slice %471 {offsets = [0, 0], sizes = [8, 256], strides = [1, 1]} : vector<8x384xf32> to vector<8x256xf32>
    %477 = arith.addf %475, %476 : vector<8x256xf32>
    %478 = arith.negf %477 : vector<8x256xf32>
    %479 = math.exp %478 : vector<8x256xf32>
    %cst_116 = arith.constant 1.000000e+00 : f32
    %480 = vector.broadcast %cst_116 : f32 to vector<8x256xf32>
    %481 = arith.addf %480, %479 : vector<8x256xf32>
    %482 = arith.divf %480, %481 : vector<8x256xf32>
    %483 = vector.extract_strided_slice %482 {offsets = [0, 0], sizes = [8, 128], strides = [1, 1]} : vector<8x256xf32> to vector<8x128xf32>
    %484 = vector.extract_strided_slice %482 {offsets = [0, 128], sizes = [8, 128], strides = [1, 1]} : vector<8x256xf32> to vector<8x128xf32>
    %485 = vector.extract_strided_slice %474 {offsets = [0, 256], sizes = [8, 128], strides = [1, 1]} : vector<8x384xf32> to vector<8x128xf32>
    %486 = vector.extract_strided_slice %471 {offsets = [0, 256], sizes = [8, 128], strides = [1, 1]} : vector<8x384xf32> to vector<8x128xf32>
    %487 = arith.addf %486, %17 : vector<8x128xf32>
    %488 = arith.mulf %483, %487 : vector<8x128xf32>
    %489 = arith.addf %485, %488 : vector<8x128xf32>
    %490 = math.tanh %489 : vector<8x128xf32>
    %491 = arith.subf %443, %490 : vector<8x128xf32>
    %492 = arith.mulf %484, %491 : vector<8x128xf32>
    %493 = arith.addf %490, %492 : vector<8x128xf32>
    %c10_i32 = arith.constant 10 : i32
    %cst_117 = arith.constant dense<0.000000e+00> : vector<8x384xf32>
    %494 = tpu.matmul %493, %11, %cst_117 {dimension_numbers = #tpu.dot_dimension_numbers<[1], [0], [0], [1], [0, 0, 1, 1], [], []>} : vector<8x128xf32>, vector<128x384xf32>, vector<8x384xf32> -> vector<8x384xf32>
    %495 = arith.addf %494, %14 : vector<8x384xf32>
    %cst_118 = arith.constant dense<0.000000e+00> : vector<8x384xf32>
    %496 = tpu.matmul %465, %10, %cst_118 {dimension_numbers = #tpu.dot_dimension_numbers<[1], [0], [0], [1], [0, 0, 1, 1], [], []>} : vector<8x128xf32>, vector<128x384xf32>, vector<8x384xf32> -> vector<8x384xf32>
    %497 = vector.extract_strided_slice %495 {offsets = [0, 0], sizes = [8, 256], strides = [1, 1]} : vector<8x384xf32> to vector<8x256xf32>
    %498 = vector.extract_strided_slice %496 {offsets = [0, 0], sizes = [8, 256], strides = [1, 1]} : vector<8x384xf32> to vector<8x256xf32>
    %499 = arith.addf %497, %498 : vector<8x256xf32>
    %500 = arith.negf %499 : vector<8x256xf32>
    %501 = math.exp %500 : vector<8x256xf32>
    %cst_119 = arith.constant 1.000000e+00 : f32
    %502 = vector.broadcast %cst_119 : f32 to vector<8x256xf32>
    %503 = arith.addf %502, %501 : vector<8x256xf32>
    %504 = arith.divf %502, %503 : vector<8x256xf32>
    %505 = vector.extract_strided_slice %504 {offsets = [0, 0], sizes = [8, 128], strides = [1, 1]} : vector<8x256xf32> to vector<8x128xf32>
    %506 = vector.extract_strided_slice %504 {offsets = [0, 128], sizes = [8, 128], strides = [1, 1]} : vector<8x256xf32> to vector<8x128xf32>
    %507 = vector.extract_strided_slice %495 {offsets = [0, 256], sizes = [8, 128], strides = [1, 1]} : vector<8x384xf32> to vector<8x128xf32>
    %508 = vector.extract_strided_slice %496 {offsets = [0, 256], sizes = [8, 128], strides = [1, 1]} : vector<8x384xf32> to vector<8x128xf32>
    %509 = arith.addf %508, %20 : vector<8x128xf32>
    %510 = arith.mulf %505, %509 : vector<8x128xf32>
    %511 = arith.addf %507, %510 : vector<8x128xf32>
    %512 = math.tanh %511 : vector<8x128xf32>
    %513 = arith.subf %465, %512 : vector<8x128xf32>
    %514 = arith.mulf %506, %513 : vector<8x128xf32>
    %515 = arith.addf %512, %514 : vector<8x128xf32>
    %c1_i32_120 = arith.constant 1 : i32
    %516 = arith.subi %c10_i32, %c1_i32_120 : i32
    %517 = arith.index_cast %516 : i32 to index
    %c0_121 = arith.constant 0 : index
    %c0_122 = arith.constant 0 : index
    %518 = vector.load %arg14[%517, %c0_121, %c0_122] : memref<16x8x128xf32, #tpu.memory_space<vmem>>, vector<1x8x128xf32>
    %519 = vector.shape_cast %518 : vector<1x8x128xf32> to vector<8x128xf32>
    %520 = vector.shape_cast %515 : vector<8x128xf32> to vector<1x8x128xf32>
    tpu.vector_store %arg14[%517, %c0_121, %c0_122], %520 {strides = array<i32>} : memref<16x8x128xf32, #tpu.memory_space<vmem>>, vector<1x8x128xf32>,
    %cst_123 = arith.constant dense<0.000000e+00> : vector<8x384xf32>
    %521 = tpu.matmul %493, %9, %cst_123 {dimension_numbers = #tpu.dot_dimension_numbers<[1], [0], [0], [1], [0, 0, 1, 1], [], []>} : vector<8x128xf32>, vector<128x384xf32>, vector<8x384xf32> -> vector<8x384xf32>
    %522 = arith.index_cast %c10_i32 : i32 to index
    %c0_124 = arith.constant 0 : index
    %c0_125 = arith.constant 0 : index
    %523 = vector.load %arg13[%522, %c0_124, %c0_125] : memref<16x8x384xf32, #tpu.memory_space<vmem>>, vector<1x8x384xf32>
    %524 = vector.shape_cast %523 : vector<1x8x384xf32> to vector<8x384xf32>
    %525 = vector.extract_strided_slice %524 {offsets = [0, 0], sizes = [8, 256], strides = [1, 1]} : vector<8x384xf32> to vector<8x256xf32>
    %526 = vector.extract_strided_slice %521 {offsets = [0, 0], sizes = [8, 256], strides = [1, 1]} : vector<8x384xf32> to vector<8x256xf32>
    %527 = arith.addf %525, %526 : vector<8x256xf32>
    %528 = arith.negf %527 : vector<8x256xf32>
    %529 = math.exp %528 : vector<8x256xf32>
    %cst_126 = arith.constant 1.000000e+00 : f32
    %530 = vector.broadcast %cst_126 : f32 to vector<8x256xf32>
    %531 = arith.addf %530, %529 : vector<8x256xf32>
    %532 = arith.divf %530, %531 : vector<8x256xf32>
    %533 = vector.extract_strided_slice %532 {offsets = [0, 0], sizes = [8, 128], strides = [1, 1]} : vector<8x256xf32> to vector<8x128xf32>
    %534 = vector.extract_strided_slice %532 {offsets = [0, 128], sizes = [8, 128], strides = [1, 1]} : vector<8x256xf32> to vector<8x128xf32>
    %535 = vector.extract_strided_slice %524 {offsets = [0, 256], sizes = [8, 128], strides = [1, 1]} : vector<8x384xf32> to vector<8x128xf32>
    %536 = vector.extract_strided_slice %521 {offsets = [0, 256], sizes = [8, 128], strides = [1, 1]} : vector<8x384xf32> to vector<8x128xf32>
    %537 = arith.addf %536, %17 : vector<8x128xf32>
    %538 = arith.mulf %533, %537 : vector<8x128xf32>
    %539 = arith.addf %535, %538 : vector<8x128xf32>
    %540 = math.tanh %539 : vector<8x128xf32>
    %541 = arith.subf %493, %540 : vector<8x128xf32>
    %542 = arith.mulf %534, %541 : vector<8x128xf32>
    %543 = arith.addf %540, %542 : vector<8x128xf32>
    %c11_i32 = arith.constant 11 : i32
    %cst_127 = arith.constant dense<0.000000e+00> : vector<8x384xf32>
    %544 = tpu.matmul %543, %11, %cst_127 {dimension_numbers = #tpu.dot_dimension_numbers<[1], [0], [0], [1], [0, 0, 1, 1], [], []>} : vector<8x128xf32>, vector<128x384xf32>, vector<8x384xf32> -> vector<8x384xf32>
    %545 = arith.addf %544, %14 : vector<8x384xf32>
    %cst_128 = arith.constant dense<0.000000e+00> : vector<8x384xf32>
    %546 = tpu.matmul %515, %10, %cst_128 {dimension_numbers = #tpu.dot_dimension_numbers<[1], [0], [0], [1], [0, 0, 1, 1], [], []>} : vector<8x128xf32>, vector<128x384xf32>, vector<8x384xf32> -> vector<8x384xf32>
    %547 = vector.extract_strided_slice %545 {offsets = [0, 0], sizes = [8, 256], strides = [1, 1]} : vector<8x384xf32> to vector<8x256xf32>
    %548 = vector.extract_strided_slice %546 {offsets = [0, 0], sizes = [8, 256], strides = [1, 1]} : vector<8x384xf32> to vector<8x256xf32>
    %549 = arith.addf %547, %548 : vector<8x256xf32>
    %550 = arith.negf %549 : vector<8x256xf32>
    %551 = math.exp %550 : vector<8x256xf32>
    %cst_129 = arith.constant 1.000000e+00 : f32
    %552 = vector.broadcast %cst_129 : f32 to vector<8x256xf32>
    %553 = arith.addf %552, %551 : vector<8x256xf32>
    %554 = arith.divf %552, %553 : vector<8x256xf32>
    %555 = vector.extract_strided_slice %554 {offsets = [0, 0], sizes = [8, 128], strides = [1, 1]} : vector<8x256xf32> to vector<8x128xf32>
    %556 = vector.extract_strided_slice %554 {offsets = [0, 128], sizes = [8, 128], strides = [1, 1]} : vector<8x256xf32> to vector<8x128xf32>
    %557 = vector.extract_strided_slice %545 {offsets = [0, 256], sizes = [8, 128], strides = [1, 1]} : vector<8x384xf32> to vector<8x128xf32>
    %558 = vector.extract_strided_slice %546 {offsets = [0, 256], sizes = [8, 128], strides = [1, 1]} : vector<8x384xf32> to vector<8x128xf32>
    %559 = arith.addf %558, %20 : vector<8x128xf32>
    %560 = arith.mulf %555, %559 : vector<8x128xf32>
    %561 = arith.addf %557, %560 : vector<8x128xf32>
    %562 = math.tanh %561 : vector<8x128xf32>
    %563 = arith.subf %515, %562 : vector<8x128xf32>
    %564 = arith.mulf %556, %563 : vector<8x128xf32>
    %565 = arith.addf %562, %564 : vector<8x128xf32>
    %c1_i32_130 = arith.constant 1 : i32
    %566 = arith.subi %c11_i32, %c1_i32_130 : i32
    %567 = arith.index_cast %566 : i32 to index
    %c0_131 = arith.constant 0 : index
    %c0_132 = arith.constant 0 : index
    %568 = vector.load %arg14[%567, %c0_131, %c0_132] : memref<16x8x128xf32, #tpu.memory_space<vmem>>, vector<1x8x128xf32>
    %569 = vector.shape_cast %568 : vector<1x8x128xf32> to vector<8x128xf32>
    %570 = vector.shape_cast %565 : vector<8x128xf32> to vector<1x8x128xf32>
    tpu.vector_store %arg14[%567, %c0_131, %c0_132], %570 {strides = array<i32>} : memref<16x8x128xf32, #tpu.memory_space<vmem>>, vector<1x8x128xf32>,
    %cst_133 = arith.constant dense<0.000000e+00> : vector<8x384xf32>
    %571 = tpu.matmul %543, %9, %cst_133 {dimension_numbers = #tpu.dot_dimension_numbers<[1], [0], [0], [1], [0, 0, 1, 1], [], []>} : vector<8x128xf32>, vector<128x384xf32>, vector<8x384xf32> -> vector<8x384xf32>
    %572 = arith.index_cast %c11_i32 : i32 to index
    %c0_134 = arith.constant 0 : index
    %c0_135 = arith.constant 0 : index
    %573 = vector.load %arg13[%572, %c0_134, %c0_135] : memref<16x8x384xf32, #tpu.memory_space<vmem>>, vector<1x8x384xf32>
    %574 = vector.shape_cast %573 : vector<1x8x384xf32> to vector<8x384xf32>
    %575 = vector.extract_strided_slice %574 {offsets = [0, 0], sizes = [8, 256], strides = [1, 1]} : vector<8x384xf32> to vector<8x256xf32>
    %576 = vector.extract_strided_slice %571 {offsets = [0, 0], sizes = [8, 256], strides = [1, 1]} : vector<8x384xf32> to vector<8x256xf32>
    %577 = arith.addf %575, %576 : vector<8x256xf32>
    %578 = arith.negf %577 : vector<8x256xf32>
    %579 = math.exp %578 : vector<8x256xf32>
    %cst_136 = arith.constant 1.000000e+00 : f32
    %580 = vector.broadcast %cst_136 : f32 to vector<8x256xf32>
    %581 = arith.addf %580, %579 : vector<8x256xf32>
    %582 = arith.divf %580, %581 : vector<8x256xf32>
    %583 = vector.extract_strided_slice %582 {offsets = [0, 0], sizes = [8, 128], strides = [1, 1]} : vector<8x256xf32> to vector<8x128xf32>
    %584 = vector.extract_strided_slice %582 {offsets = [0, 128], sizes = [8, 128], strides = [1, 1]} : vector<8x256xf32> to vector<8x128xf32>
    %585 = vector.extract_strided_slice %574 {offsets = [0, 256], sizes = [8, 128], strides = [1, 1]} : vector<8x384xf32> to vector<8x128xf32>
    %586 = vector.extract_strided_slice %571 {offsets = [0, 256], sizes = [8, 128], strides = [1, 1]} : vector<8x384xf32> to vector<8x128xf32>
    %587 = arith.addf %586, %17 : vector<8x128xf32>
    %588 = arith.mulf %583, %587 : vector<8x128xf32>
    %589 = arith.addf %585, %588 : vector<8x128xf32>
    %590 = math.tanh %589 : vector<8x128xf32>
    %591 = arith.subf %543, %590 : vector<8x128xf32>
    %592 = arith.mulf %584, %591 : vector<8x128xf32>
    %593 = arith.addf %590, %592 : vector<8x128xf32>
    %c12_i32 = arith.constant 12 : i32
    %cst_137 = arith.constant dense<0.000000e+00> : vector<8x384xf32>
    %594 = tpu.matmul %593, %11, %cst_137 {dimension_numbers = #tpu.dot_dimension_numbers<[1], [0], [0], [1], [0, 0, 1, 1], [], []>} : vector<8x128xf32>, vector<128x384xf32>, vector<8x384xf32> -> vector<8x384xf32>
    %595 = arith.addf %594, %14 : vector<8x384xf32>
    %cst_138 = arith.constant dense<0.000000e+00> : vector<8x384xf32>
    %596 = tpu.matmul %565, %10, %cst_138 {dimension_numbers = #tpu.dot_dimension_numbers<[1], [0], [0], [1], [0, 0, 1, 1], [], []>} : vector<8x128xf32>, vector<128x384xf32>, vector<8x384xf32> -> vector<8x384xf32>
    %597 = vector.extract_strided_slice %595 {offsets = [0, 0], sizes = [8, 256], strides = [1, 1]} : vector<8x384xf32> to vector<8x256xf32>
    %598 = vector.extract_strided_slice %596 {offsets = [0, 0], sizes = [8, 256], strides = [1, 1]} : vector<8x384xf32> to vector<8x256xf32>
    %599 = arith.addf %597, %598 : vector<8x256xf32>
    %600 = arith.negf %599 : vector<8x256xf32>
    %601 = math.exp %600 : vector<8x256xf32>
    %cst_139 = arith.constant 1.000000e+00 : f32
    %602 = vector.broadcast %cst_139 : f32 to vector<8x256xf32>
    %603 = arith.addf %602, %601 : vector<8x256xf32>
    %604 = arith.divf %602, %603 : vector<8x256xf32>
    %605 = vector.extract_strided_slice %604 {offsets = [0, 0], sizes = [8, 128], strides = [1, 1]} : vector<8x256xf32> to vector<8x128xf32>
    %606 = vector.extract_strided_slice %604 {offsets = [0, 128], sizes = [8, 128], strides = [1, 1]} : vector<8x256xf32> to vector<8x128xf32>
    %607 = vector.extract_strided_slice %595 {offsets = [0, 256], sizes = [8, 128], strides = [1, 1]} : vector<8x384xf32> to vector<8x128xf32>
    %608 = vector.extract_strided_slice %596 {offsets = [0, 256], sizes = [8, 128], strides = [1, 1]} : vector<8x384xf32> to vector<8x128xf32>
    %609 = arith.addf %608, %20 : vector<8x128xf32>
    %610 = arith.mulf %605, %609 : vector<8x128xf32>
    %611 = arith.addf %607, %610 : vector<8x128xf32>
    %612 = math.tanh %611 : vector<8x128xf32>
    %613 = arith.subf %565, %612 : vector<8x128xf32>
    %614 = arith.mulf %606, %613 : vector<8x128xf32>
    %615 = arith.addf %612, %614 : vector<8x128xf32>
    %c1_i32_140 = arith.constant 1 : i32
    %616 = arith.subi %c12_i32, %c1_i32_140 : i32
    %617 = arith.index_cast %616 : i32 to index
    %c0_141 = arith.constant 0 : index
    %c0_142 = arith.constant 0 : index
    %618 = vector.load %arg14[%617, %c0_141, %c0_142] : memref<16x8x128xf32, #tpu.memory_space<vmem>>, vector<1x8x128xf32>
    %619 = vector.shape_cast %618 : vector<1x8x128xf32> to vector<8x128xf32>
    %620 = vector.shape_cast %615 : vector<8x128xf32> to vector<1x8x128xf32>
    tpu.vector_store %arg14[%617, %c0_141, %c0_142], %620 {strides = array<i32>} : memref<16x8x128xf32, #tpu.memory_space<vmem>>, vector<1x8x128xf32>,
    %cst_143 = arith.constant dense<0.000000e+00> : vector<8x384xf32>
    %621 = tpu.matmul %593, %9, %cst_143 {dimension_numbers = #tpu.dot_dimension_numbers<[1], [0], [0], [1], [0, 0, 1, 1], [], []>} : vector<8x128xf32>, vector<128x384xf32>, vector<8x384xf32> -> vector<8x384xf32>
    %622 = arith.index_cast %c12_i32 : i32 to index
    %c0_144 = arith.constant 0 : index
    %c0_145 = arith.constant 0 : index
    %623 = vector.load %arg13[%622, %c0_144, %c0_145] : memref<16x8x384xf32, #tpu.memory_space<vmem>>, vector<1x8x384xf32>
    %624 = vector.shape_cast %623 : vector<1x8x384xf32> to vector<8x384xf32>
    %625 = vector.extract_strided_slice %624 {offsets = [0, 0], sizes = [8, 256], strides = [1, 1]} : vector<8x384xf32> to vector<8x256xf32>
    %626 = vector.extract_strided_slice %621 {offsets = [0, 0], sizes = [8, 256], strides = [1, 1]} : vector<8x384xf32> to vector<8x256xf32>
    %627 = arith.addf %625, %626 : vector<8x256xf32>
    %628 = arith.negf %627 : vector<8x256xf32>
    %629 = math.exp %628 : vector<8x256xf32>
    %cst_146 = arith.constant 1.000000e+00 : f32
    %630 = vector.broadcast %cst_146 : f32 to vector<8x256xf32>
    %631 = arith.addf %630, %629 : vector<8x256xf32>
    %632 = arith.divf %630, %631 : vector<8x256xf32>
    %633 = vector.extract_strided_slice %632 {offsets = [0, 0], sizes = [8, 128], strides = [1, 1]} : vector<8x256xf32> to vector<8x128xf32>
    %634 = vector.extract_strided_slice %632 {offsets = [0, 128], sizes = [8, 128], strides = [1, 1]} : vector<8x256xf32> to vector<8x128xf32>
    %635 = vector.extract_strided_slice %624 {offsets = [0, 256], sizes = [8, 128], strides = [1, 1]} : vector<8x384xf32> to vector<8x128xf32>
    %636 = vector.extract_strided_slice %621 {offsets = [0, 256], sizes = [8, 128], strides = [1, 1]} : vector<8x384xf32> to vector<8x128xf32>
    %637 = arith.addf %636, %17 : vector<8x128xf32>
    %638 = arith.mulf %633, %637 : vector<8x128xf32>
    %639 = arith.addf %635, %638 : vector<8x128xf32>
    %640 = math.tanh %639 : vector<8x128xf32>
    %641 = arith.subf %593, %640 : vector<8x128xf32>
    %642 = arith.mulf %634, %641 : vector<8x128xf32>
    %643 = arith.addf %640, %642 : vector<8x128xf32>
    %c13_i32 = arith.constant 13 : i32
    %cst_147 = arith.constant dense<0.000000e+00> : vector<8x384xf32>
    %644 = tpu.matmul %643, %11, %cst_147 {dimension_numbers = #tpu.dot_dimension_numbers<[1], [0], [0], [1], [0, 0, 1, 1], [], []>} : vector<8x128xf32>, vector<128x384xf32>, vector<8x384xf32> -> vector<8x384xf32>
    %645 = arith.addf %644, %14 : vector<8x384xf32>
    %cst_148 = arith.constant dense<0.000000e+00> : vector<8x384xf32>
    %646 = tpu.matmul %615, %10, %cst_148 {dimension_numbers = #tpu.dot_dimension_numbers<[1], [0], [0], [1], [0, 0, 1, 1], [], []>} : vector<8x128xf32>, vector<128x384xf32>, vector<8x384xf32> -> vector<8x384xf32>
    %647 = vector.extract_strided_slice %645 {offsets = [0, 0], sizes = [8, 256], strides = [1, 1]} : vector<8x384xf32> to vector<8x256xf32>
    %648 = vector.extract_strided_slice %646 {offsets = [0, 0], sizes = [8, 256], strides = [1, 1]} : vector<8x384xf32> to vector<8x256xf32>
    %649 = arith.addf %647, %648 : vector<8x256xf32>
    %650 = arith.negf %649 : vector<8x256xf32>
    %651 = math.exp %650 : vector<8x256xf32>
    %cst_149 = arith.constant 1.000000e+00 : f32
    %652 = vector.broadcast %cst_149 : f32 to vector<8x256xf32>
    %653 = arith.addf %652, %651 : vector<8x256xf32>
    %654 = arith.divf %652, %653 : vector<8x256xf32>
    %655 = vector.extract_strided_slice %654 {offsets = [0, 0], sizes = [8, 128], strides = [1, 1]} : vector<8x256xf32> to vector<8x128xf32>
    %656 = vector.extract_strided_slice %654 {offsets = [0, 128], sizes = [8, 128], strides = [1, 1]} : vector<8x256xf32> to vector<8x128xf32>
    %657 = vector.extract_strided_slice %645 {offsets = [0, 256], sizes = [8, 128], strides = [1, 1]} : vector<8x384xf32> to vector<8x128xf32>
    %658 = vector.extract_strided_slice %646 {offsets = [0, 256], sizes = [8, 128], strides = [1, 1]} : vector<8x384xf32> to vector<8x128xf32>
    %659 = arith.addf %658, %20 : vector<8x128xf32>
    %660 = arith.mulf %655, %659 : vector<8x128xf32>
    %661 = arith.addf %657, %660 : vector<8x128xf32>
    %662 = math.tanh %661 : vector<8x128xf32>
    %663 = arith.subf %615, %662 : vector<8x128xf32>
    %664 = arith.mulf %656, %663 : vector<8x128xf32>
    %665 = arith.addf %662, %664 : vector<8x128xf32>
    %c1_i32_150 = arith.constant 1 : i32
    %666 = arith.subi %c13_i32, %c1_i32_150 : i32
    %667 = arith.index_cast %666 : i32 to index
    %c0_151 = arith.constant 0 : index
    %c0_152 = arith.constant 0 : index
    %668 = vector.load %arg14[%667, %c0_151, %c0_152] : memref<16x8x128xf32, #tpu.memory_space<vmem>>, vector<1x8x128xf32>
    %669 = vector.shape_cast %668 : vector<1x8x128xf32> to vector<8x128xf32>
    %670 = vector.shape_cast %665 : vector<8x128xf32> to vector<1x8x128xf32>
    tpu.vector_store %arg14[%667, %c0_151, %c0_152], %670 {strides = array<i32>} : memref<16x8x128xf32, #tpu.memory_space<vmem>>, vector<1x8x128xf32>,
    %cst_153 = arith.constant dense<0.000000e+00> : vector<8x384xf32>
    %671 = tpu.matmul %643, %9, %cst_153 {dimension_numbers = #tpu.dot_dimension_numbers<[1], [0], [0], [1], [0, 0, 1, 1], [], []>} : vector<8x128xf32>, vector<128x384xf32>, vector<8x384xf32> -> vector<8x384xf32>
    %672 = arith.index_cast %c13_i32 : i32 to index
    %c0_154 = arith.constant 0 : index
    %c0_155 = arith.constant 0 : index
    %673 = vector.load %arg13[%672, %c0_154, %c0_155] : memref<16x8x384xf32, #tpu.memory_space<vmem>>, vector<1x8x384xf32>
    %674 = vector.shape_cast %673 : vector<1x8x384xf32> to vector<8x384xf32>
    %675 = vector.extract_strided_slice %674 {offsets = [0, 0], sizes = [8, 256], strides = [1, 1]} : vector<8x384xf32> to vector<8x256xf32>
    %676 = vector.extract_strided_slice %671 {offsets = [0, 0], sizes = [8, 256], strides = [1, 1]} : vector<8x384xf32> to vector<8x256xf32>
    %677 = arith.addf %675, %676 : vector<8x256xf32>
    %678 = arith.negf %677 : vector<8x256xf32>
    %679 = math.exp %678 : vector<8x256xf32>
    %cst_156 = arith.constant 1.000000e+00 : f32
    %680 = vector.broadcast %cst_156 : f32 to vector<8x256xf32>
    %681 = arith.addf %680, %679 : vector<8x256xf32>
    %682 = arith.divf %680, %681 : vector<8x256xf32>
    %683 = vector.extract_strided_slice %682 {offsets = [0, 0], sizes = [8, 128], strides = [1, 1]} : vector<8x256xf32> to vector<8x128xf32>
    %684 = vector.extract_strided_slice %682 {offsets = [0, 128], sizes = [8, 128], strides = [1, 1]} : vector<8x256xf32> to vector<8x128xf32>
    %685 = vector.extract_strided_slice %674 {offsets = [0, 256], sizes = [8, 128], strides = [1, 1]} : vector<8x384xf32> to vector<8x128xf32>
    %686 = vector.extract_strided_slice %671 {offsets = [0, 256], sizes = [8, 128], strides = [1, 1]} : vector<8x384xf32> to vector<8x128xf32>
    %687 = arith.addf %686, %17 : vector<8x128xf32>
    %688 = arith.mulf %683, %687 : vector<8x128xf32>
    %689 = arith.addf %685, %688 : vector<8x128xf32>
    %690 = math.tanh %689 : vector<8x128xf32>
    %691 = arith.subf %643, %690 : vector<8x128xf32>
    %692 = arith.mulf %684, %691 : vector<8x128xf32>
    %693 = arith.addf %690, %692 : vector<8x128xf32>
    %c14_i32 = arith.constant 14 : i32
    %cst_157 = arith.constant dense<0.000000e+00> : vector<8x384xf32>
    %694 = tpu.matmul %693, %11, %cst_157 {dimension_numbers = #tpu.dot_dimension_numbers<[1], [0], [0], [1], [0, 0, 1, 1], [], []>} : vector<8x128xf32>, vector<128x384xf32>, vector<8x384xf32> -> vector<8x384xf32>
    %695 = arith.addf %694, %14 : vector<8x384xf32>
    %cst_158 = arith.constant dense<0.000000e+00> : vector<8x384xf32>
    %696 = tpu.matmul %665, %10, %cst_158 {dimension_numbers = #tpu.dot_dimension_numbers<[1], [0], [0], [1], [0, 0, 1, 1], [], []>} : vector<8x128xf32>, vector<128x384xf32>, vector<8x384xf32> -> vector<8x384xf32>
    %697 = vector.extract_strided_slice %695 {offsets = [0, 0], sizes = [8, 256], strides = [1, 1]} : vector<8x384xf32> to vector<8x256xf32>
    %698 = vector.extract_strided_slice %696 {offsets = [0, 0], sizes = [8, 256], strides = [1, 1]} : vector<8x384xf32> to vector<8x256xf32>
    %699 = arith.addf %697, %698 : vector<8x256xf32>
    %700 = arith.negf %699 : vector<8x256xf32>
    %701 = math.exp %700 : vector<8x256xf32>
    %cst_159 = arith.constant 1.000000e+00 : f32
    %702 = vector.broadcast %cst_159 : f32 to vector<8x256xf32>
    %703 = arith.addf %702, %701 : vector<8x256xf32>
    %704 = arith.divf %702, %703 : vector<8x256xf32>
    %705 = vector.extract_strided_slice %704 {offsets = [0, 0], sizes = [8, 128], strides = [1, 1]} : vector<8x256xf32> to vector<8x128xf32>
    %706 = vector.extract_strided_slice %704 {offsets = [0, 128], sizes = [8, 128], strides = [1, 1]} : vector<8x256xf32> to vector<8x128xf32>
    %707 = vector.extract_strided_slice %695 {offsets = [0, 256], sizes = [8, 128], strides = [1, 1]} : vector<8x384xf32> to vector<8x128xf32>
    %708 = vector.extract_strided_slice %696 {offsets = [0, 256], sizes = [8, 128], strides = [1, 1]} : vector<8x384xf32> to vector<8x128xf32>
    %709 = arith.addf %708, %20 : vector<8x128xf32>
    %710 = arith.mulf %705, %709 : vector<8x128xf32>
    %711 = arith.addf %707, %710 : vector<8x128xf32>
    %712 = math.tanh %711 : vector<8x128xf32>
    %713 = arith.subf %665, %712 : vector<8x128xf32>
    %714 = arith.mulf %706, %713 : vector<8x128xf32>
    %715 = arith.addf %712, %714 : vector<8x128xf32>
    %c1_i32_160 = arith.constant 1 : i32
    %716 = arith.subi %c14_i32, %c1_i32_160 : i32
    %717 = arith.index_cast %716 : i32 to index
    %c0_161 = arith.constant 0 : index
    %c0_162 = arith.constant 0 : index
    %718 = vector.load %arg14[%717, %c0_161, %c0_162] : memref<16x8x128xf32, #tpu.memory_space<vmem>>, vector<1x8x128xf32>
    %719 = vector.shape_cast %718 : vector<1x8x128xf32> to vector<8x128xf32>
    %720 = vector.shape_cast %715 : vector<8x128xf32> to vector<1x8x128xf32>
    tpu.vector_store %arg14[%717, %c0_161, %c0_162], %720 {strides = array<i32>} : memref<16x8x128xf32, #tpu.memory_space<vmem>>, vector<1x8x128xf32>,
    %cst_163 = arith.constant dense<0.000000e+00> : vector<8x384xf32>
    %721 = tpu.matmul %693, %9, %cst_163 {dimension_numbers = #tpu.dot_dimension_numbers<[1], [0], [0], [1], [0, 0, 1, 1], [], []>} : vector<8x128xf32>, vector<128x384xf32>, vector<8x384xf32> -> vector<8x384xf32>
    %722 = arith.index_cast %c14_i32 : i32 to index
    %c0_164 = arith.constant 0 : index
    %c0_165 = arith.constant 0 : index
    %723 = vector.load %arg13[%722, %c0_164, %c0_165] : memref<16x8x384xf32, #tpu.memory_space<vmem>>, vector<1x8x384xf32>
    %724 = vector.shape_cast %723 : vector<1x8x384xf32> to vector<8x384xf32>
    %725 = vector.extract_strided_slice %724 {offsets = [0, 0], sizes = [8, 256], strides = [1, 1]} : vector<8x384xf32> to vector<8x256xf32>
    %726 = vector.extract_strided_slice %721 {offsets = [0, 0], sizes = [8, 256], strides = [1, 1]} : vector<8x384xf32> to vector<8x256xf32>
    %727 = arith.addf %725, %726 : vector<8x256xf32>
    %728 = arith.negf %727 : vector<8x256xf32>
    %729 = math.exp %728 : vector<8x256xf32>
    %cst_166 = arith.constant 1.000000e+00 : f32
    %730 = vector.broadcast %cst_166 : f32 to vector<8x256xf32>
    %731 = arith.addf %730, %729 : vector<8x256xf32>
    %732 = arith.divf %730, %731 : vector<8x256xf32>
    %733 = vector.extract_strided_slice %732 {offsets = [0, 0], sizes = [8, 128], strides = [1, 1]} : vector<8x256xf32> to vector<8x128xf32>
    %734 = vector.extract_strided_slice %732 {offsets = [0, 128], sizes = [8, 128], strides = [1, 1]} : vector<8x256xf32> to vector<8x128xf32>
    %735 = vector.extract_strided_slice %724 {offsets = [0, 256], sizes = [8, 128], strides = [1, 1]} : vector<8x384xf32> to vector<8x128xf32>
    %736 = vector.extract_strided_slice %721 {offsets = [0, 256], sizes = [8, 128], strides = [1, 1]} : vector<8x384xf32> to vector<8x128xf32>
    %737 = arith.addf %736, %17 : vector<8x128xf32>
    %738 = arith.mulf %733, %737 : vector<8x128xf32>
    %739 = arith.addf %735, %738 : vector<8x128xf32>
    %740 = math.tanh %739 : vector<8x128xf32>
    %741 = arith.subf %693, %740 : vector<8x128xf32>
    %742 = arith.mulf %734, %741 : vector<8x128xf32>
    %743 = arith.addf %740, %742 : vector<8x128xf32>
    %c15_i32 = arith.constant 15 : i32
    %cst_167 = arith.constant dense<0.000000e+00> : vector<8x384xf32>
    %744 = tpu.matmul %743, %11, %cst_167 {dimension_numbers = #tpu.dot_dimension_numbers<[1], [0], [0], [1], [0, 0, 1, 1], [], []>} : vector<8x128xf32>, vector<128x384xf32>, vector<8x384xf32> -> vector<8x384xf32>
    %745 = arith.addf %744, %14 : vector<8x384xf32>
    %cst_168 = arith.constant dense<0.000000e+00> : vector<8x384xf32>
    %746 = tpu.matmul %715, %10, %cst_168 {dimension_numbers = #tpu.dot_dimension_numbers<[1], [0], [0], [1], [0, 0, 1, 1], [], []>} : vector<8x128xf32>, vector<128x384xf32>, vector<8x384xf32> -> vector<8x384xf32>
    %747 = vector.extract_strided_slice %745 {offsets = [0, 0], sizes = [8, 256], strides = [1, 1]} : vector<8x384xf32> to vector<8x256xf32>
    %748 = vector.extract_strided_slice %746 {offsets = [0, 0], sizes = [8, 256], strides = [1, 1]} : vector<8x384xf32> to vector<8x256xf32>
    %749 = arith.addf %747, %748 : vector<8x256xf32>
    %750 = arith.negf %749 : vector<8x256xf32>
    %751 = math.exp %750 : vector<8x256xf32>
    %cst_169 = arith.constant 1.000000e+00 : f32
    %752 = vector.broadcast %cst_169 : f32 to vector<8x256xf32>
    %753 = arith.addf %752, %751 : vector<8x256xf32>
    %754 = arith.divf %752, %753 : vector<8x256xf32>
    %755 = vector.extract_strided_slice %754 {offsets = [0, 0], sizes = [8, 128], strides = [1, 1]} : vector<8x256xf32> to vector<8x128xf32>
    %756 = vector.extract_strided_slice %754 {offsets = [0, 128], sizes = [8, 128], strides = [1, 1]} : vector<8x256xf32> to vector<8x128xf32>
    %757 = vector.extract_strided_slice %745 {offsets = [0, 256], sizes = [8, 128], strides = [1, 1]} : vector<8x384xf32> to vector<8x128xf32>
    %758 = vector.extract_strided_slice %746 {offsets = [0, 256], sizes = [8, 128], strides = [1, 1]} : vector<8x384xf32> to vector<8x128xf32>
    %759 = arith.addf %758, %20 : vector<8x128xf32>
    %760 = arith.mulf %755, %759 : vector<8x128xf32>
    %761 = arith.addf %757, %760 : vector<8x128xf32>
    %762 = math.tanh %761 : vector<8x128xf32>
    %763 = arith.subf %715, %762 : vector<8x128xf32>
    %764 = arith.mulf %756, %763 : vector<8x128xf32>
    %765 = arith.addf %762, %764 : vector<8x128xf32>
    %c1_i32_170 = arith.constant 1 : i32
    %766 = arith.subi %c15_i32, %c1_i32_170 : i32
    %767 = arith.index_cast %766 : i32 to index
    %c0_171 = arith.constant 0 : index
    %c0_172 = arith.constant 0 : index
    %768 = vector.load %arg14[%767, %c0_171, %c0_172] : memref<16x8x128xf32, #tpu.memory_space<vmem>>, vector<1x8x128xf32>
    %769 = vector.shape_cast %768 : vector<1x8x128xf32> to vector<8x128xf32>
    %770 = vector.shape_cast %765 : vector<8x128xf32> to vector<1x8x128xf32>
    tpu.vector_store %arg14[%767, %c0_171, %c0_172], %770 {strides = array<i32>} : memref<16x8x128xf32, #tpu.memory_space<vmem>>, vector<1x8x128xf32>,
    %cst_173 = arith.constant dense<0.000000e+00> : vector<8x384xf32>
    %771 = tpu.matmul %743, %9, %cst_173 {dimension_numbers = #tpu.dot_dimension_numbers<[1], [0], [0], [1], [0, 0, 1, 1], [], []>} : vector<8x128xf32>, vector<128x384xf32>, vector<8x384xf32> -> vector<8x384xf32>
    %772 = arith.index_cast %c15_i32 : i32 to index
    %c0_174 = arith.constant 0 : index
    %c0_175 = arith.constant 0 : index
    %773 = vector.load %arg13[%772, %c0_174, %c0_175] : memref<16x8x384xf32, #tpu.memory_space<vmem>>, vector<1x8x384xf32>
    %774 = vector.shape_cast %773 : vector<1x8x384xf32> to vector<8x384xf32>
    %775 = vector.extract_strided_slice %774 {offsets = [0, 0], sizes = [8, 256], strides = [1, 1]} : vector<8x384xf32> to vector<8x256xf32>
    %776 = vector.extract_strided_slice %771 {offsets = [0, 0], sizes = [8, 256], strides = [1, 1]} : vector<8x384xf32> to vector<8x256xf32>
    %777 = arith.addf %775, %776 : vector<8x256xf32>
    %778 = arith.negf %777 : vector<8x256xf32>
    %779 = math.exp %778 : vector<8x256xf32>
    %cst_176 = arith.constant 1.000000e+00 : f32
    %780 = vector.broadcast %cst_176 : f32 to vector<8x256xf32>
    %781 = arith.addf %780, %779 : vector<8x256xf32>
    %782 = arith.divf %780, %781 : vector<8x256xf32>
    %783 = vector.extract_strided_slice %782 {offsets = [0, 0], sizes = [8, 128], strides = [1, 1]} : vector<8x256xf32> to vector<8x128xf32>
    %784 = vector.extract_strided_slice %782 {offsets = [0, 128], sizes = [8, 128], strides = [1, 1]} : vector<8x256xf32> to vector<8x128xf32>
    %785 = vector.extract_strided_slice %774 {offsets = [0, 256], sizes = [8, 128], strides = [1, 1]} : vector<8x384xf32> to vector<8x128xf32>
    %786 = vector.extract_strided_slice %771 {offsets = [0, 256], sizes = [8, 128], strides = [1, 1]} : vector<8x384xf32> to vector<8x128xf32>
    %787 = arith.addf %786, %17 : vector<8x128xf32>
    %788 = arith.mulf %783, %787 : vector<8x128xf32>
    %789 = arith.addf %785, %788 : vector<8x128xf32>
    %790 = math.tanh %789 : vector<8x128xf32>
    %791 = arith.subf %743, %790 : vector<8x128xf32>
    %792 = arith.mulf %784, %791 : vector<8x128xf32>
    %793 = arith.addf %790, %792 : vector<8x128xf32>
    %c15_i32_177 = arith.constant 15 : i32
    %cst_178 = arith.constant dense<0.000000e+00> : vector<8x384xf32>
    %794 = tpu.matmul %793, %11, %cst_178 {dimension_numbers = #tpu.dot_dimension_numbers<[1], [0], [0], [1], [0, 0, 1, 1], [], []>} : vector<8x128xf32>, vector<128x384xf32>, vector<8x384xf32> -> vector<8x384xf32>
    %795 = arith.addf %794, %14 : vector<8x384xf32>
    %cst_179 = arith.constant dense<0.000000e+00> : vector<8x384xf32>
    %796 = tpu.matmul %765, %10, %cst_179 {dimension_numbers = #tpu.dot_dimension_numbers<[1], [0], [0], [1], [0, 0, 1, 1], [], []>} : vector<8x128xf32>, vector<128x384xf32>, vector<8x384xf32> -> vector<8x384xf32>
    %797 = vector.extract_strided_slice %795 {offsets = [0, 0], sizes = [8, 256], strides = [1, 1]} : vector<8x384xf32> to vector<8x256xf32>
    %798 = vector.extract_strided_slice %796 {offsets = [0, 0], sizes = [8, 256], strides = [1, 1]} : vector<8x384xf32> to vector<8x256xf32>
    %799 = arith.addf %797, %798 : vector<8x256xf32>
    %800 = arith.negf %799 : vector<8x256xf32>
    %801 = math.exp %800 : vector<8x256xf32>
    %cst_180 = arith.constant 1.000000e+00 : f32
    %802 = vector.broadcast %cst_180 : f32 to vector<8x256xf32>
    %803 = arith.addf %802, %801 : vector<8x256xf32>
    %804 = arith.divf %802, %803 : vector<8x256xf32>
    %805 = vector.extract_strided_slice %804 {offsets = [0, 0], sizes = [8, 128], strides = [1, 1]} : vector<8x256xf32> to vector<8x128xf32>
    %806 = vector.extract_strided_slice %804 {offsets = [0, 128], sizes = [8, 128], strides = [1, 1]} : vector<8x256xf32> to vector<8x128xf32>
    %807 = vector.extract_strided_slice %795 {offsets = [0, 256], sizes = [8, 128], strides = [1, 1]} : vector<8x384xf32> to vector<8x128xf32>
    %808 = vector.extract_strided_slice %796 {offsets = [0, 256], sizes = [8, 128], strides = [1, 1]} : vector<8x384xf32> to vector<8x128xf32>
    %809 = arith.addf %808, %20 : vector<8x128xf32>
    %810 = arith.mulf %805, %809 : vector<8x128xf32>
    %811 = arith.addf %807, %810 : vector<8x128xf32>
    %812 = math.tanh %811 : vector<8x128xf32>
    %813 = arith.subf %765, %812 : vector<8x128xf32>
    %814 = arith.mulf %806, %813 : vector<8x128xf32>
    %815 = arith.addf %812, %814 : vector<8x128xf32>
    %c15 = arith.constant 15 : index
    %c0_181 = arith.constant 0 : index
    %c0_182 = arith.constant 0 : index
    %816 = vector.load %arg14[%c15, %c0_181, %c0_182] : memref<16x8x128xf32, #tpu.memory_space<vmem>>, vector<1x8x128xf32>
    %817 = vector.shape_cast %816 : vector<1x8x128xf32> to vector<8x128xf32>
    %818 = vector.shape_cast %815 : vector<8x128xf32> to vector<1x8x128xf32>
    tpu.vector_store %arg14[%c15, %c0_181, %c0_182], %818 {strides = array<i32>} : memref<16x8x128xf32, #tpu.memory_space<vmem>>, vector<1x8x128xf32>,
    %c0_183 = arith.constant 0 : index
    %c0_184 = arith.constant 0 : index
    %c0_185 = arith.constant 0 : index
    %819 = vector.load %arg14[%c0_183, %c0_184, %c0_185] : memref<16x8x128xf32, #tpu.memory_space<vmem>>, vector<16x8x128xf32>
    %820 = vector.shape_cast %819 : vector<16x8x128xf32> to vector<128x128xf32>
    %c0_186 = arith.constant 0 : index
    %c0_187 = arith.constant 0 : index
    %821 = vector.load %arg10[%c0_186, %c0_187] : memref<128x128xf32, #tpu.memory_space<vmem>>, vector<128x128xf32>
    %cst_188 = arith.constant dense<0.000000e+00> : vector<128x128xf32>
    %822 = tpu.matmul %820, %821, %cst_188 {dimension_numbers = #tpu.dot_dimension_numbers<[1], [0], [0], [1], [0, 0, 1, 1], [], []>} : vector<128x128xf32>, vector<128x128xf32>, vector<128x128xf32> -> vector<128x128xf32>
    %c0_189 = arith.constant 0 : index
    %c0_190 = arith.constant 0 : index
    %823 = vector.load %arg11[%c0_189, %c0_190] : memref<1x128xf32, #tpu.memory_space<vmem>>, vector<1x128xf32>
    %824 = vector.broadcast %823 : vector<1x128xf32> to vector<128x128xf32>
    %825 = arith.addf %822, %824 : vector<128x128xf32>
    %826 = vector.shape_cast %825 : vector<128x128xf32> to vector<16x8x128xf32>
    %c0_191 = arith.constant 0 : index
    %c0_192 = arith.constant 0 : index
    %c0_193 = arith.constant 0 : index
    %827 = vector.load %arg12[%c0_191, %c0_192, %c0_193] : memref<16x8x128xf32, #tpu.memory_space<vmem>>, vector<16x8x128xf32>
    tpu.vector_store %arg12[%c0_191, %c0_192, %c0_193], %826 {strides = array<i32>} : memref<16x8x128xf32, #tpu.memory_space<vmem>>, vector<16x8x128xf32>,
    return
  }
  func.func @transform_0(%arg0: i32) -> (i32, i32, i32) {
    %c0_i32 = arith.constant 0 : i32
    %c0_i32_0 = arith.constant 0 : i32
    %c0_i32_1 = arith.constant 0 : i32
    return %c0_i32, %arg0, %c0_i32_0 : i32, i32, i32
  }
  func.func @transform_1(%arg0: i32) -> (i32, i32) {
    %c0_i32 = arith.constant 0 : i32
    %c0_i32_0 = arith.constant 0 : i32
    %c0_i32_1 = arith.constant 0 : i32
    return %c0_i32, %c0_i32_0 : i32, i32
  }
  func.func @transform_2(%arg0: i32) -> (i32, i32) {
    %c0_i32 = arith.constant 0 : i32
    %c0_i32_0 = arith.constant 0 : i32
    %c0_i32_1 = arith.constant 0 : i32
    return %c0_i32, %c0_i32_0 : i32, i32
  }
  func.func @transform_3(%arg0: i32) -> (i32, i32) {
    %c0_i32 = arith.constant 0 : i32
    %c0_i32_0 = arith.constant 0 : i32
    %c0_i32_1 = arith.constant 0 : i32
    return %c0_i32, %c0_i32_0 : i32, i32
  }
  func.func @transform_4(%arg0: i32) -> (i32, i32) {
    %c0_i32 = arith.constant 0 : i32
    %c0_i32_0 = arith.constant 0 : i32
    %c0_i32_1 = arith.constant 0 : i32
    return %c0_i32, %c0_i32_0 : i32, i32
  }
  func.func @transform_5(%arg0: i32) -> (i32, i32) {
    %c0_i32 = arith.constant 0 : i32
    %c0_i32_0 = arith.constant 0 : i32
    %c0_i32_1 = arith.constant 0 : i32
    return %c0_i32, %c0_i32_0 : i32, i32
  }
  func.func @transform_6(%arg0: i32) -> (i32, i32) {
    %c0_i32 = arith.constant 0 : i32
    %c0_i32_0 = arith.constant 0 : i32
    %c0_i32_1 = arith.constant 0 : i32
    return %c0_i32, %c0_i32_0 : i32, i32
  }
  func.func @transform_7(%arg0: i32) -> (i32, i32) {
    %c0_i32 = arith.constant 0 : i32
    %c0_i32_0 = arith.constant 0 : i32
    %c0_i32_1 = arith.constant 0 : i32
    return %c0_i32, %c0_i32_0 : i32, i32
  }
  func.func @transform_8(%arg0: i32) -> (i32, i32) {
    %c0_i32 = arith.constant 0 : i32
    %c0_i32_0 = arith.constant 0 : i32
    %c0_i32_1 = arith.constant 0 : i32
    return %c0_i32, %c0_i32_0 : i32, i32
  }
  func.func @transform_9(%arg0: i32) -> (i32, i32) {
    %c0_i32 = arith.constant 0 : i32
    %c0_i32_0 = arith.constant 0 : i32
    %c0_i32_1 = arith.constant 0 : i32
    return %c0_i32, %c0_i32_0 : i32, i32
  }
  func.func @transform_10(%arg0: i32) -> (i32, i32) {
    %c0_i32 = arith.constant 0 : i32
    %c0_i32_0 = arith.constant 0 : i32
    %c0_i32_1 = arith.constant 0 : i32
    return %c0_i32, %c0_i32_0 : i32, i32
  }
  func.func @transform_11(%arg0: i32) -> (i32, i32, i32) {
    %c0_i32 = arith.constant 0 : i32
    %c0_i32_0 = arith.constant 0 : i32
    %c0_i32_1 = arith.constant 0 : i32
    return %c0_i32, %arg0, %c0_i32_0 : i32, i32, i32
  }
}

</mosaic_0001>

<bundles_post_ra>
// kernel: tpu_custom_call.1
= control target key start
LH: loop header
LB: loop body
LE: loop exit
PB: predicated region body
PF: predicated region fallthrough
CT: control target
= control target key end

     0   :  { %16 = vsyncpa [#allocation5], 0  ;;  %s17067_s0 = inlined_call_operand.hbm [shape: f32[16,8,16], index: 0, kind: input, shape index: {}]   ;;  %s17068_s1 = inlined_call_operand.hbm [shape: f32[16,384], index: 1, kind: input, shape index: {}]   ;;  %s17069_s2 = inlined_call_operand.hbm [shape: f32[128,384], index: 2, kind: input, shape index: {}]   ;;  %s17070_s3 = inlined_call_operand.vmem [shape: f32[1,384], index: 3, kind: input, shape index: {}]   ;;  %s17071_s4 = inlined_call_operand.vmem [shape: f32[1,128], index: 4, kind: input, shape index: {}]   ;;  %s17072_s5 = inlined_call_operand.hbm [shape: f32[128,384], index: 5, kind: input, shape index: {}]   ;;  %s17073_s6 = inlined_call_operand.hbm [shape: f32[128,384], index: 6, kind: input, shape index: {}]   ;;  %s17074_s7 = inlined_call_operand.vmem [shape: f32[1,384], index: 7, kind: input, shape index: {}]   ;;  %s17075_s8 = inlined_call_operand.vmem [shape: f32[1,128], index: 8, kind: input, shape index: {}]   ;;  %s17076_s9 = inlined_call_operand.hbm [shape: f32[128,128], index: 9, kind: input, shape index: {}]   ;;  %s17077_s10 = inlined_call_operand.vmem [shape: f32[1,128], index: 10, kind: input, shape index: {}]   ;;  %s17078_s11 = inlined_call_operand.hbm [shape: f32[16,8,128], index: 11, kind: output, shape index: {}]  }
   0x1   :  { %17 = vsyncpa [#allocation8], 0 }
   0x2   :  { %18 = vsyncpa [#allocation11], 0 }
   0x3   :  { %19 = vsyncpa [#allocation14], 0 }
   0x4   :  { %20 = vsyncpa [#allocation6], 0  ;;  %s14582_s17 = smov [#allocation7]   ;;  %s14418_s21 = scalar_lea.hbm %s17068_s1, 768 }
   0x5   :  { %s38_s18 = sshll.u32 %s14582_s17, 4  ;;  %p14419_p0 = scmp.ne.s32.totalorder %s17068_s1, %s14418_s21  ;;  %s39_s18 = int_to_ptr.vmem [resolvable:$true] %s38_s18 }
   0x6   :  { %p14422_p1 = scmp.lt.u32.totalorder %s14418_s21, %s17068_s1 }
   0x8   :  { %p14424_p2 = pnand %p14422_p1, %p14419_p0 }
   0xa   :  { %14427 = shalt.err (!%p14424_p2)
}
   0xb   :  { %s14428_s26 = scalar_lea.vmem %s39_s18, 768  ;;  %p14433_p4 = scmp.lt.s32.totalorder %s39_s18, %s39_s18 }
   0xc   :  { %p14429_p3 = scmp.ne.s32.totalorder %s39_s18, %s14428_s26  ;;  %p14434_p5 = scmp.lt.s32.totalorder %s14428_s26, %s14428_s26 }
   0xe   :  { %p14435_p6 = por %p14434_p5, %p14433_p4 }
  0x10   :  { %p14436_p7 = pnand %p14435_p6, %p14429_p3 }
  0x12   :  { %14439 = shalt.err (!%p14436_p7)
}
  0x13   :  { %s14583_s27 = smov 384   ;;  %s14584_s28 = smov 24  }
  0x14   :  { %44 = dma.hbm_to_vmem [thread:$0]  %s17068_s1, 768, %s39_s18, [#allocation8], %s14583_s27, %s14583_s27, %s14584_s28  }
  0x15   :  { %s14585_s12 = smov [#allocation10]   ;;  %s14586_s14 = smov [#allocation4]  }
  0x16   :  { %s66_s13 = sshll.u32 %s14585_s12, 4  ;;  %s26_s15 = sshll.u32 %s14586_s14, 4  ;;  %s67_s13 = int_to_ptr.vmem [resolvable:$true] %s66_s13  ;;  %s27_s15 = int_to_ptr.vmem [resolvable:$true] %s26_s15 }
  0x17   :  { %s14440_s19 = scalar_lea.hbm %s17072_s5, 6144 }
  0x18   :  { %p14441_p8 = scmp.ne.s32.totalorder %s17072_s5, %s14440_s19  ;;  %p14444_p9 = scmp.lt.u32.totalorder %s14440_s19, %s17072_s5 }
  0x1a   :  { %p14446_p10 = pnand %p14444_p9, %p14441_p8 }
  0x1c   :  { %14449 = shalt.err (!%p14446_p10)
}
  0x1d   :  { %s14450_s1 = scalar_lea.vmem %s67_s13, 6144  ;;  %p14455_p12 = scmp.lt.s32.totalorder %s67_s13, %s67_s13 }
  0x1e   :  { %p14451_p11 = scmp.ne.s32.totalorder %s67_s13, %s14450_s1  ;;  %p14456_p13 = scmp.lt.s32.totalorder %s14450_s1, %s14450_s1 }
  0x20   :  { %p14457_p0 = por %p14456_p13, %p14455_p12 }
  0x22   :  { %p14458_p1 = pnand %p14457_p0, %p14451_p11 }
  0x24   :  { %14461 = shalt.err (!%p14458_p1)
}
  0x25   :  { %72 = dma.hbm_to_vmem [thread:$0]  %s17072_s5, 6144, %s67_s13, [#allocation11], %s14583_s27, %s14583_s27, %s14584_s28  }
  0x26   :  { %s14462_s29 = scalar_lea.hbm %s17067_s0, 2048 }
  0x27   :  { %p14463_p2 = scmp.ne.s32.totalorder %s17067_s0, %s14462_s29  ;;  %p14466_p3 = scmp.lt.u32.totalorder %s14462_s29, %s17067_s0 }
  0x29   :  { %p14468_p4 = pnand %p14466_p3, %p14463_p2 }
  0x2b   :  { %14471 = shalt.err (!%p14468_p4)
}
  0x2c   :  { %s14472_s17 = scalar_lea.vmem %s27_s15, 2048  ;;  %p14477_p6 = scmp.lt.s32.totalorder %s27_s15, %s27_s15 }
  0x2d   :  { %p14473_p5 = scmp.ne.s32.totalorder %s27_s15, %s14472_s17  ;;  %p14478_p7 = scmp.lt.s32.totalorder %s14472_s17, %s14472_s17 }
  0x2f   :  { %p14479_p8 = por %p14478_p7, %p14477_p6 }
  0x31   :  { %p14480_p9 = pnand %p14479_p8, %p14473_p5 }
  0x33   :  { %14483 = shalt.err (!%p14480_p9)
}
  0x34   :  { %s14587_s5 = smov 128   ;;  %s14588_s13 = smov 8  }
  0x35   :  { %32 = dma.hbm_to_vmem [thread:$0]  %s17067_s0, 2048, %s27_s15, [#allocation5], %s14587_s5, %s14587_s5, %s14588_s13  }
  0x36   :  { %s14589_s21 = smov [#allocation9]   ;;  %s14590_s23 = smov [#allocation12]  }
  0x37   :  { %s50_s22 = sshll.u32 %s14589_s21, 4  ;;  %s78_s1 = sshll.u32 %s14590_s23, 4  ;;  %s51_s22 = int_to_ptr.vmem [resolvable:$true] %s50_s22  ;;  %s79_s1 = int_to_ptr.vmem [resolvable:$true] %s78_s1 }
  0x38   :  { %s14484_s25 = scalar_lea.hbm %s17069_s2, 6144 }
  0x39   :  { %p14485_p10 = scmp.ne.s32.totalorder %s17069_s2, %s14484_s25  ;;  %p14488_p11 = scmp.lt.u32.totalorder %s14484_s25, %s17069_s2 }
  0x3b   :  { %p14490_p12 = pnand %p14488_p11, %p14485_p10 }
  0x3d   :  { %14493 = shalt.err (!%p14490_p12)
}
  0x3e   :  { %s14494_s0 = scalar_lea.vmem %s51_s22, 6144  ;;  %p14499_p0 = scmp.lt.s32.totalorder %s51_s22, %s51_s22 }
  0x3f   :  { %p14495_p13 = scmp.ne.s32.totalorder %s51_s22, %s14494_s0  ;;  %p14500_p1 = scmp.lt.s32.totalorder %s14494_s0, %s14494_s0 }
  0x41   :  { %p14501_p2 = por %p14500_p1, %p14499_p0 }
  0x43   :  { %p14502_p3 = pnand %p14501_p2, %p14495_p13 }
  0x45   :  { %14505 = shalt.err (!%p14502_p3)
}
  0x46   :  { %56 = dma.hbm_to_vmem [thread:$0]  %s17069_s2, 6144, %s51_s22, [#allocation8], %s14583_s27, %s14583_s27, %s14584_s28  }
  0x47   :  { %s14506_s19 = scalar_lea.hbm %s17073_s6, 6144 }
  0x48   :  { %p14507_p4 = scmp.ne.s32.totalorder %s17073_s6, %s14506_s19  ;;  %p14510_p5 = scmp.lt.u32.totalorder %s14506_s19, %s17073_s6 }
  0x4a   :  { %p14512_p6 = pnand %p14510_p5, %p14507_p4 }
  0x4c   :  { %14515 = shalt.err (!%p14512_p6)
}
  0x4d   :  { %s14516_s24 = scalar_lea.vmem %s79_s1, 6144  ;;  %p14521_p8 = scmp.lt.s32.totalorder %s79_s1, %s79_s1 }
  0x4e   :  { %p14517_p7 = scmp.ne.s32.totalorder %s79_s1, %s14516_s24  ;;  %p14522_p9 = scmp.lt.s32.totalorder %s14516_s24, %s14516_s24 }
  0x50   :  { %p14523_p10 = por %p14522_p9, %p14521_p8 }
  0x52   :  { %p14524_p11 = pnand %p14523_p10, %p14517_p7 }
  0x54   :  { %14527 = shalt.err (!%p14524_p11)
}
  0x55   :  { %84 = dma.hbm_to_vmem [thread:$0]  %s17073_s6, 6144, %s79_s1, [#allocation11], %s14583_s27, %s14583_s27, %s14584_s28  }
  0x56   :  { %s14591_s25 = smov [#allocation13]   ;;  %s14528_s12 = scalar_lea.hbm %s17076_s9, 2048 }
  0x57   :  { %s94_s26 = sshll.u32 %s14591_s25, 4  ;;  %p14529_p12 = scmp.ne.s32.totalorder %s17076_s9, %s14528_s12  ;;  %s95_s26 = int_to_ptr.vmem [resolvable:$true] %s94_s26 }
  0x58   :  { %p14532_p13 = scmp.lt.u32.totalorder %s14528_s12, %s17076_s9 }
  0x5a   :  { %p14534_p0 = pnand %p14532_p13, %p14529_p12 }
  0x5c   :  { %14537 = shalt.err (!%p14534_p0)
}
  0x5d   :  { %s14538_s17 = scalar_lea.vmem %s95_s26, 2048  ;;  %p14543_p2 = scmp.lt.s32.totalorder %s95_s26, %s95_s26 }
  0x5e   :  { %p14539_p1 = scmp.ne.s32.totalorder %s95_s26, %s14538_s17  ;;  %p14544_p3 = scmp.lt.s32.totalorder %s14538_s17, %s14538_s17 }
  0x60   :  { %p14545_p4 = por %p14544_p3, %p14543_p2 }
  0x62   :  { %p14546_p5 = pnand %p14545_p4, %p14539_p1 }
  0x64   :  { %14549 = shalt.err (!%p14546_p5)
}
  0x65   :  { %100 = dma.hbm_to_vmem [thread:$0]  %s17076_s9, 2048, %s95_s26, [#allocation14], %s14587_s5, %s14587_s5, %s14588_s13  }
  0x66   :  { %14572 = dma.done.wait [#allocation5], 2048  }
  0x67   :  { %14573 = vsyncadd [#allocation5], 4294965248 }
  0x68   :  { %14574 = dma.done.wait [#allocation8], 6912  }
  0x69   :  { %14575 = vsyncadd [#allocation8], 4294960384 }
  0x6a   :  { %14576 = dma.done.wait [#allocation11], 12288  }
  0x6b   :  { %14577 = vsyncadd [#allocation11], 4294955008 }
  0x6c   :  { %14578 = dma.done.wait [#allocation14], 2048  }
  0x6d   :  { %14579 = vsyncadd [#allocation14], 4294965248  ;;  %v17079_v0 = vmov 0.0   ;;  %v138_v1 = vld [vmem:[#allocation7 + $0x8] sm:$0xff]  ;;  %v141_v2 = vld [vmem:[#allocation7 + $0x20] sm:$0xff]  ;;  %vm160_vm0 = vcmask 130048  }
  0x6e   :  { %273 = vmatprep.mubr.f32.mxu0 %v17079_v0  ;;  %v137_v3 = vld [vmem:[#allocation7] sm:$0xff]  ;;  %v11221_v4 = vpack.c.bf16 %v141_v2, %v138_v1  ;;  %v140_v5 = vld [vmem:[#allocation7 + $0x18] sm:$0xff]  ;;  %v567_v9 = vld [vmem:[#allocation9 + $0x20] sm:$0xff]  ;;  %v17081_v55 = vmov 0.0|0.0   ;;  %vm14594_vm1 = vmmov 0  }
  0x6f   :  { %v121_v6 = vld [vmem:[#allocation4] sm:$0xff]  ;;  %v564_v7 = vld [vmem:[#allocation9 + $0x8] sm:$0xff]  ;;  %v11223_v8 = vpack.c.bf16 %v140_v5, %v137_v3  ;;  %v563_v10 = vld [vmem:[#allocation9] sm:$0xff] }
  0x70   :  { %v566_v11 = vld [vmem:[#allocation9 + $0x18] sm:$0xff]  ;;  %9461 = vmatprep.mubr.msk.f32.mxu1 %vm160_vm0, %v121_v6  ;;  %11222 = vmatprep.subr.bf16.mxu0 %v11221_v4  ;;  %v14748_v12 = vpack.c.bf16 %v567_v9, %v564_v7  ;;  %v573_v15 = vld [vmem:[#allocation9 + $0x50] sm:$0xff]  ;;  %v572_v18 = vld [vmem:[#allocation9 + $0x48] sm:$0xff] }
  0x71   :  { %v570_v13 = vld [vmem:[#allocation9 + $0x38] sm:$0xff]  ;;  %11224 = vmatpush1.bf16.msra.mxu0 %v11223_v8  ;;  %v14750_v14 = vpack.c.bf16 %v566_v11, %v563_v10  ;;  %v569_v17 = vld [vmem:[#allocation9 + $0x30] sm:$0xff]  ;;  %v576_v19 = vld [vmem:[#allocation9 + $0x68] sm:$0xff] }
  0x72   :  { %11230 = vmatprep.subr.bf16.mxu0 %v14748_v12  ;;  %v14753_v16 = vpack.c.bf16 %v573_v15, %v570_v13  ;;  %v579_v20 = vld [vmem:[#allocation9 + $0x80] sm:$0xff]  ;;  %v122_v21 = vld [vmem:[#allocation4 + $0x8] sm:$0xff]  ;;  %v14758_v22 = vpack.c.bf16 %v572_v18, %v569_v17  ;;  %v585_v27 = vld [vmem:[#allocation9 + $0xb0] sm:$0xff] }
  0x73   :  { %v14761_v23 = vpack.c.bf16 %v579_v20, %v576_v19  ;;  %v575_v24 = vld [vmem:[#allocation9 + $0x60] sm:$0xff]  ;;  %v578_v25 = vld [vmem:[#allocation9 + $0x78] sm:$0xff]  ;;  %v581_v31 = vld [vmem:[#allocation9 + $0x90] sm:$0xff] }
  0x74   :  { %8492 = vmatmul.mubr.msk.f32.vlgmr.msra.gmra.mrb[0].mxu0 %vm160_vm0, %v121_v6  ;;  %v582_v26 = vld [vmem:[#allocation9 + $0x98] sm:$0xff]  ;;  %v123_v28 = vld [vmem:[#allocation4 + $0x10] sm:$0xff]  ;;  %v14766_v29 = vpack.c.bf16 %v578_v25, %v575_v24  ;;  %v584_v32 = vld [vmem:[#allocation9 + $0xa8] sm:$0xff] }
  0x75   :  { %11232 = vmatpush1.bf16.msra.mxu0 %v14750_v14  ;;  %279 = vmatprep.mubr.f32.mxu0 %v17079_v0  ;;  %v14769_v30 = vpack.c.bf16 %v585_v27, %v582_v26  ;;  %v588_v33 = vld [vmem:[#allocation9 + $0xc8] sm:$0xff]  ;;  %v591_v34 = vld [vmem:[#allocation9 + $0xe0] sm:$0xff]  ;;  %v142_v36 = vld [vmem:[#allocation7 + $0x28] sm:$0xff]  ;;  %v14774_v38 = vpack.c.bf16 %v584_v32, %v581_v31 }
  0x76   :  { %11234 = vmatprep.subr.bf16.mxu0 %v14753_v16  ;;  %v139_v35 = vld [vmem:[#allocation7 + $0x10] sm:$0xff]  ;;  %v124_v37 = vld [vmem:[#allocation4 + $0x18] sm:$0xff]  ;;  %v14777_v40 = vpack.c.bf16 %v591_v34, %v588_v33  ;;  %v590_v42 = vld [vmem:[#allocation9 + $0xd8] sm:$0xff] }
  0x77   :  { %v11225_v39 = vpack.c.bf16 %v142_v36, %v139_v35  ;;  %v587_v41 = vld [vmem:[#allocation9 + $0xc0] sm:$0xff]  ;;  %v565_v43 = vld [vmem:[#allocation9 + $0x10] sm:$0xff]  ;;  %v594_v44 = vld [vmem:[#allocation9 + $0xf8] sm:$0xff] }
  0x78   :  { %8493 = vmatmul.mubr.msk.f32.gmra.mrb[2].mxu0 %vm160_vm0, %v122_v21  ;;  %v597_v45 = vld [vmem:[#allocation9 + $0x110] sm:$0xff]  ;;  %v568_v46 = vld [vmem:[#allocation9 + $0x28] sm:$0xff]  ;;  %v14784_v49 = vpack.c.bf16 %v590_v42, %v587_v41  ;;  %v571_v50 = vld [vmem:[#allocation9 + $0x40] sm:$0xff] }
  0x79   :  { %285 = vmatprep.mubr.f32.mxu0 %v17079_v0  ;;  %11236 = vmatpush1.bf16.msra.mxu0 %v14758_v22  ;;  %v14780_v47 = vpack.c.bf16 %v568_v46, %v565_v43  ;;  %v125_v48 = vld [vmem:[#allocation4 + $0x20] sm:$0xff]  ;;  %v574_v51 = vld [vmem:[#allocation9 + $0x58] sm:$0xff]  ;;  %v14787_v52 = vpack.c.bf16 %v597_v45, %v594_v44  ;;  %v596_v54 = vld [vmem:[#allocation9 + $0x108] sm:$0xff] }
  0x7a   :  { %11238 = vmatprep.subr.bf16.mxu0 %v14761_v23  ;;  %11226 = vmatprep.subr.bf16.mxu1 %v11225_v39  ;;  %17228 = vst [vmem:[#allocation21_spill] sm:$0xff] %v14784_v49  ;;  %v593_v53 = vld [vmem:[#allocation9 + $0xf0] sm:$0xff]  ;;  %v600_v56 = vld [vmem:[#allocation9 + $0x128] sm:$0xff]  ;;  %v603_v57 = vld [vmem:[#allocation9 + $0x140] sm:$0xff]  ;;  %v14793_v58 = vpack.c.bf16 %v574_v51, %v571_v50 }
  0x7b   :  { %11228 = vmatpush3.bf16.msra.mxu1 %v11225_v39  ;;  %17229 = vst [vmem:[#allocation22_spill] sm:$0xff] %v14787_v52  ;;  %v126_v59 = vld [vmem:[#allocation4 + $0x28] sm:$0xff]  ;;  %v14797_v60 = vpack.c.bf16 %v596_v54, %v593_v53  ;;  %v577_v61 = vld [vmem:[#allocation9 + $0x70] sm:$0xff]  ;;  %v580_v62 = vld [vmem:[#allocation9 + $0x88] sm:$0xff]  ;;  %v14800_v63 = vpack.c.bf16 %v603_v57, %v600_v56 }
  0x7c   :  { %8494 = vmatmul.mubr.msk.f32.gmra.mrb[4].mxu0 %vm160_vm0, %v123_v28  ;;  %11261 = vmatprep.subr.bf16.mxu1 %v17081_v55  ;;  %v599_v1 = vld [vmem:[#allocation9 + $0x120] sm:$0xff]  ;;  %v602_v2 = vld [vmem:[#allocation9 + $0x138] sm:$0xff]  ;;  %v609_v4 = vld [vmem:[#allocation9 + $0x170] sm:$0xff]  ;;  %v14807_v5 = vpack.c.bf16 %v580_v62, %v577_v61 }
  0x7d   :  { %291 = vmatprep.mubr.f32.mxu0 %v17079_v0  ;;  %11240 = vmatpush1.bf16.msra.mxu0 %v14766_v29  ;;  %17230 = vst [vmem:[#allocation23_spill] sm:$0xff] %v14797_v60  ;;  %17231 = vst [vmem:[#allocation24_spill] sm:$0xff] %v14800_v63  ;;  %v606_v3 = vld [vmem:[#allocation9 + $0x158] sm:$0xff]  ;;  %v127_v6 = vld [vmem:[#allocation4 + $0x30] sm:$0xff]  ;;  %v14811_v7 = vpack.c.bf16 %v602_v2, %v599_v1 }
  0x7e   :  { %11242 = vmatprep.subr.bf16.mxu0 %v14769_v30  ;;  %9462 = vmatmul.mubr.msk.f32.vlgmr.msra.gmra.mrb[0].mxu1 %vm160_vm0, %v122_v21  ;;  %v583_v8 = vld [vmem:[#allocation9 + $0xa0] sm:$0xff]  ;;  %v586_v9 = vld [vmem:[#allocation9 + $0xb8] sm:$0xff]  ;;  %v14814_v10 = vpack.c.bf16 %v609_v4, %v606_v3  ;;  %v605_v11 = vld [vmem:[#allocation9 + $0x150] sm:$0xff] }
  0x7f   :  { %11263 = vmatpush3.bf16.msra.mxu1 %v14780_v47  ;;  %9464 = vmatprep.mubr.msk.f32.mxu1 %vm160_vm0, %v123_v28  ;;  %17232 = vst [vmem:[#allocation25_spill] sm:$0xff] %v14811_v7  ;;  %v608_v13 = vld [vmem:[#allocation9 + $0x168] sm:$0xff]  ;;  %v14821_v15 = vpack.c.bf16 %v586_v9, %v583_v8  ;;  %v589_v19 = vld [vmem:[#allocation9 + $0xd0] sm:$0xff]  ;;  %v595_v25 = vld [vmem:[#allocation9 + $0x100] sm:$0xff] }
  0x80   :  { %8495 = vmatmul.mubr.msk.f32.gmra.mrb[6].mxu0 %vm160_vm0, %v124_v37  ;;  %11264 = vmatprep.subr.bf16.mxu1 %v17081_v55  ;;  %17233 = vst [vmem:[#allocation26_spill] sm:$0xff] %v14814_v10  ;;  %v128_v17 = vld [vmem:[#allocation4 + $0x38] sm:$0xff]  ;;  %v14825_v18 = vpack.c.bf16 %v608_v13, %v605_v11  ;;  %v129_v24 = vld [vmem:[#allocation4 + $0x40] sm:$0xff]  ;;  %v598_v26 = vld [vmem:[#allocation9 + $0x118] sm:$0xff] }
  0x81   :  { %297 = vmatprep.mubr.f32.mxu0 %v17079_v0  ;;  %11244 = vmatpush1.bf16.msra.mxu0 %v14774_v38  ;;  %v592_v20 = vld [vmem:[#allocation9 + $0xe8] sm:$0xff]  ;;  %v130_v27 = vld [vmem:[#allocation4 + $0x48] sm:$0xff]  ;;  %v131_v28 = vld [vmem:[#allocation4 + $0x50] sm:$0xff]  ;;  %v14843_v31 = vpack.c.bf16 %v598_v26, %v595_v25 }
  0x82   :  { %11246 = vmatprep.subr.bf16.mxu0 %v14777_v40  ;;  %9465 = vmatmul.mubr.msk.f32.gmra.mrb[2].mxu1 %vm160_vm0, %v124_v37  ;;  %17234 = vst [vmem:[#allocation27_spill] sm:$0xff] %v14825_v18  ;;  %v14833_v21 = vpack.c.bf16 %v592_v20, %v589_v19  ;;  %v601_v32 = vld [vmem:[#allocation9 + $0x130] sm:$0xff]  ;;  %v604_v33 = vld [vmem:[#allocation9 + $0x148] sm:$0xff]  ;;  %v607_v37 = vld [vmem:[#allocation9 + $0x160] sm:$0xff] }
  0x83   :  { %11266 = vmatpush3.bf16.msra.mxu1 %v14793_v58  ;;  %9467 = vmatprep.mubr.msk.f32.mxu1 %vm160_vm0, %v125_v48  ;;  %17236 = vst [vmem:[#allocation29_spill] sm:$0xff] %v14843_v31  ;;  %v132_v34 = vld [vmem:[#allocation4 + $0x58] sm:$0xff]  ;;  %v133_v35 = vld [vmem:[#allocation4 + $0x60] sm:$0xff]  ;;  %v14851_v36 = vpack.c.bf16 %v604_v33, %v601_v32  ;;  %v610_v39 = vld [vmem:[#allocation9 + $0x178] sm:$0xff] }
  0x84   :  { %8496 = vmatmul.mubr.msk.f32.gmra.mrb[8].mxu0 %vm160_vm0, %v125_v48  ;;  %11267 = vmatprep.subr.bf16.mxu1 %v17081_v55  ;;  %17235 = vst [vmem:[#allocation28_spill] sm:$0xff] %v14833_v21  ;;  %v134_v41 = vld [vmem:[#allocation4 + $0x68] sm:$0xff]  ;;  %v135_v42 = vld [vmem:[#allocation4 + $0x70] sm:$0xff]  ;;  %v14859_v43 = vpack.c.bf16 %v610_v39, %v607_v37  ;;  %v136_v44 = vld [vmem:[#allocation4 + $0x78] sm:$0xff] }
  0x85   :  { %303 = vmatprep.mubr.f32.mxu0 %v17079_v0  ;;  %11248 = vmatpush1.bf16.msra.mxu0 %v14784_v49  ;;  %17237 = vst [vmem:[#allocation30_spill] sm:$0xff] %v14851_v36  ;;  %v660_v45 = vld [vmem:[#allocation10 + $0x8] sm:$0xff]  ;;  %v663_v46 = vld [vmem:[#allocation10 + $0x20] sm:$0xff]  ;;  %v662_v51 = vld [vmem:[#allocation10 + $0x18] sm:$0xff] }
  0x86   :  { %11250 = vmatprep.subr.bf16.mxu0 %v14787_v52  ;;  %9468 = vmatmul.mubr.msk.f32.gmra.mrb[4].mxu1 %vm160_vm0, %v126_v59  ;;  %17238 = vst [vmem:[#allocation31_spill] sm:$0xff] %v14859_v43  ;;  %v14883_v48 = vpack.c.bf16 %v663_v46, %v660_v45  ;;  %v659_v50 = vld [vmem:[#allocation10] sm:$0xff]  ;;  %v661_v53 = vld [vmem:[#allocation10 + $0x10] sm:$0xff]  ;;  %v664_v56 = vld [vmem:[#allocation10 + $0x28] sm:$0xff] }
  0x87   :  { %11269 = vmatpush3.bf16.msra.mxu1 %v14807_v5  ;;  %9470 = vmatprep.mubr.msk.f32.mxu1 %vm160_vm0, %v127_v6  ;;  %v14885_v54 = vpack.c.bf16 %v662_v51, %v659_v50  ;;  %v14888_v57 = vpack.c.bf16 %v664_v56, %v661_v53  ;;  %v669_v61 = vld [vmem:[#allocation10 + $0x50] sm:$0xff]  ;;  %v668_v2 = vld [vmem:[#allocation10 + $0x48] sm:$0xff]  ;;  %v667_v3 = vld [vmem:[#allocation10 + $0x40] sm:$0xff] }
  0x88   :  { %8497 = vmatmul.mubr.msk.f32.gmra.mrb[10].mxu0 %vm160_vm0, %v126_v59  ;;  %11270 = vmatprep.subr.bf16.mxu1 %v17081_v55  ;;  %17239 = vst [vmem:[#allocation32_spill] sm:$0xff] %v14883_v48  ;;  %v666_v59 = vld [vmem:[#allocation10 + $0x38] sm:$0xff]  ;;  %v665_v1 = vld [vmem:[#allocation10 + $0x30] sm:$0xff]  ;;  %v672_v8 = vld [vmem:[#allocation10 + $0x68] sm:$0xff] }
  0x89   :  { %309 = vmatprep.mubr.f32.mxu0 %v17079_v0  ;;  %11252 = vmatpush1.bf16.msra.mxu0 %v14797_v60  ;;  %17240 = vst [vmem:[#allocation33_spill] sm:$0xff] %v14885_v54  ;;  %17241 = vst [vmem:[#allocation34_spill] sm:$0xff] %v14888_v57  ;;  %v14892_v62 = vpack.c.bf16 %v669_v61, %v666_v59  ;;  %v14895_v4 = vpack.c.bf16 %v668_v2, %v665_v1  ;;  %v675_v9 = vld [vmem:[#allocation10 + $0x80] sm:$0xff]  ;;  %v674_v19 = vld [vmem:[#allocation10 + $0x78] sm:$0xff] }
  0x8a   :  { %11254 = vmatprep.subr.bf16.mxu0 %v14800_v63  ;;  %9471 = vmatmul.mubr.msk.f32.gmra.mrb[6].mxu1 %vm160_vm0, %v128_v17  ;;  %v14900_v13 = vpack.c.bf16 %v675_v9, %v672_v8  ;;  %v673_v20 = vld [vmem:[#allocation10 + $0x70] sm:$0xff]  ;;  %v676_v25 = vld [vmem:[#allocation10 + $0x88] sm:$0xff]  ;;  %v682_v39 = vld [vmem:[#allocation10 + $0xb8] sm:$0xff] }
  0x8b   :  { %11272 = vmatpush3.bf16.msra.mxu1 %v14821_v15  ;;  %9473 = vmatprep.mubr.msk.f32.mxu1 %vm160_vm0, %v129_v24  ;;  %17242 = vst [vmem:[#allocation35_spill] sm:$0xff] %v14892_v62  ;;  %17243 = vst [vmem:[#allocation36_spill] sm:$0xff] %v14895_v4  ;;  %v14908_v26 = vpack.c.bf16 %v676_v25, %v673_v20  ;;  %v677_v33 = vld [vmem:[#allocation10 + $0x90] sm:$0xff]  ;;  %v683_v46 = vld [vmem:[#allocation10 + $0xc0] sm:$0xff] }
  0x8c   :  { %8498 = vmatmul.mubr.msk.f32.gmra.mrb[12].mxu0 %vm160_vm0, %v127_v6  ;;  %11273 = vmatprep.subr.bf16.mxu1 %v17081_v55  ;;  %v670_v6 = vld [vmem:[#allocation10 + $0x58] sm:$0xff]  ;;  %17245 = vst [vmem:[#allocation38_spill] sm:$0xff] %v14900_v13  ;;  %v685_v51 = vld [vmem:[#allocation10 + $0xd0] sm:$0xff]  ;;  %v688_v56 = vld [vmem:[#allocation10 + $0xe8] sm:$0xff] }
  0x8d   :  { %315 = vmatprep.mubr.f32.mxu0 %v17079_v0  ;;  %11256 = vmatpush1.bf16.msra.mxu0 %v14811_v7  ;;  %v14898_v11 = vpack.c.bf16 %v670_v6, %v667_v3  ;;  %17247 = vst [vmem:[#allocation40_spill] sm:$0xff] %v14908_v26  ;;  %v686_v50 = vld [vmem:[#allocation10 + $0xd8] sm:$0xff]  ;;  %v14928_v59 = vpack.c.bf16 %v688_v56, %v685_v51  ;;  %v693_v1 = vld [vmem:[#allocation10 + $0x110] sm:$0xff]  ;;  %v692_v6 = vld [vmem:[#allocation10 + $0x108] sm:$0xff] }
  0x8e   :  { %11258 = vmatprep.subr.bf16.mxu0 %v14814_v10  ;;  %9474 = vmatmul.mubr.msk.f32.gmra.mrb[8].mxu1 %vm160_vm0, %v130_v27  ;;  %v14925_v53 = vpack.c.bf16 %v686_v50, %v683_v46  ;;  %v690_v61 = vld [vmem:[#allocation10 + $0xf8] sm:$0xff]  ;;  %v689_v2 = vld [vmem:[#allocation10 + $0xf0] sm:$0xff]  ;;  %v691_v8 = vld [vmem:[#allocation10 + $0x100] sm:$0xff] }
  0x8f   :  { %11275 = vmatpush3.bf16.msra.mxu1 %v14833_v21  ;;  %9476 = vmatprep.mubr.msk.f32.mxu1 %vm160_vm0, %v131_v28  ;;  %17244 = vst [vmem:[#allocation37_spill] sm:$0xff] %v14898_v11  ;;  %17253 = vst [vmem:[#allocation46_spill] sm:$0xff] %v14928_v59  ;;  %v14931_v3 = vpack.c.bf16 %v693_v1, %v690_v61  ;;  %v694_v9 = vld [vmem:[#allocation10 + $0x118] sm:$0xff]  ;;  %v696_v20 = vld [vmem:[#allocation10 + $0x128] sm:$0xff] }
  0x90   :  { %8499 = vmatmul.mubr.msk.f32.gmra.mrb[14].mxu0 %vm160_vm0, %v128_v17  ;;  %11276 = vmatprep.subr.bf16.mxu1 %v17081_v55  ;;  %v671_v17 = vld [vmem:[#allocation10 + $0x60] sm:$0xff]  ;;  %17252 = vst [vmem:[#allocation45_spill] sm:$0xff] %v14925_v53  ;;  %v701_v51 = vld [vmem:[#allocation10 + $0x150] sm:$0xff]  ;;  %v704_v56 = vld [vmem:[#allocation10 + $0x168] sm:$0xff] }
  0x91   :  { %321 = vmatprep.mubr.f32.mxu0 %v17079_v0  ;;  %11260 = vmatpush1.bf16.msra.mxu0 %v14825_v18  ;;  %17254 = vst [vmem:[#allocation47_spill] sm:$0xff] %v14931_v3  ;;  %v699_v25 = vld [vmem:[#allocation10 + $0x140] sm:$0xff]  ;;  %v706_v1 = vld [vmem:[#allocation10 + $0x178] sm:$0xff] }
  0x92   :  { %11317 = vmatprep.subr.bf16.mxu0 %v17081_v55  ;;  %9477 = vmatmul.mubr.msk.f32.gmra.mrb[10].mxu1 %vm160_vm0, %v132_v34  ;;  %v703_v61 = vld [vmem:[#allocation10 + $0x160] sm:$0xff] }
  0x93   :  { %11278 = vmatpush3.bf16.msra.mxu1 %v14843_v31  ;;  %9479 = vmatprep.mubr.msk.f32.mxu1 %vm160_vm0, %v133_v35 }
  0x94   :  { %8500 = vmatmul.mubr.msk.f32.gmra.mrb[16].mxu0 %vm160_vm0, %v129_v24  ;;  %11279 = vmatprep.subr.bf16.mxu1 %v17081_v55  ;;  %v14906_v24 = vpack.c.bf16 %v674_v19, %v671_v17  ;;  %v14934_v17 = vpack.c.bf16 %v692_v6, %v689_v2  ;;  %v14936_v19 = vpack.c.bf16 %v694_v9, %v691_v8  ;;  %v612_v2 = vld [vmem:[#allocation12 + $0x8] sm:$0xff]  ;;  %v615_v6 = vld [vmem:[#allocation12 + $0x20] sm:$0xff] }
  0x95   :  { %327 = vmatprep.mubr.f32.mxu0 %v17079_v0  ;;  %v14953_v8 = vpack.c.bf16 %v704_v56, %v701_v51  ;;  %v14957_v9 = vpack.c.bf16 %v706_v1, %v703_v61 }
  0x96   :  { %9480 = vmatmul.mubr.msk.f32.gmra.mrb[12].mxu1 %vm160_vm0, %v134_v41  ;;  %17246 = vst [vmem:[#allocation39_spill] sm:$0xff] %v14906_v24  ;;  %17255 = vst [vmem:[#allocation48_spill] sm:$0xff] %v14934_v17 }
  0x97   :  { %11281 = vmatpush3.bf16.msra.mxu1 %v14851_v36  ;;  %9482 = vmatprep.mubr.msk.f32.mxu1 %vm160_vm0, %v135_v42  ;;  %17256 = vst [vmem:[#allocation49_spill] sm:$0xff] %v14936_v19  ;;  %17261 = vst [vmem:[#allocation54_spill] sm:$0xff] %v14953_v8 }
  0x98   :  { %8501 = vmatmul.mubr.msk.f32.gmra.mrb[18].mxu0 %vm160_vm0, %v130_v27  ;;  %11282 = vmatprep.subr.bf16.mxu1 %v17081_v55  ;;  %v678_v27 = vld [vmem:[#allocation10 + $0x98] sm:$0xff]  ;;  %17262 = vst [vmem:[#allocation55_spill] sm:$0xff] %v14957_v9 }
  0x99   :  { %333 = vmatprep.mubr.f32.mxu0 %v17079_v0 }
  0x9a   :  { %9483 = vmatmul.mubr.msk.f32.gmra.mrb[14].mxu1 %vm160_vm0, %v136_v44 }
  0x9b   :  { %11284 = vmatpush3.bf16.msra.mxu1 %v14859_v43  ;;  %9517 = vmatprep.mubr.msk.f32.mxu1 %vm14594_vm1, %v17079_v0 }
  0x9c   :  { %8502 = vmatmul.mubr.msk.f32.gmra.mrb[20].mxu0 %vm160_vm0, %v131_v28  ;;  %11286 = vmatprep.subr.bf16.mxu1 %v14883_v48  ;;  %v681_v28 = vld [vmem:[#allocation10 + $0xb0] sm:$0xff] }
  0x9d   :  { %339 = vmatprep.mubr.f32.mxu0 %v17079_v0  ;;  %v14912_v32 = vpack.c.bf16 %v681_v28, %v678_v27  ;;  %v695_v27 = vld [vmem:[#allocation10 + $0x120] sm:$0xff]  ;;  %v14940_v28 = vpack.c.bf16 %v699_v25, %v696_v20  ;;  %v14959_v20 = vpack.c.bf16 %v615_v6, %v612_v2  ;;  %v145_v25 = vlaneseq }
  0x9e   :  { %9518 = vmatmul.mubr.f32.vlgmr.msra.gmra.mrb[16].mxu1 %v17079_v0 }
  0x9f   :  { %967 = vmatprep.mubr.f32.mxu1 %v17079_v0  ;;  %11288 = vmatpush1.bf16.msra.mxu1 %v14885_v54  ;;  %17248 = vst [vmem:[#allocation41_spill] sm:$0xff] %v14912_v32  ;;  %17257 = vst [vmem:[#allocation50_spill] sm:$0xff] %v14940_v28 }
  0xa0   :  { %8503 = vmatmul.mubr.msk.f32.gmra.mrb[22].mxu0 %vm160_vm0, %v132_v34  ;;  %11290 = vmatprep.subr.bf16.mxu1 %v14892_v62  ;;  %v680_v34 = vld [vmem:[#allocation10 + $0xa8] sm:$0xff]  ;;  %17263 = vst [vmem:[#allocation56_spill] sm:$0xff] %v14959_v20 }
  0xa1   :  { %345 = vmatprep.mubr.f32.mxu0 %v17079_v0  ;;  %v14915_v37 = vpack.c.bf16 %v680_v34, %v677_v33  ;;  %v698_v33 = vld [vmem:[#allocation10 + $0x138] sm:$0xff]  ;;  %v697_v34 = vld [vmem:[#allocation10 + $0x130] sm:$0xff] }
  0xa3   :  { %11292 = vmatpush1.bf16.msra.mxu1 %v14895_v4  ;;  %17249 = vst [vmem:[#allocation42_spill] sm:$0xff] %v14915_v37 }
  0xa4   :  { %8504 = vmatmul.mubr.msk.f32.gmra.mrb[24].mxu0 %vm160_vm0, %v133_v35  ;;  %11294 = vmatprep.subr.bf16.mxu1 %v14900_v13  ;;  %v679_v35 = vld [vmem:[#allocation10 + $0xa0] sm:$0xff] }
  0xa5   :  { %351 = vmatprep.mubr.f32.mxu0 %v17079_v0 }
  0xa7   :  { %11296 = vmatpush1.bf16.msra.mxu1 %v14906_v24 }
  0xa8   :  { %8505 = vmatmul.mubr.msk.f32.gmra.mrb[26].mxu0 %vm160_vm0, %v134_v41  ;;  %11298 = vmatprep.subr.bf16.mxu1 %v14912_v32  ;;  %v14918_v41 = vpack.c.bf16 %v682_v39, %v679_v35  ;;  %v700_v35 = vld [vmem:[#allocation10 + $0x148] sm:$0xff]  ;;  %v702_v39 = vld [vmem:[#allocation10 + $0x158] sm:$0xff] }
  0xa9   :  { %357 = vmatprep.mubr.f32.mxu0 %v17079_v0  ;;  %v14947_v46 = vpack.c.bf16 %v700_v35, %v697_v34  ;;  %v143_v34 = vld [vmem:[%s17070_s3] sm:$0x7] }
  0xaa   :  { %17250 = vst [vmem:[#allocation43_spill] sm:$0xff] %v14918_v41 }
  0xab   :  { %11300 = vmatpush1.bf16.msra.mxu1 %v14915_v37  ;;  %17259 = vst [vmem:[#allocation52_spill] sm:$0xff] %v14947_v46 }
  0xac   :  { %8506 = vmatmul.mubr.msk.f32.gmra.mrb[28].mxu0 %vm160_vm0, %v135_v42  ;;  %v684_v42 = vld [vmem:[#allocation10 + $0xc8] sm:$0xff] }
  0xad   :  { %363 = vmatprep.mubr.f32.mxu0 %v17079_v0 }
  0xb0   :  { %8507 = vmatmul.mubr.msk.f32.gmra.mrb[30].mxu0 %vm160_vm0, %v136_v44  ;;  %v687_v44 = vld [vmem:[#allocation10 + $0xe0] sm:$0xff] }
  0xb1   :  { %802 = vmatprep.mubr.f32.mxu0 %v17079_v0  ;;  %v14922_v45 = vpack.c.bf16 %v687_v44, %v684_v42  ;;  %v705_v42 = vld [vmem:[#allocation10 + $0x170] sm:$0xff]  ;;  %v14943_v44 = vpack.c.bf16 %v698_v33, %v695_v27  ;;  %v14966_v27 = vshrl.u32 %v145_v25, 7 }
  0xb2   :  { %v14949_v50 = vpack.c.bf16 %v705_v42, %v702_v39 }
  0xb3   :  { %17251 = vst [vmem:[#allocation44_spill] sm:$0xff] %v14922_v45  ;;  %11302 = vmatprep.subr.bf16.mxu1 %v14922_v45  ;;  %17258 = vst [vmem:[#allocation51_spill] sm:$0xff] %v14943_v44  ;;  %v17087_v33 = vsub.s32 2, %v14966_v27 }
  0xb4   :  { %803 = vmatmul.mubr.f32.vlgmr.msra.gmra.mrb[0].mxu0 %v17079_v0  ;;  %11304 = vmatpush1.bf16.msra.mxu1 %v14925_v53  ;;  %17260 = vst [vmem:[#allocation53_spill] sm:$0xff] %v14949_v50  ;;  %17264 = vst [vmem:[#allocation57_spill] sm:$0xff] %v14966_v27 }
  0xb5   :  { %9552 = vmatprep.mubr.msk.f32.mxu0 %vm14594_vm1, %v17079_v0  ;;  %11319 = vmatpush3.bf16.msra.mxu0 %v14888_v57  ;;  %v156_v35 = vrot.slane %v143_v34, %v17087_v33 }
  0xb6   :  { %11320 = vmatprep.subr.bf16.mxu0 %v17081_v55  ;;  %11306 = vmatprep.subr.bf16.mxu1 %v14931_v3 }
  0xb8   :  { %11308 = vmatpush1.bf16.msra.mxu1 %v14934_v17 }
  0xb9   :  { %11322 = vmatpush3.bf16.msra.mxu0 %v14898_v11  ;;  %11310 = vmatprep.subr.bf16.mxu1 %v14940_v28 }
  0xba   :  { %11323 = vmatprep.subr.bf16.mxu0 %v17081_v55 }
  0xbc   :  { %11312 = vmatpush1.bf16.msra.mxu1 %v14943_v44 }
  0xbd   :  { %11325 = vmatpush3.bf16.msra.mxu0 %v14908_v26  ;;  %11314 = vmatprep.subr.bf16.mxu1 %v14949_v50  ;;  %v618_v50 = vld [vmem:[#allocation12 + $0x38] sm:$0xff] }
  0xbe   :  { %11326 = vmatprep.subr.bf16.mxu0 %v17081_v55 }
  0xc0   :  { %11316 = vmatpush1.bf16.msra.mxu1 %v14953_v8 }
  0xc1   :  { %11328 = vmatpush3.bf16.msra.mxu0 %v14918_v41  ;;  %11342 = vmatprep.subr.bf16.mxu1 %v14959_v20 }
  0xc2   :  { %11329 = vmatprep.subr.bf16.mxu0 %v17081_v55 }
  0xc5   :  { %11331 = vmatpush3.bf16.msra.mxu0 %v14928_v59 }
  0xc6   :  { %11332 = vmatprep.subr.bf16.mxu0 %v17081_v55 }
  0xc9   :  { %11334 = vmatpush3.bf16.msra.mxu0 %v14936_v19 }
  0xca   :  { %11335 = vmatprep.subr.bf16.mxu0 %v17081_v55 }
  0xcd   :  { %11337 = vmatpush3.bf16.msra.mxu0 %v14947_v46  ;;  %v621_v46 = vld [vmem:[#allocation12 + $0x50] sm:$0xff] }
  0xce   :  { %11338 = vmatprep.subr.bf16.mxu0 %v17081_v55 }
  0xd1   :  { %11340 = vmatpush3.bf16.msra.mxu0 %v14957_v9 }
  0xd2   :  { %11373 = vmatprep.subr.bf16.mxu0 %v17081_v55 }
 0x151   :  { %v9463_v39 = vpop.f32.mrb[0].mxu1 }
 0x152   :  { %v14974_v42 = vadd.f32 %v9463_v39, %v156_v35  ;;  %v436_v51 = vpop.f32.mrb[1].mxu1 }
 0x154   :  { %17265 = vst [vmem:[#allocation58_spill] sm:$0xff] %v14974_v42 }
 0x155   :  { %v9466_v56 = vpop.f32.mrb[2].mxu1 }
 0x156   :  { %v14976_v61 = vadd.f32 %v9466_v56, %v156_v35  ;;  %v446_v1 = vpop.f32.mrb[3].mxu1 }
 0x157   :  { %v14978_v2 = vadd.f32 %v446_v1, %v156_v35 }
 0x158   :  { %17266 = vst [vmem:[#allocation59_spill] sm:$0xff] %v14976_v61 }
 0x159   :  { %17267 = vst [vmem:[#allocation60_spill] sm:$0xff] %v14978_v2  ;;  %v9469_v6 = vpop.f32.mrb[4].mxu1 }
 0x15a   :  { %v14980_v25 = vadd.f32 %v9469_v6, %v156_v35  ;;  %v456_v0 = vpop.f32.mrb[5].mxu1 }
 0x15b   :  { %v14982_v55 = vadd.f32 %v456_v0, %v156_v35 }
 0x15c   :  { %17268 = vst [vmem:[#allocation61_spill] sm:$0xff] %v14980_v25 }
 0x15d   :  { %17269 = vst [vmem:[#allocation62_spill] sm:$0xff] %v14982_v55  ;;  %v9472_v20 = vpop.f32.mrb[6].mxu1 }
 0x15e   :  { %v14984_v9 = vadd.f32 %v9472_v20, %v156_v35  ;;  %v466_v33 = vpop.f32.mrb[7].mxu1 }
 0x15f   :  { %v14986_v8 = vadd.f32 %v466_v33, %v156_v35 }
 0x160   :  { %17270 = vst [vmem:[#allocation63_spill] sm:$0xff] %v14984_v9 }
 0x161   :  { %17271 = vst [vmem:[#allocation64_spill] sm:$0xff] %v14986_v8  ;;  %v9475_v39 = vpop.f32.mrb[8].mxu1 }
 0x162   :  { %v14988_v42 = vadd.f32 %v9475_v39, %v156_v35  ;;  %v476_v56 = vpop.f32.mrb[9].mxu1 }
 0x163   :  { %v14990_v61 = vadd.f32 %v476_v56, %v156_v35 }
 0x164   :  { %17272 = vst [vmem:[#allocation65_spill] sm:$0xff] %v14988_v42 }
 0x165   :  { %17273 = vst [vmem:[#allocation66_spill] sm:$0xff] %v14990_v61  ;;  %v9478_v1 = vpop.f32.mrb[10].mxu1 }
 0x166   :  { %v14992_v2 = vadd.f32 %v9478_v1, %v156_v35  ;;  %v486_v6 = vpop.f32.mrb[11].mxu1  ;;  %v17090_v1 = vsub.s32 0, %v14966_v27 }
 0x167   :  { %v14994_v25 = vadd.f32 %v486_v6, %v156_v35 }
 0x168   :  { %17274 = vst [vmem:[#allocation67_spill] sm:$0xff] %v14992_v2  ;;  %v15007_v6 = vrot.slane %v143_v34, %v17090_v1  ;;  %v15019_v1 = vld [vmem:[%s17071_s4] ss:$0 sm:$0xff] }
 0x169   :  { %17275 = vst [vmem:[#allocation68_spill] sm:$0xff] %v14994_v25  ;;  %v9481_v0 = vpop.f32.mrb[12].mxu1  ;;  %v437_v25 = vadd.f32 %v436_v51, %v156_v35 }
 0x16a   :  { %v14996_v55 = vadd.f32 %v9481_v0, %v156_v35  ;;  %v496_v20 = vpop.f32.mrb[13].mxu1  ;;  %17280 = vst [vmem:[#allocation73_spill] sm:$0xff] %v15007_v6  ;;  %v17093_v0 = vsub.s32 1, %v14966_v27 }
 0x16b   :  { %v14998_v9 = vadd.f32 %v496_v20, %v156_v35 }
 0x16c   :  { %17276 = vst [vmem:[#allocation69_spill] sm:$0xff] %v14996_v55 }
 0x16d   :  { %17277 = vst [vmem:[#allocation70_spill] sm:$0xff] %v14998_v9  ;;  %v9484_v33 = vpop.f32.mrb[14].mxu1 }
 0x16e   :  { %v15000_v8 = vadd.f32 %v9484_v33, %v156_v35  ;;  %v506_v39 = vpop.f32.mrb[15].mxu1  ;;  %v15013_v33 = vrot.slane %v143_v34, %v17093_v0 }
 0x16f   :  { %v15002_v42 = vadd.f32 %v506_v39, %v156_v35  ;;  %v617_v35 = vld [vmem:[#allocation12 + $0x30] sm:$0xff] }
 0x170   :  { %17278 = vst [vmem:[#allocation71_spill] sm:$0xff] %v15000_v8  ;;  %17281 = vst [vmem:[#allocation74_spill] sm:$0xff] %v15013_v33 }
 0x171   :  { %17279 = vst [vmem:[#allocation72_spill] sm:$0xff] %v15002_v42  ;;  %v875_v56 = vpop.f32.mrb[16].mxu1 }
 0x172   :  { %v9519_v61 = vpop.f32.mrb[17].mxu1 }
 0x187   :  { %v804_v2 = vpop.f32.mrb[0].mxu0 }
 0x188   :  { %v13949_v20 = vadd.f32 %v804_v2, %v15007_v6  ;;  %v806_v55 = vpop.f32.mrb[1].mxu0  ;;  %v896_v2 = vadd.f32 %v15019_v1, %v875_v56 }
 0x189   :  { %v13950_v61 = vadd.f32 %v806_v55, %v15013_v33  ;;  %v616_v33 = vld [vmem:[#allocation12 + $0x28] sm:$0xff] }
 0x18a   :  { %v8526_v9 = vmul.f32 -1.442695, %v13949_v20 }
 0x18b   :  { %v8527_v39 = vmul.f32 -1.442695, %v13950_v61  ;;  %v611_v61 = vld [vmem:[#allocation12] sm:$0xff] }
 0x18c   :  { %14091 = vpow2.f32 %v8526_v9 }
 0x18d   :  { %14093 = vpow2.f32 %v8527_v39  ;;  %v614_v39 = vld [vmem:[#allocation12 + $0x18] sm:$0xff] }
 0x18e   :  { %v15022_v28 = vpack.c.bf16 %v614_v39, %v611_v61  ;;  %v628_v61 = vld [vmem:[#allocation12 + $0x88] sm:$0xff]  ;;  %v633_v39 = vld [vmem:[#allocation12 + $0xb0] sm:$0xff] }
 0x190   :  { %17282 = vst [vmem:[#allocation75_spill] sm:$0xff] %v15022_v28 }
 0x196   :  { %v14092_v8 = vpop.eup %14091 }
 0x197   :  { %v890_v42 = vadd.f32 1.0, %v14092_v8  ;;  %v14094_v20 = vpop.eup %14093 }
 0x198   :  { %v891_v34 = vadd.f32 1.0, %v14094_v20  ;;  %v624_v20 = vld [vmem:[#allocation12 + $0x68] sm:$0xff] }
 0x199   :  { %14095 = vrcp.f32 %v890_v42  ;;  %v613_v42 = vld [vmem:[#allocation12 + $0x10] sm:$0xff] }
 0x19a   :  { %v15024_v56 = vpack.c.bf16 %v616_v33, %v613_v42  ;;  %v17289_v42 = vmov 0.0  }
 0x19c   :  { %17283 = vst [vmem:[#allocation76_spill] sm:$0xff] %v15024_v56 }
 0x1a3   :  { %v14096_v9 = vpop.eup %14095 }
 0x1a4   :  { %v897_v6 = vmul.f32 %v14096_v9, %v896_v2  ;;  %v622_v2 = vld [vmem:[#allocation12 + $0x58] sm:$0xff]  ;;  %v627_v9 = vld [vmem:[#allocation12 + $0x80] sm:$0xff] }
 0x1a6   :  { %v898_v0 = vadd.f32 %v897_v6, %v437_v25  ;;  %v15028_v25 = vpack.c.bf16 %v621_v46, %v618_v50  ;;  %v620_v6 = vld [vmem:[#allocation12 + $0x48] sm:$0xff]  ;;  %v17287_v46 = vmov 0.0|0.0   ;;  %v15040_v50 = vpack.c.bf16 %v627_v9, %v624_v20  ;;  %v631_v9 = vld [vmem:[#allocation12 + $0xa0] sm:$0xff] }
 0x1a7   :  { %v632_v20 = vld [vmem:[#allocation12 + $0xa8] sm:$0xff] }
 0x1a8   :  { %14097 = vtanh.f32 %v898_v0  ;;  %17284 = vst [vmem:[#allocation77_spill] sm:$0xff] %v15028_v25  ;;  %v619_v0 = vld [vmem:[#allocation12 + $0x40] sm:$0xff]  ;;  %17288 = vst [vmem:[#allocation80_spill] sm:$0xff] %v15040_v50 }
 0x1a9   :  { %14099 = vrcp.f32 %v891_v34  ;;  %v15036_v33 = vpack.c.bf16 %v622_v2, %v619_v0  ;;  %v626_v34 = vld [vmem:[#allocation12 + $0x78] sm:$0xff]  ;;  %v629_v0 = vld [vmem:[#allocation12 + $0x90] sm:$0xff] }
 0x1ab   :  { %17286 = vst [vmem:[#allocation79_spill] sm:$0xff] %v15036_v33 }
 0x1b2   :  { %v14098_v55 = vpop.eup %14097 }
 0x1b3   :  { %v900_v8 = vsub.f32 0.0, %v14098_v55  ;;  %v14100_v27 = vpop.eup %14099 }
 0x1b5   :  { %v901_v44 = vmul.f32 %v14100_v27, %v900_v8  ;;  %v15034_v27 = vpack.c.bf16 %v620_v6, %v617_v35  ;;  %v630_v8 = vld [vmem:[#allocation12 + $0x98] sm:$0xff] }
 0x1b6   :  { %v15053_v2 = vpack.c.bf16 %v633_v39, %v630_v8  ;;  %v638_v8 = vld [vmem:[#allocation12 + $0xd8] sm:$0xff]  ;;  %v637_v39 = vld [vmem:[#allocation12 + $0xd0] sm:$0xff] }
 0x1b7   :  { %v15026_v51 = vadd.f32 %v14098_v55, %v901_v44  ;;  %17285 = vst [vmem:[#allocation78_spill] sm:$0xff] %v15034_v27  ;;  %v623_v44 = vld [vmem:[#allocation12 + $0x60] sm:$0xff]  ;;  %v625_v55 = vld [vmem:[#allocation12 + $0x70] sm:$0xff] }
 0x1b8   :  { %v15047_v35 = vpack.c.bf16 %v626_v34, %v623_v44  ;;  %v15049_v6 = vpack.c.bf16 %v628_v61, %v625_v55  ;;  %17292 = vst [vmem:[#allocation83_spill] sm:$0xff] %v15053_v2  ;;  %v15057_v44 = vpack.c.bf16 %v632_v20, %v629_v0  ;;  %v635_v55 = vld [vmem:[#allocation12 + $0xc0] sm:$0xff]  ;;  %v641_v20 = vld [vmem:[#allocation12 + $0xf0] sm:$0xff] }
 0x1b9   :  { %968 = vmatmul.mubr.f32.vlgmr.msra.gmra.mrb[18].mxu1 %v15026_v51  ;;  %9553 = vmatmul.mubr.f32.vlgmr.msra.gmra.mrb[32].mxu0 %v15026_v51  ;;  %v15067_v0 = vpack.c.bf16 %v638_v8, %v635_v55  ;;  %v647_v8 = vld [vmem:[#allocation12 + $0x120] sm:$0xff] }
 0x1ba   :  { %11344 = vmatpush1.bf16.msra.mxu1 %v15022_v28  ;;  %11375 = vmatpush3.bf16.msra.mxu0 %v15024_v56  ;;  %17290 = vst [vmem:[#allocation81_spill] sm:$0xff] %v15047_v35  ;;  %17291 = vst [vmem:[#allocation82_spill] sm:$0xff] %v15049_v6  ;;  %v636_v56 = vld [vmem:[#allocation12 + $0xc8] sm:$0xff]  ;;  %v639_v28 = vld [vmem:[#allocation12 + $0xe0] sm:$0xff] }
 0x1bb   :  { %11346 = vmatprep.subr.bf16.mxu1 %v15028_v25  ;;  %11376 = vmatprep.subr.bf16.mxu0 %v17287_v46  ;;  %v634_v25 = vld [vmem:[#allocation12 + $0xb8] sm:$0xff]  ;;  %17293 = vst [vmem:[#allocation84_spill] sm:$0xff] %v15057_v44  ;;  %v15063_v61 = vpack.c.bf16 %v639_v28, %v636_v56  ;;  %v644_v56 = vld [vmem:[#allocation12 + $0x108] sm:$0xff] }
 0x1bc   :  { %1108 = vmatprep.mubr.f32.mxu1 %v17289_v42  ;;  %9587 = vmatprep.mubr.msk.f32.mxu0 %vm14594_vm1, %v17289_v42  ;;  %v15059_v34 = vpack.c.bf16 %v634_v25, %v631_v9  ;;  %v643_v9 = vld [vmem:[#allocation12 + $0x100] sm:$0xff]  ;;  %v15077_v55 = vpack.c.bf16 %v644_v56, %v641_v20  ;;  %v653_v56 = vld [vmem:[#allocation12 + $0x150] sm:$0xff] }
 0x1bd   :  { %17295 = vst [vmem:[#allocation86_spill] sm:$0xff] %v15063_v61 }
 0x1be   :  { %11348 = vmatpush1.bf16.msra.mxu1 %v15034_v27  ;;  %11378 = vmatpush3.bf16.msra.mxu0 %v15036_v33  ;;  %17294 = vst [vmem:[#allocation85_spill] sm:$0xff] %v15059_v34  ;;  %v642_v33 = vld [vmem:[#allocation12 + $0xf8] sm:$0xff]  ;;  %v645_v27 = vld [vmem:[#allocation12 + $0x110] sm:$0xff]  ;;  %17297 = vst [vmem:[#allocation88_spill] sm:$0xff] %v15077_v55 }
 0x1bf   :  { %11350 = vmatprep.subr.bf16.mxu1 %v15040_v50  ;;  %11379 = vmatprep.subr.bf16.mxu0 %v17287_v46  ;;  %v640_v50 = vld [vmem:[#allocation12 + $0xe8] sm:$0xff]  ;;  %v15073_v28 = vpack.c.bf16 %v645_v27, %v642_v33  ;;  %v650_v33 = vld [vmem:[#allocation12 + $0x138] sm:$0xff] }
 0x1c0   :  { %v15069_v25 = vpack.c.bf16 %v640_v50, %v637_v39  ;;  %v649_v39 = vld [vmem:[#allocation12 + $0x130] sm:$0xff]  ;;  %v15087_v20 = vpack.c.bf16 %v650_v33, %v647_v8  ;;  %v17302_v33 = vld [vmem:[#allocation54_spill] sm:$0xff] }
 0x1c1   :  { %17296 = vst [vmem:[#allocation87_spill] sm:$0xff] %v15073_v28 }
 0x1c2   :  { %11352 = vmatpush1.bf16.msra.mxu1 %v15047_v35  ;;  %11381 = vmatpush3.bf16.msra.mxu0 %v15049_v6  ;;  %v648_v6 = vld [vmem:[#allocation12 + $0x128] sm:$0xff]  ;;  %v651_v35 = vld [vmem:[#allocation12 + $0x140] sm:$0xff] }
 0x1c3   :  { %11354 = vmatprep.subr.bf16.mxu1 %v15053_v2  ;;  %11382 = vmatprep.subr.bf16.mxu0 %v17287_v46  ;;  %v646_v2 = vld [vmem:[#allocation12 + $0x118] sm:$0xff]  ;;  %v15083_v27 = vpack.c.bf16 %v651_v35, %v648_v6  ;;  %v656_v6 = vld [vmem:[#allocation12 + $0x168] sm:$0xff] }
 0x1c4   :  { %v15079_v50 = vpack.c.bf16 %v646_v2, %v643_v9  ;;  %v655_v9 = vld [vmem:[#allocation12 + $0x160] sm:$0xff] }
 0x1c6   :  { %11356 = vmatpush1.bf16.msra.mxu1 %v15057_v44  ;;  %11384 = vmatpush3.bf16.msra.mxu0 %v15059_v34  ;;  %v654_v34 = vld [vmem:[#allocation12 + $0x158] sm:$0xff]  ;;  %v657_v44 = vld [vmem:[#allocation12 + $0x170] sm:$0xff] }
 0x1c7   :  { %11358 = vmatprep.subr.bf16.mxu1 %v15063_v61  ;;  %11385 = vmatprep.subr.bf16.mxu0 %v17287_v46  ;;  %v652_v61 = vld [vmem:[#allocation12 + $0x148] sm:$0xff]  ;;  %v15093_v35 = vpack.c.bf16 %v657_v44, %v654_v34  ;;  %v17299_v34 = vld [vmem:[#allocation51_spill] sm:$0xff] }
 0x1c8   :  { %v15089_v2 = vpack.c.bf16 %v652_v61, %v649_v39  ;;  %v17298_v44 = vld [vmem:[#allocation50_spill] sm:$0xff]  ;;  %v17300_v61 = vld [vmem:[#allocation52_spill] sm:$0xff]  ;;  %v17303_v39 = vld [vmem:[#allocation55_spill] sm:$0xff] }
 0x1ca   :  { %11360 = vmatpush1.bf16.msra.mxu1 %v15067_v0  ;;  %11387 = vmatpush3.bf16.msra.mxu0 %v15069_v25 }
 0x1cb   :  { %11362 = vmatprep.subr.bf16.mxu1 %v15073_v28  ;;  %11388 = vmatprep.subr.bf16.mxu0 %v17287_v46  ;;  %v658_v28 = vld [vmem:[#allocation12 + $0x178] sm:$0xff] }
 0x1cc   :  { %v15099_v8 = vpack.c.bf16 %v658_v28, %v655_v9  ;;  %v17301_v28 = vld [vmem:[#allocation53_spill] sm:$0xff] }
 0x1ce   :  { %11364 = vmatpush1.bf16.msra.mxu1 %v15077_v55  ;;  %11390 = vmatpush3.bf16.msra.mxu0 %v15079_v50  ;;  %v15097_v55 = vpack.c.bf16 %v656_v6, %v653_v56  ;;  %v17304_v56 = vld [vmem:[#allocation56_spill] sm:$0xff] }
 0x1cf   :  { %11366 = vmatprep.subr.bf16.mxu1 %v15083_v27  ;;  %11391 = vmatprep.subr.bf16.mxu0 %v17287_v46 }
 0x1d2   :  { %11368 = vmatpush1.bf16.msra.mxu1 %v15087_v20  ;;  %11393 = vmatpush3.bf16.msra.mxu0 %v15089_v2 }
 0x1d3   :  { %11370 = vmatprep.subr.bf16.mxu1 %v15093_v35  ;;  %11394 = vmatprep.subr.bf16.mxu0 %v17287_v46 }
 0x1d6   :  { %11372 = vmatpush1.bf16.msra.mxu1 %v15097_v55  ;;  %11396 = vmatpush3.bf16.msra.mxu0 %v15099_v8 }
 0x1d7   :  { %11398 = vmatprep.subr.bf16.mxu0 %v14748_v12  ;;  %11429 = vmatprep.subr.bf16.mxu1 %v17287_v46 }
 0x1d9   :  { %1109 = vmatmul.mubr.f32.vlgmr.msra.gmra.mrb[18].mxu1 %v17289_v42  ;;  %9588 = vmatmul.mubr.f32.vlgmr.msra.gmra.mrb[34].mxu0 %v17289_v42 }
 0x1da   :  { %11400 = vmatpush1.bf16.msra.mxu0 %v14750_v14  ;;  %11431 = vmatpush3.bf16.msra.mxu1 %v14780_v47 }
 0x1db   :  { %11402 = vmatprep.subr.bf16.mxu0 %v14753_v16  ;;  %11432 = vmatprep.subr.bf16.mxu1 %v17287_v46 }
 0x1dc   :  { %1271 = vmatprep.mubr.f32.mxu0 %v17289_v42  ;;  %9622 = vmatprep.mubr.msk.f32.mxu1 %vm14594_vm1, %v17289_v42 }
 0x1de   :  { %11404 = vmatpush1.bf16.msra.mxu0 %v14758_v22  ;;  %11434 = vmatpush3.bf16.msra.mxu1 %v14793_v58 }
 0x1df   :  { %11406 = vmatprep.subr.bf16.mxu0 %v14761_v23  ;;  %11435 = vmatprep.subr.bf16.mxu1 %v17287_v46 }
 0x1e2   :  { %11408 = vmatpush1.bf16.msra.mxu0 %v14766_v29  ;;  %11437 = vmatpush3.bf16.msra.mxu1 %v14807_v5 }
 0x1e3   :  { %11410 = vmatprep.subr.bf16.mxu0 %v14769_v30  ;;  %11438 = vmatprep.subr.bf16.mxu1 %v17287_v46 }
 0x1e6   :  { %11412 = vmatpush1.bf16.msra.mxu0 %v14774_v38  ;;  %11440 = vmatpush3.bf16.msra.mxu1 %v14821_v15 }
 0x1e7   :  { %11414 = vmatprep.subr.bf16.mxu0 %v14777_v40  ;;  %11441 = vmatprep.subr.bf16.mxu1 %v17287_v46 }
 0x1ea   :  { %11416 = vmatpush1.bf16.msra.mxu0 %v14784_v49  ;;  %11443 = vmatpush3.bf16.msra.mxu1 %v14833_v21 }
 0x1eb   :  { %11418 = vmatprep.subr.bf16.mxu0 %v14787_v52  ;;  %11444 = vmatprep.subr.bf16.mxu1 %v17287_v46 }
 0x1ee   :  { %11420 = vmatpush1.bf16.msra.mxu0 %v14797_v60  ;;  %11446 = vmatpush3.bf16.msra.mxu1 %v14843_v31 }
 0x1ef   :  { %11422 = vmatprep.subr.bf16.mxu0 %v14800_v63  ;;  %11447 = vmatprep.subr.bf16.mxu1 %v17287_v46 }
 0x1f2   :  { %11424 = vmatpush1.bf16.msra.mxu0 %v14811_v7  ;;  %11449 = vmatpush3.bf16.msra.mxu1 %v14851_v36 }
 0x1f3   :  { %11426 = vmatprep.subr.bf16.mxu0 %v14814_v10  ;;  %11450 = vmatprep.subr.bf16.mxu1 %v17287_v46 }
 0x1f6   :  { %11428 = vmatpush1.bf16.msra.mxu0 %v14825_v18  ;;  %11452 = vmatpush3.bf16.msra.mxu1 %v14859_v43 }
 0x1f7   :  { %11454 = vmatprep.subr.bf16.mxu1 %v14883_v48  ;;  %11485 = vmatprep.subr.bf16.mxu0 %v17287_v46 }
 0x1f9   :  { %1272 = vmatmul.mubr.f32.vlgmr.msra.gmra.mrb[2].mxu0 %v15026_v51  ;;  %9623 = vmatmul.mubr.f32.vlgmr.msra.gmra.mrb[20].mxu1 %v15026_v51 }
 0x1fa   :  { %11456 = vmatpush1.bf16.msra.mxu1 %v14885_v54  ;;  %11487 = vmatpush3.bf16.msra.mxu0 %v14888_v57 }
 0x1fb   :  { %11458 = vmatprep.subr.bf16.mxu1 %v14892_v62  ;;  %11488 = vmatprep.subr.bf16.mxu0 %v17287_v46 }
 0x1fc   :  { %1437 = vmatprep.mubr.f32.mxu1 %v17289_v42  ;;  %9657 = vmatprep.mubr.msk.f32.mxu0 %vm14594_vm1, %v17289_v42 }
 0x1fe   :  { %11460 = vmatpush1.bf16.msra.mxu1 %v14895_v4  ;;  %11490 = vmatpush3.bf16.msra.mxu0 %v14898_v11 }
 0x1ff   :  { %11462 = vmatprep.subr.bf16.mxu1 %v14900_v13  ;;  %11491 = vmatprep.subr.bf16.mxu0 %v17287_v46 }
 0x202   :  { %11464 = vmatpush1.bf16.msra.mxu1 %v14906_v24  ;;  %11493 = vmatpush3.bf16.msra.mxu0 %v14908_v26 }
 0x203   :  { %11466 = vmatprep.subr.bf16.mxu1 %v14912_v32  ;;  %11494 = vmatprep.subr.bf16.mxu0 %v17287_v46 }
 0x206   :  { %11468 = vmatpush1.bf16.msra.mxu1 %v14915_v37  ;;  %11496 = vmatpush3.bf16.msra.mxu0 %v14918_v41 }
 0x207   :  { %11470 = vmatprep.subr.bf16.mxu1 %v14922_v45  ;;  %11497 = vmatprep.subr.bf16.mxu0 %v17287_v46 }
 0x20a   :  { %11472 = vmatpush1.bf16.msra.mxu1 %v14925_v53  ;;  %11499 = vmatpush3.bf16.msra.mxu0 %v14928_v59 }
 0x20b   :  { %11474 = vmatprep.subr.bf16.mxu1 %v14931_v3  ;;  %11500 = vmatprep.subr.bf16.mxu0 %v17287_v46 }
 0x20e   :  { %11476 = vmatpush1.bf16.msra.mxu1 %v14934_v17  ;;  %11502 = vmatpush3.bf16.msra.mxu0 %v14936_v19 }
 0x20f   :  { %11478 = vmatprep.subr.bf16.mxu1 %v17298_v44  ;;  %11503 = vmatprep.subr.bf16.mxu0 %v17287_v46  ;;  %v17305_v44 = vld [vmem:[#allocation57_spill] sm:$0xff] }
 0x212   :  { %11480 = vmatpush1.bf16.msra.mxu1 %v17299_v34  ;;  %11505 = vmatpush3.bf16.msra.mxu0 %v17300_v61  ;;  %v707_v34 = vld [vmem:[%s17074_s7] sm:$0x7]  ;;  %v17306_v61 = vsub.s32 0, %v17305_v44 }
 0x213   :  { %11482 = vmatprep.subr.bf16.mxu1 %v17301_v28  ;;  %11506 = vmatprep.subr.bf16.mxu0 %v17287_v46 }
 0x214   :  { %v15186_v19 = vrot.slane %v707_v34, %v17306_v61  ;;  %v15197_v61 = vld [vmem:[%s17075_s8] ss:$0 sm:$0xff] }
 0x215   :  { %17310 = vst [vmem:[#allocation90_spill] sm:$0xff] %v15197_v61 }
 0x216   :  { %11484 = vmatpush1.bf16.msra.mxu1 %v17302_v33  ;;  %11508 = vmatpush3.bf16.msra.mxu0 %v17303_v39  ;;  %17307 = vst [vmem:[#allocation57_spill] sm:$0xff] %v15186_v19 }
 0x217   :  { %11510 = vmatprep.subr.bf16.mxu1 %v17304_v56  ;;  %11541 = vmatprep.subr.bf16.mxu0 %v17287_v46  ;;  %v17308_v56 = vsub.s32 1, %v17305_v44 }
 0x219   :  { %v15191_v53 = vrot.slane %v707_v34, %v17308_v56 }
 0x21b   :  { %17309 = vst [vmem:[#allocation89_spill] sm:$0xff] %v15191_v53 }
 0x28c   :  { %v1040_v6 = vpop.f32.mrb[32].mxu0 }
 0x28d   :  { %v9554_v9 = vpop.f32.mrb[33].mxu0 }
 0x2ac   :  { %v1110_v28 = vpop.f32.mrb[18].mxu1  ;;  %v1181_v17 = vpop.f32.mrb[34].mxu0 }
 0x2ad   :  { %v13981_v33 = vadd.f32 %v1110_v28, %v15186_v19  ;;  %v1112_v3 = vpop.f32.mrb[19].mxu1  ;;  %v9589_v39 = vpop.f32.mrb[35].mxu0  ;;  %v17311_v28 = vsub.s32 2, %v17305_v44  ;;  %v17312_v19 = vld [vmem:[#allocation73_spill] sm:$0xff] }
 0x2ae   :  { %v13982_v9 = vadd.f32 %v1112_v3, %v15191_v53  ;;  %v1199_v39 = vadd.f32 %v15197_v61, %v1181_v17 }
 0x2af   :  { %v8528_v59 = vmul.f32 -1.442695, %v13981_v33  ;;  %v15201_v33 = vrot.slane %v707_v34, %v17311_v28  ;;  %v17313_v34 = vld [vmem:[#allocation74_spill] sm:$0xff] }
 0x2b0   :  { %v8529_v45 = vmul.f32 -1.442695, %v13982_v9 }
 0x2b1   :  { %14101 = vpow2.f32 %v8528_v59  ;;  %v1041_v3 = vadd.f32 %v1040_v6, %v15201_v33 }
 0x2b2   :  { %14103 = vpow2.f32 %v8529_v45 }
 0x2bb   :  { %v14102_v41 = vpop.eup %14101 }
 0x2bc   :  { %v1193_v37 = vadd.f32 1.0, %v14102_v41  ;;  %v14104_v59 = vpop.eup %14103 }
 0x2bd   :  { %v1194_v53 = vadd.f32 1.0, %v14104_v59 }
 0x2be   :  { %14105 = vrcp.f32 %v1193_v37 }
 0x2c8   :  { %v14106_v56 = vpop.eup %14105 }
 0x2c9   :  { %v1200_v9 = vmul.f32 %v14106_v56, %v1199_v39 }
 0x2cb   :  { %v1201_v41 = vadd.f32 %v1200_v9, %v1041_v3 }
 0x2cc   :  { %v1273_v45 = vpop.f32.mrb[2].mxu0  ;;  %v1344_v37 = vpop.f32.mrb[20].mxu1 }
 0x2cd   :  { %14107 = vtanh.f32 %v1201_v41  ;;  %v13951_v32 = vadd.f32 %v1273_v45, %v17312_v19  ;;  %v1275_v26 = vpop.f32.mrb[3].mxu0  ;;  %v9624_v24 = vpop.f32.mrb[21].mxu1  ;;  %v1366_v9 = vadd.f32 %v15019_v1, %v1344_v37  ;;  %v17318_v37 = vld [vmem:[#allocation77_spill] sm:$0xff] }
 0x2ce   :  { %14109 = vrcp.f32 %v1194_v53  ;;  %v13952_v28 = vadd.f32 %v1275_v26, %v17313_v34 }
 0x2cf   :  { %v8530_v44 = vmul.f32 -1.442695, %v13951_v32  ;;  %v17315_v32 = vld [vmem:[#allocation58_spill] sm:$0xff] }
 0x2d0   :  { %v8531_v11 = vmul.f32 -1.442695, %v13952_v28 }
 0x2d1   :  { %14111 = vpow2.f32 %v8530_v44 }
 0x2d2   :  { %14113 = vpow2.f32 %v8531_v11  ;;  %v17316_v11 = vld [vmem:[#allocation75_spill] sm:$0xff] }
 0x2d7   :  { %v14108_v13 = vpop.eup %14107 }
 0x2d8   :  { %v1203_v17 = vsub.f32 0.0, %v14108_v13  ;;  %v14110_v61 = vpop.eup %14109 }
 0x2da   :  { %v1204_v6 = vmul.f32 %v14110_v61, %v1203_v17 }
 0x2db   :  { %v14112_v39 = vpop.eup %14111 }
 0x2dc   :  { %v1360_v59 = vadd.f32 1.0, %v14112_v39  ;;  %v15207_v56 = vadd.f32 %v14108_v13, %v1204_v6  ;;  %v14114_v3 = vpop.eup %14113  ;;  %v17317_v13 = vld [vmem:[#allocation76_spill] sm:$0xff]  ;;  %v17320_v6 = vld [vmem:[#allocation79_spill] sm:$0xff] }
 0x2dd   :  { %v1361_v45 = vadd.f32 1.0, %v14114_v3  ;;  %v17321_v39 = vld [vmem:[#allocation80_spill] sm:$0xff]  ;;  %v17323_v3 = vld [vmem:[#allocation82_spill] sm:$0xff] }
 0x2de   :  { %17314 = vst [vmem:[#allocation73_spill] sm:$0xff] %v15207_v56  ;;  %14115 = vrcp.f32 %v1360_v59  ;;  %v17322_v59 = vld [vmem:[#allocation81_spill] sm:$0xff] }
 0x2e8   :  { %v14116_v24 = vpop.eup %14115 }
 0x2e9   :  { %v1367_v53 = vmul.f32 %v14116_v24, %v1366_v9  ;;  %v17324_v9 = vld [vmem:[#allocation83_spill] sm:$0xff]  ;;  %v17325_v24 = vld [vmem:[#allocation84_spill] sm:$0xff] }
 0x2eb   :  { %v1368_v41 = vadd.f32 %v1367_v53, %v17315_v32  ;;  %v17326_v53 = vld [vmem:[#allocation85_spill] sm:$0xff]  ;;  %v17327_v32 = vld [vmem:[#allocation86_spill] sm:$0xff] }
 0x2ed   :  { %14117 = vtanh.f32 %v1368_v41  ;;  %v17328_v41 = vld [vmem:[#allocation87_spill] sm:$0xff] }
 0x2ee   :  { %14119 = vrcp.f32 %v1361_v45  ;;  %v17329_v45 = vld [vmem:[#allocation88_spill] sm:$0xff] }
 0x2f7   :  { %v14118_v26 = vpop.eup %14117 }
 0x2f8   :  { %v1370_v44 = vsub.f32 %v15026_v51, %v14118_v26  ;;  %v14120_v61 = vpop.eup %14119  ;;  %v17319_v51 = vld [vmem:[#allocation78_spill] sm:$0xff] }
 0x2fa   :  { %v1371_v28 = vmul.f32 %v14120_v61, %v1370_v44  ;;  %v17331_v44 = vld [vmem:[#allocation38_spill] sm:$0xff]  ;;  %v17332_v61 = vld [vmem:[#allocation39_spill] sm:$0xff] }
 0x2fc   :  { %v15212_v17 = vadd.f32 %v14118_v26, %v1371_v28  ;;  %v17330_v26 = vld [vmem:[#allocation37_spill] sm:$0xff]  ;;  %v17333_v28 = vld [vmem:[#allocation40_spill] sm:$0xff] }
 0x2fe   :  { %1438 = vmatmul.mubr.f32.vlgmr.msra.gmra.mrb[22].mxu1 %v15212_v17  ;;  %9658 = vmatmul.mubr.f32.vlgmr.msra.gmra.mrb[36].mxu0 %v15212_v17 }
 0x2ff   :  { %11512 = vmatpush1.bf16.msra.mxu1 %v17316_v11  ;;  %11543 = vmatpush3.bf16.msra.mxu0 %v17317_v13 }
 0x300   :  { %11514 = vmatprep.subr.bf16.mxu1 %v17318_v37  ;;  %11544 = vmatprep.subr.bf16.mxu0 %v17287_v46 }
 0x301   :  { %1578 = vmatprep.mubr.f32.mxu1 %v17289_v42  ;;  %9692 = vmatprep.mubr.msk.f32.mxu0 %vm14594_vm1, %v17289_v42 }
 0x303   :  { %11516 = vmatpush1.bf16.msra.mxu1 %v17319_v51  ;;  %11546 = vmatpush3.bf16.msra.mxu0 %v17320_v6 }
 0x304   :  { %11518 = vmatprep.subr.bf16.mxu1 %v17321_v39  ;;  %11547 = vmatprep.subr.bf16.mxu0 %v17287_v46 }
 0x307   :  { %11520 = vmatpush1.bf16.msra.mxu1 %v17322_v59  ;;  %11549 = vmatpush3.bf16.msra.mxu0 %v17323_v3 }
 0x308   :  { %11522 = vmatprep.subr.bf16.mxu1 %v17324_v9  ;;  %11550 = vmatprep.subr.bf16.mxu0 %v17287_v46 }
 0x30b   :  { %11524 = vmatpush1.bf16.msra.mxu1 %v17325_v24  ;;  %11552 = vmatpush3.bf16.msra.mxu0 %v17326_v53 }
 0x30c   :  { %11526 = vmatprep.subr.bf16.mxu1 %v17327_v32  ;;  %11553 = vmatprep.subr.bf16.mxu0 %v17287_v46 }
 0x30f   :  { %11528 = vmatpush1.bf16.msra.mxu1 %v15067_v0  ;;  %11555 = vmatpush3.bf16.msra.mxu0 %v15069_v25 }
 0x310   :  { %11530 = vmatprep.subr.bf16.mxu1 %v17328_v41  ;;  %11556 = vmatprep.subr.bf16.mxu0 %v17287_v46 }
 0x313   :  { %11532 = vmatpush1.bf16.msra.mxu1 %v17329_v45  ;;  %11558 = vmatpush3.bf16.msra.mxu0 %v15079_v50 }
 0x314   :  { %11534 = vmatprep.subr.bf16.mxu1 %v15083_v27  ;;  %11559 = vmatprep.subr.bf16.mxu0 %v17287_v46 }
 0x317   :  { %11536 = vmatpush1.bf16.msra.mxu1 %v15087_v20  ;;  %11561 = vmatpush3.bf16.msra.mxu0 %v15089_v2 }
 0x318   :  { %11538 = vmatprep.subr.bf16.mxu1 %v15093_v35  ;;  %11562 = vmatprep.subr.bf16.mxu0 %v17287_v46 }
 0x31b   :  { %11540 = vmatpush1.bf16.msra.mxu1 %v15097_v55  ;;  %11564 = vmatpush3.bf16.msra.mxu0 %v15099_v8 }
 0x31c   :  { %11566 = vmatprep.subr.bf16.mxu0 %v14748_v12  ;;  %11597 = vmatprep.subr.bf16.mxu1 %v17287_v46 }
 0x31e   :  { %1579 = vmatmul.mubr.f32.vlgmr.msra.gmra.mrb[22].mxu1 %v15207_v56  ;;  %9693 = vmatmul.mubr.f32.vlgmr.msra.gmra.mrb[38].mxu0 %v15207_v56 }
 0x31f   :  { %11568 = vmatpush1.bf16.msra.mxu0 %v14750_v14  ;;  %11599 = vmatpush3.bf16.msra.mxu1 %v14780_v47 }
 0x320   :  { %11570 = vmatprep.subr.bf16.mxu0 %v14753_v16  ;;  %11600 = vmatprep.subr.bf16.mxu1 %v17287_v46 }
 0x321   :  { %1742 = vmatprep.mubr.f32.mxu0 %v17289_v42  ;;  %9727 = vmatprep.mubr.msk.f32.mxu1 %vm14594_vm1, %v17289_v42 }
 0x323   :  { %11572 = vmatpush1.bf16.msra.mxu0 %v14758_v22  ;;  %11602 = vmatpush3.bf16.msra.mxu1 %v14793_v58 }
 0x324   :  { %11574 = vmatprep.subr.bf16.mxu0 %v14761_v23  ;;  %11603 = vmatprep.subr.bf16.mxu1 %v17287_v46 }
 0x327   :  { %11576 = vmatpush1.bf16.msra.mxu0 %v14766_v29  ;;  %11605 = vmatpush3.bf16.msra.mxu1 %v14807_v5 }
 0x328   :  { %11578 = vmatprep.subr.bf16.mxu0 %v14769_v30  ;;  %11606 = vmatprep.subr.bf16.mxu1 %v17287_v46 }
 0x32b   :  { %11580 = vmatpush1.bf16.msra.mxu0 %v14774_v38  ;;  %11608 = vmatpush3.bf16.msra.mxu1 %v14821_v15 }
 0x32c   :  { %11582 = vmatprep.subr.bf16.mxu0 %v14777_v40  ;;  %11609 = vmatprep.subr.bf16.mxu1 %v17287_v46 }
 0x32f   :  { %11584 = vmatpush1.bf16.msra.mxu0 %v14784_v49  ;;  %11611 = vmatpush3.bf16.msra.mxu1 %v14833_v21 }
 0x330   :  { %11586 = vmatprep.subr.bf16.mxu0 %v14787_v52  ;;  %11612 = vmatprep.subr.bf16.mxu1 %v17287_v46 }
 0x333   :  { %11588 = vmatpush1.bf16.msra.mxu0 %v14797_v60  ;;  %11614 = vmatpush3.bf16.msra.mxu1 %v14843_v31 }
 0x334   :  { %11590 = vmatprep.subr.bf16.mxu0 %v14800_v63  ;;  %11615 = vmatprep.subr.bf16.mxu1 %v17287_v46 }
 0x337   :  { %11592 = vmatpush1.bf16.msra.mxu0 %v14811_v7  ;;  %11617 = vmatpush3.bf16.msra.mxu1 %v14851_v36 }
 0x338   :  { %11594 = vmatprep.subr.bf16.mxu0 %v14814_v10  ;;  %11618 = vmatprep.subr.bf16.mxu1 %v17287_v46 }
 0x33b   :  { %11596 = vmatpush1.bf16.msra.mxu0 %v14825_v18  ;;  %11620 = vmatpush3.bf16.msra.mxu1 %v14859_v43  ;;  %v17350_v18 = vld [vmem:[#allocation57_spill] sm:$0xff] }
 0x33c   :  { %11622 = vmatprep.subr.bf16.mxu1 %v14883_v48  ;;  %11653 = vmatprep.subr.bf16.mxu0 %v17287_v46  ;;  %v17337_v48 = vld [vmem:[#allocation44_spill] sm:$0xff] }
 0x33e   :  { %1743 = vmatmul.mubr.f32.vlgmr.msra.gmra.mrb[4].mxu0 %v15212_v17  ;;  %9728 = vmatmul.mubr.f32.vlgmr.msra.gmra.mrb[24].mxu1 %v15212_v17 }
 0x33f   :  { %11624 = vmatpush1.bf16.msra.mxu1 %v14885_v54  ;;  %11655 = vmatpush3.bf16.msra.mxu0 %v14888_v57  ;;  %v17335_v57 = vld [vmem:[#allocation42_spill] sm:$0xff]  ;;  %v17336_v54 = vld [vmem:[#allocation43_spill] sm:$0xff] }
 0x340   :  { %11626 = vmatprep.subr.bf16.mxu1 %v14892_v62  ;;  %11656 = vmatprep.subr.bf16.mxu0 %v17287_v46  ;;  %v17334_v62 = vld [vmem:[#allocation41_spill] sm:$0xff] }
 0x341   :  { %1908 = vmatprep.mubr.f32.mxu1 %v17289_v42  ;;  %9762 = vmatprep.mubr.msk.f32.mxu0 %vm14594_vm1, %v17289_v42 }
 0x343   :  { %11628 = vmatpush1.bf16.msra.mxu1 %v14895_v4  ;;  %11658 = vmatpush3.bf16.msra.mxu0 %v17330_v26  ;;  %v17338_v26 = vld [vmem:[#allocation45_spill] sm:$0xff]  ;;  %v17340_v4 = vld [vmem:[#allocation47_spill] sm:$0xff] }
 0x344   :  { %11630 = vmatprep.subr.bf16.mxu1 %v17331_v44  ;;  %11659 = vmatprep.subr.bf16.mxu0 %v17287_v46  ;;  %v17339_v44 = vld [vmem:[#allocation46_spill] sm:$0xff] }
 0x347   :  { %11632 = vmatpush1.bf16.msra.mxu1 %v17332_v61  ;;  %11661 = vmatpush3.bf16.msra.mxu0 %v17333_v28  ;;  %v17341_v28 = vld [vmem:[#allocation48_spill] sm:$0xff]  ;;  %v17343_v61 = vld [vmem:[#allocation50_spill] sm:$0xff] }
 0x348   :  { %11634 = vmatprep.subr.bf16.mxu1 %v17334_v62  ;;  %11662 = vmatprep.subr.bf16.mxu0 %v17287_v46  ;;  %v17342_v62 = vld [vmem:[#allocation49_spill] sm:$0xff] }
 0x34b   :  { %11636 = vmatpush1.bf16.msra.mxu1 %v17335_v57  ;;  %11664 = vmatpush3.bf16.msra.mxu0 %v17336_v54  ;;  %v17344_v54 = vld [vmem:[#allocation51_spill] sm:$0xff]  ;;  %v17346_v57 = vld [vmem:[#allocation53_spill] sm:$0xff] }
 0x34c   :  { %11638 = vmatprep.subr.bf16.mxu1 %v17337_v48  ;;  %11665 = vmatprep.subr.bf16.mxu0 %v17287_v46  ;;  %v17345_v48 = vld [vmem:[#allocation52_spill] sm:$0xff] }
 0x34f   :  { %11640 = vmatpush1.bf16.msra.mxu1 %v17338_v26  ;;  %11667 = vmatpush3.bf16.msra.mxu0 %v17339_v44  ;;  %v17347_v44 = vld [vmem:[#allocation54_spill] sm:$0xff]  ;;  %v17349_v26 = vld [vmem:[#allocation56_spill] sm:$0xff] }
 0x350   :  { %11642 = vmatprep.subr.bf16.mxu1 %v17340_v4  ;;  %11668 = vmatprep.subr.bf16.mxu0 %v17287_v46  ;;  %v17348_v4 = vld [vmem:[#allocation55_spill] sm:$0xff] }
 0x353   :  { %11644 = vmatpush1.bf16.msra.mxu1 %v17341_v28  ;;  %11670 = vmatpush3.bf16.msra.mxu0 %v17342_v62 }
 0x354   :  { %11646 = vmatprep.subr.bf16.mxu1 %v17343_v61  ;;  %11671 = vmatprep.subr.bf16.mxu0 %v17287_v46 }
 0x357   :  { %11648 = vmatpush1.bf16.msra.mxu1 %v17344_v54  ;;  %11673 = vmatpush3.bf16.msra.mxu0 %v17345_v48 }
 0x358   :  { %11650 = vmatprep.subr.bf16.mxu1 %v17346_v57  ;;  %11674 = vmatprep.subr.bf16.mxu0 %v17287_v46  ;;  %v17351_v57 = vld [vmem:[#allocation89_spill] sm:$0xff] }
 0x35b   :  { %11652 = vmatpush1.bf16.msra.mxu1 %v17347_v44  ;;  %11676 = vmatpush3.bf16.msra.mxu0 %v17348_v4  ;;  %v17352_v4 = vld [vmem:[#allocation90_spill] sm:$0xff] }
 0x35c   :  { %11678 = vmatprep.subr.bf16.mxu1 %v17349_v26  ;;  %11709 = vmatprep.subr.bf16.mxu0 %v17287_v46 }
 0x3d1   :  { %v1510_v62 = vpop.f32.mrb[36].mxu0 }
 0x3d2   :  { %v9659_v61 = vpop.f32.mrb[37].mxu0 }
 0x3d3   :  { %v1511_v61 = vadd.f32 %v1510_v62, %v15201_v33 }
 0x3f1   :  { %v1580_v28 = vpop.f32.mrb[22].mxu1  ;;  %v1651_v43 = vpop.f32.mrb[38].mxu0 }
 0x3f2   :  { %v13983_v54 = vadd.f32 %v1580_v28, %v17350_v18  ;;  %v1582_v10 = vpop.f32.mrb[23].mxu1  ;;  %v9694_v48 = vpop.f32.mrb[39].mxu0  ;;  %v1669_v60 = vadd.f32 %v17352_v4, %v1651_v43 }
 0x3f3   :  { %v13984_v7 = vadd.f32 %v1582_v10, %v17351_v57 }
 0x3f4   :  { %v8532_v36 = vmul.f32 -1.442695, %v13983_v54 }
 0x3f5   :  { %v8533_v63 = vmul.f32 -1.442695, %v13984_v7 }
 0x3f6   :  { %14121 = vpow2.f32 %v8532_v36 }
 0x3f7   :  { %14123 = vpow2.f32 %v8533_v63 }
 0x400   :  { %v14122_v44 = vpop.eup %14121 }
 0x401   :  { %v1663_v31 = vadd.f32 1.0, %v14122_v44  ;;  %v14124_v26 = vpop.eup %14123 }
 0x402   :  { %v1664_v28 = vadd.f32 1.0, %v14124_v26 }
 0x403   :  { %14125 = vrcp.f32 %v1663_v31 }
 0x40d   :  { %v14126_v52 = vpop.eup %14125 }
 0x40e   :  { %v1670_v21 = vmul.f32 %v14126_v52, %v1669_v60 }
 0x410   :  { %v1671_v49 = vadd.f32 %v1670_v21, %v1511_v61 }
 0x411   :  { %v1744_v18 = vpop.f32.mrb[4].mxu0  ;;  %v1815_v48 = vpop.f32.mrb[24].mxu1 }
 0x412   :  { %14127 = vtanh.f32 %v1671_v49  ;;  %v13953_v36 = vadd.f32 %v1744_v18, %v17312_v19  ;;  %v1746_v10 = vpop.f32.mrb[5].mxu0  ;;  %v9729_v7 = vpop.f32.mrb[25].mxu1  ;;  %v1837_v18 = vadd.f32 %v15019_v1, %v1815_v48  ;;  %v17355_v1 = vld [vmem:[#allocation21_spill] sm:$0xff]  ;;  %v17357_v48 = vld [vmem:[#allocation22_spill] sm:$0xff] }
 0x413   :  { %14129 = vrcp.f32 %v1664_v28  ;;  %v13954_v63 = vadd.f32 %v1746_v10, %v17313_v34 }
 0x414   :  { %v8534_v54 = vmul.f32 -1.442695, %v13953_v36  ;;  %v17354_v36 = vld [vmem:[#allocation60_spill] sm:$0xff] }
 0x415   :  { %v8535_v62 = vmul.f32 -1.442695, %v13954_v63 }
 0x416   :  { %14131 = vpow2.f32 %v8534_v54 }
 0x417   :  { %14133 = vpow2.f32 %v8535_v62  ;;  %v17359_v62 = vld [vmem:[#allocation29_spill] sm:$0xff] }
 0x41c   :  { %v14128_v31 = vpop.eup %14127 }
 0x41d   :  { %v1673_v43 = vsub.f32 %v15207_v56, %v14128_v31  ;;  %v14130_v44 = vpop.eup %14129  ;;  %v17373_v56 = vld [vmem:[#allocation39_spill] sm:$0xff] }
 0x41f   :  { %v1674_v52 = vmul.f32 %v14130_v44, %v1673_v43 }
 0x420   :  { %v14132_v60 = vpop.eup %14131 }
 0x421   :  { %v1831_v21 = vadd.f32 1.0, %v14132_v60  ;;  %v15332_v26 = vadd.f32 %v14128_v31, %v1674_v52  ;;  %v14134_v49 = vpop.eup %14133  ;;  %v17358_v31 = vld [vmem:[#allocation23_spill] sm:$0xff]  ;;  %v17360_v52 = vld [vmem:[#allocation24_spill] sm:$0xff] }
 0x422   :  { %v1832_v10 = vadd.f32 1.0, %v14134_v49  ;;  %v17362_v49 = vld [vmem:[#allocation30_spill] sm:$0xff] }
 0x423   :  { %17353 = vst [vmem:[#allocation74_spill] sm:$0xff] %v15332_v26  ;;  %14135 = vrcp.f32 %v1831_v21  ;;  %v17361_v21 = vld [vmem:[#allocation25_spill] sm:$0xff] }
 0x42d   :  { %v14136_v61 = vpop.eup %14135 }
 0x42e   :  { %v1838_v28 = vmul.f32 %v14136_v61, %v1837_v18  ;;  %v17363_v18 = vld [vmem:[#allocation26_spill] sm:$0xff]  ;;  %v17364_v61 = vld [vmem:[#allocation27_spill] sm:$0xff] }
 0x430   :  { %v1839_v7 = vadd.f32 %v1838_v28, %v17354_v36  ;;  %v17365_v28 = vld [vmem:[#allocation31_spill] sm:$0xff]  ;;  %v17366_v36 = vld [vmem:[#allocation32_spill] sm:$0xff] }
 0x432   :  { %14137 = vtanh.f32 %v1839_v7  ;;  %v17367_v7 = vld [vmem:[#allocation33_spill] sm:$0xff] }
 0x433   :  { %14139 = vrcp.f32 %v1832_v10  ;;  %v17368_v10 = vld [vmem:[#allocation34_spill] sm:$0xff] }
 0x43c   :  { %v14138_v54 = vpop.eup %14137 }
 0x43d   :  { %v1841_v63 = vsub.f32 %v15212_v17, %v14138_v54  ;;  %v14140_v43 = vpop.eup %14139  ;;  %v17356_v17 = vld [vmem:[#allocation28_spill] sm:$0xff] }
 0x43f   :  { %v1842_v44 = vmul.f32 %v14140_v43, %v1841_v63  ;;  %v17370_v63 = vld [vmem:[#allocation36_spill] sm:$0xff]  ;;  %v17371_v43 = vld [vmem:[#allocation37_spill] sm:$0xff] }
 0x441   :  { %v15337_v60 = vadd.f32 %v14138_v54, %v1842_v44  ;;  %v17369_v54 = vld [vmem:[#allocation35_spill] sm:$0xff]  ;;  %v17372_v44 = vld [vmem:[#allocation38_spill] sm:$0xff] }
 0x443   :  { %1909 = vmatmul.mubr.f32.vlgmr.msra.gmra.mrb[26].mxu1 %v15337_v60  ;;  %9763 = vmatmul.mubr.f32.vlgmr.msra.gmra.mrb[40].mxu0 %v15337_v60 }
 0x444   :  { %11680 = vmatpush1.bf16.msra.mxu1 %v17316_v11  ;;  %11711 = vmatpush3.bf16.msra.mxu0 %v17317_v13 }
 0x445   :  { %11682 = vmatprep.subr.bf16.mxu1 %v17318_v37  ;;  %11712 = vmatprep.subr.bf16.mxu0 %v17287_v46 }
 0x446   :  { %2049 = vmatprep.mubr.f32.mxu1 %v17289_v42  ;;  %9797 = vmatprep.mubr.msk.f32.mxu0 %vm14594_vm1, %v17289_v42 }
 0x448   :  { %11684 = vmatpush1.bf16.msra.mxu1 %v17319_v51  ;;  %11714 = vmatpush3.bf16.msra.mxu0 %v17320_v6 }
 0x449   :  { %11686 = vmatprep.subr.bf16.mxu1 %v17321_v39  ;;  %11715 = vmatprep.subr.bf16.mxu0 %v17287_v46 }
 0x44c   :  { %11688 = vmatpush1.bf16.msra.mxu1 %v17322_v59  ;;  %11717 = vmatpush3.bf16.msra.mxu0 %v17323_v3 }
 0x44d   :  { %11690 = vmatprep.subr.bf16.mxu1 %v17324_v9  ;;  %11718 = vmatprep.subr.bf16.mxu0 %v17287_v46 }
 0x450   :  { %11692 = vmatpush1.bf16.msra.mxu1 %v17325_v24  ;;  %11720 = vmatpush3.bf16.msra.mxu0 %v17326_v53 }
 0x451   :  { %11694 = vmatprep.subr.bf16.mxu1 %v17327_v32  ;;  %11721 = vmatprep.subr.bf16.mxu0 %v17287_v46 }
 0x454   :  { %11696 = vmatpush1.bf16.msra.mxu1 %v15067_v0  ;;  %11723 = vmatpush3.bf16.msra.mxu0 %v15069_v25 }
 0x455   :  { %11698 = vmatprep.subr.bf16.mxu1 %v17328_v41  ;;  %11724 = vmatprep.subr.bf16.mxu0 %v17287_v46 }
 0x458   :  { %11700 = vmatpush1.bf16.msra.mxu1 %v17329_v45  ;;  %11726 = vmatpush3.bf16.msra.mxu0 %v15079_v50 }
 0x459   :  { %11702 = vmatprep.subr.bf16.mxu1 %v15083_v27  ;;  %11727 = vmatprep.subr.bf16.mxu0 %v17287_v46 }
 0x45c   :  { %11704 = vmatpush1.bf16.msra.mxu1 %v15087_v20  ;;  %11729 = vmatpush3.bf16.msra.mxu0 %v15089_v2 }
 0x45d   :  { %11706 = vmatprep.subr.bf16.mxu1 %v15093_v35  ;;  %11730 = vmatprep.subr.bf16.mxu0 %v17287_v46 }
 0x460   :  { %11708 = vmatpush1.bf16.msra.mxu1 %v15097_v55  ;;  %11732 = vmatpush3.bf16.msra.mxu0 %v15099_v8 }
 0x461   :  { %11734 = vmatprep.subr.bf16.mxu0 %v14748_v12  ;;  %11765 = vmatprep.subr.bf16.mxu1 %v17287_v46 }
 0x463   :  { %2050 = vmatmul.mubr.f32.vlgmr.msra.gmra.mrb[26].mxu1 %v15332_v26  ;;  %9798 = vmatmul.mubr.f32.vlgmr.msra.gmra.mrb[42].mxu0 %v15332_v26 }
 0x464   :  { %11736 = vmatpush1.bf16.msra.mxu0 %v14750_v14  ;;  %11767 = vmatpush3.bf16.msra.mxu1 %v14780_v47 }
 0x465   :  { %11738 = vmatprep.subr.bf16.mxu0 %v14753_v16  ;;  %11768 = vmatprep.subr.bf16.mxu1 %v17287_v46 }
 0x466   :  { %2213 = vmatprep.mubr.f32.mxu0 %v17289_v42  ;;  %9832 = vmatprep.mubr.msk.f32.mxu1 %vm14594_vm1, %v17289_v42 }
 0x468   :  { %11740 = vmatpush1.bf16.msra.mxu0 %v14758_v22  ;;  %11770 = vmatpush3.bf16.msra.mxu1 %v14793_v58 }
 0x469   :  { %11742 = vmatprep.subr.bf16.mxu0 %v14761_v23  ;;  %11771 = vmatprep.subr.bf16.mxu1 %v17287_v46 }
 0x46c   :  { %11744 = vmatpush1.bf16.msra.mxu0 %v14766_v29  ;;  %11773 = vmatpush3.bf16.msra.mxu1 %v14807_v5 }
 0x46d   :  { %11746 = vmatprep.subr.bf16.mxu0 %v14769_v30  ;;  %11774 = vmatprep.subr.bf16.mxu1 %v17287_v46 }
 0x470   :  { %11748 = vmatpush1.bf16.msra.mxu0 %v14774_v38  ;;  %11776 = vmatpush3.bf16.msra.mxu1 %v14821_v15 }
 0x471   :  { %11750 = vmatprep.subr.bf16.mxu0 %v14777_v40  ;;  %11777 = vmatprep.subr.bf16.mxu1 %v17287_v46 }
 0x474   :  { %11752 = vmatpush1.bf16.msra.mxu0 %v17355_v1  ;;  %11779 = vmatpush3.bf16.msra.mxu1 %v17356_v17 }
 0x475   :  { %11754 = vmatprep.subr.bf16.mxu0 %v17357_v48  ;;  %11780 = vmatprep.subr.bf16.mxu1 %v17287_v46 }
 0x478   :  { %11756 = vmatpush1.bf16.msra.mxu0 %v17358_v31  ;;  %11782 = vmatpush3.bf16.msra.mxu1 %v17359_v62 }
 0x479   :  { %11758 = vmatprep.subr.bf16.mxu0 %v17360_v52  ;;  %11783 = vmatprep.subr.bf16.mxu1 %v17287_v46 }
 0x47c   :  { %11760 = vmatpush1.bf16.msra.mxu0 %v17361_v21  ;;  %11785 = vmatpush3.bf16.msra.mxu1 %v17362_v49 }
 0x47d   :  { %11762 = vmatprep.subr.bf16.mxu0 %v17363_v18  ;;  %11786 = vmatprep.subr.bf16.mxu1 %v17287_v46  ;;  %v17391_v18 = vld [vmem:[#allocation57_spill] sm:$0xff] }
 0x480   :  { %11764 = vmatpush1.bf16.msra.mxu0 %v17364_v61  ;;  %11788 = vmatpush3.bf16.msra.mxu1 %v17365_v28  ;;  %v17378_v28 = vld [vmem:[#allocation44_spill] sm:$0xff] }
 0x481   :  { %11790 = vmatprep.subr.bf16.mxu1 %v17366_v36  ;;  %11821 = vmatprep.subr.bf16.mxu0 %v17287_v46  ;;  %v17377_v36 = vld [vmem:[#allocation43_spill] sm:$0xff] }
 0x483   :  { %2214 = vmatmul.mubr.f32.vlgmr.msra.gmra.mrb[6].mxu0 %v15337_v60  ;;  %9833 = vmatmul.mubr.f32.vlgmr.msra.gmra.mrb[28].mxu1 %v15337_v60 }
 0x484   :  { %11792 = vmatpush1.bf16.msra.mxu1 %v17367_v7  ;;  %11823 = vmatpush3.bf16.msra.mxu0 %v17368_v10  ;;  %v17374_v10 = vld [vmem:[#allocation40_spill] sm:$0xff]  ;;  %v17376_v7 = vld [vmem:[#allocation42_spill] sm:$0xff] }
 0x485   :  { %11794 = vmatprep.subr.bf16.mxu1 %v17369_v54  ;;  %11824 = vmatprep.subr.bf16.mxu0 %v17287_v46  ;;  %v17375_v54 = vld [vmem:[#allocation41_spill] sm:$0xff] }
 0x486   :  { %2379 = vmatprep.mubr.f32.mxu1 %v17289_v42  ;;  %9867 = vmatprep.mubr.msk.f32.mxu0 %vm14594_vm1, %v17289_v42 }
 0x488   :  { %11796 = vmatpush1.bf16.msra.mxu1 %v17370_v63  ;;  %11826 = vmatpush3.bf16.msra.mxu0 %v17371_v43  ;;  %v17379_v43 = vld [vmem:[#allocation45_spill] sm:$0xff]  ;;  %v17381_v63 = vld [vmem:[#allocation47_spill] sm:$0xff] }
 0x489   :  { %11798 = vmatprep.subr.bf16.mxu1 %v17372_v44  ;;  %11827 = vmatprep.subr.bf16.mxu0 %v17287_v46  ;;  %v17380_v44 = vld [vmem:[#allocation46_spill] sm:$0xff] }
 0x48c   :  { %11800 = vmatpush1.bf16.msra.mxu1 %v17373_v56  ;;  %11829 = vmatpush3.bf16.msra.mxu0 %v17374_v10  ;;  %v17382_v10 = vld [vmem:[#allocation48_spill] sm:$0xff]  ;;  %v17384_v56 = vld [vmem:[#allocation50_spill] sm:$0xff] }
 0x48d   :  { %11802 = vmatprep.subr.bf16.mxu1 %v17375_v54  ;;  %11830 = vmatprep.subr.bf16.mxu0 %v17287_v46  ;;  %v17383_v54 = vld [vmem:[#allocation49_spill] sm:$0xff] }
 0x490   :  { %11804 = vmatpush1.bf16.msra.mxu1 %v17376_v7  ;;  %11832 = vmatpush3.bf16.msra.mxu0 %v17377_v36  ;;  %v17385_v36 = vld [vmem:[#allocation51_spill] sm:$0xff]  ;;  %v17387_v7 = vld [vmem:[#allocation53_spill] sm:$0xff] }
 0x491   :  { %11806 = vmatprep.subr.bf16.mxu1 %v17378_v28  ;;  %11833 = vmatprep.subr.bf16.mxu0 %v17287_v46  ;;  %v17386_v28 = vld [vmem:[#allocation52_spill] sm:$0xff] }
 0x494   :  { %11808 = vmatpush1.bf16.msra.mxu1 %v17379_v43  ;;  %11835 = vmatpush3.bf16.msra.mxu0 %v17380_v44  ;;  %v17388_v44 = vld [vmem:[#allocation54_spill] sm:$0xff]  ;;  %v17390_v43 = vld [vmem:[#allocation56_spill] sm:$0xff] }
 0x495   :  { %11810 = vmatprep.subr.bf16.mxu1 %v17381_v63  ;;  %11836 = vmatprep.subr.bf16.mxu0 %v17287_v46  ;;  %v17389_v63 = vld [vmem:[#allocation55_spill] sm:$0xff] }
 0x498   :  { %11812 = vmatpush1.bf16.msra.mxu1 %v17382_v10  ;;  %11838 = vmatpush3.bf16.msra.mxu0 %v17383_v54 }
 0x499   :  { %11814 = vmatprep.subr.bf16.mxu1 %v17384_v56  ;;  %11839 = vmatprep.subr.bf16.mxu0 %v17287_v46 }
 0x49c   :  { %11816 = vmatpush1.bf16.msra.mxu1 %v17385_v36  ;;  %11841 = vmatpush3.bf16.msra.mxu0 %v17386_v28 }
 0x49d   :  { %11818 = vmatprep.subr.bf16.mxu1 %v17387_v7  ;;  %11842 = vmatprep.subr.bf16.mxu0 %v17287_v46 }
 0x4a0   :  { %11820 = vmatpush1.bf16.msra.mxu1 %v17388_v44  ;;  %11844 = vmatpush3.bf16.msra.mxu0 %v17389_v63 }
 0x4a1   :  { %11846 = vmatprep.subr.bf16.mxu1 %v17390_v43  ;;  %11877 = vmatprep.subr.bf16.mxu0 %v17287_v46 }
 0x516   :  { %v1981_v54 = vpop.f32.mrb[40].mxu0 }
 0x517   :  { %v9764_v56 = vpop.f32.mrb[41].mxu0 }
 0x518   :  { %v1982_v56 = vadd.f32 %v1981_v54, %v15201_v33 }
 0x536   :  { %v2051_v10 = vpop.f32.mrb[26].mxu1  ;;  %v2122_v61 = vpop.f32.mrb[42].mxu0 }
 0x537   :  { %v13985_v36 = vadd.f32 %v2051_v10, %v17391_v18  ;;  %v2053_v49 = vpop.f32.mrb[27].mxu1  ;;  %v9799_v28 = vpop.f32.mrb[43].mxu0  ;;  %v2140_v63 = vadd.f32 %v17352_v4, %v2122_v61 }
 0x538   :  { %v13986_v7 = vadd.f32 %v2053_v49, %v17351_v57 }
 0x539   :  { %v8536_v21 = vmul.f32 -1.442695, %v13985_v36 }
 0x53a   :  { %v8537_v52 = vmul.f32 -1.442695, %v13986_v7 }
 0x53b   :  { %14141 = vpow2.f32 %v8536_v21 }
 0x53c   :  { %14143 = vpow2.f32 %v8537_v52 }
 0x545   :  { %v14142_v44 = vpop.eup %14141 }
 0x546   :  { %v2134_v62 = vadd.f32 1.0, %v14142_v44  ;;  %v14144_v43 = vpop.eup %14143 }
 0x547   :  { %v2135_v10 = vadd.f32 1.0, %v14144_v43 }
 0x548   :  { %14145 = vrcp.f32 %v2134_v62 }
 0x552   :  { %v14146_v31 = vpop.eup %14145 }
 0x553   :  { %v2141_v48 = vmul.f32 %v14146_v31, %v2140_v63 }
 0x555   :  { %v2142_v17 = vadd.f32 %v2141_v48, %v1982_v56 }
 0x556   :  { %v2215_v18 = vpop.f32.mrb[6].mxu0  ;;  %v2286_v28 = vpop.f32.mrb[28].mxu1 }
 0x557   :  { %14147 = vtanh.f32 %v2142_v17  ;;  %v13955_v21 = vadd.f32 %v2215_v18, %v17312_v19  ;;  %v2217_v49 = vpop.f32.mrb[7].mxu0  ;;  %v9834_v36 = vpop.f32.mrb[29].mxu1  ;;  %v15462_v18 = vld [vmem:[%s17071_s4] ss:$0 sm:$0xff] }
 0x558   :  { %14149 = vrcp.f32 %v2135_v10  ;;  %v13956_v62 = vadd.f32 %v2217_v49, %v17313_v34  ;;  %v2308_v56 = vadd.f32 %v15462_v18, %v2286_v28  ;;  %v17393_v49 = vld [vmem:[#allocation59_spill] sm:$0xff]  ;;  %v17395_v28 = vld [vmem:[#allocation22_spill] sm:$0xff] }
 0x559   :  { %v8538_v7 = vmul.f32 -1.442695, %v13955_v21 }
 0x55a   :  { %v8539_v54 = vmul.f32 -1.442695, %v13956_v62 }
 0x55b   :  { %14151 = vpow2.f32 %v8538_v7 }
 0x55c   :  { %14153 = vpow2.f32 %v8539_v54 }
 0x561   :  { %v14148_v52 = vpop.eup %14147 }
 0x562   :  { %v2144_v61 = vsub.f32 %v15332_v26, %v14148_v52  ;;  %v14150_v44 = vpop.eup %14149  ;;  %v17410_v26 = vld [vmem:[#allocation38_spill] sm:$0xff] }
 0x564   :  { %v2145_v31 = vmul.f32 %v14150_v44, %v2144_v61 }
 0x565   :  { %v14152_v48 = vpop.eup %14151 }
 0x566   :  { %v2302_v63 = vadd.f32 1.0, %v14152_v48  ;;  %v15457_v43 = vadd.f32 %v14148_v52, %v2145_v31  ;;  %v14154_v17 = vpop.eup %14153  ;;  %v17396_v31 = vld [vmem:[#allocation23_spill] sm:$0xff]  ;;  %v17397_v48 = vld [vmem:[#allocation29_spill] sm:$0xff] }
 0x567   :  { %v2303_v7 = vadd.f32 1.0, %v14154_v17  ;;  %v17399_v17 = vld [vmem:[#allocation25_spill] sm:$0xff] }
 0x568   :  { %17392 = vst [vmem:[#allocation58_spill] sm:$0xff] %v15457_v43  ;;  %14155 = vrcp.f32 %v2302_v63  ;;  %v17398_v63 = vld [vmem:[#allocation24_spill] sm:$0xff] }
 0x572   :  { %v14156_v10 = vpop.eup %14155 }
 0x573   :  { %v2309_v21 = vmul.f32 %v14156_v10, %v2308_v56  ;;  %v17400_v56 = vld [vmem:[#allocation30_spill] sm:$0xff] }
 0x574   :  { %v17401_v10 = vld [vmem:[#allocation26_spill] sm:$0xff] }
 0x575   :  { %v2310_v36 = vadd.f32 %v2309_v21, %v17393_v49  ;;  %v17402_v21 = vld [vmem:[#allocation27_spill] sm:$0xff] }
 0x576   :  { %v17403_v49 = vld [vmem:[#allocation31_spill] sm:$0xff] }
 0x577   :  { %14157 = vtanh.f32 %v2310_v36  ;;  %v17404_v36 = vld [vmem:[#allocation32_spill] sm:$0xff] }
 0x578   :  { %14159 = vrcp.f32 %v2303_v7  ;;  %v17405_v7 = vld [vmem:[#allocation33_spill] sm:$0xff] }
 0x581   :  { %v14158_v62 = vpop.eup %14157 }
 0x582   :  { %v2312_v52 = vsub.f32 %v15337_v60, %v14158_v62  ;;  %v14160_v61 = vpop.eup %14159  ;;  %v17394_v60 = vld [vmem:[#allocation28_spill] sm:$0xff] }
 0x584   :  { %v2313_v44 = vmul.f32 %v14160_v61, %v2312_v52  ;;  %v17407_v52 = vld [vmem:[#allocation35_spill] sm:$0xff]  ;;  %v17408_v61 = vld [vmem:[#allocation36_spill] sm:$0xff] }
 0x586   :  { %v15467_v54 = vadd.f32 %v14158_v62, %v2313_v44  ;;  %v17406_v62 = vld [vmem:[#allocation34_spill] sm:$0xff]  ;;  %v17409_v44 = vld [vmem:[#allocation37_spill] sm:$0xff] }
 0x588   :  { %2380 = vmatmul.mubr.f32.vlgmr.msra.gmra.mrb[30].mxu1 %v15467_v54  ;;  %9868 = vmatmul.mubr.f32.vlgmr.msra.gmra.mrb[44].mxu0 %v15467_v54 }
 0x589   :  { %11848 = vmatpush1.bf16.msra.mxu1 %v17316_v11  ;;  %11879 = vmatpush3.bf16.msra.mxu0 %v17317_v13 }
 0x58a   :  { %11850 = vmatprep.subr.bf16.mxu1 %v17318_v37  ;;  %11880 = vmatprep.subr.bf16.mxu0 %v17287_v46 }
 0x58b   :  { %2520 = vmatprep.mubr.f32.mxu1 %v17289_v42  ;;  %9902 = vmatprep.mubr.msk.f32.mxu0 %vm14594_vm1, %v17289_v42 }
 0x58d   :  { %11852 = vmatpush1.bf16.msra.mxu1 %v17319_v51  ;;  %11882 = vmatpush3.bf16.msra.mxu0 %v17320_v6 }
 0x58e   :  { %11854 = vmatprep.subr.bf16.mxu1 %v17321_v39  ;;  %11883 = vmatprep.subr.bf16.mxu0 %v17287_v46 }
 0x591   :  { %11856 = vmatpush1.bf16.msra.mxu1 %v17322_v59  ;;  %11885 = vmatpush3.bf16.msra.mxu0 %v17323_v3 }
 0x592   :  { %11858 = vmatprep.subr.bf16.mxu1 %v17324_v9  ;;  %11886 = vmatprep.subr.bf16.mxu0 %v17287_v46 }
 0x595   :  { %11860 = vmatpush1.bf16.msra.mxu1 %v17325_v24  ;;  %11888 = vmatpush3.bf16.msra.mxu0 %v17326_v53 }
 0x596   :  { %11862 = vmatprep.subr.bf16.mxu1 %v17327_v32  ;;  %11889 = vmatprep.subr.bf16.mxu0 %v17287_v46 }
 0x599   :  { %11864 = vmatpush1.bf16.msra.mxu1 %v15067_v0  ;;  %11891 = vmatpush3.bf16.msra.mxu0 %v15069_v25 }
 0x59a   :  { %11866 = vmatprep.subr.bf16.mxu1 %v17328_v41  ;;  %11892 = vmatprep.subr.bf16.mxu0 %v17287_v46 }
 0x59d   :  { %11868 = vmatpush1.bf16.msra.mxu1 %v17329_v45  ;;  %11894 = vmatpush3.bf16.msra.mxu0 %v15079_v50 }
 0x59e   :  { %11870 = vmatprep.subr.bf16.mxu1 %v15083_v27  ;;  %11895 = vmatprep.subr.bf16.mxu0 %v17287_v46 }
 0x5a1   :  { %11872 = vmatpush1.bf16.msra.mxu1 %v15087_v20  ;;  %11897 = vmatpush3.bf16.msra.mxu0 %v15089_v2 }
 0x5a2   :  { %11874 = vmatprep.subr.bf16.mxu1 %v15093_v35  ;;  %11898 = vmatprep.subr.bf16.mxu0 %v17287_v46 }
 0x5a5   :  { %11876 = vmatpush1.bf16.msra.mxu1 %v15097_v55  ;;  %11900 = vmatpush3.bf16.msra.mxu0 %v15099_v8 }
 0x5a6   :  { %11902 = vmatprep.subr.bf16.mxu0 %v14748_v12  ;;  %11933 = vmatprep.subr.bf16.mxu1 %v17287_v46 }
 0x5a8   :  { %2521 = vmatmul.mubr.f32.vlgmr.msra.gmra.mrb[30].mxu1 %v15457_v43  ;;  %9903 = vmatmul.mubr.f32.vlgmr.msra.gmra.mrb[46].mxu0 %v15457_v43 }
 0x5a9   :  { %11904 = vmatpush1.bf16.msra.mxu0 %v14750_v14  ;;  %11935 = vmatpush3.bf16.msra.mxu1 %v14780_v47 }
 0x5aa   :  { %11906 = vmatprep.subr.bf16.mxu0 %v14753_v16  ;;  %11936 = vmatprep.subr.bf16.mxu1 %v17287_v46 }
 0x5ab   :  { %2684 = vmatprep.mubr.f32.mxu0 %v17289_v42  ;;  %9937 = vmatprep.mubr.msk.f32.mxu1 %vm14594_vm1, %v17289_v42 }
 0x5ad   :  { %11908 = vmatpush1.bf16.msra.mxu0 %v14758_v22  ;;  %11938 = vmatpush3.bf16.msra.mxu1 %v14793_v58 }
 0x5ae   :  { %11910 = vmatprep.subr.bf16.mxu0 %v14761_v23  ;;  %11939 = vmatprep.subr.bf16.mxu1 %v17287_v46 }
 0x5b1   :  { %11912 = vmatpush1.bf16.msra.mxu0 %v14766_v29  ;;  %11941 = vmatpush3.bf16.msra.mxu1 %v14807_v5 }
 0x5b2   :  { %11914 = vmatprep.subr.bf16.mxu0 %v14769_v30  ;;  %11942 = vmatprep.subr.bf16.mxu1 %v17287_v46 }
 0x5b5   :  { %11916 = vmatpush1.bf16.msra.mxu0 %v14774_v38  ;;  %11944 = vmatpush3.bf16.msra.mxu1 %v14821_v15 }
 0x5b6   :  { %11918 = vmatprep.subr.bf16.mxu0 %v14777_v40  ;;  %11945 = vmatprep.subr.bf16.mxu1 %v17287_v46 }
 0x5b9   :  { %11920 = vmatpush1.bf16.msra.mxu0 %v17355_v1  ;;  %11947 = vmatpush3.bf16.msra.mxu1 %v17394_v60 }
 0x5ba   :  { %11922 = vmatprep.subr.bf16.mxu0 %v17395_v28  ;;  %11948 = vmatprep.subr.bf16.mxu1 %v17287_v46 }
 0x5bd   :  { %11924 = vmatpush1.bf16.msra.mxu0 %v17396_v31  ;;  %11950 = vmatpush3.bf16.msra.mxu1 %v17397_v48 }
 0x5be   :  { %11926 = vmatprep.subr.bf16.mxu0 %v17398_v63  ;;  %11951 = vmatprep.subr.bf16.mxu1 %v17287_v46 }
 0x5c1   :  { %11928 = vmatpush1.bf16.msra.mxu0 %v17399_v17  ;;  %11953 = vmatpush3.bf16.msra.mxu1 %v17400_v56  ;;  %v17429_v56 = vld [vmem:[#allocation57_spill] sm:$0xff] }
 0x5c2   :  { %11930 = vmatprep.subr.bf16.mxu0 %v17401_v10  ;;  %11954 = vmatprep.subr.bf16.mxu1 %v17287_v46 }
 0x5c5   :  { %11932 = vmatpush1.bf16.msra.mxu0 %v17402_v21  ;;  %11956 = vmatpush3.bf16.msra.mxu1 %v17403_v49  ;;  %v17415_v49 = vld [vmem:[#allocation43_spill] sm:$0xff]  ;;  %v17416_v21 = vld [vmem:[#allocation44_spill] sm:$0xff] }
 0x5c6   :  { %11958 = vmatprep.subr.bf16.mxu1 %v17404_v36  ;;  %11989 = vmatprep.subr.bf16.mxu0 %v17287_v46  ;;  %v17414_v36 = vld [vmem:[#allocation42_spill] sm:$0xff] }
 0x5c8   :  { %2685 = vmatmul.mubr.f32.vlgmr.msra.gmra.mrb[8].mxu0 %v15467_v54  ;;  %9938 = vmatmul.mubr.f32.vlgmr.msra.gmra.mrb[32].mxu1 %v15467_v54 }
 0x5c9   :  { %11960 = vmatpush1.bf16.msra.mxu1 %v17405_v7  ;;  %11991 = vmatpush3.bf16.msra.mxu0 %v17406_v62  ;;  %v17411_v7 = vld [vmem:[#allocation39_spill] sm:$0xff]  ;;  %v17412_v62 = vld [vmem:[#allocation40_spill] sm:$0xff] }
 0x5ca   :  { %11962 = vmatprep.subr.bf16.mxu1 %v17407_v52  ;;  %11992 = vmatprep.subr.bf16.mxu0 %v17287_v46  ;;  %v17413_v52 = vld [vmem:[#allocation41_spill] sm:$0xff] }
 0x5cb   :  { %2850 = vmatprep.mubr.f32.mxu1 %v17289_v42  ;;  %9972 = vmatprep.mubr.msk.f32.mxu0 %vm14594_vm1, %v17289_v42 }
 0x5cd   :  { %11964 = vmatpush1.bf16.msra.mxu1 %v17408_v61  ;;  %11994 = vmatpush3.bf16.msra.mxu0 %v17409_v44  ;;  %v17417_v44 = vld [vmem:[#allocation45_spill] sm:$0xff]  ;;  %v17419_v61 = vld [vmem:[#allocation47_spill] sm:$0xff] }
 0x5ce   :  { %11966 = vmatprep.subr.bf16.mxu1 %v17410_v26  ;;  %11995 = vmatprep.subr.bf16.mxu0 %v17287_v46  ;;  %v17418_v26 = vld [vmem:[#allocation46_spill] sm:$0xff] }
 0x5d1   :  { %11968 = vmatpush1.bf16.msra.mxu1 %v17411_v7  ;;  %11997 = vmatpush3.bf16.msra.mxu0 %v17412_v62  ;;  %v17420_v62 = vld [vmem:[#allocation48_spill] sm:$0xff]  ;;  %v17422_v7 = vld [vmem:[#allocation50_spill] sm:$0xff] }
 0x5d2   :  { %11970 = vmatprep.subr.bf16.mxu1 %v17413_v52  ;;  %11998 = vmatprep.subr.bf16.mxu0 %v17287_v46  ;;  %v17421_v52 = vld [vmem:[#allocation49_spill] sm:$0xff] }
 0x5d5   :  { %11972 = vmatpush1.bf16.msra.mxu1 %v17414_v36  ;;  %12000 = vmatpush3.bf16.msra.mxu0 %v17415_v49  ;;  %v17423_v49 = vld [vmem:[#allocation51_spill] sm:$0xff]  ;;  %v17425_v36 = vld [vmem:[#allocation53_spill] sm:$0xff] }
 0x5d6   :  { %11974 = vmatprep.subr.bf16.mxu1 %v17416_v21  ;;  %12001 = vmatprep.subr.bf16.mxu0 %v17287_v46  ;;  %v17424_v21 = vld [vmem:[#allocation52_spill] sm:$0xff] }
 0x5d9   :  { %11976 = vmatpush1.bf16.msra.mxu1 %v17417_v44  ;;  %12003 = vmatpush3.bf16.msra.mxu0 %v17418_v26  ;;  %v17426_v26 = vld [vmem:[#allocation54_spill] sm:$0xff]  ;;  %v17428_v44 = vld [vmem:[#allocation56_spill] sm:$0xff] }
 0x5da   :  { %11978 = vmatprep.subr.bf16.mxu1 %v17419_v61  ;;  %12004 = vmatprep.subr.bf16.mxu0 %v17287_v46  ;;  %v17427_v61 = vld [vmem:[#allocation55_spill] sm:$0xff] }
 0x5dd   :  { %11980 = vmatpush1.bf16.msra.mxu1 %v17420_v62  ;;  %12006 = vmatpush3.bf16.msra.mxu0 %v17421_v52 }
 0x5de   :  { %11982 = vmatprep.subr.bf16.mxu1 %v17422_v7  ;;  %12007 = vmatprep.subr.bf16.mxu0 %v17287_v46 }
 0x5e1   :  { %11984 = vmatpush1.bf16.msra.mxu1 %v17423_v49  ;;  %12009 = vmatpush3.bf16.msra.mxu0 %v17424_v21 }
 0x5e2   :  { %11986 = vmatprep.subr.bf16.mxu1 %v17425_v36  ;;  %12010 = vmatprep.subr.bf16.mxu0 %v17287_v46 }
 0x5e5   :  { %11988 = vmatpush1.bf16.msra.mxu1 %v17426_v26  ;;  %12012 = vmatpush3.bf16.msra.mxu0 %v17427_v61 }
 0x5e6   :  { %12014 = vmatprep.subr.bf16.mxu1 %v17428_v44  ;;  %12045 = vmatprep.subr.bf16.mxu0 %v17287_v46 }
 0x65b   :  { %v2452_v52 = vpop.f32.mrb[44].mxu0 }
 0x65c   :  { %v9869_v7 = vpop.f32.mrb[45].mxu0 }
 0x65d   :  { %v2453_v7 = vadd.f32 %v2452_v52, %v15201_v33 }
 0x67b   :  { %v2522_v62 = vpop.f32.mrb[30].mxu1  ;;  %v2593_v10 = vpop.f32.mrb[46].mxu0 }
 0x67c   :  { %v13987_v49 = vadd.f32 %v2522_v62, %v17429_v56  ;;  %v2524_v17 = vpop.f32.mrb[31].mxu1  ;;  %v9904_v21 = vpop.f32.mrb[47].mxu0  ;;  %v2611_v61 = vadd.f32 %v17352_v4, %v2593_v10 }
 0x67d   :  { %v13988_v36 = vadd.f32 %v2524_v17, %v17351_v57 }
 0x67e   :  { %v8540_v63 = vmul.f32 -1.442695, %v13987_v49 }
 0x67f   :  { %v8541_v48 = vmul.f32 -1.442695, %v13988_v36 }
 0x680   :  { %14161 = vpow2.f32 %v8540_v63 }
 0x681   :  { %14163 = vpow2.f32 %v8541_v48 }
 0x68a   :  { %v14162_v26 = vpop.eup %14161 }
 0x68b   :  { %v2605_v31 = vadd.f32 1.0, %v14162_v26  ;;  %v14164_v44 = vpop.eup %14163 }
 0x68c   :  { %v2606_v62 = vadd.f32 1.0, %v14164_v44 }
 0x68d   :  { %14165 = vrcp.f32 %v2605_v31 }
 0x697   :  { %v14166_v28 = vpop.eup %14165 }
 0x698   :  { %v2612_v60 = vmul.f32 %v14166_v28, %v2611_v61 }
 0x69a   :  { %v2613_v1 = vadd.f32 %v2612_v60, %v2453_v7 }
 0x69b   :  { %v2686_v56 = vpop.f32.mrb[8].mxu0  ;;  %v2757_v21 = vpop.f32.mrb[32].mxu1 }
 0x69c   :  { %14167 = vtanh.f32 %v2613_v1  ;;  %v13957_v63 = vadd.f32 %v2686_v56, %v17312_v19  ;;  %v2688_v17 = vpop.f32.mrb[9].mxu0  ;;  %v9939_v49 = vpop.f32.mrb[33].mxu1  ;;  %v2779_v56 = vadd.f32 %v15462_v18, %v2757_v21  ;;  %v17433_v21 = vld [vmem:[#allocation28_spill] sm:$0xff] }
 0x69d   :  { %14169 = vrcp.f32 %v2606_v62  ;;  %v13958_v31 = vadd.f32 %v2688_v17, %v17313_v34  ;;  %v17431_v62 = vld [vmem:[#allocation62_spill] sm:$0xff] }
 0x69e   :  { %v8542_v26 = vmul.f32 -1.442695, %v13957_v63 }
 0x69f   :  { %v8543_v36 = vmul.f32 -1.442695, %v13958_v31 }
 0x6a0   :  { %14171 = vpow2.f32 %v8542_v26 }
 0x6a1   :  { %14173 = vpow2.f32 %v8543_v36  ;;  %v17435_v36 = vld [vmem:[#allocation23_spill] sm:$0xff] }
 0x6a6   :  { %v14168_v48 = vpop.eup %14167 }
 0x6a7   :  { %v2615_v4 = vsub.f32 %v15457_v43, %v14168_v48  ;;  %v14170_v10 = vpop.eup %14169  ;;  %v17450_v43 = vld [vmem:[#allocation39_spill] sm:$0xff] }
 0x6a9   :  { %v2616_v28 = vmul.f32 %v14170_v10, %v2615_v4 }
 0x6aa   :  { %v14172_v60 = vpop.eup %14171 }
 0x6ab   :  { %v2773_v52 = vadd.f32 1.0, %v14172_v60  ;;  %v15587_v61 = vadd.f32 %v14168_v48, %v2616_v28  ;;  %v14174_v1 = vpop.eup %14173  ;;  %v17434_v48 = vld [vmem:[#allocation22_spill] sm:$0xff]  ;;  %v17436_v28 = vld [vmem:[#allocation29_spill] sm:$0xff]  ;;  %v17437_v60 = vld [vmem:[#allocation24_spill] sm:$0xff] }
 0x6ac   :  { %v2774_v17 = vadd.f32 1.0, %v14174_v1  ;;  %v17439_v1 = vld [vmem:[#allocation30_spill] sm:$0xff] }
 0x6ad   :  { %17430 = vst [vmem:[#allocation75_spill] sm:$0xff] %v15587_v61  ;;  %14175 = vrcp.f32 %v2773_v52  ;;  %v17438_v52 = vld [vmem:[#allocation25_spill] sm:$0xff] }
 0x6b7   :  { %v14176_v44 = vpop.eup %14175 }
 0x6b8   :  { %v2780_v7 = vmul.f32 %v14176_v44, %v2779_v56  ;;  %v17440_v56 = vld [vmem:[#allocation26_spill] sm:$0xff]  ;;  %v17441_v44 = vld [vmem:[#allocation27_spill] sm:$0xff] }
 0x6ba   :  { %v2781_v63 = vadd.f32 %v2780_v7, %v17431_v62  ;;  %v17442_v7 = vld [vmem:[#allocation31_spill] sm:$0xff]  ;;  %v17443_v62 = vld [vmem:[#allocation32_spill] sm:$0xff] }
 0x6bc   :  { %14177 = vtanh.f32 %v2781_v63  ;;  %v17444_v63 = vld [vmem:[#allocation33_spill] sm:$0xff] }
 0x6bd   :  { %14179 = vrcp.f32 %v2774_v17  ;;  %v17445_v17 = vld [vmem:[#allocation34_spill] sm:$0xff] }
 0x6c6   :  { %v14178_v49 = vpop.eup %14177 }
 0x6c7   :  { %v2783_v26 = vsub.f32 %v15467_v54, %v14178_v49  ;;  %v14180_v31 = vpop.eup %14179  ;;  %v17432_v54 = vld [vmem:[#allocation21_spill] sm:$0xff] }
 0x6c9   :  { %v2784_v4 = vmul.f32 %v14180_v31, %v2783_v26  ;;  %v17447_v26 = vld [vmem:[#allocation36_spill] sm:$0xff]  ;;  %v17448_v31 = vld [vmem:[#allocation37_spill] sm:$0xff] }
 0x6cb   :  { %v15592_v10 = vadd.f32 %v14178_v49, %v2784_v4  ;;  %v17446_v49 = vld [vmem:[#allocation35_spill] sm:$0xff]  ;;  %v17449_v4 = vld [vmem:[#allocation38_spill] sm:$0xff] }
 0x6cd   :  { %2851 = vmatmul.mubr.f32.vlgmr.msra.gmra.mrb[34].mxu1 %v15592_v10  ;;  %9973 = vmatmul.mubr.f32.vlgmr.msra.gmra.mrb[48].mxu0 %v15592_v10 }
 0x6ce   :  { %12016 = vmatpush1.bf16.msra.mxu1 %v17316_v11  ;;  %12047 = vmatpush3.bf16.msra.mxu0 %v17317_v13 }
 0x6cf   :  { %12018 = vmatprep.subr.bf16.mxu1 %v17318_v37  ;;  %12048 = vmatprep.subr.bf16.mxu0 %v17287_v46 }
 0x6d0   :  { %2991 = vmatprep.mubr.f32.mxu1 %v17289_v42  ;;  %10007 = vmatprep.mubr.msk.f32.mxu0 %vm14594_vm1, %v17289_v42 }
 0x6d2   :  { %12020 = vmatpush1.bf16.msra.mxu1 %v17319_v51  ;;  %12050 = vmatpush3.bf16.msra.mxu0 %v17320_v6 }
 0x6d3   :  { %12022 = vmatprep.subr.bf16.mxu1 %v17321_v39  ;;  %12051 = vmatprep.subr.bf16.mxu0 %v17287_v46 }
 0x6d6   :  { %12024 = vmatpush1.bf16.msra.mxu1 %v17322_v59  ;;  %12053 = vmatpush3.bf16.msra.mxu0 %v17323_v3 }
 0x6d7   :  { %12026 = vmatprep.subr.bf16.mxu1 %v17324_v9  ;;  %12054 = vmatprep.subr.bf16.mxu0 %v17287_v46 }
 0x6da   :  { %12028 = vmatpush1.bf16.msra.mxu1 %v17325_v24  ;;  %12056 = vmatpush3.bf16.msra.mxu0 %v17326_v53 }
 0x6db   :  { %12030 = vmatprep.subr.bf16.mxu1 %v17327_v32  ;;  %12057 = vmatprep.subr.bf16.mxu0 %v17287_v46 }
 0x6de   :  { %12032 = vmatpush1.bf16.msra.mxu1 %v15067_v0  ;;  %12059 = vmatpush3.bf16.msra.mxu0 %v15069_v25 }
 0x6df   :  { %12034 = vmatprep.subr.bf16.mxu1 %v17328_v41  ;;  %12060 = vmatprep.subr.bf16.mxu0 %v17287_v46 }
 0x6e2   :  { %12036 = vmatpush1.bf16.msra.mxu1 %v17329_v45  ;;  %12062 = vmatpush3.bf16.msra.mxu0 %v15079_v50 }
 0x6e3   :  { %12038 = vmatprep.subr.bf16.mxu1 %v15083_v27  ;;  %12063 = vmatprep.subr.bf16.mxu0 %v17287_v46 }
 0x6e6   :  { %12040 = vmatpush1.bf16.msra.mxu1 %v15087_v20  ;;  %12065 = vmatpush3.bf16.msra.mxu0 %v15089_v2 }
 0x6e7   :  { %12042 = vmatprep.subr.bf16.mxu1 %v15093_v35  ;;  %12066 = vmatprep.subr.bf16.mxu0 %v17287_v46 }
 0x6ea   :  { %12044 = vmatpush1.bf16.msra.mxu1 %v15097_v55  ;;  %12068 = vmatpush3.bf16.msra.mxu0 %v15099_v8 }
 0x6eb   :  { %12070 = vmatprep.subr.bf16.mxu0 %v14748_v12  ;;  %12101 = vmatprep.subr.bf16.mxu1 %v17287_v46 }
 0x6ed   :  { %2992 = vmatmul.mubr.f32.vlgmr.msra.gmra.mrb[34].mxu1 %v15587_v61  ;;  %10008 = vmatmul.mubr.f32.vlgmr.msra.gmra.mrb[50].mxu0 %v15587_v61 }
 0x6ee   :  { %12072 = vmatpush1.bf16.msra.mxu0 %v14750_v14  ;;  %12103 = vmatpush3.bf16.msra.mxu1 %v14780_v47 }
 0x6ef   :  { %12074 = vmatprep.subr.bf16.mxu0 %v14753_v16  ;;  %12104 = vmatprep.subr.bf16.mxu1 %v17287_v46 }
 0x6f0   :  { %3155 = vmatprep.mubr.f32.mxu0 %v17289_v42  ;;  %10042 = vmatprep.mubr.msk.f32.mxu1 %vm14594_vm1, %v17289_v42 }
 0x6f2   :  { %12076 = vmatpush1.bf16.msra.mxu0 %v14758_v22  ;;  %12106 = vmatpush3.bf16.msra.mxu1 %v14793_v58 }
 0x6f3   :  { %12078 = vmatprep.subr.bf16.mxu0 %v14761_v23  ;;  %12107 = vmatprep.subr.bf16.mxu1 %v17287_v46 }
 0x6f6   :  { %12080 = vmatpush1.bf16.msra.mxu0 %v14766_v29  ;;  %12109 = vmatpush3.bf16.msra.mxu1 %v14807_v5 }
 0x6f7   :  { %12082 = vmatprep.subr.bf16.mxu0 %v14769_v30  ;;  %12110 = vmatprep.subr.bf16.mxu1 %v17287_v46 }
 0x6fa   :  { %12084 = vmatpush1.bf16.msra.mxu0 %v14774_v38  ;;  %12112 = vmatpush3.bf16.msra.mxu1 %v14821_v15 }
 0x6fb   :  { %12086 = vmatprep.subr.bf16.mxu0 %v14777_v40  ;;  %12113 = vmatprep.subr.bf16.mxu1 %v17287_v46 }
 0x6fe   :  { %12088 = vmatpush1.bf16.msra.mxu0 %v17432_v54  ;;  %12115 = vmatpush3.bf16.msra.mxu1 %v17433_v21 }
 0x6ff   :  { %12090 = vmatprep.subr.bf16.mxu0 %v17434_v48  ;;  %12116 = vmatprep.subr.bf16.mxu1 %v17287_v46 }
 0x702   :  { %12092 = vmatpush1.bf16.msra.mxu0 %v17435_v36  ;;  %12118 = vmatpush3.bf16.msra.mxu1 %v17436_v28 }
 0x703   :  { %12094 = vmatprep.subr.bf16.mxu0 %v17437_v60  ;;  %12119 = vmatprep.subr.bf16.mxu1 %v17287_v46 }
 0x706   :  { %12096 = vmatpush1.bf16.msra.mxu0 %v17438_v52  ;;  %12121 = vmatpush3.bf16.msra.mxu1 %v17439_v1 }
 0x707   :  { %12098 = vmatprep.subr.bf16.mxu0 %v17440_v56  ;;  %12122 = vmatprep.subr.bf16.mxu1 %v17287_v46  ;;  %v17468_v56 = vld [vmem:[#allocation57_spill] sm:$0xff] }
 0x70a   :  { %12100 = vmatpush1.bf16.msra.mxu0 %v17441_v44  ;;  %12124 = vmatpush3.bf16.msra.mxu1 %v17442_v7  ;;  %v17455_v7 = vld [vmem:[#allocation44_spill] sm:$0xff] }
 0x70b   :  { %12126 = vmatprep.subr.bf16.mxu1 %v17443_v62  ;;  %12157 = vmatprep.subr.bf16.mxu0 %v17287_v46  ;;  %v17454_v62 = vld [vmem:[#allocation43_spill] sm:$0xff] }
 0x70d   :  { %3156 = vmatmul.mubr.f32.vlgmr.msra.gmra.mrb[10].mxu0 %v15592_v10  ;;  %10043 = vmatmul.mubr.f32.vlgmr.msra.gmra.mrb[36].mxu1 %v15592_v10 }
 0x70e   :  { %12128 = vmatpush1.bf16.msra.mxu1 %v17444_v63  ;;  %12159 = vmatpush3.bf16.msra.mxu0 %v17445_v17  ;;  %v17451_v17 = vld [vmem:[#allocation40_spill] sm:$0xff]  ;;  %v17453_v63 = vld [vmem:[#allocation42_spill] sm:$0xff] }
 0x70f   :  { %12130 = vmatprep.subr.bf16.mxu1 %v17446_v49  ;;  %12160 = vmatprep.subr.bf16.mxu0 %v17287_v46  ;;  %v17452_v49 = vld [vmem:[#allocation41_spill] sm:$0xff] }
 0x710   :  { %3321 = vmatprep.mubr.f32.mxu1 %v17289_v42  ;;  %10077 = vmatprep.mubr.msk.f32.mxu0 %vm14594_vm1, %v17289_v42 }
 0x712   :  { %12132 = vmatpush1.bf16.msra.mxu1 %v17447_v26  ;;  %12162 = vmatpush3.bf16.msra.mxu0 %v17448_v31  ;;  %v17456_v31 = vld [vmem:[#allocation45_spill] sm:$0xff]  ;;  %v17458_v26 = vld [vmem:[#allocation47_spill] sm:$0xff] }
 0x713   :  { %12134 = vmatprep.subr.bf16.mxu1 %v17449_v4  ;;  %12163 = vmatprep.subr.bf16.mxu0 %v17287_v46  ;;  %v17457_v4 = vld [vmem:[#allocation46_spill] sm:$0xff] }
 0x716   :  { %12136 = vmatpush1.bf16.msra.mxu1 %v17450_v43  ;;  %12165 = vmatpush3.bf16.msra.mxu0 %v17451_v17  ;;  %v17459_v17 = vld [vmem:[#allocation48_spill] sm:$0xff]  ;;  %v17461_v43 = vld [vmem:[#allocation50_spill] sm:$0xff] }
 0x717   :  { %12138 = vmatprep.subr.bf16.mxu1 %v17452_v49  ;;  %12166 = vmatprep.subr.bf16.mxu0 %v17287_v46  ;;  %v17460_v49 = vld [vmem:[#allocation49_spill] sm:$0xff] }
 0x71a   :  { %12140 = vmatpush1.bf16.msra.mxu1 %v17453_v63  ;;  %12168 = vmatpush3.bf16.msra.mxu0 %v17454_v62  ;;  %v17462_v62 = vld [vmem:[#allocation51_spill] sm:$0xff]  ;;  %v17464_v63 = vld [vmem:[#allocation53_spill] sm:$0xff] }
 0x71b   :  { %12142 = vmatprep.subr.bf16.mxu1 %v17455_v7  ;;  %12169 = vmatprep.subr.bf16.mxu0 %v17287_v46  ;;  %v17463_v7 = vld [vmem:[#allocation52_spill] sm:$0xff] }
 0x71e   :  { %12144 = vmatpush1.bf16.msra.mxu1 %v17456_v31  ;;  %12171 = vmatpush3.bf16.msra.mxu0 %v17457_v4  ;;  %v17465_v4 = vld [vmem:[#allocation54_spill] sm:$0xff]  ;;  %v17467_v31 = vld [vmem:[#allocation56_spill] sm:$0xff] }
 0x71f   :  { %12146 = vmatprep.subr.bf16.mxu1 %v17458_v26  ;;  %12172 = vmatprep.subr.bf16.mxu0 %v17287_v46  ;;  %v17466_v26 = vld [vmem:[#allocation55_spill] sm:$0xff] }
 0x722   :  { %12148 = vmatpush1.bf16.msra.mxu1 %v17459_v17  ;;  %12174 = vmatpush3.bf16.msra.mxu0 %v17460_v49 }
 0x723   :  { %12150 = vmatprep.subr.bf16.mxu1 %v17461_v43  ;;  %12175 = vmatprep.subr.bf16.mxu0 %v17287_v46 }
 0x726   :  { %12152 = vmatpush1.bf16.msra.mxu1 %v17462_v62  ;;  %12177 = vmatpush3.bf16.msra.mxu0 %v17463_v7 }
 0x727   :  { %12154 = vmatprep.subr.bf16.mxu1 %v17464_v63  ;;  %12178 = vmatprep.subr.bf16.mxu0 %v17287_v46 }
 0x72a   :  { %12156 = vmatpush1.bf16.msra.mxu1 %v17465_v4  ;;  %12180 = vmatpush3.bf16.msra.mxu0 %v17466_v26 }
 0x72b   :  { %12182 = vmatprep.subr.bf16.mxu1 %v17467_v31  ;;  %12213 = vmatprep.subr.bf16.mxu0 %v17287_v46 }
 0x7a0   :  { %v2923_v49 = vpop.f32.mrb[48].mxu0 }
 0x7a1   :  { %v9974_v43 = vpop.f32.mrb[49].mxu0 }
 0x7a2   :  { %v15710_v43 = vld [vmem:[%s17075_s8] ss:$0 sm:$0xff] }
 0x7a3   :  { %17469 = vst [vmem:[#allocation76_spill] sm:$0xff] %v15710_v43 }
 0x7c0   :  { %v2993_v17 = vpop.f32.mrb[34].mxu1  ;;  %v3064_v44 = vpop.f32.mrb[50].mxu0 }
 0x7c1   :  { %v13989_v62 = vadd.f32 %v2993_v17, %v17468_v56  ;;  %v2995_v1 = vpop.f32.mrb[35].mxu1  ;;  %v10009_v7 = vpop.f32.mrb[51].mxu0  ;;  %v3082_v26 = vadd.f32 %v15710_v43, %v3064_v44 }
 0x7c2   :  { %v13990_v63 = vadd.f32 %v2995_v1, %v17351_v57  ;;  %v2924_v7 = vadd.f32 %v2923_v49, %v15201_v33 }
 0x7c3   :  { %v8544_v52 = vmul.f32 -1.442695, %v13989_v62 }
 0x7c4   :  { %v8545_v60 = vmul.f32 -1.442695, %v13990_v63 }
 0x7c5   :  { %14181 = vpow2.f32 %v8544_v52 }
 0x7c6   :  { %14183 = vpow2.f32 %v8545_v60 }
 0x7cf   :  { %v14182_v4 = vpop.eup %14181 }
 0x7d0   :  { %v3076_v28 = vadd.f32 1.0, %v14182_v4  ;;  %v14184_v31 = vpop.eup %14183 }
 0x7d1   :  { %v3077_v56 = vadd.f32 1.0, %v14184_v31 }
 0x7d2   :  { %14185 = vrcp.f32 %v3076_v28 }
 0x7dc   :  { %v14186_v17 = vpop.eup %14185 }
 0x7dd   :  { %v3083_v62 = vmul.f32 %v14186_v17, %v3082_v26 }
 0x7df   :  { %v3084_v52 = vadd.f32 %v3083_v62, %v2924_v7 }
 0x7e0   :  { %v3157_v1 = vpop.f32.mrb[10].mxu0  ;;  %v3228_v63 = vpop.f32.mrb[36].mxu1 }
 0x7e1   :  { %14187 = vtanh.f32 %v3084_v52  ;;  %v13959_v60 = vadd.f32 %v3157_v1, %v17312_v19  ;;  %v3159_v28 = vpop.f32.mrb[11].mxu0  ;;  %v10044_v4 = vpop.f32.mrb[37].mxu1  ;;  %v3250_v52 = vadd.f32 %v15462_v18, %v3228_v63  ;;  %v17474_v63 = vld [vmem:[#allocation29_spill] sm:$0xff] }
 0x7e2   :  { %14189 = vrcp.f32 %v3077_v56  ;;  %v13960_v36 = vadd.f32 %v3159_v28, %v17313_v34 }
 0x7e3   :  { %v8546_v57 = vmul.f32 -1.442695, %v13959_v60 }
 0x7e4   :  { %v8547_v49 = vmul.f32 -1.442695, %v13960_v36 }
 0x7e5   :  { %14191 = vpow2.f32 %v8546_v57  ;;  %v17471_v57 = vld [vmem:[#allocation61_spill] sm:$0xff] }
 0x7e6   :  { %14193 = vpow2.f32 %v8547_v49  ;;  %v17475_v49 = vld [vmem:[#allocation24_spill] sm:$0xff] }
 0x7eb   :  { %v14188_v48 = vpop.eup %14187 }
 0x7ec   :  { %v3086_v44 = vsub.f32 %v15587_v61, %v14188_v48  ;;  %v14190_v43 = vpop.eup %14189  ;;  %v17489_v61 = vld [vmem:[#allocation40_spill] sm:$0xff] }
 0x7ee   :  { %v3087_v26 = vmul.f32 %v14190_v43, %v3086_v44 }
 0x7ef   :  { %v14192_v17 = vpop.eup %14191 }
 0x7f0   :  { %v3244_v31 = vadd.f32 1.0, %v14192_v17  ;;  %v15717_v7 = vadd.f32 %v14188_v48, %v3087_v26  ;;  %v14194_v62 = vpop.eup %14193  ;;  %v17473_v48 = vld [vmem:[#allocation23_spill] sm:$0xff]  ;;  %v17476_v26 = vld [vmem:[#allocation25_spill] sm:$0xff] }
 0x7f1   :  { %v3245_v28 = vadd.f32 1.0, %v14194_v62  ;;  %v17478_v62 = vld [vmem:[#allocation26_spill] sm:$0xff] }
 0x7f2   :  { %17470 = vst [vmem:[#allocation77_spill] sm:$0xff] %v15717_v7  ;;  %14195 = vrcp.f32 %v3244_v31  ;;  %v17477_v31 = vld [vmem:[#allocation30_spill] sm:$0xff] }
 0x7fc   :  { %v14196_v56 = vpop.eup %14195 }
 0x7fd   :  { %v3251_v1 = vmul.f32 %v14196_v56, %v3250_v52  ;;  %v17479_v52 = vld [vmem:[#allocation27_spill] sm:$0xff] }
 0x7fe   :  { %v17480_v56 = vld [vmem:[#allocation31_spill] sm:$0xff] }
 0x7ff   :  { %v3252_v60 = vadd.f32 %v3251_v1, %v17471_v57  ;;  %v17481_v1 = vld [vmem:[#allocation32_spill] sm:$0xff]  ;;  %v17482_v57 = vld [vmem:[#allocation33_spill] sm:$0xff] }
 0x801   :  { %14197 = vtanh.f32 %v3252_v60  ;;  %v17483_v60 = vld [vmem:[#allocation34_spill] sm:$0xff] }
 0x802   :  { %14199 = vrcp.f32 %v3245_v28  ;;  %v17484_v28 = vld [vmem:[#allocation35_spill] sm:$0xff] }
 0x80b   :  { %v14198_v4 = vpop.eup %14197 }
 0x80c   :  { %v3254_v36 = vsub.f32 %v15592_v10, %v14198_v4  ;;  %v14200_v43 = vpop.eup %14199  ;;  %v17472_v10 = vld [vmem:[#allocation22_spill] sm:$0xff] }
 0x80e   :  { %v3255_v44 = vmul.f32 %v14200_v43, %v3254_v36  ;;  %v17486_v36 = vld [vmem:[#allocation37_spill] sm:$0xff]  ;;  %v17487_v43 = vld [vmem:[#allocation38_spill] sm:$0xff] }
 0x810   :  { %v15722_v17 = vadd.f32 %v14198_v4, %v3255_v44  ;;  %v17485_v4 = vld [vmem:[#allocation36_spill] sm:$0xff]  ;;  %v17488_v44 = vld [vmem:[#allocation39_spill] sm:$0xff] }
 0x812   :  { %3322 = vmatmul.mubr.f32.vlgmr.msra.gmra.mrb[38].mxu1 %v15722_v17  ;;  %10078 = vmatmul.mubr.f32.vlgmr.msra.gmra.mrb[52].mxu0 %v15722_v17 }
 0x813   :  { %12184 = vmatpush1.bf16.msra.mxu1 %v17316_v11  ;;  %12215 = vmatpush3.bf16.msra.mxu0 %v17317_v13 }
 0x814   :  { %12186 = vmatprep.subr.bf16.mxu1 %v17318_v37  ;;  %12216 = vmatprep.subr.bf16.mxu0 %v17287_v46 }
 0x815   :  { %3462 = vmatprep.mubr.f32.mxu1 %v17289_v42  ;;  %10112 = vmatprep.mubr.msk.f32.mxu0 %vm14594_vm1, %v17289_v42 }
 0x817   :  { %12188 = vmatpush1.bf16.msra.mxu1 %v17319_v51  ;;  %12218 = vmatpush3.bf16.msra.mxu0 %v17320_v6 }
 0x818   :  { %12190 = vmatprep.subr.bf16.mxu1 %v17321_v39  ;;  %12219 = vmatprep.subr.bf16.mxu0 %v17287_v46 }
 0x81b   :  { %12192 = vmatpush1.bf16.msra.mxu1 %v17322_v59  ;;  %12221 = vmatpush3.bf16.msra.mxu0 %v17323_v3 }
 0x81c   :  { %12194 = vmatprep.subr.bf16.mxu1 %v17324_v9  ;;  %12222 = vmatprep.subr.bf16.mxu0 %v17287_v46 }
 0x81f   :  { %12196 = vmatpush1.bf16.msra.mxu1 %v17325_v24  ;;  %12224 = vmatpush3.bf16.msra.mxu0 %v17326_v53 }
 0x820   :  { %12198 = vmatprep.subr.bf16.mxu1 %v17327_v32  ;;  %12225 = vmatprep.subr.bf16.mxu0 %v17287_v46 }
 0x823   :  { %12200 = vmatpush1.bf16.msra.mxu1 %v15067_v0  ;;  %12227 = vmatpush3.bf16.msra.mxu0 %v15069_v25 }
 0x824   :  { %12202 = vmatprep.subr.bf16.mxu1 %v17328_v41  ;;  %12228 = vmatprep.subr.bf16.mxu0 %v17287_v46 }
 0x827   :  { %12204 = vmatpush1.bf16.msra.mxu1 %v17329_v45  ;;  %12230 = vmatpush3.bf16.msra.mxu0 %v15079_v50 }
 0x828   :  { %12206 = vmatprep.subr.bf16.mxu1 %v15083_v27  ;;  %12231 = vmatprep.subr.bf16.mxu0 %v17287_v46 }
 0x82b   :  { %12208 = vmatpush1.bf16.msra.mxu1 %v15087_v20  ;;  %12233 = vmatpush3.bf16.msra.mxu0 %v15089_v2 }
 0x82c   :  { %12210 = vmatprep.subr.bf16.mxu1 %v15093_v35  ;;  %12234 = vmatprep.subr.bf16.mxu0 %v17287_v46 }
 0x82f   :  { %12212 = vmatpush1.bf16.msra.mxu1 %v15097_v55  ;;  %12236 = vmatpush3.bf16.msra.mxu0 %v15099_v8 }
 0x830   :  { %12238 = vmatprep.subr.bf16.mxu0 %v14748_v12  ;;  %12269 = vmatprep.subr.bf16.mxu1 %v17287_v46 }
 0x832   :  { %3463 = vmatmul.mubr.f32.vlgmr.msra.gmra.mrb[38].mxu1 %v15717_v7  ;;  %10113 = vmatmul.mubr.f32.vlgmr.msra.gmra.mrb[54].mxu0 %v15717_v7 }
 0x833   :  { %12240 = vmatpush1.bf16.msra.mxu0 %v14750_v14  ;;  %12271 = vmatpush3.bf16.msra.mxu1 %v14780_v47 }
 0x834   :  { %12242 = vmatprep.subr.bf16.mxu0 %v14753_v16  ;;  %12272 = vmatprep.subr.bf16.mxu1 %v17287_v46 }
 0x835   :  { %3626 = vmatprep.mubr.f32.mxu0 %v17289_v42  ;;  %10147 = vmatprep.mubr.msk.f32.mxu1 %vm14594_vm1, %v17289_v42 }
 0x837   :  { %12244 = vmatpush1.bf16.msra.mxu0 %v14758_v22  ;;  %12274 = vmatpush3.bf16.msra.mxu1 %v14793_v58 }
 0x838   :  { %12246 = vmatprep.subr.bf16.mxu0 %v14761_v23  ;;  %12275 = vmatprep.subr.bf16.mxu1 %v17287_v46 }
 0x83b   :  { %12248 = vmatpush1.bf16.msra.mxu0 %v14766_v29  ;;  %12277 = vmatpush3.bf16.msra.mxu1 %v14807_v5 }
 0x83c   :  { %12250 = vmatprep.subr.bf16.mxu0 %v14769_v30  ;;  %12278 = vmatprep.subr.bf16.mxu1 %v17287_v46 }
 0x83f   :  { %12252 = vmatpush1.bf16.msra.mxu0 %v14774_v38  ;;  %12280 = vmatpush3.bf16.msra.mxu1 %v14821_v15 }
 0x840   :  { %12254 = vmatprep.subr.bf16.mxu0 %v14777_v40  ;;  %12281 = vmatprep.subr.bf16.mxu1 %v17287_v46 }
 0x843   :  { %12256 = vmatpush1.bf16.msra.mxu0 %v17432_v54  ;;  %12283 = vmatpush3.bf16.msra.mxu1 %v17433_v21 }
 0x844   :  { %12258 = vmatprep.subr.bf16.mxu0 %v17472_v10  ;;  %12284 = vmatprep.subr.bf16.mxu1 %v17287_v46 }
 0x847   :  { %12260 = vmatpush1.bf16.msra.mxu0 %v17473_v48  ;;  %12286 = vmatpush3.bf16.msra.mxu1 %v17474_v63 }
 0x848   :  { %12262 = vmatprep.subr.bf16.mxu0 %v17475_v49  ;;  %12287 = vmatprep.subr.bf16.mxu1 %v17287_v46 }
 0x84b   :  { %12264 = vmatpush1.bf16.msra.mxu0 %v17476_v26  ;;  %12289 = vmatpush3.bf16.msra.mxu1 %v17477_v31 }
 0x84c   :  { %12266 = vmatprep.subr.bf16.mxu0 %v17478_v62  ;;  %12290 = vmatprep.subr.bf16.mxu1 %v17287_v46 }
 0x84f   :  { %12268 = vmatpush1.bf16.msra.mxu0 %v17479_v52  ;;  %12292 = vmatpush3.bf16.msra.mxu1 %v17480_v56  ;;  %v17506_v52 = vld [vmem:[#allocation57_spill] sm:$0xff] }
 0x850   :  { %12294 = vmatprep.subr.bf16.mxu1 %v17481_v1  ;;  %12325 = vmatprep.subr.bf16.mxu0 %v17287_v46  ;;  %v17493_v1 = vld [vmem:[#allocation44_spill] sm:$0xff] }
 0x852   :  { %3627 = vmatmul.mubr.f32.vlgmr.msra.gmra.mrb[12].mxu0 %v15722_v17  ;;  %10148 = vmatmul.mubr.f32.vlgmr.msra.gmra.mrb[40].mxu1 %v15722_v17 }
 0x853   :  { %12296 = vmatpush1.bf16.msra.mxu1 %v17482_v57  ;;  %12327 = vmatpush3.bf16.msra.mxu0 %v17483_v60  ;;  %v17491_v60 = vld [vmem:[#allocation42_spill] sm:$0xff]  ;;  %v17492_v57 = vld [vmem:[#allocation43_spill] sm:$0xff] }
 0x854   :  { %12298 = vmatprep.subr.bf16.mxu1 %v17484_v28  ;;  %12328 = vmatprep.subr.bf16.mxu0 %v17287_v46  ;;  %v17490_v28 = vld [vmem:[#allocation41_spill] sm:$0xff] }
 0x855   :  { %3792 = vmatprep.mubr.f32.mxu1 %v17289_v42  ;;  %10182 = vmatprep.mubr.msk.f32.mxu0 %vm14594_vm1, %v17289_v42 }
 0x857   :  { %12300 = vmatpush1.bf16.msra.mxu1 %v17485_v4  ;;  %12330 = vmatpush3.bf16.msra.mxu0 %v17486_v36  ;;  %v17494_v36 = vld [vmem:[#allocation45_spill] sm:$0xff]  ;;  %v17496_v4 = vld [vmem:[#allocation47_spill] sm:$0xff] }
 0x858   :  { %12302 = vmatprep.subr.bf16.mxu1 %v17487_v43  ;;  %12331 = vmatprep.subr.bf16.mxu0 %v17287_v46  ;;  %v17495_v43 = vld [vmem:[#allocation46_spill] sm:$0xff] }
 0x85b   :  { %12304 = vmatpush1.bf16.msra.mxu1 %v17488_v44  ;;  %12333 = vmatpush3.bf16.msra.mxu0 %v17489_v61  ;;  %v17497_v61 = vld [vmem:[#allocation48_spill] sm:$0xff]  ;;  %v17499_v44 = vld [vmem:[#allocation50_spill] sm:$0xff] }
 0x85c   :  { %12306 = vmatprep.subr.bf16.mxu1 %v17490_v28  ;;  %12334 = vmatprep.subr.bf16.mxu0 %v17287_v46  ;;  %v17498_v28 = vld [vmem:[#allocation49_spill] sm:$0xff] }
 0x85f   :  { %12308 = vmatpush1.bf16.msra.mxu1 %v17491_v60  ;;  %12336 = vmatpush3.bf16.msra.mxu0 %v17492_v57  ;;  %v17500_v57 = vld [vmem:[#allocation51_spill] sm:$0xff]  ;;  %v17502_v60 = vld [vmem:[#allocation53_spill] sm:$0xff] }
 0x860   :  { %12310 = vmatprep.subr.bf16.mxu1 %v17493_v1  ;;  %12337 = vmatprep.subr.bf16.mxu0 %v17287_v46  ;;  %v17501_v1 = vld [vmem:[#allocation52_spill] sm:$0xff] }
 0x863   :  { %12312 = vmatpush1.bf16.msra.mxu1 %v17494_v36  ;;  %12339 = vmatpush3.bf16.msra.mxu0 %v17495_v43  ;;  %v17503_v43 = vld [vmem:[#allocation54_spill] sm:$0xff]  ;;  %v17505_v36 = vld [vmem:[#allocation56_spill] sm:$0xff] }
 0x864   :  { %12314 = vmatprep.subr.bf16.mxu1 %v17496_v4  ;;  %12340 = vmatprep.subr.bf16.mxu0 %v17287_v46  ;;  %v17504_v4 = vld [vmem:[#allocation55_spill] sm:$0xff] }
 0x867   :  { %12316 = vmatpush1.bf16.msra.mxu1 %v17497_v61  ;;  %12342 = vmatpush3.bf16.msra.mxu0 %v17498_v28 }
 0x868   :  { %12318 = vmatprep.subr.bf16.mxu1 %v17499_v44  ;;  %12343 = vmatprep.subr.bf16.mxu0 %v17287_v46 }
 0x86b   :  { %12320 = vmatpush1.bf16.msra.mxu1 %v17500_v57  ;;  %12345 = vmatpush3.bf16.msra.mxu0 %v17501_v1 }
 0x86c   :  { %12322 = vmatprep.subr.bf16.mxu1 %v17502_v60  ;;  %12346 = vmatprep.subr.bf16.mxu0 %v17287_v46  ;;  %v17507_v60 = vld [vmem:[#allocation89_spill] sm:$0xff] }
 0x86f   :  { %12324 = vmatpush1.bf16.msra.mxu1 %v17503_v43  ;;  %12348 = vmatpush3.bf16.msra.mxu0 %v17504_v4  ;;  %v17508_v4 = vld [vmem:[#allocation76_spill] sm:$0xff] }
 0x870   :  { %12350 = vmatprep.subr.bf16.mxu1 %v17505_v36  ;;  %12381 = vmatprep.subr.bf16.mxu0 %v17287_v46 }
 0x8e5   :  { %v3394_v28 = vpop.f32.mrb[52].mxu0 }
 0x8e6   :  { %v10079_v44 = vpop.f32.mrb[53].mxu0 }
 0x8e7   :  { %v3395_v44 = vadd.f32 %v3394_v28, %v15201_v33 }
 0x905   :  { %v3464_v61 = vpop.f32.mrb[38].mxu1  ;;  %v3535_v56 = vpop.f32.mrb[54].mxu0 }
 0x906   :  { %v13991_v57 = vadd.f32 %v3464_v61, %v17506_v52  ;;  %v3466_v62 = vpop.f32.mrb[39].mxu1  ;;  %v10114_v1 = vpop.f32.mrb[55].mxu0  ;;  %v3553_v48 = vadd.f32 %v17508_v4, %v3535_v56 }
 0x907   :  { %v13992_v26 = vadd.f32 %v3466_v62, %v17507_v60 }
 0x908   :  { %v8548_v31 = vmul.f32 -1.442695, %v13991_v57 }
 0x909   :  { %v8549_v49 = vmul.f32 -1.442695, %v13992_v26 }
 0x90a   :  { %14201 = vpow2.f32 %v8548_v31 }
 0x90b   :  { %14203 = vpow2.f32 %v8549_v49 }
 0x914   :  { %v14202_v43 = vpop.eup %14201 }
 0x915   :  { %v3547_v63 = vadd.f32 1.0, %v14202_v43  ;;  %v14204_v36 = vpop.eup %14203 }
 0x916   :  { %v3548_v61 = vadd.f32 1.0, %v14204_v36 }
 0x917   :  { %14205 = vrcp.f32 %v3547_v63 }
 0x921   :  { %v14206_v10 = vpop.eup %14205 }
 0x922   :  { %v3554_v21 = vmul.f32 %v14206_v10, %v3553_v48 }
 0x924   :  { %v3555_v54 = vadd.f32 %v3554_v21, %v3395_v44 }
 0x925   :  { %v3628_v52 = vpop.f32.mrb[12].mxu0  ;;  %v3699_v1 = vpop.f32.mrb[40].mxu1 }
 0x926   :  { %14207 = vtanh.f32 %v3555_v54  ;;  %v13961_v31 = vadd.f32 %v3628_v52, %v17312_v19  ;;  %v3630_v62 = vpop.f32.mrb[13].mxu0  ;;  %v10149_v26 = vpop.f32.mrb[41].mxu1  ;;  %v3721_v52 = vadd.f32 %v15462_v18, %v3699_v1  ;;  %v17511_v18 = vld [vmem:[#allocation21_spill] sm:$0xff]  ;;  %v17513_v1 = vld [vmem:[#allocation22_spill] sm:$0xff] }
 0x927   :  { %14209 = vrcp.f32 %v3548_v61  ;;  %v13962_v63 = vadd.f32 %v3630_v62, %v17313_v34 }
 0x928   :  { %v8550_v57 = vmul.f32 -1.442695, %v13961_v31  ;;  %v17510_v31 = vld [vmem:[#allocation64_spill] sm:$0xff] }
 0x929   :  { %v8551_v28 = vmul.f32 -1.442695, %v13962_v63 }
 0x92a   :  { %14211 = vpow2.f32 %v8550_v57 }
 0x92b   :  { %14213 = vpow2.f32 %v8551_v28  ;;  %v17515_v28 = vld [vmem:[#allocation29_spill] sm:$0xff] }
 0x930   :  { %v14208_v49 = vpop.eup %14207 }
 0x931   :  { %v3557_v56 = vsub.f32 %v15717_v7, %v14208_v49  ;;  %v14210_v43 = vpop.eup %14209  ;;  %v17529_v7 = vld [vmem:[#allocation39_spill] sm:$0xff] }
 0x933   :  { %v3558_v10 = vmul.f32 %v14210_v43, %v3557_v56 }
 0x934   :  { %v14212_v21 = vpop.eup %14211 }
 0x935   :  { %v3715_v48 = vadd.f32 1.0, %v14212_v21  ;;  %v15842_v36 = vadd.f32 %v14208_v49, %v3558_v10  ;;  %v14214_v54 = vpop.eup %14213  ;;  %v17514_v49 = vld [vmem:[#allocation23_spill] sm:$0xff]  ;;  %v17516_v10 = vld [vmem:[#allocation24_spill] sm:$0xff] }
 0x936   :  { %v3716_v62 = vadd.f32 1.0, %v14214_v54  ;;  %v17518_v54 = vld [vmem:[#allocation30_spill] sm:$0xff] }
 0x937   :  { %17509 = vst [vmem:[#allocation78_spill] sm:$0xff] %v15842_v36  ;;  %14215 = vrcp.f32 %v3715_v48  ;;  %v17517_v48 = vld [vmem:[#allocation25_spill] sm:$0xff] }
 0x941   :  { %v14216_v44 = vpop.eup %14215 }
 0x942   :  { %v3722_v61 = vmul.f32 %v14216_v44, %v3721_v52  ;;  %v17519_v52 = vld [vmem:[#allocation26_spill] sm:$0xff]  ;;  %v17520_v44 = vld [vmem:[#allocation27_spill] sm:$0xff] }
 0x944   :  { %v3723_v26 = vadd.f32 %v3722_v61, %v17510_v31  ;;  %v17521_v61 = vld [vmem:[#allocation31_spill] sm:$0xff]  ;;  %v17522_v31 = vld [vmem:[#allocation32_spill] sm:$0xff] }
 0x946   :  { %14217 = vtanh.f32 %v3723_v26  ;;  %v17523_v26 = vld [vmem:[#allocation33_spill] sm:$0xff] }
 0x947   :  { %14219 = vrcp.f32 %v3716_v62  ;;  %v17524_v62 = vld [vmem:[#allocation34_spill] sm:$0xff] }
 0x950   :  { %v14218_v57 = vpop.eup %14217 }
 0x951   :  { %v3725_v63 = vsub.f32 %v15722_v17, %v14218_v57  ;;  %v14220_v56 = vpop.eup %14219  ;;  %v17512_v17 = vld [vmem:[#allocation28_spill] sm:$0xff] }
 0x953   :  { %v3726_v43 = vmul.f32 %v14220_v56, %v3725_v63  ;;  %v17526_v63 = vld [vmem:[#allocation36_spill] sm:$0xff]  ;;  %v17527_v56 = vld [vmem:[#allocation37_spill] sm:$0xff] }
 0x955   :  { %v15847_v21 = vadd.f32 %v14218_v57, %v3726_v43  ;;  %v17525_v57 = vld [vmem:[#allocation35_spill] sm:$0xff]  ;;  %v17528_v43 = vld [vmem:[#allocation38_spill] sm:$0xff] }
 0x957   :  { %3793 = vmatmul.mubr.f32.vlgmr.msra.gmra.mrb[42].mxu1 %v15847_v21  ;;  %10183 = vmatmul.mubr.f32.vlgmr.msra.gmra.mrb[56].mxu0 %v15847_v21 }
 0x958   :  { %12352 = vmatpush1.bf16.msra.mxu1 %v17316_v11  ;;  %12383 = vmatpush3.bf16.msra.mxu0 %v17317_v13 }
 0x959   :  { %12354 = vmatprep.subr.bf16.mxu1 %v17318_v37  ;;  %12384 = vmatprep.subr.bf16.mxu0 %v17287_v46 }
 0x95a   :  { %3933 = vmatprep.mubr.f32.mxu1 %v17289_v42  ;;  %10217 = vmatprep.mubr.msk.f32.mxu0 %vm14594_vm1, %v17289_v42 }
 0x95c   :  { %12356 = vmatpush1.bf16.msra.mxu1 %v17319_v51  ;;  %12386 = vmatpush3.bf16.msra.mxu0 %v17320_v6 }
 0x95d   :  { %12358 = vmatprep.subr.bf16.mxu1 %v17321_v39  ;;  %12387 = vmatprep.subr.bf16.mxu0 %v17287_v46 }
 0x960   :  { %12360 = vmatpush1.bf16.msra.mxu1 %v17322_v59  ;;  %12389 = vmatpush3.bf16.msra.mxu0 %v17323_v3 }
 0x961   :  { %12362 = vmatprep.subr.bf16.mxu1 %v17324_v9  ;;  %12390 = vmatprep.subr.bf16.mxu0 %v17287_v46 }
 0x964   :  { %12364 = vmatpush1.bf16.msra.mxu1 %v17325_v24  ;;  %12392 = vmatpush3.bf16.msra.mxu0 %v17326_v53 }
 0x965   :  { %12366 = vmatprep.subr.bf16.mxu1 %v17327_v32  ;;  %12393 = vmatprep.subr.bf16.mxu0 %v17287_v46 }
 0x968   :  { %12368 = vmatpush1.bf16.msra.mxu1 %v15067_v0  ;;  %12395 = vmatpush3.bf16.msra.mxu0 %v15069_v25 }
 0x969   :  { %12370 = vmatprep.subr.bf16.mxu1 %v17328_v41  ;;  %12396 = vmatprep.subr.bf16.mxu0 %v17287_v46 }
 0x96c   :  { %12372 = vmatpush1.bf16.msra.mxu1 %v17329_v45  ;;  %12398 = vmatpush3.bf16.msra.mxu0 %v15079_v50 }
 0x96d   :  { %12374 = vmatprep.subr.bf16.mxu1 %v15083_v27  ;;  %12399 = vmatprep.subr.bf16.mxu0 %v17287_v46 }
 0x970   :  { %12376 = vmatpush1.bf16.msra.mxu1 %v15087_v20  ;;  %12401 = vmatpush3.bf16.msra.mxu0 %v15089_v2 }
 0x971   :  { %12378 = vmatprep.subr.bf16.mxu1 %v15093_v35  ;;  %12402 = vmatprep.subr.bf16.mxu0 %v17287_v46 }
 0x974   :  { %12380 = vmatpush1.bf16.msra.mxu1 %v15097_v55  ;;  %12404 = vmatpush3.bf16.msra.mxu0 %v15099_v8 }
 0x975   :  { %12406 = vmatprep.subr.bf16.mxu0 %v14748_v12  ;;  %12437 = vmatprep.subr.bf16.mxu1 %v17287_v46 }
 0x977   :  { %3934 = vmatmul.mubr.f32.vlgmr.msra.gmra.mrb[42].mxu1 %v15842_v36  ;;  %10218 = vmatmul.mubr.f32.vlgmr.msra.gmra.mrb[58].mxu0 %v15842_v36 }
 0x978   :  { %12408 = vmatpush1.bf16.msra.mxu0 %v14750_v14  ;;  %12439 = vmatpush3.bf16.msra.mxu1 %v14780_v47 }
 0x979   :  { %12410 = vmatprep.subr.bf16.mxu0 %v14753_v16  ;;  %12440 = vmatprep.subr.bf16.mxu1 %v17287_v46 }
 0x97a   :  { %4097 = vmatprep.mubr.f32.mxu0 %v17289_v42  ;;  %10252 = vmatprep.mubr.msk.f32.mxu1 %vm14594_vm1, %v17289_v42 }
 0x97c   :  { %12412 = vmatpush1.bf16.msra.mxu0 %v14758_v22  ;;  %12442 = vmatpush3.bf16.msra.mxu1 %v14793_v58 }
 0x97d   :  { %12414 = vmatprep.subr.bf16.mxu0 %v14761_v23  ;;  %12443 = vmatprep.subr.bf16.mxu1 %v17287_v46 }
 0x980   :  { %12416 = vmatpush1.bf16.msra.mxu0 %v14766_v29  ;;  %12445 = vmatpush3.bf16.msra.mxu1 %v14807_v5 }
 0x981   :  { %12418 = vmatprep.subr.bf16.mxu0 %v14769_v30  ;;  %12446 = vmatprep.subr.bf16.mxu1 %v17287_v46 }
 0x984   :  { %12420 = vmatpush1.bf16.msra.mxu0 %v14774_v38  ;;  %12448 = vmatpush3.bf16.msra.mxu1 %v14821_v15 }
 0x985   :  { %12422 = vmatprep.subr.bf16.mxu0 %v14777_v40  ;;  %12449 = vmatprep.subr.bf16.mxu1 %v17287_v46 }
 0x988   :  { %12424 = vmatpush1.bf16.msra.mxu0 %v17511_v18  ;;  %12451 = vmatpush3.bf16.msra.mxu1 %v17512_v17 }
 0x989   :  { %12426 = vmatprep.subr.bf16.mxu0 %v17513_v1  ;;  %12452 = vmatprep.subr.bf16.mxu1 %v17287_v46 }
 0x98c   :  { %12428 = vmatpush1.bf16.msra.mxu0 %v17514_v49  ;;  %12454 = vmatpush3.bf16.msra.mxu1 %v17515_v28 }
 0x98d   :  { %12430 = vmatprep.subr.bf16.mxu0 %v17516_v10  ;;  %12455 = vmatprep.subr.bf16.mxu1 %v17287_v46 }
 0x990   :  { %12432 = vmatpush1.bf16.msra.mxu0 %v17517_v48  ;;  %12457 = vmatpush3.bf16.msra.mxu1 %v17518_v54 }
 0x991   :  { %12434 = vmatprep.subr.bf16.mxu0 %v17519_v52  ;;  %12458 = vmatprep.subr.bf16.mxu1 %v17287_v46  ;;  %v17547_v52 = vld [vmem:[#allocation57_spill] sm:$0xff] }
 0x994   :  { %12436 = vmatpush1.bf16.msra.mxu0 %v17520_v44  ;;  %12460 = vmatpush3.bf16.msra.mxu1 %v17521_v61  ;;  %v17534_v61 = vld [vmem:[#allocation44_spill] sm:$0xff] }
 0x995   :  { %12462 = vmatprep.subr.bf16.mxu1 %v17522_v31  ;;  %12493 = vmatprep.subr.bf16.mxu0 %v17287_v46  ;;  %v17533_v31 = vld [vmem:[#allocation43_spill] sm:$0xff] }
 0x997   :  { %4098 = vmatmul.mubr.f32.vlgmr.msra.gmra.mrb[14].mxu0 %v15847_v21  ;;  %10253 = vmatmul.mubr.f32.vlgmr.msra.gmra.mrb[44].mxu1 %v15847_v21 }
 0x998   :  { %12464 = vmatpush1.bf16.msra.mxu1 %v17523_v26  ;;  %12495 = vmatpush3.bf16.msra.mxu0 %v17524_v62  ;;  %v17530_v62 = vld [vmem:[#allocation40_spill] sm:$0xff]  ;;  %v17532_v26 = vld [vmem:[#allocation42_spill] sm:$0xff] }
 0x999   :  { %12466 = vmatprep.subr.bf16.mxu1 %v17525_v57  ;;  %12496 = vmatprep.subr.bf16.mxu0 %v17287_v46  ;;  %v17531_v57 = vld [vmem:[#allocation41_spill] sm:$0xff] }
 0x99a   :  { %4263 = vmatprep.mubr.f32.mxu1 %v17289_v42  ;;  %10287 = vmatprep.mubr.msk.f32.mxu0 %vm14594_vm1, %v17289_v42 }
 0x99c   :  { %12468 = vmatpush1.bf16.msra.mxu1 %v17526_v63  ;;  %12498 = vmatpush3.bf16.msra.mxu0 %v17527_v56  ;;  %v17535_v56 = vld [vmem:[#allocation45_spill] sm:$0xff]  ;;  %v17537_v63 = vld [vmem:[#allocation47_spill] sm:$0xff] }
 0x99d   :  { %12470 = vmatprep.subr.bf16.mxu1 %v17528_v43  ;;  %12499 = vmatprep.subr.bf16.mxu0 %v17287_v46  ;;  %v17536_v43 = vld [vmem:[#allocation46_spill] sm:$0xff] }
 0x9a0   :  { %12472 = vmatpush1.bf16.msra.mxu1 %v17529_v7  ;;  %12501 = vmatpush3.bf16.msra.mxu0 %v17530_v62  ;;  %v17538_v62 = vld [vmem:[#allocation48_spill] sm:$0xff]  ;;  %v17540_v7 = vld [vmem:[#allocation50_spill] sm:$0xff] }
 0x9a1   :  { %12474 = vmatprep.subr.bf16.mxu1 %v17531_v57  ;;  %12502 = vmatprep.subr.bf16.mxu0 %v17287_v46  ;;  %v17539_v57 = vld [vmem:[#allocation49_spill] sm:$0xff] }
 0x9a4   :  { %12476 = vmatpush1.bf16.msra.mxu1 %v17532_v26  ;;  %12504 = vmatpush3.bf16.msra.mxu0 %v17533_v31  ;;  %v17541_v31 = vld [vmem:[#allocation51_spill] sm:$0xff]  ;;  %v17543_v26 = vld [vmem:[#allocation53_spill] sm:$0xff] }
 0x9a5   :  { %12478 = vmatprep.subr.bf16.mxu1 %v17534_v61  ;;  %12505 = vmatprep.subr.bf16.mxu0 %v17287_v46  ;;  %v17542_v61 = vld [vmem:[#allocation52_spill] sm:$0xff] }
 0x9a8   :  { %12480 = vmatpush1.bf16.msra.mxu1 %v17535_v56  ;;  %12507 = vmatpush3.bf16.msra.mxu0 %v17536_v43  ;;  %v17544_v43 = vld [vmem:[#allocation54_spill] sm:$0xff]  ;;  %v17546_v56 = vld [vmem:[#allocation56_spill] sm:$0xff] }
 0x9a9   :  { %12482 = vmatprep.subr.bf16.mxu1 %v17537_v63  ;;  %12508 = vmatprep.subr.bf16.mxu0 %v17287_v46  ;;  %v17545_v63 = vld [vmem:[#allocation55_spill] sm:$0xff] }
 0x9ac   :  { %12484 = vmatpush1.bf16.msra.mxu1 %v17538_v62  ;;  %12510 = vmatpush3.bf16.msra.mxu0 %v17539_v57 }
 0x9ad   :  { %12486 = vmatprep.subr.bf16.mxu1 %v17540_v7  ;;  %12511 = vmatprep.subr.bf16.mxu0 %v17287_v46 }
 0x9b0   :  { %12488 = vmatpush1.bf16.msra.mxu1 %v17541_v31  ;;  %12513 = vmatpush3.bf16.msra.mxu0 %v17542_v61 }
 0x9b1   :  { %12490 = vmatprep.subr.bf16.mxu1 %v17543_v26  ;;  %12514 = vmatprep.subr.bf16.mxu0 %v17287_v46 }
 0x9b4   :  { %12492 = vmatpush1.bf16.msra.mxu1 %v17544_v43  ;;  %12516 = vmatpush3.bf16.msra.mxu0 %v17545_v63 }
 0x9b5   :  { %12518 = vmatprep.subr.bf16.mxu1 %v17546_v56  ;;  %12549 = vmatprep.subr.bf16.mxu0 %v17287_v46 }
 0xa2a   :  { %v3865_v57 = vpop.f32.mrb[56].mxu0 }
 0xa2b   :  { %v10184_v7 = vpop.f32.mrb[57].mxu0 }
 0xa2c   :  { %v3866_v7 = vadd.f32 %v3865_v57, %v15201_v33 }
 0xa4a   :  { %v3935_v62 = vpop.f32.mrb[42].mxu1  ;;  %v4006_v44 = vpop.f32.mrb[58].mxu0 }
 0xa4b   :  { %v13993_v31 = vadd.f32 %v3935_v62, %v17547_v52  ;;  %v3937_v54 = vpop.f32.mrb[43].mxu1  ;;  %v10219_v61 = vpop.f32.mrb[59].mxu0  ;;  %v4024_v63 = vadd.f32 %v17508_v4, %v4006_v44 }
 0xa4c   :  { %v13994_v26 = vadd.f32 %v3937_v54, %v17507_v60 }
 0xa4d   :  { %v8552_v48 = vmul.f32 -1.442695, %v13993_v31 }
 0xa4e   :  { %v8553_v10 = vmul.f32 -1.442695, %v13994_v26 }
 0xa4f   :  { %14221 = vpow2.f32 %v8552_v48 }
 0xa50   :  { %14223 = vpow2.f32 %v8553_v10 }
 0xa59   :  { %v14222_v43 = vpop.eup %14221 }
 0xa5a   :  { %v4018_v28 = vadd.f32 1.0, %v14222_v43  ;;  %v14224_v56 = vpop.eup %14223 }
 0xa5b   :  { %v4019_v62 = vadd.f32 1.0, %v14224_v56 }
 0xa5c   :  { %14225 = vrcp.f32 %v4018_v28 }
 0xa66   :  { %v14226_v49 = vpop.eup %14225 }
 0xa67   :  { %v4025_v1 = vmul.f32 %v14226_v49, %v4024_v63 }
 0xa69   :  { %v4026_v17 = vadd.f32 %v4025_v1, %v3866_v7 }
 0xa6a   :  { %v4099_v52 = vpop.f32.mrb[14].mxu0  ;;  %v4170_v61 = vpop.f32.mrb[44].mxu1 }
 0xa6b   :  { %14227 = vtanh.f32 %v4026_v17  ;;  %v13963_v48 = vadd.f32 %v4099_v52, %v17312_v19  ;;  %v4101_v54 = vpop.f32.mrb[15].mxu0  ;;  %v10254_v31 = vpop.f32.mrb[45].mxu1  ;;  %v15972_v52 = vld [vmem:[%s17071_s4] ss:$0 sm:$0xff] }
 0xa6c   :  { %14229 = vrcp.f32 %v4019_v62  ;;  %v13964_v28 = vadd.f32 %v4101_v54, %v17313_v34  ;;  %v4192_v7 = vadd.f32 %v15972_v52, %v4170_v61  ;;  %v17549_v54 = vld [vmem:[#allocation63_spill] sm:$0xff]  ;;  %v17551_v61 = vld [vmem:[#allocation22_spill] sm:$0xff] }
 0xa6d   :  { %v8554_v26 = vmul.f32 -1.442695, %v13963_v48 }
 0xa6e   :  { %v8555_v57 = vmul.f32 -1.442695, %v13964_v28 }
 0xa6f   :  { %14231 = vpow2.f32 %v8554_v26 }
 0xa70   :  { %14233 = vpow2.f32 %v8555_v57 }
 0xa75   :  { %v14228_v10 = vpop.eup %14227 }
 0xa76   :  { %v4028_v44 = vsub.f32 %v15842_v36, %v14228_v10  ;;  %v14230_v43 = vpop.eup %14229  ;;  %v17566_v36 = vld [vmem:[#allocation38_spill] sm:$0xff] }
 0xa78   :  { %v4029_v49 = vmul.f32 %v14230_v43, %v4028_v44 }
 0xa79   :  { %v14232_v1 = vpop.eup %14231 }
 0xa7a   :  { %v4186_v63 = vadd.f32 1.0, %v14232_v1  ;;  %v15967_v56 = vadd.f32 %v14228_v10, %v4029_v49  ;;  %v14234_v17 = vpop.eup %14233  ;;  %v17552_v49 = vld [vmem:[#allocation23_spill] sm:$0xff]  ;;  %v17553_v1 = vld [vmem:[#allocation29_spill] sm:$0xff] }
 0xa7b   :  { %v4187_v26 = vadd.f32 1.0, %v14234_v17  ;;  %v17555_v17 = vld [vmem:[#allocation25_spill] sm:$0xff] }
 0xa7c   :  { %17548 = vst [vmem:[#allocation79_spill] sm:$0xff] %v15967_v56  ;;  %14235 = vrcp.f32 %v4186_v63  ;;  %v17554_v63 = vld [vmem:[#allocation24_spill] sm:$0xff] }
 0xa86   :  { %v14236_v62 = vpop.eup %14235 }
 0xa87   :  { %v4193_v48 = vmul.f32 %v14236_v62, %v4192_v7  ;;  %v17556_v7 = vld [vmem:[#allocation30_spill] sm:$0xff] }
 0xa88   :  { %v17557_v62 = vld [vmem:[#allocation26_spill] sm:$0xff] }
 0xa89   :  { %v4194_v31 = vadd.f32 %v4193_v48, %v17549_v54  ;;  %v17558_v48 = vld [vmem:[#allocation27_spill] sm:$0xff] }
 0xa8a   :  { %v17559_v54 = vld [vmem:[#allocation31_spill] sm:$0xff] }
 0xa8b   :  { %14237 = vtanh.f32 %v4194_v31  ;;  %v17560_v31 = vld [vmem:[#allocation32_spill] sm:$0xff] }
 0xa8c   :  { %14239 = vrcp.f32 %v4187_v26  ;;  %v17561_v26 = vld [vmem:[#allocation33_spill] sm:$0xff] }
 0xa95   :  { %v14238_v28 = vpop.eup %14237 }
 0xa96   :  { %v4196_v10 = vsub.f32 %v15847_v21, %v14238_v28  ;;  %v14240_v44 = vpop.eup %14239  ;;  %v17550_v21 = vld [vmem:[#allocation28_spill] sm:$0xff] }
 0xa98   :  { %v4197_v43 = vmul.f32 %v14240_v44, %v4196_v10  ;;  %v17563_v10 = vld [vmem:[#allocation35_spill] sm:$0xff]  ;;  %v17564_v44 = vld [vmem:[#allocation36_spill] sm:$0xff] }
 0xa9a   :  { %v15977_v57 = vadd.f32 %v14238_v28, %v4197_v43  ;;  %v17562_v28 = vld [vmem:[#allocation34_spill] sm:$0xff]  ;;  %v17565_v43 = vld [vmem:[#allocation37_spill] sm:$0xff] }
 0xa9c   :  { %4264 = vmatmul.mubr.f32.vlgmr.msra.gmra.mrb[46].mxu1 %v15977_v57  ;;  %10288 = vmatmul.mubr.f32.vlgmr.msra.gmra.mrb[60].mxu0 %v15977_v57 }
 0xa9d   :  { %12520 = vmatpush1.bf16.msra.mxu1 %v17316_v11  ;;  %12551 = vmatpush3.bf16.msra.mxu0 %v17317_v13 }
 0xa9e   :  { %12522 = vmatprep.subr.bf16.mxu1 %v17318_v37  ;;  %12552 = vmatprep.subr.bf16.mxu0 %v17287_v46 }
 0xa9f   :  { %4404 = vmatprep.mubr.f32.mxu1 %v17289_v42  ;;  %10322 = vmatprep.mubr.msk.f32.mxu0 %vm14594_vm1, %v17289_v42 }
 0xaa1   :  { %12524 = vmatpush1.bf16.msra.mxu1 %v17319_v51  ;;  %12554 = vmatpush3.bf16.msra.mxu0 %v17320_v6 }
 0xaa2   :  { %12526 = vmatprep.subr.bf16.mxu1 %v17321_v39  ;;  %12555 = vmatprep.subr.bf16.mxu0 %v17287_v46 }
 0xaa5   :  { %12528 = vmatpush1.bf16.msra.mxu1 %v17322_v59  ;;  %12557 = vmatpush3.bf16.msra.mxu0 %v17323_v3 }
 0xaa6   :  { %12530 = vmatprep.subr.bf16.mxu1 %v17324_v9  ;;  %12558 = vmatprep.subr.bf16.mxu0 %v17287_v46 }
 0xaa9   :  { %12532 = vmatpush1.bf16.msra.mxu1 %v17325_v24  ;;  %12560 = vmatpush3.bf16.msra.mxu0 %v17326_v53 }
 0xaaa   :  { %12534 = vmatprep.subr.bf16.mxu1 %v17327_v32  ;;  %12561 = vmatprep.subr.bf16.mxu0 %v17287_v46 }
 0xaad   :  { %12536 = vmatpush1.bf16.msra.mxu1 %v15067_v0  ;;  %12563 = vmatpush3.bf16.msra.mxu0 %v15069_v25 }
 0xaae   :  { %12538 = vmatprep.subr.bf16.mxu1 %v17328_v41  ;;  %12564 = vmatprep.subr.bf16.mxu0 %v17287_v46 }
 0xab1   :  { %12540 = vmatpush1.bf16.msra.mxu1 %v17329_v45  ;;  %12566 = vmatpush3.bf16.msra.mxu0 %v15079_v50 }
 0xab2   :  { %12542 = vmatprep.subr.bf16.mxu1 %v15083_v27  ;;  %12567 = vmatprep.subr.bf16.mxu0 %v17287_v46 }
 0xab5   :  { %12544 = vmatpush1.bf16.msra.mxu1 %v15087_v20  ;;  %12569 = vmatpush3.bf16.msra.mxu0 %v15089_v2 }
 0xab6   :  { %12546 = vmatprep.subr.bf16.mxu1 %v15093_v35  ;;  %12570 = vmatprep.subr.bf16.mxu0 %v17287_v46 }
 0xab9   :  { %12548 = vmatpush1.bf16.msra.mxu1 %v15097_v55  ;;  %12572 = vmatpush3.bf16.msra.mxu0 %v15099_v8 }
 0xaba   :  { %12574 = vmatprep.subr.bf16.mxu0 %v14748_v12  ;;  %12605 = vmatprep.subr.bf16.mxu1 %v17287_v46 }
 0xabc   :  { %4405 = vmatmul.mubr.f32.vlgmr.msra.gmra.mrb[46].mxu1 %v15967_v56  ;;  %10323 = vmatmul.mubr.f32.vlgmr.msra.gmra.mrb[62].mxu0 %v15967_v56 }
 0xabd   :  { %12576 = vmatpush1.bf16.msra.mxu0 %v14750_v14  ;;  %12607 = vmatpush3.bf16.msra.mxu1 %v14780_v47 }
 0xabe   :  { %12578 = vmatprep.subr.bf16.mxu0 %v14753_v16  ;;  %12608 = vmatprep.subr.bf16.mxu1 %v17287_v46 }
 0xabf   :  { %4568 = vmatprep.mubr.f32.mxu0 %v17289_v42  ;;  %10357 = vmatprep.mubr.msk.f32.mxu1 %vm14594_vm1, %v17289_v42 }
 0xac1   :  { %12580 = vmatpush1.bf16.msra.mxu0 %v14758_v22  ;;  %12610 = vmatpush3.bf16.msra.mxu1 %v14793_v58 }
 0xac2   :  { %12582 = vmatprep.subr.bf16.mxu0 %v14761_v23  ;;  %12611 = vmatprep.subr.bf16.mxu1 %v17287_v46 }
 0xac5   :  { %12584 = vmatpush1.bf16.msra.mxu0 %v14766_v29  ;;  %12613 = vmatpush3.bf16.msra.mxu1 %v14807_v5 }
 0xac6   :  { %12586 = vmatprep.subr.bf16.mxu0 %v14769_v30  ;;  %12614 = vmatprep.subr.bf16.mxu1 %v17287_v46 }
 0xac9   :  { %12588 = vmatpush1.bf16.msra.mxu0 %v14774_v38  ;;  %12616 = vmatpush3.bf16.msra.mxu1 %v14821_v15 }
 0xaca   :  { %12590 = vmatprep.subr.bf16.mxu0 %v14777_v40  ;;  %12617 = vmatprep.subr.bf16.mxu1 %v17287_v46 }
 0xacd   :  { %12592 = vmatpush1.bf16.msra.mxu0 %v17511_v18  ;;  %12619 = vmatpush3.bf16.msra.mxu1 %v17550_v21 }
 0xace   :  { %12594 = vmatprep.subr.bf16.mxu0 %v17551_v61  ;;  %12620 = vmatprep.subr.bf16.mxu1 %v17287_v46 }
 0xad1   :  { %12596 = vmatpush1.bf16.msra.mxu0 %v17552_v49  ;;  %12622 = vmatpush3.bf16.msra.mxu1 %v17553_v1 }
 0xad2   :  { %12598 = vmatprep.subr.bf16.mxu0 %v17554_v63  ;;  %12623 = vmatprep.subr.bf16.mxu1 %v17287_v46 }
 0xad5   :  { %12600 = vmatpush1.bf16.msra.mxu0 %v17555_v17  ;;  %12625 = vmatpush3.bf16.msra.mxu1 %v17556_v7  ;;  %v17585_v7 = vld [vmem:[#allocation57_spill] sm:$0xff] }
 0xad6   :  { %12602 = vmatprep.subr.bf16.mxu0 %v17557_v62  ;;  %12626 = vmatprep.subr.bf16.mxu1 %v17287_v46 }
 0xad9   :  { %12604 = vmatpush1.bf16.msra.mxu0 %v17558_v48  ;;  %12628 = vmatpush3.bf16.msra.mxu1 %v17559_v54  ;;  %v17571_v54 = vld [vmem:[#allocation43_spill] sm:$0xff]  ;;  %v17572_v48 = vld [vmem:[#allocation44_spill] sm:$0xff] }
 0xada   :  { %12630 = vmatprep.subr.bf16.mxu1 %v17560_v31  ;;  %12661 = vmatprep.subr.bf16.mxu0 %v17287_v46  ;;  %v17570_v31 = vld [vmem:[#allocation42_spill] sm:$0xff] }
 0xadc   :  { %4569 = vmatmul.mubr.f32.vlgmr.msra.gmra.mrb[16].mxu0 %v15977_v57  ;;  %10358 = vmatmul.mubr.f32.vlgmr.msra.gmra.mrb[48].mxu1 %v15977_v57 }
 0xadd   :  { %12632 = vmatpush1.bf16.msra.mxu1 %v17561_v26  ;;  %12663 = vmatpush3.bf16.msra.mxu0 %v17562_v28  ;;  %v17567_v26 = vld [vmem:[#allocation39_spill] sm:$0xff]  ;;  %v17568_v28 = vld [vmem:[#allocation40_spill] sm:$0xff] }
 0xade   :  { %12634 = vmatprep.subr.bf16.mxu1 %v17563_v10  ;;  %12664 = vmatprep.subr.bf16.mxu0 %v17287_v46  ;;  %v17569_v10 = vld [vmem:[#allocation41_spill] sm:$0xff] }
 0xadf   :  { %4734 = vmatprep.mubr.f32.mxu1 %v17289_v42  ;;  %10392 = vmatprep.mubr.msk.f32.mxu0 %vm14594_vm1, %v17289_v42 }
 0xae1   :  { %12636 = vmatpush1.bf16.msra.mxu1 %v17564_v44  ;;  %12666 = vmatpush3.bf16.msra.mxu0 %v17565_v43  ;;  %v17573_v43 = vld [vmem:[#allocation45_spill] sm:$0xff]  ;;  %v17575_v44 = vld [vmem:[#allocation47_spill] sm:$0xff] }
 0xae2   :  { %12638 = vmatprep.subr.bf16.mxu1 %v17566_v36  ;;  %12667 = vmatprep.subr.bf16.mxu0 %v17287_v46  ;;  %v17574_v36 = vld [vmem:[#allocation46_spill] sm:$0xff] }
 0xae5   :  { %12640 = vmatpush1.bf16.msra.mxu1 %v17567_v26  ;;  %12669 = vmatpush3.bf16.msra.mxu0 %v17568_v28  ;;  %v17576_v28 = vld [vmem:[#allocation48_spill] sm:$0xff]  ;;  %v17578_v26 = vld [vmem:[#allocation50_spill] sm:$0xff] }
 0xae6   :  { %12642 = vmatprep.subr.bf16.mxu1 %v17569_v10  ;;  %12670 = vmatprep.subr.bf16.mxu0 %v17287_v46  ;;  %v17577_v10 = vld [vmem:[#allocation49_spill] sm:$0xff] }
 0xae9   :  { %12644 = vmatpush1.bf16.msra.mxu1 %v17570_v31  ;;  %12672 = vmatpush3.bf16.msra.mxu0 %v17571_v54  ;;  %v17579_v54 = vld [vmem:[#allocation51_spill] sm:$0xff]  ;;  %v17581_v31 = vld [vmem:[#allocation53_spill] sm:$0xff] }
 0xaea   :  { %12646 = vmatprep.subr.bf16.mxu1 %v17572_v48  ;;  %12673 = vmatprep.subr.bf16.mxu0 %v17287_v46  ;;  %v17580_v48 = vld [vmem:[#allocation52_spill] sm:$0xff] }
 0xaed   :  { %12648 = vmatpush1.bf16.msra.mxu1 %v17573_v43  ;;  %12675 = vmatpush3.bf16.msra.mxu0 %v17574_v36  ;;  %v17582_v36 = vld [vmem:[#allocation54_spill] sm:$0xff]  ;;  %v17584_v43 = vld [vmem:[#allocation56_spill] sm:$0xff] }
 0xaee   :  { %12650 = vmatprep.subr.bf16.mxu1 %v17575_v44  ;;  %12676 = vmatprep.subr.bf16.mxu0 %v17287_v46  ;;  %v17583_v44 = vld [vmem:[#allocation55_spill] sm:$0xff] }
 0xaf1   :  { %12652 = vmatpush1.bf16.msra.mxu1 %v17576_v28  ;;  %12678 = vmatpush3.bf16.msra.mxu0 %v17577_v10 }
 0xaf2   :  { %12654 = vmatprep.subr.bf16.mxu1 %v17578_v26  ;;  %12679 = vmatprep.subr.bf16.mxu0 %v17287_v46 }
 0xaf5   :  { %12656 = vmatpush1.bf16.msra.mxu1 %v17579_v54  ;;  %12681 = vmatpush3.bf16.msra.mxu0 %v17580_v48 }
 0xaf6   :  { %12658 = vmatprep.subr.bf16.mxu1 %v17581_v31  ;;  %12682 = vmatprep.subr.bf16.mxu0 %v17287_v46 }
 0xaf9   :  { %12660 = vmatpush1.bf16.msra.mxu1 %v17582_v36  ;;  %12684 = vmatpush3.bf16.msra.mxu0 %v17583_v44 }
 0xafa   :  { %12686 = vmatprep.subr.bf16.mxu1 %v17584_v43  ;;  %12717 = vmatprep.subr.bf16.mxu0 %v17287_v46 }
 0xb6f   :  { %v4336_v10 = vpop.f32.mrb[60].mxu0 }
 0xb70   :  { %v10289_v26 = vpop.f32.mrb[61].mxu0 }
 0xb71   :  { %v4337_v26 = vadd.f32 %v4336_v10, %v15201_v33 }
 0xb8f   :  { %v4406_v28 = vpop.f32.mrb[46].mxu1  ;;  %v4477_v62 = vpop.f32.mrb[62].mxu0 }
 0xb90   :  { %v13995_v54 = vadd.f32 %v4406_v28, %v17585_v7  ;;  %v4408_v17 = vpop.f32.mrb[47].mxu1  ;;  %v10324_v48 = vpop.f32.mrb[63].mxu0  ;;  %v4495_v44 = vadd.f32 %v17508_v4, %v4477_v62 }
 0xb91   :  { %v13996_v31 = vadd.f32 %v4408_v17, %v17507_v60 }
 0xb92   :  { %v8556_v63 = vmul.f32 -1.442695, %v13995_v54 }
 0xb93   :  { %v8557_v1 = vmul.f32 -1.442695, %v13996_v31 }
 0xb94   :  { %14241 = vpow2.f32 %v8556_v63 }
 0xb95   :  { %14243 = vpow2.f32 %v8557_v1 }
 0xb9e   :  { %v14242_v36 = vpop.eup %14241 }
 0xb9f   :  { %v4489_v49 = vadd.f32 1.0, %v14242_v36  ;;  %v14244_v43 = vpop.eup %14243 }
 0xba0   :  { %v4490_v28 = vadd.f32 1.0, %v14244_v43 }
 0xba1   :  { %14245 = vrcp.f32 %v4489_v49 }
 0xbab   :  { %v14246_v61 = vpop.eup %14245 }
 0xbac   :  { %v4496_v21 = vmul.f32 %v14246_v61, %v4495_v44 }
 0xbae   :  { %v4497_v18 = vadd.f32 %v4496_v21, %v4337_v26 }
 0xbaf   :  { %v4570_v7 = vpop.f32.mrb[16].mxu0  ;;  %v4641_v48 = vpop.f32.mrb[48].mxu1 }
 0xbb0   :  { %14247 = vtanh.f32 %v4497_v18  ;;  %v13965_v63 = vadd.f32 %v4570_v7, %v17312_v19  ;;  %v4572_v17 = vpop.f32.mrb[17].mxu0  ;;  %v10359_v54 = vpop.f32.mrb[49].mxu1  ;;  %v4663_v7 = vadd.f32 %v15972_v52, %v4641_v48  ;;  %v17589_v48 = vld [vmem:[#allocation28_spill] sm:$0xff] }
 0xbb1   :  { %14249 = vrcp.f32 %v4490_v28  ;;  %v13966_v49 = vadd.f32 %v4572_v17, %v17313_v34  ;;  %v17587_v28 = vld [vmem:[#allocation66_spill] sm:$0xff] }
 0xbb2   :  { %v8558_v36 = vmul.f32 -1.442695, %v13965_v63 }
 0xbb3   :  { %v8559_v31 = vmul.f32 -1.442695, %v13966_v49 }
 0xbb4   :  { %14251 = vpow2.f32 %v8558_v36 }
 0xbb5   :  { %14253 = vpow2.f32 %v8559_v31  ;;  %v17591_v31 = vld [vmem:[#allocation23_spill] sm:$0xff] }
 0xbba   :  { %v14248_v1 = vpop.eup %14247 }
 0xbbb   :  { %v4499_v4 = vsub.f32 %v15967_v56, %v14248_v1  ;;  %v14250_v62 = vpop.eup %14249  ;;  %v17606_v56 = vld [vmem:[#allocation39_spill] sm:$0xff] }
 0xbbd   :  { %v4500_v61 = vmul.f32 %v14250_v62, %v4499_v4 }
 0xbbe   :  { %v14252_v21 = vpop.eup %14251 }
 0xbbf   :  { %v4657_v10 = vadd.f32 1.0, %v14252_v21  ;;  %v16097_v44 = vadd.f32 %v14248_v1, %v4500_v61  ;;  %v14254_v18 = vpop.eup %14253  ;;  %v17590_v1 = vld [vmem:[#allocation22_spill] sm:$0xff]  ;;  %v17592_v61 = vld [vmem:[#allocation29_spill] sm:$0xff]  ;;  %v17593_v21 = vld [vmem:[#allocation24_spill] sm:$0xff] }
 0xbc0   :  { %v4658_v17 = vadd.f32 1.0, %v14254_v18  ;;  %v17595_v18 = vld [vmem:[#allocation30_spill] sm:$0xff] }
 0xbc1   :  { %17586 = vst [vmem:[#allocation80_spill] sm:$0xff] %v16097_v44  ;;  %14255 = vrcp.f32 %v4657_v10  ;;  %v17594_v10 = vld [vmem:[#allocation25_spill] sm:$0xff] }
 0xbcb   :  { %v14256_v43 = vpop.eup %14255 }
 0xbcc   :  { %v4664_v26 = vmul.f32 %v14256_v43, %v4663_v7  ;;  %v17596_v7 = vld [vmem:[#allocation26_spill] sm:$0xff]  ;;  %v17597_v43 = vld [vmem:[#allocation27_spill] sm:$0xff] }
 0xbce   :  { %v4665_v63 = vadd.f32 %v4664_v26, %v17587_v28  ;;  %v17598_v26 = vld [vmem:[#allocation31_spill] sm:$0xff]  ;;  %v17599_v28 = vld [vmem:[#allocation32_spill] sm:$0xff] }
 0xbd0   :  { %14257 = vtanh.f32 %v4665_v63  ;;  %v17600_v63 = vld [vmem:[#allocation33_spill] sm:$0xff] }
 0xbd1   :  { %14259 = vrcp.f32 %v4658_v17  ;;  %v17601_v17 = vld [vmem:[#allocation34_spill] sm:$0xff] }
 0xbda   :  { %v14258_v54 = vpop.eup %14257 }
 0xbdb   :  { %v4667_v36 = vsub.f32 %v15977_v57, %v14258_v54  ;;  %v14260_v49 = vpop.eup %14259  ;;  %v17588_v57 = vld [vmem:[#allocation21_spill] sm:$0xff] }
 0xbdd   :  { %v4668_v4 = vmul.f32 %v14260_v49, %v4667_v36  ;;  %v17603_v36 = vld [vmem:[#allocation36_spill] sm:$0xff]  ;;  %v17604_v49 = vld [vmem:[#allocation37_spill] sm:$0xff] }
 0xbdf   :  { %v16102_v62 = vadd.f32 %v14258_v54, %v4668_v4  ;;  %v17602_v54 = vld [vmem:[#allocation35_spill] sm:$0xff]  ;;  %v17605_v4 = vld [vmem:[#allocation38_spill] sm:$0xff] }
 0xbe1   :  { %4735 = vmatmul.mubr.f32.vlgmr.msra.gmra.mrb[50].mxu1 %v16102_v62  ;;  %10393 = vmatmul.mubr.f32.vlgmr.msra.gmra.mrb[64].mxu0 %v16102_v62 }
 0xbe2   :  { %12688 = vmatpush1.bf16.msra.mxu1 %v17316_v11  ;;  %12719 = vmatpush3.bf16.msra.mxu0 %v17317_v13 }
 0xbe3   :  { %12690 = vmatprep.subr.bf16.mxu1 %v17318_v37  ;;  %12720 = vmatprep.subr.bf16.mxu0 %v17287_v46 }
 0xbe4   :  { %4875 = vmatprep.mubr.f32.mxu1 %v17289_v42  ;;  %10427 = vmatprep.mubr.msk.f32.mxu0 %vm14594_vm1, %v17289_v42 }
 0xbe6   :  { %12692 = vmatpush1.bf16.msra.mxu1 %v17319_v51  ;;  %12722 = vmatpush3.bf16.msra.mxu0 %v17320_v6 }
 0xbe7   :  { %12694 = vmatprep.subr.bf16.mxu1 %v17321_v39  ;;  %12723 = vmatprep.subr.bf16.mxu0 %v17287_v46 }
 0xbea   :  { %12696 = vmatpush1.bf16.msra.mxu1 %v17322_v59  ;;  %12725 = vmatpush3.bf16.msra.mxu0 %v17323_v3 }
 0xbeb   :  { %12698 = vmatprep.subr.bf16.mxu1 %v17324_v9  ;;  %12726 = vmatprep.subr.bf16.mxu0 %v17287_v46 }
 0xbee   :  { %12700 = vmatpush1.bf16.msra.mxu1 %v17325_v24  ;;  %12728 = vmatpush3.bf16.msra.mxu0 %v17326_v53 }
 0xbef   :  { %12702 = vmatprep.subr.bf16.mxu1 %v17327_v32  ;;  %12729 = vmatprep.subr.bf16.mxu0 %v17287_v46 }
 0xbf2   :  { %12704 = vmatpush1.bf16.msra.mxu1 %v15067_v0  ;;  %12731 = vmatpush3.bf16.msra.mxu0 %v15069_v25 }
 0xbf3   :  { %12706 = vmatprep.subr.bf16.mxu1 %v17328_v41  ;;  %12732 = vmatprep.subr.bf16.mxu0 %v17287_v46 }
 0xbf6   :  { %12708 = vmatpush1.bf16.msra.mxu1 %v17329_v45  ;;  %12734 = vmatpush3.bf16.msra.mxu0 %v15079_v50 }
 0xbf7   :  { %12710 = vmatprep.subr.bf16.mxu1 %v15083_v27  ;;  %12735 = vmatprep.subr.bf16.mxu0 %v17287_v46 }
 0xbfa   :  { %12712 = vmatpush1.bf16.msra.mxu1 %v15087_v20  ;;  %12737 = vmatpush3.bf16.msra.mxu0 %v15089_v2 }
 0xbfb   :  { %12714 = vmatprep.subr.bf16.mxu1 %v15093_v35  ;;  %12738 = vmatprep.subr.bf16.mxu0 %v17287_v46 }
 0xbfe   :  { %12716 = vmatpush1.bf16.msra.mxu1 %v15097_v55  ;;  %12740 = vmatpush3.bf16.msra.mxu0 %v15099_v8 }
 0xbff   :  { %12742 = vmatprep.subr.bf16.mxu0 %v14748_v12  ;;  %12773 = vmatprep.subr.bf16.mxu1 %v17287_v46 }
 0xc01   :  { %4876 = vmatmul.mubr.f32.vlgmr.msra.gmra.mrb[50].mxu1 %v16097_v44  ;;  %10428 = vmatmul.mubr.f32.vlgmr.msra.gmra.mrb[66].mxu0 %v16097_v44 }
 0xc02   :  { %12744 = vmatpush1.bf16.msra.mxu0 %v14750_v14  ;;  %12775 = vmatpush3.bf16.msra.mxu1 %v14780_v47 }
 0xc03   :  { %12746 = vmatprep.subr.bf16.mxu0 %v14753_v16  ;;  %12776 = vmatprep.subr.bf16.mxu1 %v17287_v46 }
 0xc04   :  { %5039 = vmatprep.mubr.f32.mxu0 %v17289_v42  ;;  %10462 = vmatprep.mubr.msk.f32.mxu1 %vm14594_vm1, %v17289_v42 }
 0xc06   :  { %12748 = vmatpush1.bf16.msra.mxu0 %v14758_v22  ;;  %12778 = vmatpush3.bf16.msra.mxu1 %v14793_v58 }
 0xc07   :  { %12750 = vmatprep.subr.bf16.mxu0 %v14761_v23  ;;  %12779 = vmatprep.subr.bf16.mxu1 %v17287_v46 }
 0xc0a   :  { %12752 = vmatpush1.bf16.msra.mxu0 %v14766_v29  ;;  %12781 = vmatpush3.bf16.msra.mxu1 %v14807_v5 }
 0xc0b   :  { %12754 = vmatprep.subr.bf16.mxu0 %v14769_v30  ;;  %12782 = vmatprep.subr.bf16.mxu1 %v17287_v46 }
 0xc0e   :  { %12756 = vmatpush1.bf16.msra.mxu0 %v14774_v38  ;;  %12784 = vmatpush3.bf16.msra.mxu1 %v14821_v15 }
 0xc0f   :  { %12758 = vmatprep.subr.bf16.mxu0 %v14777_v40  ;;  %12785 = vmatprep.subr.bf16.mxu1 %v17287_v46 }
 0xc12   :  { %12760 = vmatpush1.bf16.msra.mxu0 %v17588_v57  ;;  %12787 = vmatpush3.bf16.msra.mxu1 %v17589_v48 }
 0xc13   :  { %12762 = vmatprep.subr.bf16.mxu0 %v17590_v1  ;;  %12788 = vmatprep.subr.bf16.mxu1 %v17287_v46 }
 0xc16   :  { %12764 = vmatpush1.bf16.msra.mxu0 %v17591_v31  ;;  %12790 = vmatpush3.bf16.msra.mxu1 %v17592_v61 }
 0xc17   :  { %12766 = vmatprep.subr.bf16.mxu0 %v17593_v21  ;;  %12791 = vmatprep.subr.bf16.mxu1 %v17287_v46 }
 0xc1a   :  { %12768 = vmatpush1.bf16.msra.mxu0 %v17594_v10  ;;  %12793 = vmatpush3.bf16.msra.mxu1 %v17595_v18 }
 0xc1b   :  { %12770 = vmatprep.subr.bf16.mxu0 %v17596_v7  ;;  %12794 = vmatprep.subr.bf16.mxu1 %v17287_v46  ;;  %v17624_v7 = vld [vmem:[#allocation57_spill] sm:$0xff] }
 0xc1e   :  { %12772 = vmatpush1.bf16.msra.mxu0 %v17597_v43  ;;  %12796 = vmatpush3.bf16.msra.mxu1 %v17598_v26  ;;  %v17611_v26 = vld [vmem:[#allocation44_spill] sm:$0xff] }
 0xc1f   :  { %12798 = vmatprep.subr.bf16.mxu1 %v17599_v28  ;;  %12829 = vmatprep.subr.bf16.mxu0 %v17287_v46  ;;  %v17610_v28 = vld [vmem:[#allocation43_spill] sm:$0xff] }
 0xc21   :  { %5040 = vmatmul.mubr.f32.vlgmr.msra.gmra.mrb[18].mxu0 %v16102_v62  ;;  %10463 = vmatmul.mubr.f32.vlgmr.msra.gmra.mrb[52].mxu1 %v16102_v62 }
 0xc22   :  { %12800 = vmatpush1.bf16.msra.mxu1 %v17600_v63  ;;  %12831 = vmatpush3.bf16.msra.mxu0 %v17601_v17  ;;  %v17607_v17 = vld [vmem:[#allocation40_spill] sm:$0xff]  ;;  %v17609_v63 = vld [vmem:[#allocation42_spill] sm:$0xff] }
 0xc23   :  { %12802 = vmatprep.subr.bf16.mxu1 %v17602_v54  ;;  %12832 = vmatprep.subr.bf16.mxu0 %v17287_v46  ;;  %v17608_v54 = vld [vmem:[#allocation41_spill] sm:$0xff] }
 0xc24   :  { %5205 = vmatprep.mubr.f32.mxu1 %v17289_v42  ;;  %10497 = vmatprep.mubr.msk.f32.mxu0 %vm14594_vm1, %v17289_v42 }
 0xc26   :  { %12804 = vmatpush1.bf16.msra.mxu1 %v17603_v36  ;;  %12834 = vmatpush3.bf16.msra.mxu0 %v17604_v49  ;;  %v17612_v49 = vld [vmem:[#allocation45_spill] sm:$0xff]  ;;  %v17614_v36 = vld [vmem:[#allocation47_spill] sm:$0xff] }
 0xc27   :  { %12806 = vmatprep.subr.bf16.mxu1 %v17605_v4  ;;  %12835 = vmatprep.subr.bf16.mxu0 %v17287_v46  ;;  %v17613_v4 = vld [vmem:[#allocation46_spill] sm:$0xff] }
 0xc2a   :  { %12808 = vmatpush1.bf16.msra.mxu1 %v17606_v56  ;;  %12837 = vmatpush3.bf16.msra.mxu0 %v17607_v17  ;;  %v17615_v17 = vld [vmem:[#allocation48_spill] sm:$0xff]  ;;  %v17617_v56 = vld [vmem:[#allocation50_spill] sm:$0xff] }
 0xc2b   :  { %12810 = vmatprep.subr.bf16.mxu1 %v17608_v54  ;;  %12838 = vmatprep.subr.bf16.mxu0 %v17287_v46  ;;  %v17616_v54 = vld [vmem:[#allocation49_spill] sm:$0xff] }
 0xc2e   :  { %12812 = vmatpush1.bf16.msra.mxu1 %v17609_v63  ;;  %12840 = vmatpush3.bf16.msra.mxu0 %v17610_v28  ;;  %v17618_v28 = vld [vmem:[#allocation51_spill] sm:$0xff]  ;;  %v17620_v63 = vld [vmem:[#allocation53_spill] sm:$0xff] }
 0xc2f   :  { %12814 = vmatprep.subr.bf16.mxu1 %v17611_v26  ;;  %12841 = vmatprep.subr.bf16.mxu0 %v17287_v46  ;;  %v17619_v26 = vld [vmem:[#allocation52_spill] sm:$0xff] }
 0xc32   :  { %12816 = vmatpush1.bf16.msra.mxu1 %v17612_v49  ;;  %12843 = vmatpush3.bf16.msra.mxu0 %v17613_v4  ;;  %v17621_v4 = vld [vmem:[#allocation54_spill] sm:$0xff]  ;;  %v17623_v49 = vld [vmem:[#allocation56_spill] sm:$0xff] }
 0xc33   :  { %12818 = vmatprep.subr.bf16.mxu1 %v17614_v36  ;;  %12844 = vmatprep.subr.bf16.mxu0 %v17287_v46  ;;  %v17622_v36 = vld [vmem:[#allocation55_spill] sm:$0xff] }
 0xc36   :  { %12820 = vmatpush1.bf16.msra.mxu1 %v17615_v17  ;;  %12846 = vmatpush3.bf16.msra.mxu0 %v17616_v54 }
 0xc37   :  { %12822 = vmatprep.subr.bf16.mxu1 %v17617_v56  ;;  %12847 = vmatprep.subr.bf16.mxu0 %v17287_v46 }
 0xc3a   :  { %12824 = vmatpush1.bf16.msra.mxu1 %v17618_v28  ;;  %12849 = vmatpush3.bf16.msra.mxu0 %v17619_v26 }
 0xc3b   :  { %12826 = vmatprep.subr.bf16.mxu1 %v17620_v63  ;;  %12850 = vmatprep.subr.bf16.mxu0 %v17287_v46 }
 0xc3e   :  { %12828 = vmatpush1.bf16.msra.mxu1 %v17621_v4  ;;  %12852 = vmatpush3.bf16.msra.mxu0 %v17622_v36 }
 0xc3f   :  { %12854 = vmatprep.subr.bf16.mxu1 %v17623_v49  ;;  %12885 = vmatprep.subr.bf16.mxu0 %v17287_v46 }
 0xcb4   :  { %v4807_v54 = vpop.f32.mrb[64].mxu0 }
 0xcb5   :  { %v10394_v56 = vpop.f32.mrb[65].mxu0 }
 0xcb6   :  { %v16220_v56 = vld [vmem:[%s17075_s8] ss:$0 sm:$0xff] }
 0xcb7   :  { %17625 = vst [vmem:[#allocation81_spill] sm:$0xff] %v16220_v56 }
 0xcd4   :  { %v4877_v17 = vpop.f32.mrb[50].mxu1  ;;  %v4948_v43 = vpop.f32.mrb[66].mxu0 }
 0xcd5   :  { %v13997_v28 = vadd.f32 %v4877_v17, %v17624_v7  ;;  %v4879_v18 = vpop.f32.mrb[51].mxu1  ;;  %v10429_v26 = vpop.f32.mrb[67].mxu0  ;;  %v4966_v36 = vadd.f32 %v16220_v56, %v4948_v43 }
 0xcd6   :  { %v13998_v63 = vadd.f32 %v4879_v18, %v17507_v60  ;;  %v4808_v26 = vadd.f32 %v4807_v54, %v15201_v33 }
 0xcd7   :  { %v8560_v10 = vmul.f32 -1.442695, %v13997_v28 }
 0xcd8   :  { %v8561_v21 = vmul.f32 -1.442695, %v13998_v63 }
 0xcd9   :  { %14261 = vpow2.f32 %v8560_v10 }
 0xcda   :  { %14263 = vpow2.f32 %v8561_v21 }
 0xce3   :  { %v14262_v4 = vpop.eup %14261 }
 0xce4   :  { %v4960_v61 = vadd.f32 1.0, %v14262_v4  ;;  %v14264_v49 = vpop.eup %14263 }
 0xce5   :  { %v4961_v7 = vadd.f32 1.0, %v14264_v49 }
 0xce6   :  { %14265 = vrcp.f32 %v4960_v61 }
 0xcf0   :  { %v14266_v17 = vpop.eup %14265 }
 0xcf1   :  { %v4967_v28 = vmul.f32 %v14266_v17, %v4966_v36 }
 0xcf3   :  { %v4968_v10 = vadd.f32 %v4967_v28, %v4808_v26 }
 0xcf4   :  { %v5041_v18 = vpop.f32.mrb[18].mxu0  ;;  %v5112_v63 = vpop.f32.mrb[52].mxu1 }
 0xcf5   :  { %14267 = vtanh.f32 %v4968_v10  ;;  %v13967_v21 = vadd.f32 %v5041_v18, %v17312_v19  ;;  %v5043_v61 = vpop.f32.mrb[19].mxu0  ;;  %v10464_v4 = vpop.f32.mrb[53].mxu1  ;;  %v5134_v10 = vadd.f32 %v15972_v52, %v5112_v63  ;;  %v17630_v63 = vld [vmem:[#allocation29_spill] sm:$0xff] }
 0xcf6   :  { %14269 = vrcp.f32 %v4961_v7  ;;  %v13968_v31 = vadd.f32 %v5043_v61, %v17313_v34 }
 0xcf7   :  { %v8562_v60 = vmul.f32 -1.442695, %v13967_v21 }
 0xcf8   :  { %v8563_v54 = vmul.f32 -1.442695, %v13968_v31 }
 0xcf9   :  { %14271 = vpow2.f32 %v8562_v60  ;;  %v17627_v60 = vld [vmem:[#allocation65_spill] sm:$0xff] }
 0xcfa   :  { %14273 = vpow2.f32 %v8563_v54  ;;  %v17631_v54 = vld [vmem:[#allocation24_spill] sm:$0xff] }
 0xcff   :  { %v14268_v1 = vpop.eup %14267 }
 0xd00   :  { %v4970_v43 = vsub.f32 %v16097_v44, %v14268_v1  ;;  %v14270_v56 = vpop.eup %14269  ;;  %v17645_v44 = vld [vmem:[#allocation40_spill] sm:$0xff] }
 0xd02   :  { %v4971_v36 = vmul.f32 %v14270_v56, %v4970_v43 }
 0xd03   :  { %v14272_v17 = vpop.eup %14271 }
 0xd04   :  { %v5128_v49 = vadd.f32 1.0, %v14272_v17  ;;  %v16227_v26 = vadd.f32 %v14268_v1, %v4971_v36  ;;  %v14274_v28 = vpop.eup %14273  ;;  %v17629_v1 = vld [vmem:[#allocation23_spill] sm:$0xff]  ;;  %v17632_v36 = vld [vmem:[#allocation25_spill] sm:$0xff] }
 0xd05   :  { %v5129_v61 = vadd.f32 1.0, %v14274_v28  ;;  %v17634_v28 = vld [vmem:[#allocation26_spill] sm:$0xff] }
 0xd06   :  { %17626 = vst [vmem:[#allocation82_spill] sm:$0xff] %v16227_v26  ;;  %14275 = vrcp.f32 %v5128_v49  ;;  %v17633_v49 = vld [vmem:[#allocation30_spill] sm:$0xff] }
 0xd10   :  { %v14276_v7 = vpop.eup %14275 }
 0xd11   :  { %v5135_v18 = vmul.f32 %v14276_v7, %v5134_v10  ;;  %v17635_v10 = vld [vmem:[#allocation27_spill] sm:$0xff] }
 0xd12   :  { %v17636_v7 = vld [vmem:[#allocation31_spill] sm:$0xff] }
 0xd13   :  { %v5136_v21 = vadd.f32 %v5135_v18, %v17627_v60  ;;  %v17637_v18 = vld [vmem:[#allocation32_spill] sm:$0xff]  ;;  %v17638_v60 = vld [vmem:[#allocation33_spill] sm:$0xff] }
 0xd15   :  { %14277 = vtanh.f32 %v5136_v21  ;;  %v17639_v21 = vld [vmem:[#allocation34_spill] sm:$0xff] }
 0xd16   :  { %14279 = vrcp.f32 %v5129_v61  ;;  %v17640_v61 = vld [vmem:[#allocation35_spill] sm:$0xff] }
 0xd1f   :  { %v14278_v4 = vpop.eup %14277 }
 0xd20   :  { %v5138_v31 = vsub.f32 %v16102_v62, %v14278_v4  ;;  %v14280_v56 = vpop.eup %14279  ;;  %v17628_v62 = vld [vmem:[#allocation22_spill] sm:$0xff] }
 0xd22   :  { %v5139_v43 = vmul.f32 %v14280_v56, %v5138_v31  ;;  %v17642_v31 = vld [vmem:[#allocation37_spill] sm:$0xff]  ;;  %v17643_v56 = vld [vmem:[#allocation38_spill] sm:$0xff] }
 0xd24   :  { %v16232_v17 = vadd.f32 %v14278_v4, %v5139_v43  ;;  %v17641_v4 = vld [vmem:[#allocation36_spill] sm:$0xff]  ;;  %v17644_v43 = vld [vmem:[#allocation39_spill] sm:$0xff] }
 0xd26   :  { %5206 = vmatmul.mubr.f32.vlgmr.msra.gmra.mrb[54].mxu1 %v16232_v17  ;;  %10498 = vmatmul.mubr.f32.vlgmr.msra.gmra.mrb[68].mxu0 %v16232_v17 }
 0xd27   :  { %12856 = vmatpush1.bf16.msra.mxu1 %v17316_v11  ;;  %12887 = vmatpush3.bf16.msra.mxu0 %v17317_v13 }
 0xd28   :  { %12858 = vmatprep.subr.bf16.mxu1 %v17318_v37  ;;  %12888 = vmatprep.subr.bf16.mxu0 %v17287_v46 }
 0xd29   :  { %5346 = vmatprep.mubr.f32.mxu1 %v17289_v42  ;;  %10532 = vmatprep.mubr.msk.f32.mxu0 %vm14594_vm1, %v17289_v42 }
 0xd2b   :  { %12860 = vmatpush1.bf16.msra.mxu1 %v17319_v51  ;;  %12890 = vmatpush3.bf16.msra.mxu0 %v17320_v6 }
 0xd2c   :  { %12862 = vmatprep.subr.bf16.mxu1 %v17321_v39  ;;  %12891 = vmatprep.subr.bf16.mxu0 %v17287_v46 }
 0xd2f   :  { %12864 = vmatpush1.bf16.msra.mxu1 %v17322_v59  ;;  %12893 = vmatpush3.bf16.msra.mxu0 %v17323_v3 }
 0xd30   :  { %12866 = vmatprep.subr.bf16.mxu1 %v17324_v9  ;;  %12894 = vmatprep.subr.bf16.mxu0 %v17287_v46 }
 0xd33   :  { %12868 = vmatpush1.bf16.msra.mxu1 %v17325_v24  ;;  %12896 = vmatpush3.bf16.msra.mxu0 %v17326_v53 }
 0xd34   :  { %12870 = vmatprep.subr.bf16.mxu1 %v17327_v32  ;;  %12897 = vmatprep.subr.bf16.mxu0 %v17287_v46 }
 0xd37   :  { %12872 = vmatpush1.bf16.msra.mxu1 %v15067_v0  ;;  %12899 = vmatpush3.bf16.msra.mxu0 %v15069_v25 }
 0xd38   :  { %12874 = vmatprep.subr.bf16.mxu1 %v17328_v41  ;;  %12900 = vmatprep.subr.bf16.mxu0 %v17287_v46 }
 0xd3b   :  { %12876 = vmatpush1.bf16.msra.mxu1 %v17329_v45  ;;  %12902 = vmatpush3.bf16.msra.mxu0 %v15079_v50 }
 0xd3c   :  { %12878 = vmatprep.subr.bf16.mxu1 %v15083_v27  ;;  %12903 = vmatprep.subr.bf16.mxu0 %v17287_v46 }
 0xd3f   :  { %12880 = vmatpush1.bf16.msra.mxu1 %v15087_v20  ;;  %12905 = vmatpush3.bf16.msra.mxu0 %v15089_v2 }
 0xd40   :  { %12882 = vmatprep.subr.bf16.mxu1 %v15093_v35  ;;  %12906 = vmatprep.subr.bf16.mxu0 %v17287_v46 }
 0xd43   :  { %12884 = vmatpush1.bf16.msra.mxu1 %v15097_v55  ;;  %12908 = vmatpush3.bf16.msra.mxu0 %v15099_v8 }
 0xd44   :  { %12910 = vmatprep.subr.bf16.mxu0 %v14748_v12  ;;  %12941 = vmatprep.subr.bf16.mxu1 %v17287_v46 }
 0xd46   :  { %5347 = vmatmul.mubr.f32.vlgmr.msra.gmra.mrb[54].mxu1 %v16227_v26  ;;  %10533 = vmatmul.mubr.f32.vlgmr.msra.gmra.mrb[70].mxu0 %v16227_v26 }
 0xd47   :  { %12912 = vmatpush1.bf16.msra.mxu0 %v14750_v14  ;;  %12943 = vmatpush3.bf16.msra.mxu1 %v14780_v47 }
 0xd48   :  { %12914 = vmatprep.subr.bf16.mxu0 %v14753_v16  ;;  %12944 = vmatprep.subr.bf16.mxu1 %v17287_v46 }
 0xd49   :  { %5510 = vmatprep.mubr.f32.mxu0 %v17289_v42  ;;  %10567 = vmatprep.mubr.msk.f32.mxu1 %vm14594_vm1, %v17289_v42 }
 0xd4b   :  { %12916 = vmatpush1.bf16.msra.mxu0 %v14758_v22  ;;  %12946 = vmatpush3.bf16.msra.mxu1 %v14793_v58 }
 0xd4c   :  { %12918 = vmatprep.subr.bf16.mxu0 %v14761_v23  ;;  %12947 = vmatprep.subr.bf16.mxu1 %v17287_v46 }
 0xd4f   :  { %12920 = vmatpush1.bf16.msra.mxu0 %v14766_v29  ;;  %12949 = vmatpush3.bf16.msra.mxu1 %v14807_v5 }
 0xd50   :  { %12922 = vmatprep.subr.bf16.mxu0 %v14769_v30  ;;  %12950 = vmatprep.subr.bf16.mxu1 %v17287_v46 }
 0xd53   :  { %12924 = vmatpush1.bf16.msra.mxu0 %v14774_v38  ;;  %12952 = vmatpush3.bf16.msra.mxu1 %v14821_v15 }
 0xd54   :  { %12926 = vmatprep.subr.bf16.mxu0 %v14777_v40  ;;  %12953 = vmatprep.subr.bf16.mxu1 %v17287_v46 }
 0xd57   :  { %12928 = vmatpush1.bf16.msra.mxu0 %v17588_v57  ;;  %12955 = vmatpush3.bf16.msra.mxu1 %v17589_v48 }
 0xd58   :  { %12930 = vmatprep.subr.bf16.mxu0 %v17628_v62  ;;  %12956 = vmatprep.subr.bf16.mxu1 %v17287_v46 }
 0xd5b   :  { %12932 = vmatpush1.bf16.msra.mxu0 %v17629_v1  ;;  %12958 = vmatpush3.bf16.msra.mxu1 %v17630_v63 }
 0xd5c   :  { %12934 = vmatprep.subr.bf16.mxu0 %v17631_v54  ;;  %12959 = vmatprep.subr.bf16.mxu1 %v17287_v46 }
 0xd5f   :  { %12936 = vmatpush1.bf16.msra.mxu0 %v17632_v36  ;;  %12961 = vmatpush3.bf16.msra.mxu1 %v17633_v49 }
 0xd60   :  { %12938 = vmatprep.subr.bf16.mxu0 %v17634_v28  ;;  %12962 = vmatprep.subr.bf16.mxu1 %v17287_v46 }
 0xd63   :  { %12940 = vmatpush1.bf16.msra.mxu0 %v17635_v10  ;;  %12964 = vmatpush3.bf16.msra.mxu1 %v17636_v7  ;;  %v17662_v10 = vld [vmem:[#allocation57_spill] sm:$0xff] }
 0xd64   :  { %12966 = vmatprep.subr.bf16.mxu1 %v17637_v18  ;;  %12997 = vmatprep.subr.bf16.mxu0 %v17287_v46  ;;  %v17649_v18 = vld [vmem:[#allocation44_spill] sm:$0xff] }
 0xd66   :  { %5511 = vmatmul.mubr.f32.vlgmr.msra.gmra.mrb[20].mxu0 %v16232_v17  ;;  %10568 = vmatmul.mubr.f32.vlgmr.msra.gmra.mrb[56].mxu1 %v16232_v17 }
 0xd67   :  { %12968 = vmatpush1.bf16.msra.mxu1 %v17638_v60  ;;  %12999 = vmatpush3.bf16.msra.mxu0 %v17639_v21  ;;  %v17647_v21 = vld [vmem:[#allocation42_spill] sm:$0xff]  ;;  %v17648_v60 = vld [vmem:[#allocation43_spill] sm:$0xff] }
 0xd68   :  { %12970 = vmatprep.subr.bf16.mxu1 %v17640_v61  ;;  %13000 = vmatprep.subr.bf16.mxu0 %v17287_v46  ;;  %v17646_v61 = vld [vmem:[#allocation41_spill] sm:$0xff] }
 0xd69   :  { %5676 = vmatprep.mubr.f32.mxu1 %v17289_v42  ;;  %10602 = vmatprep.mubr.msk.f32.mxu0 %vm14594_vm1, %v17289_v42 }
 0xd6b   :  { %12972 = vmatpush1.bf16.msra.mxu1 %v17641_v4  ;;  %13002 = vmatpush3.bf16.msra.mxu0 %v17642_v31  ;;  %v17650_v31 = vld [vmem:[#allocation45_spill] sm:$0xff]  ;;  %v17652_v4 = vld [vmem:[#allocation47_spill] sm:$0xff] }
 0xd6c   :  { %12974 = vmatprep.subr.bf16.mxu1 %v17643_v56  ;;  %13003 = vmatprep.subr.bf16.mxu0 %v17287_v46  ;;  %v17651_v56 = vld [vmem:[#allocation46_spill] sm:$0xff] }
 0xd6f   :  { %12976 = vmatpush1.bf16.msra.mxu1 %v17644_v43  ;;  %13005 = vmatpush3.bf16.msra.mxu0 %v17645_v44  ;;  %v17653_v44 = vld [vmem:[#allocation48_spill] sm:$0xff]  ;;  %v17655_v43 = vld [vmem:[#allocation50_spill] sm:$0xff] }
 0xd70   :  { %12978 = vmatprep.subr.bf16.mxu1 %v17646_v61  ;;  %13006 = vmatprep.subr.bf16.mxu0 %v17287_v46  ;;  %v17654_v61 = vld [vmem:[#allocation49_spill] sm:$0xff] }
 0xd73   :  { %12980 = vmatpush1.bf16.msra.mxu1 %v17647_v21  ;;  %13008 = vmatpush3.bf16.msra.mxu0 %v17648_v60  ;;  %v17656_v60 = vld [vmem:[#allocation51_spill] sm:$0xff]  ;;  %v17658_v21 = vld [vmem:[#allocation53_spill] sm:$0xff] }
 0xd74   :  { %12982 = vmatprep.subr.bf16.mxu1 %v17649_v18  ;;  %13009 = vmatprep.subr.bf16.mxu0 %v17287_v46  ;;  %v17657_v18 = vld [vmem:[#allocation52_spill] sm:$0xff] }
 0xd77   :  { %12984 = vmatpush1.bf16.msra.mxu1 %v17650_v31  ;;  %13011 = vmatpush3.bf16.msra.mxu0 %v17651_v56  ;;  %v17659_v56 = vld [vmem:[#allocation54_spill] sm:$0xff]  ;;  %v17661_v31 = vld [vmem:[#allocation56_spill] sm:$0xff] }
 0xd78   :  { %12986 = vmatprep.subr.bf16.mxu1 %v17652_v4  ;;  %13012 = vmatprep.subr.bf16.mxu0 %v17287_v46  ;;  %v17660_v4 = vld [vmem:[#allocation55_spill] sm:$0xff] }
 0xd7b   :  { %12988 = vmatpush1.bf16.msra.mxu1 %v17653_v44  ;;  %13014 = vmatpush3.bf16.msra.mxu0 %v17654_v61 }
 0xd7c   :  { %12990 = vmatprep.subr.bf16.mxu1 %v17655_v43  ;;  %13015 = vmatprep.subr.bf16.mxu0 %v17287_v46 }
 0xd7f   :  { %12992 = vmatpush1.bf16.msra.mxu1 %v17656_v60  ;;  %13017 = vmatpush3.bf16.msra.mxu0 %v17657_v18 }
 0xd80   :  { %12994 = vmatprep.subr.bf16.mxu1 %v17658_v21  ;;  %13018 = vmatprep.subr.bf16.mxu0 %v17287_v46  ;;  %v17663_v21 = vld [vmem:[#allocation89_spill] sm:$0xff] }
 0xd83   :  { %12996 = vmatpush1.bf16.msra.mxu1 %v17659_v56  ;;  %13020 = vmatpush3.bf16.msra.mxu0 %v17660_v4  ;;  %v17664_v4 = vld [vmem:[#allocation81_spill] sm:$0xff] }
 0xd84   :  { %13022 = vmatprep.subr.bf16.mxu1 %v17661_v31  ;;  %13053 = vmatprep.subr.bf16.mxu0 %v17287_v46 }
 0xdf9   :  { %v5278_v61 = vpop.f32.mrb[68].mxu0 }
 0xdfa   :  { %v10499_v43 = vpop.f32.mrb[69].mxu0 }
 0xdfb   :  { %v5279_v43 = vadd.f32 %v5278_v61, %v15201_v33 }
 0xe19   :  { %v5348_v44 = vpop.f32.mrb[54].mxu1  ;;  %v5419_v7 = vpop.f32.mrb[70].mxu0 }
 0xe1a   :  { %v13999_v60 = vadd.f32 %v5348_v44, %v17662_v10  ;;  %v5350_v28 = vpop.f32.mrb[55].mxu1  ;;  %v10534_v18 = vpop.f32.mrb[71].mxu0  ;;  %v5437_v1 = vadd.f32 %v17664_v4, %v5419_v7 }
 0xe1b   :  { %v14000_v36 = vadd.f32 %v5350_v28, %v17663_v21 }
 0xe1c   :  { %v8564_v49 = vmul.f32 -1.442695, %v13999_v60 }
 0xe1d   :  { %v8565_v54 = vmul.f32 -1.442695, %v14000_v36 }
 0xe1e   :  { %14281 = vpow2.f32 %v8564_v49 }
 0xe1f   :  { %14283 = vpow2.f32 %v8565_v54 }
 0xe28   :  { %v14282_v56 = vpop.eup %14281 }
 0xe29   :  { %v5431_v63 = vadd.f32 1.0, %v14282_v56  ;;  %v14284_v31 = vpop.eup %14283 }
 0xe2a   :  { %v5432_v44 = vadd.f32 1.0, %v14284_v31 }
 0xe2b   :  { %14285 = vrcp.f32 %v5431_v63 }
 0xe35   :  { %v14286_v62 = vpop.eup %14285 }
 0xe36   :  { %v5438_v48 = vmul.f32 %v14286_v62, %v5437_v1 }
 0xe38   :  { %v5439_v57 = vadd.f32 %v5438_v48, %v5279_v43 }
 0xe39   :  { %v5512_v10 = vpop.f32.mrb[20].mxu0  ;;  %v5583_v18 = vpop.f32.mrb[56].mxu1 }
 0xe3a   :  { %14287 = vtanh.f32 %v5439_v57  ;;  %v13969_v49 = vadd.f32 %v5512_v10, %v17312_v19  ;;  %v5514_v28 = vpop.f32.mrb[21].mxu0  ;;  %v10569_v36 = vpop.f32.mrb[57].mxu1  ;;  %v5605_v10 = vadd.f32 %v15972_v52, %v5583_v18  ;;  %v17667_v52 = vld [vmem:[#allocation21_spill] sm:$0xff]  ;;  %v17669_v18 = vld [vmem:[#allocation22_spill] sm:$0xff] }
 0xe3b   :  { %14289 = vrcp.f32 %v5432_v44  ;;  %v13970_v63 = vadd.f32 %v5514_v28, %v17313_v34 }
 0xe3c   :  { %v8566_v60 = vmul.f32 -1.442695, %v13969_v49  ;;  %v17666_v49 = vld [vmem:[#allocation68_spill] sm:$0xff] }
 0xe3d   :  { %v8567_v61 = vmul.f32 -1.442695, %v13970_v63 }
 0xe3e   :  { %14291 = vpow2.f32 %v8566_v60 }
 0xe3f   :  { %14293 = vpow2.f32 %v8567_v61  ;;  %v17671_v61 = vld [vmem:[#allocation29_spill] sm:$0xff] }
 0xe44   :  { %v14288_v54 = vpop.eup %14287 }
 0xe45   :  { %v5441_v7 = vsub.f32 %v16227_v26, %v14288_v54  ;;  %v14290_v56 = vpop.eup %14289  ;;  %v17685_v26 = vld [vmem:[#allocation39_spill] sm:$0xff] }
 0xe47   :  { %v5442_v62 = vmul.f32 %v14290_v56, %v5441_v7 }
 0xe48   :  { %v14292_v48 = vpop.eup %14291 }
 0xe49   :  { %v5599_v1 = vadd.f32 1.0, %v14292_v48  ;;  %v16352_v31 = vadd.f32 %v14288_v54, %v5442_v62  ;;  %v14294_v57 = vpop.eup %14293  ;;  %v17670_v54 = vld [vmem:[#allocation23_spill] sm:$0xff]  ;;  %v17672_v62 = vld [vmem:[#allocation24_spill] sm:$0xff] }
 0xe4a   :  { %v5600_v28 = vadd.f32 1.0, %v14294_v57  ;;  %v17674_v57 = vld [vmem:[#allocation30_spill] sm:$0xff] }
 0xe4b   :  { %17665 = vst [vmem:[#allocation83_spill] sm:$0xff] %v16352_v31  ;;  %14295 = vrcp.f32 %v5599_v1  ;;  %v17673_v1 = vld [vmem:[#allocation25_spill] sm:$0xff] }
 0xe55   :  { %v14296_v43 = vpop.eup %14295 }
 0xe56   :  { %v5606_v44 = vmul.f32 %v14296_v43, %v5605_v10  ;;  %v17675_v10 = vld [vmem:[#allocation26_spill] sm:$0xff]  ;;  %v17676_v43 = vld [vmem:[#allocation27_spill] sm:$0xff] }
 0xe58   :  { %v5607_v36 = vadd.f32 %v5606_v44, %v17666_v49  ;;  %v17677_v44 = vld [vmem:[#allocation31_spill] sm:$0xff]  ;;  %v17678_v49 = vld [vmem:[#allocation32_spill] sm:$0xff] }
 0xe5a   :  { %14297 = vtanh.f32 %v5607_v36  ;;  %v17679_v36 = vld [vmem:[#allocation33_spill] sm:$0xff] }
 0xe5b   :  { %14299 = vrcp.f32 %v5600_v28  ;;  %v17680_v28 = vld [vmem:[#allocation34_spill] sm:$0xff] }
 0xe64   :  { %v14298_v60 = vpop.eup %14297 }
 0xe65   :  { %v5609_v63 = vsub.f32 %v16232_v17, %v14298_v60  ;;  %v14300_v7 = vpop.eup %14299  ;;  %v17668_v17 = vld [vmem:[#allocation28_spill] sm:$0xff] }
 0xe67   :  { %v5610_v56 = vmul.f32 %v14300_v7, %v5609_v63  ;;  %v17682_v63 = vld [vmem:[#allocation36_spill] sm:$0xff]  ;;  %v17683_v7 = vld [vmem:[#allocation37_spill] sm:$0xff] }
 0xe69   :  { %v16357_v48 = vadd.f32 %v14298_v60, %v5610_v56  ;;  %v17681_v60 = vld [vmem:[#allocation35_spill] sm:$0xff]  ;;  %v17684_v56 = vld [vmem:[#allocation38_spill] sm:$0xff] }
 0xe6b   :  { %5677 = vmatmul.mubr.f32.vlgmr.msra.gmra.mrb[58].mxu1 %v16357_v48  ;;  %10603 = vmatmul.mubr.f32.vlgmr.msra.gmra.mrb[72].mxu0 %v16357_v48 }
 0xe6c   :  { %13024 = vmatpush1.bf16.msra.mxu1 %v17316_v11  ;;  %13055 = vmatpush3.bf16.msra.mxu0 %v17317_v13 }
 0xe6d   :  { %13026 = vmatprep.subr.bf16.mxu1 %v17318_v37  ;;  %13056 = vmatprep.subr.bf16.mxu0 %v17287_v46 }
 0xe6e   :  { %5817 = vmatprep.mubr.f32.mxu1 %v17289_v42  ;;  %10637 = vmatprep.mubr.msk.f32.mxu0 %vm14594_vm1, %v17289_v42 }
 0xe70   :  { %13028 = vmatpush1.bf16.msra.mxu1 %v17319_v51  ;;  %13058 = vmatpush3.bf16.msra.mxu0 %v17320_v6 }
 0xe71   :  { %13030 = vmatprep.subr.bf16.mxu1 %v17321_v39  ;;  %13059 = vmatprep.subr.bf16.mxu0 %v17287_v46 }
 0xe74   :  { %13032 = vmatpush1.bf16.msra.mxu1 %v17322_v59  ;;  %13061 = vmatpush3.bf16.msra.mxu0 %v17323_v3 }
 0xe75   :  { %13034 = vmatprep.subr.bf16.mxu1 %v17324_v9  ;;  %13062 = vmatprep.subr.bf16.mxu0 %v17287_v46 }
 0xe78   :  { %13036 = vmatpush1.bf16.msra.mxu1 %v17325_v24  ;;  %13064 = vmatpush3.bf16.msra.mxu0 %v17326_v53 }
 0xe79   :  { %13038 = vmatprep.subr.bf16.mxu1 %v17327_v32  ;;  %13065 = vmatprep.subr.bf16.mxu0 %v17287_v46 }
 0xe7c   :  { %13040 = vmatpush1.bf16.msra.mxu1 %v15067_v0  ;;  %13067 = vmatpush3.bf16.msra.mxu0 %v15069_v25 }
 0xe7d   :  { %13042 = vmatprep.subr.bf16.mxu1 %v17328_v41  ;;  %13068 = vmatprep.subr.bf16.mxu0 %v17287_v46 }
 0xe80   :  { %13044 = vmatpush1.bf16.msra.mxu1 %v17329_v45  ;;  %13070 = vmatpush3.bf16.msra.mxu0 %v15079_v50 }
 0xe81   :  { %13046 = vmatprep.subr.bf16.mxu1 %v15083_v27  ;;  %13071 = vmatprep.subr.bf16.mxu0 %v17287_v46 }
 0xe84   :  { %13048 = vmatpush1.bf16.msra.mxu1 %v15087_v20  ;;  %13073 = vmatpush3.bf16.msra.mxu0 %v15089_v2 }
 0xe85   :  { %13050 = vmatprep.subr.bf16.mxu1 %v15093_v35  ;;  %13074 = vmatprep.subr.bf16.mxu0 %v17287_v46 }
 0xe88   :  { %13052 = vmatpush1.bf16.msra.mxu1 %v15097_v55  ;;  %13076 = vmatpush3.bf16.msra.mxu0 %v15099_v8 }
 0xe89   :  { %13078 = vmatprep.subr.bf16.mxu0 %v14748_v12  ;;  %13109 = vmatprep.subr.bf16.mxu1 %v17287_v46 }
 0xe8b   :  { %5818 = vmatmul.mubr.f32.vlgmr.msra.gmra.mrb[58].mxu1 %v16352_v31  ;;  %10638 = vmatmul.mubr.f32.vlgmr.msra.gmra.mrb[74].mxu0 %v16352_v31 }
 0xe8c   :  { %13080 = vmatpush1.bf16.msra.mxu0 %v14750_v14  ;;  %13111 = vmatpush3.bf16.msra.mxu1 %v14780_v47 }
 0xe8d   :  { %13082 = vmatprep.subr.bf16.mxu0 %v14753_v16  ;;  %13112 = vmatprep.subr.bf16.mxu1 %v17287_v46 }
 0xe8e   :  { %5981 = vmatprep.mubr.f32.mxu0 %v17289_v42  ;;  %10672 = vmatprep.mubr.msk.f32.mxu1 %vm14594_vm1, %v17289_v42 }
 0xe90   :  { %13084 = vmatpush1.bf16.msra.mxu0 %v14758_v22  ;;  %13114 = vmatpush3.bf16.msra.mxu1 %v14793_v58 }
 0xe91   :  { %13086 = vmatprep.subr.bf16.mxu0 %v14761_v23  ;;  %13115 = vmatprep.subr.bf16.mxu1 %v17287_v46 }
 0xe94   :  { %13088 = vmatpush1.bf16.msra.mxu0 %v14766_v29  ;;  %13117 = vmatpush3.bf16.msra.mxu1 %v14807_v5 }
 0xe95   :  { %13090 = vmatprep.subr.bf16.mxu0 %v14769_v30  ;;  %13118 = vmatprep.subr.bf16.mxu1 %v17287_v46 }
 0xe98   :  { %13092 = vmatpush1.bf16.msra.mxu0 %v14774_v38  ;;  %13120 = vmatpush3.bf16.msra.mxu1 %v14821_v15 }
 0xe99   :  { %13094 = vmatprep.subr.bf16.mxu0 %v14777_v40  ;;  %13121 = vmatprep.subr.bf16.mxu1 %v17287_v46 }
 0xe9c   :  { %13096 = vmatpush1.bf16.msra.mxu0 %v17667_v52  ;;  %13123 = vmatpush3.bf16.msra.mxu1 %v17668_v17 }
 0xe9d   :  { %13098 = vmatprep.subr.bf16.mxu0 %v17669_v18  ;;  %13124 = vmatprep.subr.bf16.mxu1 %v17287_v46 }
 0xea0   :  { %13100 = vmatpush1.bf16.msra.mxu0 %v17670_v54  ;;  %13126 = vmatpush3.bf16.msra.mxu1 %v17671_v61 }
 0xea1   :  { %13102 = vmatprep.subr.bf16.mxu0 %v17672_v62  ;;  %13127 = vmatprep.subr.bf16.mxu1 %v17287_v46 }
 0xea4   :  { %13104 = vmatpush1.bf16.msra.mxu0 %v17673_v1  ;;  %13129 = vmatpush3.bf16.msra.mxu1 %v17674_v57 }
 0xea5   :  { %13106 = vmatprep.subr.bf16.mxu0 %v17675_v10  ;;  %13130 = vmatprep.subr.bf16.mxu1 %v17287_v46  ;;  %v17703_v10 = vld [vmem:[#allocation57_spill] sm:$0xff] }
 0xea8   :  { %13108 = vmatpush1.bf16.msra.mxu0 %v17676_v43  ;;  %13132 = vmatpush3.bf16.msra.mxu1 %v17677_v44  ;;  %v17690_v44 = vld [vmem:[#allocation44_spill] sm:$0xff] }
 0xea9   :  { %13134 = vmatprep.subr.bf16.mxu1 %v17678_v49  ;;  %13165 = vmatprep.subr.bf16.mxu0 %v17287_v46  ;;  %v17689_v49 = vld [vmem:[#allocation43_spill] sm:$0xff] }
 0xeab   :  { %5982 = vmatmul.mubr.f32.vlgmr.msra.gmra.mrb[22].mxu0 %v16357_v48  ;;  %10673 = vmatmul.mubr.f32.vlgmr.msra.gmra.mrb[60].mxu1 %v16357_v48 }
 0xeac   :  { %13136 = vmatpush1.bf16.msra.mxu1 %v17679_v36  ;;  %13167 = vmatpush3.bf16.msra.mxu0 %v17680_v28  ;;  %v17686_v28 = vld [vmem:[#allocation40_spill] sm:$0xff]  ;;  %v17688_v36 = vld [vmem:[#allocation42_spill] sm:$0xff] }
 0xead   :  { %13138 = vmatprep.subr.bf16.mxu1 %v17681_v60  ;;  %13168 = vmatprep.subr.bf16.mxu0 %v17287_v46  ;;  %v17687_v60 = vld [vmem:[#allocation41_spill] sm:$0xff] }
 0xeae   :  { %6147 = vmatprep.mubr.f32.mxu1 %v17289_v42  ;;  %10707 = vmatprep.mubr.msk.f32.mxu0 %vm14594_vm1, %v17289_v42 }
 0xeb0   :  { %13140 = vmatpush1.bf16.msra.mxu1 %v17682_v63  ;;  %13170 = vmatpush3.bf16.msra.mxu0 %v17683_v7  ;;  %v17691_v7 = vld [vmem:[#allocation45_spill] sm:$0xff]  ;;  %v17693_v63 = vld [vmem:[#allocation47_spill] sm:$0xff] }
 0xeb1   :  { %13142 = vmatprep.subr.bf16.mxu1 %v17684_v56  ;;  %13171 = vmatprep.subr.bf16.mxu0 %v17287_v46  ;;  %v17692_v56 = vld [vmem:[#allocation46_spill] sm:$0xff] }
 0xeb4   :  { %13144 = vmatpush1.bf16.msra.mxu1 %v17685_v26  ;;  %13173 = vmatpush3.bf16.msra.mxu0 %v17686_v28  ;;  %v17694_v28 = vld [vmem:[#allocation48_spill] sm:$0xff]  ;;  %v17696_v26 = vld [vmem:[#allocation50_spill] sm:$0xff] }
 0xeb5   :  { %13146 = vmatprep.subr.bf16.mxu1 %v17687_v60  ;;  %13174 = vmatprep.subr.bf16.mxu0 %v17287_v46  ;;  %v17695_v60 = vld [vmem:[#allocation49_spill] sm:$0xff] }
 0xeb8   :  { %13148 = vmatpush1.bf16.msra.mxu1 %v17688_v36  ;;  %13176 = vmatpush3.bf16.msra.mxu0 %v17689_v49  ;;  %v17697_v49 = vld [vmem:[#allocation51_spill] sm:$0xff]  ;;  %v17699_v36 = vld [vmem:[#allocation53_spill] sm:$0xff] }
 0xeb9   :  { %13150 = vmatprep.subr.bf16.mxu1 %v17690_v44  ;;  %13177 = vmatprep.subr.bf16.mxu0 %v17287_v46  ;;  %v17698_v44 = vld [vmem:[#allocation52_spill] sm:$0xff] }
 0xebc   :  { %13152 = vmatpush1.bf16.msra.mxu1 %v17691_v7  ;;  %13179 = vmatpush3.bf16.msra.mxu0 %v17692_v56  ;;  %v17700_v56 = vld [vmem:[#allocation54_spill] sm:$0xff]  ;;  %v17702_v7 = vld [vmem:[#allocation56_spill] sm:$0xff] }
 0xebd   :  { %13154 = vmatprep.subr.bf16.mxu1 %v17693_v63  ;;  %13180 = vmatprep.subr.bf16.mxu0 %v17287_v46  ;;  %v17701_v63 = vld [vmem:[#allocation55_spill] sm:$0xff] }
 0xec0   :  { %13156 = vmatpush1.bf16.msra.mxu1 %v17694_v28  ;;  %13182 = vmatpush3.bf16.msra.mxu0 %v17695_v60 }
 0xec1   :  { %13158 = vmatprep.subr.bf16.mxu1 %v17696_v26  ;;  %13183 = vmatprep.subr.bf16.mxu0 %v17287_v46 }
 0xec4   :  { %13160 = vmatpush1.bf16.msra.mxu1 %v17697_v49  ;;  %13185 = vmatpush3.bf16.msra.mxu0 %v17698_v44 }
 0xec5   :  { %13162 = vmatprep.subr.bf16.mxu1 %v17699_v36  ;;  %13186 = vmatprep.subr.bf16.mxu0 %v17287_v46 }
 0xec8   :  { %13164 = vmatpush1.bf16.msra.mxu1 %v17700_v56  ;;  %13188 = vmatpush3.bf16.msra.mxu0 %v17701_v63 }
 0xec9   :  { %13190 = vmatprep.subr.bf16.mxu1 %v17702_v7  ;;  %13221 = vmatprep.subr.bf16.mxu0 %v17287_v46 }
 0xf3e   :  { %v5749_v60 = vpop.f32.mrb[72].mxu0 }
 0xf3f   :  { %v10604_v26 = vpop.f32.mrb[73].mxu0 }
 0xf40   :  { %v5750_v26 = vadd.f32 %v5749_v60, %v15201_v33 }
 0xf5e   :  { %v5819_v28 = vpop.f32.mrb[58].mxu1  ;;  %v5890_v43 = vpop.f32.mrb[74].mxu0 }
 0xf5f   :  { %v14001_v49 = vadd.f32 %v5819_v28, %v17703_v10  ;;  %v5821_v57 = vpop.f32.mrb[59].mxu1  ;;  %v10639_v44 = vpop.f32.mrb[75].mxu0  ;;  %v5908_v63 = vadd.f32 %v17664_v4, %v5890_v43 }
 0xf60   :  { %v14002_v36 = vadd.f32 %v5821_v57, %v17663_v21 }
 0xf61   :  { %v8568_v1 = vmul.f32 -1.442695, %v14001_v49 }
 0xf62   :  { %v8569_v62 = vmul.f32 -1.442695, %v14002_v36 }
 0xf63   :  { %14301 = vpow2.f32 %v8568_v1 }
 0xf64   :  { %14303 = vpow2.f32 %v8569_v62 }
 0xf6d   :  { %v14302_v56 = vpop.eup %14301 }
 0xf6e   :  { %v5902_v61 = vadd.f32 1.0, %v14302_v56  ;;  %v14304_v7 = vpop.eup %14303 }
 0xf6f   :  { %v5903_v28 = vadd.f32 1.0, %v14304_v7 }
 0xf70   :  { %14305 = vrcp.f32 %v5902_v61 }
 0xf7a   :  { %v14306_v54 = vpop.eup %14305 }
 0xf7b   :  { %v5909_v18 = vmul.f32 %v14306_v54, %v5908_v63 }
 0xf7d   :  { %v5910_v17 = vadd.f32 %v5909_v18, %v5750_v26 }
 0xf7e   :  { %v5983_v10 = vpop.f32.mrb[22].mxu0  ;;  %v6054_v44 = vpop.f32.mrb[60].mxu1 }
 0xf7f   :  { %14307 = vtanh.f32 %v5910_v17  ;;  %v13971_v1 = vadd.f32 %v5983_v10, %v17312_v19  ;;  %v5985_v57 = vpop.f32.mrb[23].mxu0  ;;  %v10674_v49 = vpop.f32.mrb[61].mxu1  ;;  %v16482_v10 = vld [vmem:[%s17071_s4] ss:$0 sm:$0xff] }
 0xf80   :  { %14309 = vrcp.f32 %v5903_v28  ;;  %v13972_v61 = vadd.f32 %v5985_v57, %v17313_v34  ;;  %v6076_v26 = vadd.f32 %v16482_v10, %v6054_v44  ;;  %v17705_v57 = vld [vmem:[#allocation67_spill] sm:$0xff]  ;;  %v17707_v44 = vld [vmem:[#allocation22_spill] sm:$0xff] }
 0xf81   :  { %v8570_v36 = vmul.f32 -1.442695, %v13971_v1 }
 0xf82   :  { %v8571_v60 = vmul.f32 -1.442695, %v13972_v61 }
 0xf83   :  { %14311 = vpow2.f32 %v8570_v36 }
 0xf84   :  { %14313 = vpow2.f32 %v8571_v60 }
 0xf89   :  { %v14308_v62 = vpop.eup %14307 }
 0xf8a   :  { %v5912_v43 = vsub.f32 %v16352_v31, %v14308_v62  ;;  %v14310_v56 = vpop.eup %14309  ;;  %v17722_v31 = vld [vmem:[#allocation38_spill] sm:$0xff] }
 0xf8c   :  { %v5913_v54 = vmul.f32 %v14310_v56, %v5912_v43 }
 0xf8d   :  { %v14312_v18 = vpop.eup %14311 }
 0xf8e   :  { %v6070_v63 = vadd.f32 1.0, %v14312_v18  ;;  %v16477_v7 = vadd.f32 %v14308_v62, %v5913_v54  ;;  %v14314_v17 = vpop.eup %14313  ;;  %v17708_v54 = vld [vmem:[#allocation23_spill] sm:$0xff]  ;;  %v17709_v18 = vld [vmem:[#allocation29_spill] sm:$0xff] }
 0xf8f   :  { %v6071_v36 = vadd.f32 1.0, %v14314_v17  ;;  %v17711_v17 = vld [vmem:[#allocation25_spill] sm:$0xff] }
 0xf90   :  { %17704 = vst [vmem:[#allocation84_spill] sm:$0xff] %v16477_v7  ;;  %14315 = vrcp.f32 %v6070_v63  ;;  %v17710_v63 = vld [vmem:[#allocation24_spill] sm:$0xff] }
 0xf9a   :  { %v14316_v28 = vpop.eup %14315 }
 0xf9b   :  { %v6077_v1 = vmul.f32 %v14316_v28, %v6076_v26  ;;  %v17712_v26 = vld [vmem:[#allocation30_spill] sm:$0xff] }
 0xf9c   :  { %v17713_v28 = vld [vmem:[#allocation26_spill] sm:$0xff] }
 0xf9d   :  { %v6078_v49 = vadd.f32 %v6077_v1, %v17705_v57  ;;  %v17714_v1 = vld [vmem:[#allocation27_spill] sm:$0xff] }
 0xf9e   :  { %v17715_v57 = vld [vmem:[#allocation31_spill] sm:$0xff] }
 0xf9f   :  { %14317 = vtanh.f32 %v6078_v49  ;;  %v17716_v49 = vld [vmem:[#allocation32_spill] sm:$0xff] }
 0xfa0   :  { %14319 = vrcp.f32 %v6071_v36  ;;  %v17717_v36 = vld [vmem:[#allocation33_spill] sm:$0xff] }
 0xfa9   :  { %v14318_v61 = vpop.eup %14317 }
 0xfaa   :  { %v6080_v62 = vsub.f32 %v16357_v48, %v14318_v61  ;;  %v14320_v43 = vpop.eup %14319  ;;  %v17706_v48 = vld [vmem:[#allocation28_spill] sm:$0xff] }
 0xfac   :  { %v6081_v56 = vmul.f32 %v14320_v43, %v6080_v62  ;;  %v17719_v62 = vld [vmem:[#allocation35_spill] sm:$0xff]  ;;  %v17720_v43 = vld [vmem:[#allocation36_spill] sm:$0xff] }
 0xfae   :  { %v16487_v60 = vadd.f32 %v14318_v61, %v6081_v56  ;;  %v17718_v61 = vld [vmem:[#allocation34_spill] sm:$0xff]  ;;  %v17721_v56 = vld [vmem:[#allocation37_spill] sm:$0xff] }
 0xfb0   :  { %6148 = vmatmul.mubr.f32.vlgmr.msra.gmra.mrb[62].mxu1 %v16487_v60  ;;  %10708 = vmatmul.mubr.f32.vlgmr.msra.gmra.mrb[76].mxu0 %v16487_v60 }
 0xfb1   :  { %13192 = vmatpush1.bf16.msra.mxu1 %v17316_v11  ;;  %13223 = vmatpush3.bf16.msra.mxu0 %v17317_v13 }
 0xfb2   :  { %13194 = vmatprep.subr.bf16.mxu1 %v17318_v37  ;;  %13224 = vmatprep.subr.bf16.mxu0 %v17287_v46 }
 0xfb3   :  { %6288 = vmatprep.mubr.f32.mxu1 %v17289_v42  ;;  %10742 = vmatprep.mubr.msk.f32.mxu0 %vm14594_vm1, %v17289_v42 }
 0xfb5   :  { %13196 = vmatpush1.bf16.msra.mxu1 %v17319_v51  ;;  %13226 = vmatpush3.bf16.msra.mxu0 %v17320_v6 }
 0xfb6   :  { %13198 = vmatprep.subr.bf16.mxu1 %v17321_v39  ;;  %13227 = vmatprep.subr.bf16.mxu0 %v17287_v46 }
 0xfb9   :  { %13200 = vmatpush1.bf16.msra.mxu1 %v17322_v59  ;;  %13229 = vmatpush3.bf16.msra.mxu0 %v17323_v3 }
 0xfba   :  { %13202 = vmatprep.subr.bf16.mxu1 %v17324_v9  ;;  %13230 = vmatprep.subr.bf16.mxu0 %v17287_v46 }
 0xfbd   :  { %13204 = vmatpush1.bf16.msra.mxu1 %v17325_v24  ;;  %13232 = vmatpush3.bf16.msra.mxu0 %v17326_v53 }
 0xfbe   :  { %13206 = vmatprep.subr.bf16.mxu1 %v17327_v32  ;;  %13233 = vmatprep.subr.bf16.mxu0 %v17287_v46 }
 0xfc1   :  { %13208 = vmatpush1.bf16.msra.mxu1 %v15067_v0  ;;  %13235 = vmatpush3.bf16.msra.mxu0 %v15069_v25 }
 0xfc2   :  { %13210 = vmatprep.subr.bf16.mxu1 %v17328_v41  ;;  %13236 = vmatprep.subr.bf16.mxu0 %v17287_v46 }
 0xfc5   :  { %13212 = vmatpush1.bf16.msra.mxu1 %v17329_v45  ;;  %13238 = vmatpush3.bf16.msra.mxu0 %v15079_v50 }
 0xfc6   :  { %13214 = vmatprep.subr.bf16.mxu1 %v15083_v27  ;;  %13239 = vmatprep.subr.bf16.mxu0 %v17287_v46 }
 0xfc9   :  { %13216 = vmatpush1.bf16.msra.mxu1 %v15087_v20  ;;  %13241 = vmatpush3.bf16.msra.mxu0 %v15089_v2 }
 0xfca   :  { %13218 = vmatprep.subr.bf16.mxu1 %v15093_v35  ;;  %13242 = vmatprep.subr.bf16.mxu0 %v17287_v46 }
 0xfcd   :  { %13220 = vmatpush1.bf16.msra.mxu1 %v15097_v55  ;;  %13244 = vmatpush3.bf16.msra.mxu0 %v15099_v8 }
 0xfce   :  { %13246 = vmatprep.subr.bf16.mxu0 %v14748_v12  ;;  %13277 = vmatprep.subr.bf16.mxu1 %v17287_v46 }
 0xfd0   :  { %6289 = vmatmul.mubr.f32.vlgmr.msra.gmra.mrb[62].mxu1 %v16477_v7  ;;  %10743 = vmatmul.mubr.f32.vlgmr.msra.gmra.mrb[78].mxu0 %v16477_v7 }
 0xfd1   :  { %13248 = vmatpush1.bf16.msra.mxu0 %v14750_v14  ;;  %13279 = vmatpush3.bf16.msra.mxu1 %v14780_v47 }
 0xfd2   :  { %13250 = vmatprep.subr.bf16.mxu0 %v14753_v16  ;;  %13280 = vmatprep.subr.bf16.mxu1 %v17287_v46 }
 0xfd3   :  { %6452 = vmatprep.mubr.f32.mxu0 %v17289_v42  ;;  %10777 = vmatprep.mubr.msk.f32.mxu1 %vm14594_vm1, %v17289_v42 }
 0xfd5   :  { %13252 = vmatpush1.bf16.msra.mxu0 %v14758_v22  ;;  %13282 = vmatpush3.bf16.msra.mxu1 %v14793_v58 }
 0xfd6   :  { %13254 = vmatprep.subr.bf16.mxu0 %v14761_v23  ;;  %13283 = vmatprep.subr.bf16.mxu1 %v17287_v46 }
 0xfd9   :  { %13256 = vmatpush1.bf16.msra.mxu0 %v14766_v29  ;;  %13285 = vmatpush3.bf16.msra.mxu1 %v14807_v5 }
 0xfda   :  { %13258 = vmatprep.subr.bf16.mxu0 %v14769_v30  ;;  %13286 = vmatprep.subr.bf16.mxu1 %v17287_v46 }
 0xfdd   :  { %13260 = vmatpush1.bf16.msra.mxu0 %v14774_v38  ;;  %13288 = vmatpush3.bf16.msra.mxu1 %v14821_v15 }
 0xfde   :  { %13262 = vmatprep.subr.bf16.mxu0 %v14777_v40  ;;  %13289 = vmatprep.subr.bf16.mxu1 %v17287_v46 }
 0xfe1   :  { %13264 = vmatpush1.bf16.msra.mxu0 %v17667_v52  ;;  %13291 = vmatpush3.bf16.msra.mxu1 %v17706_v48 }
 0xfe2   :  { %13266 = vmatprep.subr.bf16.mxu0 %v17707_v44  ;;  %13292 = vmatprep.subr.bf16.mxu1 %v17287_v46 }
 0xfe5   :  { %13268 = vmatpush1.bf16.msra.mxu0 %v17708_v54  ;;  %13294 = vmatpush3.bf16.msra.mxu1 %v17709_v18 }
 0xfe6   :  { %13270 = vmatprep.subr.bf16.mxu0 %v17710_v63  ;;  %13295 = vmatprep.subr.bf16.mxu1 %v17287_v46 }
 0xfe9   :  { %13272 = vmatpush1.bf16.msra.mxu0 %v17711_v17  ;;  %13297 = vmatpush3.bf16.msra.mxu1 %v17712_v26  ;;  %v17741_v26 = vld [vmem:[#allocation57_spill] sm:$0xff] }
 0xfea   :  { %13274 = vmatprep.subr.bf16.mxu0 %v17713_v28  ;;  %13298 = vmatprep.subr.bf16.mxu1 %v17287_v46 }
 0xfed   :  { %13276 = vmatpush1.bf16.msra.mxu0 %v17714_v1  ;;  %13300 = vmatpush3.bf16.msra.mxu1 %v17715_v57  ;;  %v17727_v57 = vld [vmem:[#allocation43_spill] sm:$0xff]  ;;  %v17728_v1 = vld [vmem:[#allocation44_spill] sm:$0xff] }
 0xfee   :  { %13302 = vmatprep.subr.bf16.mxu1 %v17716_v49  ;;  %13333 = vmatprep.subr.bf16.mxu0 %v17287_v46  ;;  %v17726_v49 = vld [vmem:[#allocation42_spill] sm:$0xff] }
 0xff0   :  { %6453 = vmatmul.mubr.f32.vlgmr.msra.gmra.mrb[24].mxu0 %v16487_v60  ;;  %10778 = vmatmul.mubr.f32.vlgmr.msra.gmra.mrb[64].mxu1 %v16487_v60 }
 0xff1   :  { %13304 = vmatpush1.bf16.msra.mxu1 %v17717_v36  ;;  %13335 = vmatpush3.bf16.msra.mxu0 %v17718_v61  ;;  %v17723_v36 = vld [vmem:[#allocation39_spill] sm:$0xff]  ;;  %v17724_v61 = vld [vmem:[#allocation40_spill] sm:$0xff] }
 0xff2   :  { %13306 = vmatprep.subr.bf16.mxu1 %v17719_v62  ;;  %13336 = vmatprep.subr.bf16.mxu0 %v17287_v46  ;;  %v17725_v62 = vld [vmem:[#allocation41_spill] sm:$0xff] }
 0xff3   :  { %6618 = vmatprep.mubr.f32.mxu1 %v17289_v42  ;;  %10812 = vmatprep.mubr.msk.f32.mxu0 %vm14594_vm1, %v17289_v42 }
 0xff5   :  { %13308 = vmatpush1.bf16.msra.mxu1 %v17720_v43  ;;  %13338 = vmatpush3.bf16.msra.mxu0 %v17721_v56  ;;  %v17729_v56 = vld [vmem:[#allocation45_spill] sm:$0xff]  ;;  %v17731_v43 = vld [vmem:[#allocation47_spill] sm:$0xff] }
 0xff6   :  { %13310 = vmatprep.subr.bf16.mxu1 %v17722_v31  ;;  %13339 = vmatprep.subr.bf16.mxu0 %v17287_v46  ;;  %v17730_v31 = vld [vmem:[#allocation46_spill] sm:$0xff] }
 0xff9   :  { %13312 = vmatpush1.bf16.msra.mxu1 %v17723_v36  ;;  %13341 = vmatpush3.bf16.msra.mxu0 %v17724_v61  ;;  %v17732_v61 = vld [vmem:[#allocation48_spill] sm:$0xff]  ;;  %v17734_v36 = vld [vmem:[#allocation50_spill] sm:$0xff] }
 0xffa   :  { %13314 = vmatprep.subr.bf16.mxu1 %v17725_v62  ;;  %13342 = vmatprep.subr.bf16.mxu0 %v17287_v46  ;;  %v17733_v62 = vld [vmem:[#allocation49_spill] sm:$0xff] }
 0xffd   :  { %13316 = vmatpush1.bf16.msra.mxu1 %v17726_v49  ;;  %13344 = vmatpush3.bf16.msra.mxu0 %v17727_v57  ;;  %v17735_v57 = vld [vmem:[#allocation51_spill] sm:$0xff]  ;;  %v17737_v49 = vld [vmem:[#allocation53_spill] sm:$0xff] }
 0xffe   :  { %13318 = vmatprep.subr.bf16.mxu1 %v17728_v1  ;;  %13345 = vmatprep.subr.bf16.mxu0 %v17287_v46  ;;  %v17736_v1 = vld [vmem:[#allocation52_spill] sm:$0xff] }
0x1001   :  { %13320 = vmatpush1.bf16.msra.mxu1 %v17729_v56  ;;  %13347 = vmatpush3.bf16.msra.mxu0 %v17730_v31  ;;  %v17738_v31 = vld [vmem:[#allocation54_spill] sm:$0xff]  ;;  %v17740_v56 = vld [vmem:[#allocation56_spill] sm:$0xff] }
0x1002   :  { %13322 = vmatprep.subr.bf16.mxu1 %v17731_v43  ;;  %13348 = vmatprep.subr.bf16.mxu0 %v17287_v46  ;;  %v17739_v43 = vld [vmem:[#allocation55_spill] sm:$0xff] }
0x1005   :  { %13324 = vmatpush1.bf16.msra.mxu1 %v17732_v61  ;;  %13350 = vmatpush3.bf16.msra.mxu0 %v17733_v62 }
0x1006   :  { %13326 = vmatprep.subr.bf16.mxu1 %v17734_v36  ;;  %13351 = vmatprep.subr.bf16.mxu0 %v17287_v46 }
0x1009   :  { %13328 = vmatpush1.bf16.msra.mxu1 %v17735_v57  ;;  %13353 = vmatpush3.bf16.msra.mxu0 %v17736_v1 }
0x100a   :  { %13330 = vmatprep.subr.bf16.mxu1 %v17737_v49  ;;  %13354 = vmatprep.subr.bf16.mxu0 %v17287_v46 }
0x100d   :  { %13332 = vmatpush1.bf16.msra.mxu1 %v17738_v31  ;;  %13356 = vmatpush3.bf16.msra.mxu0 %v17739_v43 }
0x100e   :  { %13358 = vmatprep.subr.bf16.mxu1 %v17740_v56  ;;  %13389 = vmatprep.subr.bf16.mxu0 %v17287_v46 }
0x1083   :  { %v6220_v62 = vpop.f32.mrb[76].mxu0 }
0x1084   :  { %v10709_v36 = vpop.f32.mrb[77].mxu0 }
0x1085   :  { %v6221_v36 = vadd.f32 %v6220_v62, %v15201_v33 }
0x10a3   :  { %v6290_v61 = vpop.f32.mrb[62].mxu1  ;;  %v6361_v28 = vpop.f32.mrb[78].mxu0 }
0x10a4   :  { %v14003_v57 = vadd.f32 %v6290_v61, %v17741_v26  ;;  %v6292_v17 = vpop.f32.mrb[63].mxu1  ;;  %v10744_v1 = vpop.f32.mrb[79].mxu0  ;;  %v6379_v43 = vadd.f32 %v17664_v4, %v6361_v28 }
0x10a5   :  { %v14004_v49 = vadd.f32 %v6292_v17, %v17663_v21 }
0x10a6   :  { %v8572_v63 = vmul.f32 -1.442695, %v14003_v57 }
0x10a7   :  { %v8573_v18 = vmul.f32 -1.442695, %v14004_v49 }
0x10a8   :  { %14321 = vpow2.f32 %v8572_v63 }
0x10a9   :  { %14323 = vpow2.f32 %v8573_v18 }
0x10b2   :  { %v14322_v31 = vpop.eup %14321 }
0x10b3   :  { %v6373_v54 = vadd.f32 1.0, %v14322_v31  ;;  %v14324_v56 = vpop.eup %14323 }
0x10b4   :  { %v6374_v61 = vadd.f32 1.0, %v14324_v56 }
0x10b5   :  { %14325 = vrcp.f32 %v6373_v54 }
0x10bf   :  { %v14326_v44 = vpop.eup %14325 }
0x10c0   :  { %v6380_v48 = vmul.f32 %v14326_v44, %v6379_v43 }
0x10c2   :  { %v6381_v52 = vadd.f32 %v6380_v48, %v6221_v36 }
0x10c3   :  { %v6454_v26 = vpop.f32.mrb[24].mxu0  ;;  %v6525_v1 = vpop.f32.mrb[64].mxu1 }
0x10c4   :  { %14327 = vtanh.f32 %v6381_v52  ;;  %v13973_v63 = vadd.f32 %v6454_v26, %v17312_v19  ;;  %v6456_v17 = vpop.f32.mrb[25].mxu0  ;;  %v10779_v57 = vpop.f32.mrb[65].mxu1  ;;  %v6547_v26 = vadd.f32 %v16482_v10, %v6525_v1  ;;  %v17745_v1 = vld [vmem:[#allocation28_spill] sm:$0xff] }
0x10c5   :  { %14329 = vrcp.f32 %v6374_v61  ;;  %v13974_v54 = vadd.f32 %v6456_v17, %v17313_v34  ;;  %v17743_v61 = vld [vmem:[#allocation70_spill] sm:$0xff] }
0x10c6   :  { %v8574_v31 = vmul.f32 -1.442695, %v13973_v63 }
0x10c7   :  { %v8575_v49 = vmul.f32 -1.442695, %v13974_v54 }
0x10c8   :  { %14331 = vpow2.f32 %v8574_v31 }
0x10c9   :  { %14333 = vpow2.f32 %v8575_v49  ;;  %v17747_v49 = vld [vmem:[#allocation23_spill] sm:$0xff] }
0x10ce   :  { %v14328_v18 = vpop.eup %14327 }
0x10cf   :  { %v6383_v4 = vsub.f32 %v16477_v7, %v14328_v18  ;;  %v14330_v28 = vpop.eup %14329  ;;  %v17762_v7 = vld [vmem:[#allocation39_spill] sm:$0xff] }
0x10d1   :  { %v6384_v44 = vmul.f32 %v14330_v28, %v6383_v4 }
0x10d2   :  { %v14332_v48 = vpop.eup %14331 }
0x10d3   :  { %v6541_v62 = vadd.f32 1.0, %v14332_v48  ;;  %v16607_v43 = vadd.f32 %v14328_v18, %v6384_v44  ;;  %v14334_v52 = vpop.eup %14333  ;;  %v17746_v18 = vld [vmem:[#allocation22_spill] sm:$0xff]  ;;  %v17748_v44 = vld [vmem:[#allocation29_spill] sm:$0xff]  ;;  %v17749_v48 = vld [vmem:[#allocation24_spill] sm:$0xff] }
0x10d4   :  { %v6542_v17 = vadd.f32 1.0, %v14334_v52  ;;  %v17751_v52 = vld [vmem:[#allocation30_spill] sm:$0xff] }
0x10d5   :  { %17742 = vst [vmem:[#allocation85_spill] sm:$0xff] %v16607_v43  ;;  %14335 = vrcp.f32 %v6541_v62  ;;  %v17750_v62 = vld [vmem:[#allocation25_spill] sm:$0xff] }
0x10df   :  { %v14336_v56 = vpop.eup %14335 }
0x10e0   :  { %v6548_v36 = vmul.f32 %v14336_v56, %v6547_v26  ;;  %v17752_v26 = vld [vmem:[#allocation26_spill] sm:$0xff]  ;;  %v17753_v56 = vld [vmem:[#allocation27_spill] sm:$0xff] }
0x10e2   :  { %v6549_v63 = vadd.f32 %v6548_v36, %v17743_v61  ;;  %v17754_v36 = vld [vmem:[#allocation31_spill] sm:$0xff]  ;;  %v17755_v61 = vld [vmem:[#allocation32_spill] sm:$0xff] }
0x10e4   :  { %14337 = vtanh.f32 %v6549_v63  ;;  %v17756_v63 = vld [vmem:[#allocation33_spill] sm:$0xff] }
0x10e5   :  { %14339 = vrcp.f32 %v6542_v17  ;;  %v17757_v17 = vld [vmem:[#allocation34_spill] sm:$0xff] }
0x10ee   :  { %v14338_v57 = vpop.eup %14337 }
0x10ef   :  { %v6551_v31 = vsub.f32 %v16487_v60, %v14338_v57  ;;  %v14340_v54 = vpop.eup %14339  ;;  %v17744_v60 = vld [vmem:[#allocation21_spill] sm:$0xff] }
0x10f1   :  { %v6552_v4 = vmul.f32 %v14340_v54, %v6551_v31  ;;  %v17759_v31 = vld [vmem:[#allocation36_spill] sm:$0xff]  ;;  %v17760_v54 = vld [vmem:[#allocation37_spill] sm:$0xff] }
0x10f3   :  { %v16612_v28 = vadd.f32 %v14338_v57, %v6552_v4  ;;  %v17758_v57 = vld [vmem:[#allocation35_spill] sm:$0xff]  ;;  %v17761_v4 = vld [vmem:[#allocation38_spill] sm:$0xff] }
0x10f5   :  { %6619 = vmatmul.mubr.f32.vlgmr.msra.gmra.mrb[66].mxu1 %v16612_v28  ;;  %10813 = vmatmul.mubr.f32.vlgmr.msra.gmra.mrb[80].mxu0 %v16612_v28 }
0x10f6   :  { %13360 = vmatpush1.bf16.msra.mxu1 %v17316_v11  ;;  %13391 = vmatpush3.bf16.msra.mxu0 %v17317_v13 }
0x10f7   :  { %13362 = vmatprep.subr.bf16.mxu1 %v17318_v37  ;;  %13392 = vmatprep.subr.bf16.mxu0 %v17287_v46 }
0x10f8   :  { %6759 = vmatprep.mubr.f32.mxu1 %v17289_v42  ;;  %10847 = vmatprep.mubr.msk.f32.mxu0 %vm14594_vm1, %v17289_v42 }
0x10fa   :  { %13364 = vmatpush1.bf16.msra.mxu1 %v17319_v51  ;;  %13394 = vmatpush3.bf16.msra.mxu0 %v17320_v6 }
0x10fb   :  { %13366 = vmatprep.subr.bf16.mxu1 %v17321_v39  ;;  %13395 = vmatprep.subr.bf16.mxu0 %v17287_v46 }
0x10fe   :  { %13368 = vmatpush1.bf16.msra.mxu1 %v17322_v59  ;;  %13397 = vmatpush3.bf16.msra.mxu0 %v17323_v3 }
0x10ff   :  { %13370 = vmatprep.subr.bf16.mxu1 %v17324_v9  ;;  %13398 = vmatprep.subr.bf16.mxu0 %v17287_v46 }
0x1102   :  { %13372 = vmatpush1.bf16.msra.mxu1 %v17325_v24  ;;  %13400 = vmatpush3.bf16.msra.mxu0 %v17326_v53 }
0x1103   :  { %13374 = vmatprep.subr.bf16.mxu1 %v17327_v32  ;;  %13401 = vmatprep.subr.bf16.mxu0 %v17287_v46 }
0x1106   :  { %13376 = vmatpush1.bf16.msra.mxu1 %v15067_v0  ;;  %13403 = vmatpush3.bf16.msra.mxu0 %v15069_v25 }
0x1107   :  { %13378 = vmatprep.subr.bf16.mxu1 %v17328_v41  ;;  %13404 = vmatprep.subr.bf16.mxu0 %v17287_v46 }
0x110a   :  { %13380 = vmatpush1.bf16.msra.mxu1 %v17329_v45  ;;  %13406 = vmatpush3.bf16.msra.mxu0 %v15079_v50 }
0x110b   :  { %13382 = vmatprep.subr.bf16.mxu1 %v15083_v27  ;;  %13407 = vmatprep.subr.bf16.mxu0 %v17287_v46 }
0x110e   :  { %13384 = vmatpush1.bf16.msra.mxu1 %v15087_v20  ;;  %13409 = vmatpush3.bf16.msra.mxu0 %v15089_v2 }
0x110f   :  { %13386 = vmatprep.subr.bf16.mxu1 %v15093_v35  ;;  %13410 = vmatprep.subr.bf16.mxu0 %v17287_v46 }
0x1112   :  { %13388 = vmatpush1.bf16.msra.mxu1 %v15097_v55  ;;  %13412 = vmatpush3.bf16.msra.mxu0 %v15099_v8 }
0x1113   :  { %13414 = vmatprep.subr.bf16.mxu0 %v14748_v12  ;;  %13445 = vmatprep.subr.bf16.mxu1 %v17287_v46 }
0x1115   :  { %6760 = vmatmul.mubr.f32.vlgmr.msra.gmra.mrb[66].mxu1 %v16607_v43  ;;  %10848 = vmatmul.mubr.f32.vlgmr.msra.gmra.mrb[82].mxu0 %v16607_v43 }
0x1116   :  { %13416 = vmatpush1.bf16.msra.mxu0 %v14750_v14  ;;  %13447 = vmatpush3.bf16.msra.mxu1 %v14780_v47 }
0x1117   :  { %13418 = vmatprep.subr.bf16.mxu0 %v14753_v16  ;;  %13448 = vmatprep.subr.bf16.mxu1 %v17287_v46 }
0x1118   :  { %6923 = vmatprep.mubr.f32.mxu0 %v17289_v42  ;;  %10882 = vmatprep.mubr.msk.f32.mxu1 %vm14594_vm1, %v17289_v42 }
0x111a   :  { %13420 = vmatpush1.bf16.msra.mxu0 %v14758_v22  ;;  %13450 = vmatpush3.bf16.msra.mxu1 %v14793_v58 }
0x111b   :  { %13422 = vmatprep.subr.bf16.mxu0 %v14761_v23  ;;  %13451 = vmatprep.subr.bf16.mxu1 %v17287_v46 }
0x111e   :  { %13424 = vmatpush1.bf16.msra.mxu0 %v14766_v29  ;;  %13453 = vmatpush3.bf16.msra.mxu1 %v14807_v5 }
0x111f   :  { %13426 = vmatprep.subr.bf16.mxu0 %v14769_v30  ;;  %13454 = vmatprep.subr.bf16.mxu1 %v17287_v46 }
0x1122   :  { %13428 = vmatpush1.bf16.msra.mxu0 %v14774_v38  ;;  %13456 = vmatpush3.bf16.msra.mxu1 %v14821_v15 }
0x1123   :  { %13430 = vmatprep.subr.bf16.mxu0 %v14777_v40  ;;  %13457 = vmatprep.subr.bf16.mxu1 %v17287_v46 }
0x1126   :  { %13432 = vmatpush1.bf16.msra.mxu0 %v17744_v60  ;;  %13459 = vmatpush3.bf16.msra.mxu1 %v17745_v1 }
0x1127   :  { %13434 = vmatprep.subr.bf16.mxu0 %v17746_v18  ;;  %13460 = vmatprep.subr.bf16.mxu1 %v17287_v46 }
0x112a   :  { %13436 = vmatpush1.bf16.msra.mxu0 %v17747_v49  ;;  %13462 = vmatpush3.bf16.msra.mxu1 %v17748_v44 }
0x112b   :  { %13438 = vmatprep.subr.bf16.mxu0 %v17749_v48  ;;  %13463 = vmatprep.subr.bf16.mxu1 %v17287_v46 }
0x112e   :  { %13440 = vmatpush1.bf16.msra.mxu0 %v17750_v62  ;;  %13465 = vmatpush3.bf16.msra.mxu1 %v17751_v52 }
0x112f   :  { %13442 = vmatprep.subr.bf16.mxu0 %v17752_v26  ;;  %13466 = vmatprep.subr.bf16.mxu1 %v17287_v46  ;;  %v17780_v26 = vld [vmem:[#allocation57_spill] sm:$0xff] }
0x1132   :  { %13444 = vmatpush1.bf16.msra.mxu0 %v17753_v56  ;;  %13468 = vmatpush3.bf16.msra.mxu1 %v17754_v36  ;;  %v17767_v36 = vld [vmem:[#allocation44_spill] sm:$0xff] }
0x1133   :  { %13470 = vmatprep.subr.bf16.mxu1 %v17755_v61  ;;  %13501 = vmatprep.subr.bf16.mxu0 %v17287_v46  ;;  %v17766_v61 = vld [vmem:[#allocation43_spill] sm:$0xff] }
0x1135   :  { %6924 = vmatmul.mubr.f32.vlgmr.msra.gmra.mrb[26].mxu0 %v16612_v28  ;;  %10883 = vmatmul.mubr.f32.vlgmr.msra.gmra.mrb[68].mxu1 %v16612_v28 }
0x1136   :  { %13472 = vmatpush1.bf16.msra.mxu1 %v17756_v63  ;;  %13503 = vmatpush3.bf16.msra.mxu0 %v17757_v17  ;;  %v17763_v17 = vld [vmem:[#allocation40_spill] sm:$0xff]  ;;  %v17765_v63 = vld [vmem:[#allocation42_spill] sm:$0xff] }
0x1137   :  { %13474 = vmatprep.subr.bf16.mxu1 %v17758_v57  ;;  %13504 = vmatprep.subr.bf16.mxu0 %v17287_v46  ;;  %v17764_v57 = vld [vmem:[#allocation41_spill] sm:$0xff] }
0x1138   :  { %7089 = vmatprep.mubr.f32.mxu1 %v17289_v42  ;;  %10917 = vmatprep.mubr.msk.f32.mxu0 %vm14594_vm1, %v17289_v42 }
0x113a   :  { %13476 = vmatpush1.bf16.msra.mxu1 %v17759_v31  ;;  %13506 = vmatpush3.bf16.msra.mxu0 %v17760_v54  ;;  %v17768_v54 = vld [vmem:[#allocation45_spill] sm:$0xff]  ;;  %v17770_v31 = vld [vmem:[#allocation47_spill] sm:$0xff] }
0x113b   :  { %13478 = vmatprep.subr.bf16.mxu1 %v17761_v4  ;;  %13507 = vmatprep.subr.bf16.mxu0 %v17287_v46  ;;  %v17769_v4 = vld [vmem:[#allocation46_spill] sm:$0xff] }
0x113e   :  { %13480 = vmatpush1.bf16.msra.mxu1 %v17762_v7  ;;  %13509 = vmatpush3.bf16.msra.mxu0 %v17763_v17  ;;  %v17771_v17 = vld [vmem:[#allocation48_spill] sm:$0xff]  ;;  %v17773_v7 = vld [vmem:[#allocation50_spill] sm:$0xff] }
0x113f   :  { %13482 = vmatprep.subr.bf16.mxu1 %v17764_v57  ;;  %13510 = vmatprep.subr.bf16.mxu0 %v17287_v46  ;;  %v17772_v57 = vld [vmem:[#allocation49_spill] sm:$0xff] }
0x1142   :  { %13484 = vmatpush1.bf16.msra.mxu1 %v17765_v63  ;;  %13512 = vmatpush3.bf16.msra.mxu0 %v17766_v61  ;;  %v17774_v61 = vld [vmem:[#allocation51_spill] sm:$0xff]  ;;  %v17776_v63 = vld [vmem:[#allocation53_spill] sm:$0xff] }
0x1143   :  { %13486 = vmatprep.subr.bf16.mxu1 %v17767_v36  ;;  %13513 = vmatprep.subr.bf16.mxu0 %v17287_v46  ;;  %v17775_v36 = vld [vmem:[#allocation52_spill] sm:$0xff] }
0x1146   :  { %13488 = vmatpush1.bf16.msra.mxu1 %v17768_v54  ;;  %13515 = vmatpush3.bf16.msra.mxu0 %v17769_v4  ;;  %v17777_v4 = vld [vmem:[#allocation54_spill] sm:$0xff]  ;;  %v17779_v54 = vld [vmem:[#allocation56_spill] sm:$0xff] }
0x1147   :  { %13490 = vmatprep.subr.bf16.mxu1 %v17770_v31  ;;  %13516 = vmatprep.subr.bf16.mxu0 %v17287_v46  ;;  %v17778_v31 = vld [vmem:[#allocation55_spill] sm:$0xff] }
0x114a   :  { %13492 = vmatpush1.bf16.msra.mxu1 %v17771_v17  ;;  %13518 = vmatpush3.bf16.msra.mxu0 %v17772_v57 }
0x114b   :  { %13494 = vmatprep.subr.bf16.mxu1 %v17773_v7  ;;  %13519 = vmatprep.subr.bf16.mxu0 %v17287_v46 }
0x114e   :  { %13496 = vmatpush1.bf16.msra.mxu1 %v17774_v61  ;;  %13521 = vmatpush3.bf16.msra.mxu0 %v17775_v36 }
0x114f   :  { %13498 = vmatprep.subr.bf16.mxu1 %v17776_v63  ;;  %13522 = vmatprep.subr.bf16.mxu0 %v17287_v46 }
0x1152   :  { %13500 = vmatpush1.bf16.msra.mxu1 %v17777_v4  ;;  %13524 = vmatpush3.bf16.msra.mxu0 %v17778_v31 }
0x1153   :  { %13526 = vmatprep.subr.bf16.mxu1 %v17779_v54  ;;  %13557 = vmatprep.subr.bf16.mxu0 %v17287_v46 }
0x11c8   :  { %v6691_v57 = vpop.f32.mrb[80].mxu0 }
0x11c9   :  { %v10814_v7 = vpop.f32.mrb[81].mxu0 }
0x11ca   :  { %v16730_v7 = vld [vmem:[%s17075_s8] ss:$0 sm:$0xff] }
0x11cb   :  { %17781 = vst [vmem:[#allocation86_spill] sm:$0xff] %v16730_v7 }
0x11e8   :  { %v6761_v17 = vpop.f32.mrb[66].mxu1  ;;  %v6832_v56 = vpop.f32.mrb[82].mxu0 }
0x11e9   :  { %v14005_v61 = vadd.f32 %v6761_v17, %v17780_v26  ;;  %v6763_v52 = vpop.f32.mrb[67].mxu1  ;;  %v10849_v36 = vpop.f32.mrb[83].mxu0  ;;  %v6850_v31 = vadd.f32 %v16730_v7, %v6832_v56 }
0x11ea   :  { %v14006_v63 = vadd.f32 %v6763_v52, %v17663_v21  ;;  %v6692_v36 = vadd.f32 %v6691_v57, %v15201_v33 }
0x11eb   :  { %v8576_v62 = vmul.f32 -1.442695, %v14005_v61 }
0x11ec   :  { %v8577_v48 = vmul.f32 -1.442695, %v14006_v63 }
0x11ed   :  { %14341 = vpow2.f32 %v8576_v62 }
0x11ee   :  { %14343 = vpow2.f32 %v8577_v48 }
0x11f7   :  { %v14342_v4 = vpop.eup %14341 }
0x11f8   :  { %v6844_v44 = vadd.f32 1.0, %v14342_v4  ;;  %v14344_v54 = vpop.eup %14343 }
0x11f9   :  { %v6845_v26 = vadd.f32 1.0, %v14344_v54 }
0x11fa   :  { %14345 = vrcp.f32 %v6844_v44 }
0x1204   :  { %v14346_v17 = vpop.eup %14345 }
0x1205   :  { %v6851_v61 = vmul.f32 %v14346_v17, %v6850_v31 }
0x1207   :  { %v6852_v62 = vadd.f32 %v6851_v61, %v6692_v36 }
0x1208   :  { %v6925_v52 = vpop.f32.mrb[26].mxu0  ;;  %v6996_v63 = vpop.f32.mrb[68].mxu1 }
0x1209   :  { %14347 = vtanh.f32 %v6852_v62  ;;  %v13975_v48 = vadd.f32 %v6925_v52, %v17312_v19  ;;  %v6927_v44 = vpop.f32.mrb[27].mxu0  ;;  %v10884_v4 = vpop.f32.mrb[69].mxu1  ;;  %v7018_v62 = vadd.f32 %v16482_v10, %v6996_v63  ;;  %v17785_v63 = vld [vmem:[#allocation29_spill] sm:$0xff] }
0x120a   :  { %14349 = vrcp.f32 %v6845_v26  ;;  %v13976_v49 = vadd.f32 %v6927_v44, %v17313_v34 }
0x120b   :  { %v8578_v21 = vmul.f32 -1.442695, %v13975_v48 }
0x120c   :  { %v8579_v57 = vmul.f32 -1.442695, %v13976_v49 }
0x120d   :  { %14351 = vpow2.f32 %v8578_v21  ;;  %v17782_v21 = vld [vmem:[#allocation69_spill] sm:$0xff] }
0x120e   :  { %14353 = vpow2.f32 %v8579_v57  ;;  %v17786_v57 = vld [vmem:[#allocation24_spill] sm:$0xff] }
0x1213   :  { %v14348_v18 = vpop.eup %14347 }
0x1214   :  { %v6854_v56 = vsub.f32 %v16607_v43, %v14348_v18  ;;  %v14350_v7 = vpop.eup %14349  ;;  %v17800_v43 = vld [vmem:[#allocation40_spill] sm:$0xff] }
0x1216   :  { %v6855_v31 = vmul.f32 %v14350_v7, %v6854_v56 }
0x1217   :  { %v14352_v17 = vpop.eup %14351 }
0x1218   :  { %v7012_v54 = vadd.f32 1.0, %v14352_v17  ;;  %v16737_v36 = vadd.f32 %v14348_v18, %v6855_v31  ;;  %v14354_v61 = vpop.eup %14353  ;;  %v17784_v18 = vld [vmem:[#allocation23_spill] sm:$0xff]  ;;  %v17787_v31 = vld [vmem:[#allocation25_spill] sm:$0xff] }
0x1219   :  { %v7013_v44 = vadd.f32 1.0, %v14354_v61  ;;  %v17789_v61 = vld [vmem:[#allocation26_spill] sm:$0xff] }
0x121a   :  { %14355 = vrcp.f32 %v7012_v54  ;;  %v17788_v54 = vld [vmem:[#allocation30_spill] sm:$0xff] }
0x1224   :  { %v14356_v26 = vpop.eup %14355 }
0x1225   :  { %v7019_v52 = vmul.f32 %v14356_v26, %v7018_v62  ;;  %v17790_v62 = vld [vmem:[#allocation27_spill] sm:$0xff] }
0x1226   :  { %v17791_v26 = vld [vmem:[#allocation31_spill] sm:$0xff] }
0x1227   :  { %v7020_v48 = vadd.f32 %v7019_v52, %v17782_v21  ;;  %v17792_v52 = vld [vmem:[#allocation32_spill] sm:$0xff]  ;;  %v17793_v21 = vld [vmem:[#allocation33_spill] sm:$0xff] }
0x1229   :  { %14357 = vtanh.f32 %v7020_v48  ;;  %v17794_v48 = vld [vmem:[#allocation34_spill] sm:$0xff] }
0x122a   :  { %14359 = vrcp.f32 %v7013_v44  ;;  %v17795_v44 = vld [vmem:[#allocation35_spill] sm:$0xff] }
0x1233   :  { %v14358_v4 = vpop.eup %14357 }
0x1234   :  { %v7022_v49 = vsub.f32 %v16612_v28, %v14358_v4  ;;  %v14360_v7 = vpop.eup %14359  ;;  %v17783_v28 = vld [vmem:[#allocation22_spill] sm:$0xff] }
0x1236   :  { %v7023_v56 = vmul.f32 %v14360_v7, %v7022_v49  ;;  %v17797_v49 = vld [vmem:[#allocation37_spill] sm:$0xff]  ;;  %v17798_v7 = vld [vmem:[#allocation38_spill] sm:$0xff] }
0x1238   :  { %v16742_v17 = vadd.f32 %v14358_v4, %v7023_v56  ;;  %v17796_v4 = vld [vmem:[#allocation36_spill] sm:$0xff]  ;;  %v17799_v56 = vld [vmem:[#allocation39_spill] sm:$0xff] }
0x123a   :  { %7090 = vmatmul.mubr.f32.vlgmr.msra.gmra.mrb[70].mxu1 %v16742_v17  ;;  %10918 = vmatmul.mubr.f32.vlgmr.msra.gmra.mrb[84].mxu0 %v16742_v17 }
0x123b   :  { %13528 = vmatpush1.bf16.msra.mxu1 %v17316_v11  ;;  %13559 = vmatpush3.bf16.msra.mxu0 %v17317_v13 }
0x123c   :  { %13530 = vmatprep.subr.bf16.mxu1 %v17318_v37  ;;  %13560 = vmatprep.subr.bf16.mxu0 %v17287_v46 }
0x123d   :  { %7230 = vmatprep.mubr.f32.mxu1 %v17289_v42  ;;  %10952 = vmatprep.mubr.msk.f32.mxu0 %vm14594_vm1, %v17289_v42 }
0x123f   :  { %13532 = vmatpush1.bf16.msra.mxu1 %v17319_v51  ;;  %13562 = vmatpush3.bf16.msra.mxu0 %v17320_v6 }
0x1240   :  { %13534 = vmatprep.subr.bf16.mxu1 %v17321_v39  ;;  %13563 = vmatprep.subr.bf16.mxu0 %v17287_v46 }
0x1243   :  { %13536 = vmatpush1.bf16.msra.mxu1 %v17322_v59  ;;  %13565 = vmatpush3.bf16.msra.mxu0 %v17323_v3 }
0x1244   :  { %13538 = vmatprep.subr.bf16.mxu1 %v17324_v9  ;;  %13566 = vmatprep.subr.bf16.mxu0 %v17287_v46 }
0x1247   :  { %13540 = vmatpush1.bf16.msra.mxu1 %v17325_v24  ;;  %13568 = vmatpush3.bf16.msra.mxu0 %v17326_v53 }
0x1248   :  { %13542 = vmatprep.subr.bf16.mxu1 %v17327_v32  ;;  %13569 = vmatprep.subr.bf16.mxu0 %v17287_v46 }
0x124b   :  { %13544 = vmatpush1.bf16.msra.mxu1 %v15067_v0  ;;  %13571 = vmatpush3.bf16.msra.mxu0 %v15069_v25 }
0x124c   :  { %13546 = vmatprep.subr.bf16.mxu1 %v17328_v41  ;;  %13572 = vmatprep.subr.bf16.mxu0 %v17287_v46 }
0x124f   :  { %13548 = vmatpush1.bf16.msra.mxu1 %v17329_v45  ;;  %13574 = vmatpush3.bf16.msra.mxu0 %v15079_v50 }
0x1250   :  { %13550 = vmatprep.subr.bf16.mxu1 %v15083_v27  ;;  %13575 = vmatprep.subr.bf16.mxu0 %v17287_v46 }
0x1253   :  { %13552 = vmatpush1.bf16.msra.mxu1 %v15087_v20  ;;  %13577 = vmatpush3.bf16.msra.mxu0 %v15089_v2 }
0x1254   :  { %13554 = vmatprep.subr.bf16.mxu1 %v15093_v35  ;;  %13578 = vmatprep.subr.bf16.mxu0 %v17287_v46 }
0x1257   :  { %13556 = vmatpush1.bf16.msra.mxu1 %v15097_v55  ;;  %13580 = vmatpush3.bf16.msra.mxu0 %v15099_v8 }
0x1258   :  { %13582 = vmatprep.subr.bf16.mxu0 %v14748_v12  ;;  %13613 = vmatprep.subr.bf16.mxu1 %v17287_v46 }
0x125a   :  { %7231 = vmatmul.mubr.f32.vlgmr.msra.gmra.mrb[70].mxu1 %v16737_v36  ;;  %10953 = vmatmul.mubr.f32.vlgmr.msra.gmra.mrb[86].mxu0 %v16737_v36 }
0x125b   :  { %13584 = vmatpush1.bf16.msra.mxu0 %v14750_v14  ;;  %13615 = vmatpush3.bf16.msra.mxu1 %v14780_v47 }
0x125c   :  { %13586 = vmatprep.subr.bf16.mxu0 %v14753_v16  ;;  %13616 = vmatprep.subr.bf16.mxu1 %v17287_v46 }
0x125d   :  { %7394 = vmatprep.mubr.f32.mxu0 %v17289_v42  ;;  %10987 = vmatprep.mubr.msk.f32.mxu1 %vm14594_vm1, %v17289_v42 }
0x125f   :  { %13588 = vmatpush1.bf16.msra.mxu0 %v14758_v22  ;;  %13618 = vmatpush3.bf16.msra.mxu1 %v14793_v58 }
0x1260   :  { %13590 = vmatprep.subr.bf16.mxu0 %v14761_v23  ;;  %13619 = vmatprep.subr.bf16.mxu1 %v17287_v46 }
0x1263   :  { %13592 = vmatpush1.bf16.msra.mxu0 %v14766_v29  ;;  %13621 = vmatpush3.bf16.msra.mxu1 %v14807_v5 }
0x1264   :  { %13594 = vmatprep.subr.bf16.mxu0 %v14769_v30  ;;  %13622 = vmatprep.subr.bf16.mxu1 %v17287_v46 }
0x1267   :  { %13596 = vmatpush1.bf16.msra.mxu0 %v14774_v38  ;;  %13624 = vmatpush3.bf16.msra.mxu1 %v14821_v15 }
0x1268   :  { %13598 = vmatprep.subr.bf16.mxu0 %v14777_v40  ;;  %13625 = vmatprep.subr.bf16.mxu1 %v17287_v46 }
0x126b   :  { %13600 = vmatpush1.bf16.msra.mxu0 %v17744_v60  ;;  %13627 = vmatpush3.bf16.msra.mxu1 %v17745_v1 }
0x126c   :  { %13602 = vmatprep.subr.bf16.mxu0 %v17783_v28  ;;  %13628 = vmatprep.subr.bf16.mxu1 %v17287_v46 }
0x126f   :  { %13604 = vmatpush1.bf16.msra.mxu0 %v17784_v18  ;;  %13630 = vmatpush3.bf16.msra.mxu1 %v17785_v63 }
0x1270   :  { %13606 = vmatprep.subr.bf16.mxu0 %v17786_v57  ;;  %13631 = vmatprep.subr.bf16.mxu1 %v17287_v46 }
0x1273   :  { %13608 = vmatpush1.bf16.msra.mxu0 %v17787_v31  ;;  %13633 = vmatpush3.bf16.msra.mxu1 %v17788_v54 }
0x1274   :  { %13610 = vmatprep.subr.bf16.mxu0 %v17789_v61  ;;  %13634 = vmatprep.subr.bf16.mxu1 %v17287_v46 }
0x1277   :  { %13612 = vmatpush1.bf16.msra.mxu0 %v17790_v62  ;;  %13636 = vmatpush3.bf16.msra.mxu1 %v17791_v26  ;;  %v17817_v62 = vld [vmem:[#allocation57_spill] sm:$0xff] }
0x1278   :  { %13638 = vmatprep.subr.bf16.mxu1 %v17792_v52  ;;  %13669 = vmatprep.subr.bf16.mxu0 %v17287_v46  ;;  %v17804_v52 = vld [vmem:[#allocation44_spill] sm:$0xff] }
0x127a   :  { %7395 = vmatmul.mubr.f32.vlgmr.msra.gmra.mrb[28].mxu0 %v16742_v17  ;;  %10988 = vmatmul.mubr.f32.vlgmr.msra.gmra.mrb[72].mxu1 %v16742_v17 }
0x127b   :  { %13640 = vmatpush1.bf16.msra.mxu1 %v17793_v21  ;;  %13671 = vmatpush3.bf16.msra.mxu0 %v17794_v48  ;;  %v17802_v48 = vld [vmem:[#allocation42_spill] sm:$0xff]  ;;  %v17803_v21 = vld [vmem:[#allocation43_spill] sm:$0xff] }
0x127c   :  { %13642 = vmatprep.subr.bf16.mxu1 %v17795_v44  ;;  %13672 = vmatprep.subr.bf16.mxu0 %v17287_v46  ;;  %v17801_v44 = vld [vmem:[#allocation41_spill] sm:$0xff] }
0x127d   :  { %7560 = vmatprep.mubr.f32.mxu1 %v17289_v42  ;;  %11022 = vmatprep.mubr.msk.f32.mxu0 %vm14594_vm1, %v17289_v42 }
0x127f   :  { %13644 = vmatpush1.bf16.msra.mxu1 %v17796_v4  ;;  %13674 = vmatpush3.bf16.msra.mxu0 %v17797_v49  ;;  %v17805_v49 = vld [vmem:[#allocation45_spill] sm:$0xff]  ;;  %v17807_v4 = vld [vmem:[#allocation47_spill] sm:$0xff] }
0x1280   :  { %13646 = vmatprep.subr.bf16.mxu1 %v17798_v7  ;;  %13675 = vmatprep.subr.bf16.mxu0 %v17287_v46  ;;  %v17806_v7 = vld [vmem:[#allocation46_spill] sm:$0xff] }
0x1283   :  { %13648 = vmatpush1.bf16.msra.mxu1 %v17799_v56  ;;  %13677 = vmatpush3.bf16.msra.mxu0 %v17800_v43  ;;  %v17808_v43 = vld [vmem:[#allocation48_spill] sm:$0xff]  ;;  %v17810_v56 = vld [vmem:[#allocation50_spill] sm:$0xff] }
0x1284   :  { %13650 = vmatprep.subr.bf16.mxu1 %v17801_v44  ;;  %13678 = vmatprep.subr.bf16.mxu0 %v17287_v46  ;;  %v17809_v44 = vld [vmem:[#allocation49_spill] sm:$0xff] }
0x1287   :  { %13652 = vmatpush1.bf16.msra.mxu1 %v17802_v48  ;;  %13680 = vmatpush3.bf16.msra.mxu0 %v17803_v21  ;;  %v17811_v21 = vld [vmem:[#allocation51_spill] sm:$0xff]  ;;  %v17813_v48 = vld [vmem:[#allocation53_spill] sm:$0xff] }
0x1288   :  { %13654 = vmatprep.subr.bf16.mxu1 %v17804_v52  ;;  %13681 = vmatprep.subr.bf16.mxu0 %v17287_v46  ;;  %v17812_v52 = vld [vmem:[#allocation52_spill] sm:$0xff] }
0x128b   :  { %13656 = vmatpush1.bf16.msra.mxu1 %v17805_v49  ;;  %13683 = vmatpush3.bf16.msra.mxu0 %v17806_v7  ;;  %v17814_v7 = vld [vmem:[#allocation54_spill] sm:$0xff]  ;;  %v17816_v49 = vld [vmem:[#allocation56_spill] sm:$0xff] }
0x128c   :  { %13658 = vmatprep.subr.bf16.mxu1 %v17807_v4  ;;  %13684 = vmatprep.subr.bf16.mxu0 %v17287_v46  ;;  %v17815_v4 = vld [vmem:[#allocation55_spill] sm:$0xff] }
0x128f   :  { %13660 = vmatpush1.bf16.msra.mxu1 %v17808_v43  ;;  %13686 = vmatpush3.bf16.msra.mxu0 %v17809_v44 }
0x1290   :  { %13662 = vmatprep.subr.bf16.mxu1 %v17810_v56  ;;  %13687 = vmatprep.subr.bf16.mxu0 %v17287_v46 }
0x1293   :  { %13664 = vmatpush1.bf16.msra.mxu1 %v17811_v21  ;;  %13689 = vmatpush3.bf16.msra.mxu0 %v17812_v52 }
0x1294   :  { %13666 = vmatprep.subr.bf16.mxu1 %v17813_v48  ;;  %13690 = vmatprep.subr.bf16.mxu0 %v17287_v46  ;;  %v17818_v48 = vld [vmem:[#allocation89_spill] sm:$0xff] }
0x1297   :  { %13668 = vmatpush1.bf16.msra.mxu1 %v17814_v7  ;;  %13692 = vmatpush3.bf16.msra.mxu0 %v17815_v4  ;;  %v17819_v4 = vld [vmem:[#allocation86_spill] sm:$0xff] }
0x1298   :  { %13694 = vmatprep.subr.bf16.mxu1 %v17816_v49  ;;  %13725 = vmatprep.subr.bf16.mxu0 %v17287_v46 }
0x130d   :  { %v7162_v44 = vpop.f32.mrb[84].mxu0 }
0x130e   :  { %v10919_v56 = vpop.f32.mrb[85].mxu0 }
0x130f   :  { %v7163_v56 = vadd.f32 %v7162_v44, %v15201_v33 }
0x132d   :  { %v7232_v43 = vpop.f32.mrb[70].mxu1  ;;  %v7303_v26 = vpop.f32.mrb[86].mxu0 }
0x132e   :  { %v14007_v21 = vadd.f32 %v7232_v43, %v17817_v62  ;;  %v7234_v61 = vpop.f32.mrb[71].mxu1  ;;  %v10954_v52 = vpop.f32.mrb[87].mxu0  ;;  %v7321_v18 = vadd.f32 %v17819_v4, %v7303_v26 }
0x132f   :  { %v14008_v31 = vadd.f32 %v7234_v61, %v17818_v48 }
0x1330   :  { %v8580_v54 = vmul.f32 -1.442695, %v14007_v21 }
0x1331   :  { %v8581_v57 = vmul.f32 -1.442695, %v14008_v31 }
0x1332   :  { %14361 = vpow2.f32 %v8580_v54 }
0x1333   :  { %14363 = vpow2.f32 %v8581_v57 }
0x133c   :  { %v14362_v7 = vpop.eup %14361 }
0x133d   :  { %v7315_v63 = vadd.f32 1.0, %v14362_v7  ;;  %v14364_v49 = vpop.eup %14363 }
0x133e   :  { %v7316_v43 = vadd.f32 1.0, %v14364_v49 }
0x133f   :  { %14365 = vrcp.f32 %v7315_v63 }
0x1349   :  { %v14366_v28 = vpop.eup %14365 }
0x134a   :  { %v7322_v1 = vmul.f32 %v14366_v28, %v7321_v18 }
0x134c   :  { %v7323_v60 = vadd.f32 %v7322_v1, %v7163_v56 }
0x134d   :  { %v7396_v62 = vpop.f32.mrb[28].mxu0  ;;  %v7467_v52 = vpop.f32.mrb[72].mxu1 }
0x134e   :  { %14367 = vtanh.f32 %v7323_v60  ;;  %v13977_v54 = vadd.f32 %v7396_v62, %v17312_v19  ;;  %v7398_v61 = vpop.f32.mrb[29].mxu0  ;;  %v10989_v31 = vpop.f32.mrb[73].mxu1  ;;  %v7489_v62 = vadd.f32 %v16482_v10, %v7467_v52  ;;  %v17834_v10 = vld [vmem:[#allocation34_spill] sm:$0xff]  ;;  %v17836_v52 = vld [vmem:[#allocation36_spill] sm:$0xff] }
0x134f   :  { %14369 = vrcp.f32 %v7316_v43  ;;  %v13978_v63 = vadd.f32 %v7398_v61, %v17313_v34 }
0x1350   :  { %v8582_v21 = vmul.f32 -1.442695, %v13977_v54  ;;  %v17820_v54 = vld [vmem:[#allocation72_spill] sm:$0xff] }
0x1351   :  { %v8583_v44 = vmul.f32 -1.442695, %v13978_v63 }
0x1352   :  { %14371 = vpow2.f32 %v8582_v21 }
0x1353   :  { %14373 = vpow2.f32 %v8583_v44  ;;  %v17838_v44 = vld [vmem:[#allocation38_spill] sm:$0xff] }
0x1358   :  { %v14368_v57 = vpop.eup %14367 }
0x1359   :  { %v7325_v26 = vsub.f32 %v16737_v36, %v14368_v57  ;;  %v14370_v7 = vpop.eup %14369 }
0x135b   :  { %v7326_v28 = vmul.f32 %v14370_v7, %v7325_v26 }
0x135c   :  { %v14372_v1 = vpop.eup %14371 }
0x135d   :  { %v7483_v18 = vadd.f32 1.0, %v14372_v1  ;;  %v16862_v49 = vadd.f32 %v14368_v57, %v7326_v28  ;;  %v14374_v60 = vpop.eup %14373  ;;  %v17837_v57 = vld [vmem:[#allocation37_spill] sm:$0xff]  ;;  %v17839_v28 = vld [vmem:[#allocation39_spill] sm:$0xff] }
0x135e   :  { %v7484_v61 = vadd.f32 1.0, %v14374_v60  ;;  %v17841_v60 = vld [vmem:[#allocation41_spill] sm:$0xff] }
0x135f   :  { %14375 = vrcp.f32 %v7483_v18  ;;  %v17840_v18 = vld [vmem:[#allocation40_spill] sm:$0xff] }
0x1369   :  { %v14376_v56 = vpop.eup %14375 }
0x136a   :  { %v7490_v43 = vmul.f32 %v14376_v56, %v7489_v62  ;;  %v17842_v62 = vld [vmem:[#allocation42_spill] sm:$0xff]  ;;  %v17843_v56 = vld [vmem:[#allocation43_spill] sm:$0xff] }
0x136c   :  { %v7491_v31 = vadd.f32 %v7490_v43, %v17820_v54  ;;  %v17844_v43 = vld [vmem:[#allocation44_spill] sm:$0xff]  ;;  %v17845_v54 = vld [vmem:[#allocation45_spill] sm:$0xff] }
0x136e   :  { %14377 = vtanh.f32 %v7491_v31  ;;  %v17846_v31 = vld [vmem:[#allocation46_spill] sm:$0xff] }
0x136f   :  { %14379 = vrcp.f32 %v7484_v61  ;;  %v17847_v61 = vld [vmem:[#allocation47_spill] sm:$0xff] }
0x1378   :  { %v14378_v21 = vpop.eup %14377 }
0x1379   :  { %v7493_v63 = vsub.f32 %v16742_v17, %v14378_v21  ;;  %v14380_v26 = vpop.eup %14379  ;;  %v17835_v17 = vld [vmem:[#allocation35_spill] sm:$0xff] }
0x137b   :  { %v7494_v7 = vmul.f32 %v14380_v26, %v7493_v63  ;;  %v17849_v63 = vld [vmem:[#allocation49_spill] sm:$0xff]  ;;  %v17850_v26 = vld [vmem:[#allocation50_spill] sm:$0xff] }
0x137d   :  { %v16867_v1 = vadd.f32 %v14378_v21, %v7494_v7  ;;  %v17848_v21 = vld [vmem:[#allocation48_spill] sm:$0xff]  ;;  %v17851_v7 = vld [vmem:[#allocation51_spill] sm:$0xff] }
0x137f   :  { %7561 = vmatmul.mubr.f32.vlgmr.msra.gmra.mrb[74].mxu1 %v16867_v1  ;;  %11023 = vmatmul.mubr.f32.vlgmr.msra.gmra.mrb[88].mxu0 %v16867_v1 }
0x1380   :  { %13696 = vmatpush1.bf16.msra.mxu1 %v17316_v11  ;;  %13727 = vmatpush3.bf16.msra.mxu0 %v17317_v13 }
0x1381   :  { %13698 = vmatprep.subr.bf16.mxu1 %v17318_v37  ;;  %13728 = vmatprep.subr.bf16.mxu0 %v17287_v46 }
0x1382   :  { %7701 = vmatprep.mubr.f32.mxu1 %v17289_v42  ;;  %11057 = vmatprep.mubr.msk.f32.mxu0 %vm14594_vm1, %v17289_v42 }
0x1384   :  { %13700 = vmatpush1.bf16.msra.mxu1 %v17319_v51  ;;  %13730 = vmatpush3.bf16.msra.mxu0 %v17320_v6 }
0x1385   :  { %13702 = vmatprep.subr.bf16.mxu1 %v17321_v39  ;;  %13731 = vmatprep.subr.bf16.mxu0 %v17287_v46 }
0x1388   :  { %13704 = vmatpush1.bf16.msra.mxu1 %v17322_v59  ;;  %13733 = vmatpush3.bf16.msra.mxu0 %v17323_v3 }
0x1389   :  { %13706 = vmatprep.subr.bf16.mxu1 %v17324_v9  ;;  %13734 = vmatprep.subr.bf16.mxu0 %v17287_v46 }
0x138c   :  { %13708 = vmatpush1.bf16.msra.mxu1 %v17325_v24  ;;  %13736 = vmatpush3.bf16.msra.mxu0 %v17326_v53 }
0x138d   :  { %13710 = vmatprep.subr.bf16.mxu1 %v17327_v32  ;;  %13737 = vmatprep.subr.bf16.mxu0 %v17287_v46 }
0x1390   :  { %13712 = vmatpush1.bf16.msra.mxu1 %v15067_v0  ;;  %13739 = vmatpush3.bf16.msra.mxu0 %v15069_v25 }
0x1391   :  { %13714 = vmatprep.subr.bf16.mxu1 %v17328_v41  ;;  %13740 = vmatprep.subr.bf16.mxu0 %v17287_v46 }
0x1394   :  { %13716 = vmatpush1.bf16.msra.mxu1 %v17329_v45  ;;  %13742 = vmatpush3.bf16.msra.mxu0 %v15079_v50 }
0x1395   :  { %13718 = vmatprep.subr.bf16.mxu1 %v15083_v27  ;;  %13743 = vmatprep.subr.bf16.mxu0 %v17287_v46 }
0x1398   :  { %13720 = vmatpush1.bf16.msra.mxu1 %v15087_v20  ;;  %13745 = vmatpush3.bf16.msra.mxu0 %v15089_v2 }
0x1399   :  { %13722 = vmatprep.subr.bf16.mxu1 %v15093_v35  ;;  %13746 = vmatprep.subr.bf16.mxu0 %v17287_v46 }
0x139c   :  { %13724 = vmatpush1.bf16.msra.mxu1 %v15097_v55  ;;  %13748 = vmatpush3.bf16.msra.mxu0 %v15099_v8 }
0x139d   :  { %13750 = vmatprep.subr.bf16.mxu0 %v14748_v12  ;;  %13781 = vmatprep.subr.bf16.mxu1 %v17287_v46  ;;  %v17821_v12 = vld [vmem:[#allocation21_spill] sm:$0xff] }
0x139f   :  { %7702 = vmatmul.mubr.f32.vlgmr.msra.gmra.mrb[74].mxu1 %v16862_v49  ;;  %11058 = vmatmul.mubr.f32.vlgmr.msra.gmra.mrb[90].mxu0 %v16862_v49 }
0x13a0   :  { %13752 = vmatpush1.bf16.msra.mxu0 %v14750_v14  ;;  %13783 = vmatpush3.bf16.msra.mxu1 %v14780_v47  ;;  %v17822_v14 = vld [vmem:[#allocation28_spill] sm:$0xff]  ;;  %v17830_v47 = vld [vmem:[#allocation27_spill] sm:$0xff] }
0x13a1   :  { %13754 = vmatprep.subr.bf16.mxu0 %v14753_v16  ;;  %13784 = vmatprep.subr.bf16.mxu1 %v17287_v46  ;;  %v17823_v16 = vld [vmem:[#allocation22_spill] sm:$0xff] }
0x13a2   :  { %7865 = vmatprep.mubr.f32.mxu0 %v17289_v42  ;;  %11092 = vmatprep.mubr.msk.f32.mxu1 %vm14594_vm1, %v17289_v42 }
0x13a4   :  { %13756 = vmatpush1.bf16.msra.mxu0 %v14758_v22  ;;  %13786 = vmatpush3.bf16.msra.mxu1 %v14793_v58  ;;  %v17824_v22 = vld [vmem:[#allocation23_spill] sm:$0xff] }
0x13a5   :  { %13758 = vmatprep.subr.bf16.mxu0 %v14761_v23  ;;  %13787 = vmatprep.subr.bf16.mxu1 %v17287_v46  ;;  %v17825_v23 = vld [vmem:[#allocation29_spill] sm:$0xff]  ;;  %v17831_v58 = vld [vmem:[#allocation31_spill] sm:$0xff] }
0x13a8   :  { %13760 = vmatpush1.bf16.msra.mxu0 %v14766_v29  ;;  %13789 = vmatpush3.bf16.msra.mxu1 %v14807_v5  ;;  %v17826_v29 = vld [vmem:[#allocation24_spill] sm:$0xff] }
0x13a9   :  { %13762 = vmatprep.subr.bf16.mxu0 %v14769_v30  ;;  %13790 = vmatprep.subr.bf16.mxu1 %v17287_v46  ;;  %v17827_v30 = vld [vmem:[#allocation25_spill] sm:$0xff]  ;;  %v17832_v5 = vld [vmem:[#allocation32_spill] sm:$0xff] }
0x13ac   :  { %13764 = vmatpush1.bf16.msra.mxu0 %v14774_v38  ;;  %13792 = vmatpush3.bf16.msra.mxu1 %v14821_v15  ;;  %v17828_v38 = vld [vmem:[#allocation30_spill] sm:$0xff]  ;;  %v17833_v15 = vld [vmem:[#allocation33_spill] sm:$0xff] }
0x13ad   :  { %13766 = vmatprep.subr.bf16.mxu0 %v14777_v40  ;;  %13793 = vmatprep.subr.bf16.mxu1 %v17287_v46  ;;  %v17829_v40 = vld [vmem:[#allocation26_spill] sm:$0xff] }
0x13b0   :  { %13768 = vmatpush1.bf16.msra.mxu0 %v17821_v12  ;;  %13795 = vmatpush3.bf16.msra.mxu1 %v17822_v14  ;;  %v17852_v12 = vld [vmem:[#allocation52_spill] sm:$0xff]  ;;  %v17853_v14 = vld [vmem:[#allocation53_spill] sm:$0xff] }
0x13b1   :  { %13770 = vmatprep.subr.bf16.mxu0 %v17823_v16  ;;  %13796 = vmatprep.subr.bf16.mxu1 %v17287_v46  ;;  %v17854_v16 = vld [vmem:[#allocation54_spill] sm:$0xff] }
0x13b4   :  { %13772 = vmatpush1.bf16.msra.mxu0 %v17824_v22  ;;  %13798 = vmatpush3.bf16.msra.mxu1 %v17825_v23  ;;  %v17855_v22 = vld [vmem:[#allocation55_spill] sm:$0xff]  ;;  %v17856_v23 = vld [vmem:[#allocation56_spill] sm:$0xff] }
0x13b5   :  { %13774 = vmatprep.subr.bf16.mxu0 %v17826_v29  ;;  %13799 = vmatprep.subr.bf16.mxu1 %v17287_v46 }
0x13b8   :  { %13776 = vmatpush1.bf16.msra.mxu0 %v17827_v30  ;;  %13801 = vmatpush3.bf16.msra.mxu1 %v17828_v38 }
0x13b9   :  { %13778 = vmatprep.subr.bf16.mxu0 %v17829_v40  ;;  %13802 = vmatprep.subr.bf16.mxu1 %v17287_v46 }
0x13bc   :  { %13780 = vmatpush1.bf16.msra.mxu0 %v17830_v47  ;;  %13804 = vmatpush3.bf16.msra.mxu1 %v17831_v58  ;;  %v17857_v47 = vld [vmem:[#allocation57_spill] sm:$0xff] }
0x13bd   :  { %13806 = vmatprep.subr.bf16.mxu1 %v17832_v5  ;;  %13837 = vmatprep.subr.bf16.mxu0 %v17287_v46 }
0x13bf   :  { %7866 = vmatmul.mubr.f32.vlgmr.msra.gmra.mrb[30].mxu0 %v16867_v1  ;;  %11093 = vmatmul.mubr.f32.vlgmr.msra.gmra.mrb[76].mxu1 %v16867_v1 }
0x13c0   :  { %13808 = vmatpush1.bf16.msra.mxu1 %v17833_v15  ;;  %13839 = vmatpush3.bf16.msra.mxu0 %v17834_v10 }
0x13c1   :  { %13810 = vmatprep.subr.bf16.mxu1 %v17835_v17  ;;  %13840 = vmatprep.subr.bf16.mxu0 %v17287_v46 }
0x13c2   :  { %8031 = vmatprep.mubr.f32.mxu1 %v17289_v42  ;;  %11127 = vmatprep.mubr.msk.f32.mxu0 %vm14594_vm1, %v17289_v42 }
0x13c4   :  { %13812 = vmatpush1.bf16.msra.mxu1 %v17836_v52  ;;  %13842 = vmatpush3.bf16.msra.mxu0 %v17837_v57 }
0x13c5   :  { %13814 = vmatprep.subr.bf16.mxu1 %v17838_v44  ;;  %13843 = vmatprep.subr.bf16.mxu0 %v17287_v46 }
0x13c8   :  { %13816 = vmatpush1.bf16.msra.mxu1 %v17839_v28  ;;  %13845 = vmatpush3.bf16.msra.mxu0 %v17840_v18 }
0x13c9   :  { %13818 = vmatprep.subr.bf16.mxu1 %v17841_v60  ;;  %13846 = vmatprep.subr.bf16.mxu0 %v17287_v46 }
0x13cc   :  { %13820 = vmatpush1.bf16.msra.mxu1 %v17842_v62  ;;  %13848 = vmatpush3.bf16.msra.mxu0 %v17843_v56 }
0x13cd   :  { %13822 = vmatprep.subr.bf16.mxu1 %v17844_v43  ;;  %13849 = vmatprep.subr.bf16.mxu0 %v17287_v46 }
0x13d0   :  { %13824 = vmatpush1.bf16.msra.mxu1 %v17845_v54  ;;  %13851 = vmatpush3.bf16.msra.mxu0 %v17846_v31 }
0x13d1   :  { %13826 = vmatprep.subr.bf16.mxu1 %v17847_v61  ;;  %13852 = vmatprep.subr.bf16.mxu0 %v17287_v46 }
0x13d4   :  { %13828 = vmatpush1.bf16.msra.mxu1 %v17848_v21  ;;  %13854 = vmatpush3.bf16.msra.mxu0 %v17849_v63 }
0x13d5   :  { %13830 = vmatprep.subr.bf16.mxu1 %v17850_v26  ;;  %13855 = vmatprep.subr.bf16.mxu0 %v17287_v46 }
0x13d8   :  { %13832 = vmatpush1.bf16.msra.mxu1 %v17851_v7  ;;  %13857 = vmatpush3.bf16.msra.mxu0 %v17852_v12 }
0x13d9   :  { %13834 = vmatprep.subr.bf16.mxu1 %v17853_v14  ;;  %13858 = vmatprep.subr.bf16.mxu0 %v17287_v46 }
0x13dc   :  { %13836 = vmatpush1.bf16.msra.mxu1 %v17854_v16  ;;  %13860 = vmatpush3.bf16.msra.mxu0 %v17855_v22 }
0x13dd   :  { %13862 = vmatprep.subr.bf16.mxu1 %v17856_v23  ;;  %13893 = vmatprep.subr.bf16.mxu0 %v17287_v46 }
0x1452   :  { %v7633_v29 = vpop.f32.mrb[88].mxu0 }
0x1453   :  { %v11024_v30 = vpop.f32.mrb[89].mxu0  ;;  %v7634_v62 = vadd.f32 %v7633_v29, %v15201_v33 }
0x1472   :  { %v7703_v38 = vpop.f32.mrb[74].mxu1  ;;  %v7774_v40 = vpop.f32.mrb[90].mxu0 }
0x1473   :  { %v14009_v58 = vadd.f32 %v7703_v38, %v17857_v47  ;;  %v7705_v5 = vpop.f32.mrb[75].mxu1  ;;  %v11059_v15 = vpop.f32.mrb[91].mxu0  ;;  %v7792_v18 = vadd.f32 %v17819_v4, %v7774_v40 }
0x1474   :  { %v14010_v17 = vadd.f32 %v7705_v5, %v17818_v48 }
0x1475   :  { %v8584_v10 = vmul.f32 -1.442695, %v14009_v58  ;;  %v14417_v58 = vld [vmem:[%s17071_s4] ss:$0 sm:$0xff] }
0x1476   :  { %v8585_v52 = vmul.f32 -1.442695, %v14010_v17 }
0x1477   :  { %14381 = vpow2.f32 %v8584_v10  ;;  %v17858_v10 = vld [vmem:[#allocation71_spill] sm:$0xff] }
0x1478   :  { %14383 = vpow2.f32 %v8585_v52 }
0x1481   :  { %v14382_v57 = vpop.eup %14381 }
0x1482   :  { %v7786_v44 = vadd.f32 1.0, %v14382_v57  ;;  %v14384_v28 = vpop.eup %14383 }
0x1483   :  { %v7787_v54 = vadd.f32 1.0, %v14384_v28 }
0x1484   :  { %14385 = vrcp.f32 %v7786_v44 }
0x148e   :  { %v14386_v60 = vpop.eup %14385 }
0x148f   :  { %v7793_v56 = vmul.f32 %v14386_v60, %v7792_v18 }
0x1491   :  { %v7794_v43 = vadd.f32 %v7793_v56, %v7634_v62  ;;  %v17861_v62 = vld [vmem:[#allocation58_spill] sm:$0xff]  ;;  %v17862_v56 = vld [vmem:[#allocation75_spill] sm:$0xff] }
0x1492   :  { %v7867_v31 = vpop.f32.mrb[30].mxu0  ;;  %v7938_v61 = vpop.f32.mrb[76].mxu1 }
0x1493   :  { %14387 = vtanh.f32 %v7794_v43  ;;  %v13979_v21 = vadd.f32 %v7867_v31, %v17312_v19  ;;  %v7869_v63 = vpop.f32.mrb[31].mxu0  ;;  %v11094_v26 = vpop.f32.mrb[77].mxu1  ;;  %v7960_v5 = vadd.f32 %v14417_v58, %v7938_v61  ;;  %v17863_v43 = vld [vmem:[#allocation77_spill] sm:$0xff]  ;;  %v17865_v31 = vld [vmem:[#allocation79_spill] sm:$0xff]  ;;  %v17866_v61 = vld [vmem:[#allocation80_spill] sm:$0xff] }
0x1494   :  { %14389 = vrcp.f32 %v7787_v54  ;;  %v13980_v12 = vadd.f32 %v7869_v63, %v17313_v34  ;;  %v17864_v54 = vld [vmem:[#allocation78_spill] sm:$0xff]  ;;  %v17868_v63 = vld [vmem:[#allocation83_spill] sm:$0xff]  ;;  %v17869_v26 = vld [vmem:[#allocation84_spill] sm:$0xff] }
0x1495   :  { %v8586_v7 = vmul.f32 -1.442695, %v13979_v21  ;;  %v17867_v21 = vld [vmem:[#allocation82_spill] sm:$0xff] }
0x1496   :  { %v8587_v23 = vmul.f32 -1.442695, %v13980_v12 }
0x1497   :  { %14391 = vpow2.f32 %v8586_v7  ;;  %v17870_v7 = vld [vmem:[#allocation85_spill] sm:$0xff] }
0x1498   :  { %14393 = vpow2.f32 %v8587_v23 }
0x149d   :  { %v14388_v14 = vpop.eup %14387 }
0x149e   :  { %v7796_v16 = vsub.f32 %v16862_v49, %v14388_v14  ;;  %v14390_v22 = vpop.eup %14389 }
0x14a0   :  { %v7797_v29 = vmul.f32 %v14390_v22, %v7796_v16 }
0x14a1   :  { %v14392_v30 = vpop.eup %14391 }
0x14a2   :  { %v7954_v38 = vadd.f32 1.0, %v14392_v30  ;;  %v16987_v40 = vadd.f32 %v14388_v14, %v7797_v29  ;;  %v14394_v19 = vpop.eup %14393 }
0x14a3   :  { %v7955_v52 = vadd.f32 1.0, %v14394_v19 }
0x14a4   :  { %14395 = vrcp.f32 %v7954_v38 }
0x14ae   :  { %v14396_v15 = vpop.eup %14395 }
0x14af   :  { %v7961_v34 = vmul.f32 %v14396_v15, %v7960_v5 }
0x14b1   :  { %v7962_v17 = vadd.f32 %v7961_v34, %v17858_v10 }
0x14b3   :  { %14397 = vtanh.f32 %v7962_v17 }
0x14b4   :  { %14399 = vrcp.f32 %v7955_v52 }
0x14bd   :  { %v14398_v57 = vpop.eup %14397 }
0x14be   :  { %v7964_v44 = vsub.f32 %v16867_v1, %v14398_v57  ;;  %v14400_v28 = vpop.eup %14399  ;;  %v17860_v1 = vld [vmem:[#allocation74_spill] sm:$0xff] }
0x14c0   :  { %v7965_v18 = vmul.f32 %v14400_v28, %v7964_v44 }
0x14c2   :  { %v7966_v60 = vadd.f32 %v14398_v57, %v7965_v18 }
0x14c4   :  { %8032 = vmatmul.mubr.f32.vlgmr.msra.gmra.mrb[78].mxu1 %v7966_v60  ;;  %11128 = vmatmul.mubr.f32.vlgmr.msra.gmra.mrb[92].mxu0 %v7966_v60 }
0x14c5   :  { %13864 = vmatpush1.bf16.msra.mxu1 %v17316_v11  ;;  %13895 = vmatpush3.bf16.msra.mxu0 %v17317_v13  ;;  %v8289_v11 = vld [vmem:[#allocation13 + $0x8] sm:$0xff]  ;;  %v8291_v13 = vld [vmem:[#allocation13 + $0x18] sm:$0xff] }
0x14c6   :  { %13866 = vmatprep.subr.bf16.mxu1 %v17318_v37  ;;  %13896 = vmatprep.subr.bf16.mxu0 %v17287_v46  ;;  %v8293_v37 = vld [vmem:[#allocation13 + $0x28] sm:$0xff] }
0x14c7   :  { %8172 = vmatprep.mubr.f32.mxu1 %v17289_v42  ;;  %11162 = vmatprep.mubr.msk.f32.mxu0 %vm14594_vm1, %v17289_v42  ;;  %v8288_v42 = vld [vmem:[#allocation13] sm:$0xff] }
0x14c9   :  { %13868 = vmatpush1.bf16.msra.mxu1 %v17319_v51  ;;  %13898 = vmatpush3.bf16.msra.mxu0 %v17320_v6  ;;  %v8296_v51 = vld [vmem:[#allocation13 + $0x40] sm:$0xff] }
0x14ca   :  { %13870 = vmatprep.subr.bf16.mxu1 %v17321_v39  ;;  %13899 = vmatprep.subr.bf16.mxu0 %v17287_v46  ;;  %v8298_v39 = vld [vmem:[#allocation13 + $0x50] sm:$0xff] }
0x14cd   :  { %13872 = vmatpush1.bf16.msra.mxu1 %v17322_v59  ;;  %13901 = vmatpush3.bf16.msra.mxu0 %v17323_v3  ;;  %v8299_v59 = vld [vmem:[#allocation13 + $0x58] sm:$0xff] }
0x14ce   :  { %13874 = vmatprep.subr.bf16.mxu1 %v17324_v9  ;;  %13902 = vmatprep.subr.bf16.mxu0 %v17287_v46  ;;  %v13937_v3 = vpack.c.bf16 %v8299_v59, %v8298_v39  ;;  %v8300_v9 = vld [vmem:[#allocation13 + $0x60] sm:$0xff] }
0x14d1   :  { %13876 = vmatpush1.bf16.msra.mxu1 %v17325_v24  ;;  %13904 = vmatpush3.bf16.msra.mxu0 %v17326_v53  ;;  %v8301_v24 = vld [vmem:[#allocation13 + $0x68] sm:$0xff] }
0x14d2   :  { %13878 = vmatprep.subr.bf16.mxu1 %v17327_v32  ;;  %13905 = vmatprep.subr.bf16.mxu0 %v17287_v46  ;;  %v13941_v53 = vpack.c.bf16 %v8301_v24, %v8300_v9  ;;  %v8302_v32 = vld [vmem:[#allocation13 + $0x70] sm:$0xff] }
0x14d5   :  { %13880 = vmatpush1.bf16.msra.mxu1 %v15067_v0  ;;  %13907 = vmatpush3.bf16.msra.mxu0 %v15069_v25  ;;  %v13917_v0 = vpack.c.bf16 %v8289_v11, %v8288_v42  ;;  %v8290_v25 = vld [vmem:[#allocation13 + $0x10] sm:$0xff] }
0x14d6   :  { %13882 = vmatprep.subr.bf16.mxu1 %v17328_v41  ;;  %13908 = vmatprep.subr.bf16.mxu0 %v17287_v46  ;;  %v8303_v41 = vld [vmem:[#allocation13 + $0x78] sm:$0xff] }
0x14d9   :  { %13884 = vmatpush1.bf16.msra.mxu1 %v17329_v45  ;;  %13910 = vmatpush3.bf16.msra.mxu0 %v15079_v50  ;;  %v13921_v50 = vpack.c.bf16 %v8291_v13, %v8290_v25  ;;  %v13945_v45 = vpack.c.bf16 %v8303_v41, %v8302_v32 }
0x14da   :  { %13886 = vmatprep.subr.bf16.mxu1 %v15083_v27  ;;  %13911 = vmatprep.subr.bf16.mxu0 %v17287_v46  ;;  %v8292_v27 = vld [vmem:[#allocation13 + $0x20] sm:$0xff] }
0x14dd   :  { %13888 = vmatpush1.bf16.msra.mxu1 %v15087_v20  ;;  %13913 = vmatpush3.bf16.msra.mxu0 %v15089_v2  ;;  %v17859_v20 = vld [vmem:[#allocation73_spill] sm:$0xff]  ;;  %v8294_v2 = vld [vmem:[#allocation13 + $0x30] sm:$0xff] }
0x14de   :  { %13890 = vmatprep.subr.bf16.mxu1 %v15093_v35  ;;  %13914 = vmatprep.subr.bf16.mxu0 %v17287_v46  ;;  %v13925_v46 = vpack.c.bf16 %v8293_v37, %v8292_v27  ;;  %v8295_v35 = vld [vmem:[#allocation13 + $0x38] sm:$0xff] }
0x14e1   :  { %13892 = vmatpush1.bf16.msra.mxu1 %v15097_v55  ;;  %13916 = vmatpush3.bf16.msra.mxu0 %v15099_v8  ;;  %v13929_v55 = vpack.c.bf16 %v8295_v35, %v8294_v2  ;;  %v8297_v8 = vld [vmem:[#allocation13 + $0x48] sm:$0xff] }
0x14e2   :  { %13918 = vmatprep.subr.bf16.mxu1 %v13917_v0  ;;  %v13933_v6 = vpack.c.bf16 %v8297_v8, %v8296_v51 }
0x14e4   :  { %8173 = vmatmul.mubr.f32.vlgmr.msra.gmra.mrb[78].mxu1 %v16987_v40  ;;  %11163 = vmatmul.mubr.f32.vlgmr.msra.gmra.mrb[94].mxu0 %v16987_v40 }
0x14e5   :  { %13920 = vmatpush3.bf16.msra.mxu1 %v13917_v0  ;;  %11197 = vmatprep.mubr.f32.mxu1 %v17859_v20 }
0x14e6   :  { %13922 = vmatprep.subr.bf16.mxu1 %v13921_v50 }
0x14e9   :  { %13924 = vmatpush3.bf16.msra.mxu1 %v13921_v50 }
0x14ea   :  { %13926 = vmatprep.subr.bf16.mxu1 %v13925_v46 }
0x14ed   :  { %13928 = vmatpush3.bf16.msra.mxu1 %v13925_v46 }
0x14ee   :  { %13930 = vmatprep.subr.bf16.mxu1 %v13929_v55 }
0x14f1   :  { %13932 = vmatpush3.bf16.msra.mxu1 %v13929_v55 }
0x14f2   :  { %13934 = vmatprep.subr.bf16.mxu1 %v13933_v6 }
0x14f5   :  { %13936 = vmatpush3.bf16.msra.mxu1 %v13933_v6 }
0x14f6   :  { %13938 = vmatprep.subr.bf16.mxu1 %v13937_v3 }
0x14f9   :  { %13940 = vmatpush3.bf16.msra.mxu1 %v13937_v3 }
0x14fa   :  { %13942 = vmatprep.subr.bf16.mxu1 %v13941_v53 }
0x14fd   :  { %13944 = vmatpush3.bf16.msra.mxu1 %v13941_v53 }
0x14fe   :  { %13946 = vmatprep.subr.bf16.mxu1 %v13945_v45 }
0x1501   :  { %13948 = vmatpush3.bf16.msra.mxu1 %v13945_v45 }
0x1504   :  { %11198 = vmatmul.mubr.f32.vlgmr.msra.gmra.mrb[80].mxu1 %v17860_v1 }
0x1505   :  { %11200 = vmatprep.mubr.f32.mxu1 %v17861_v62 }
0x1508   :  { %11201 = vmatmul.mubr.f32.gmra.mrb[82].mxu1 %v17862_v56 }
0x1509   :  { %11203 = vmatprep.mubr.f32.mxu1 %v17863_v43 }
0x150c   :  { %11204 = vmatmul.mubr.f32.gmra.mrb[84].mxu1 %v17864_v54 }
0x150d   :  { %11206 = vmatprep.mubr.f32.mxu1 %v17865_v31 }
0x1510   :  { %11207 = vmatmul.mubr.f32.gmra.mrb[86].mxu1 %v17866_v61 }
0x1511   :  { %11209 = vmatprep.mubr.f32.mxu1 %v17867_v21 }
0x1514   :  { %11210 = vmatmul.mubr.f32.gmra.mrb[88].mxu1 %v17868_v63 }
0x1515   :  { %11212 = vmatprep.mubr.f32.mxu1 %v17869_v26 }
0x1518   :  { %11213 = vmatmul.mubr.f32.gmra.mrb[90].mxu1 %v17870_v7 }
0x1519   :  { %11215 = vmatprep.mubr.f32.mxu1 %v16737_v36 }
0x151c   :  { %11216 = vmatmul.mubr.f32.gmra.mrb[92].mxu1 %v16862_v49 }
0x151d   :  { %11218 = vmatprep.mubr.f32.mxu1 %v16987_v40 }
0x1597   :  { %v8104_v12 = vpop.f32.mrb[92].mxu0 }
0x1598   :  { %v11129_v14 = vpop.f32.mrb[93].mxu0  ;;  %v8105_v10 = vadd.f32 %v8104_v12, %v15201_v33 }
0x15b7   :  { %v8174_v16 = vpop.f32.mrb[78].mxu1  ;;  %v8245_v22 = vpop.f32.mrb[94].mxu0 }
0x15b8   :  { %v14011_v23 = vadd.f32 %v8174_v16, %v17857_v47  ;;  %v8176_v29 = vpop.f32.mrb[79].mxu1  ;;  %v11164_v30 = vpop.f32.mrb[95].mxu0  ;;  %v8263_v49 = vadd.f32 %v17819_v4, %v8245_v22  ;;  %v8590_v47 = vld [vmem:[%s17077_s10] ss:$0 sm:$0xff]  ;;  %s14595_s10 = smov [#allocation15]  }
0x15b9   :  { %v14012_v19 = vadd.f32 %v8176_v29, %v17818_v48  ;;  %s8477_s17 = sshll.u32 %s14595_s10, 4  ;;  %s8478_s17 = int_to_ptr.vmem [resolvable:$true] %s8477_s17 }
0x15ba   :  { %v8588_v38 = vmul.f32 -1.442695, %v14011_v23  ;;  %s14550_s6 = scalar_lea.vmem %s8478_s17, 2048  ;;  %p14555_p7 = scmp.lt.s32.totalorder %s8478_s17, %s8478_s17 }
0x15bb   :  { %v8589_v58 = vmul.f32 -1.442695, %v14012_v19  ;;  %p14551_p6 = scmp.ne.s32.totalorder %s8478_s17, %s14550_s6  ;;  %p14556_p8 = scmp.lt.s32.totalorder %s14550_s6, %s14550_s6 }
0x15bc   :  { %14401 = vpow2.f32 %v8588_v38 }
0x15bd   :  { %14403 = vpow2.f32 %v8589_v58  ;;  %p14557_p9 = por %p14556_p8, %p14555_p7 }
0x15bf   :  { %p14558_p10 = pnand %p14557_p9, %p14551_p6 }
0x15c6   :  { %v14402_v5 = vpop.eup %14401 }
0x15c7   :  { %v8257_v15 = vadd.f32 1.0, %v14402_v5  ;;  %v14404_v36 = vpop.eup %14403 }
0x15c8   :  { %v8258_v57 = vadd.f32 1.0, %v14404_v36 }
0x15c9   :  { %14405 = vrcp.f32 %v8257_v15 }
0x15d3   :  { %v14406_v34 = vpop.eup %14405 }
0x15d4   :  { %v8264_v17 = vmul.f32 %v14406_v34, %v8263_v49 }
0x15d6   :  { %v8265_v52 = vadd.f32 %v8264_v17, %v8105_v10 }
0x15d7   :  { %v11199_v44 = vpop.f32.mrb[80].mxu1 }
0x15d8   :  { %14407 = vtanh.f32 %v8265_v52  ;;  %v8383_v48 = vadd.f32 %v11199_v44, %v8590_v47  ;;  %v8377_v28 = vpop.f32.mrb[81].mxu1 }
0x15d9   :  { %v8378_v18 = vadd.f32 %v8590_v47, %v8377_v28  ;;  %14409 = vrcp.f32 %v8258_v57 }
0x15da   :  { %8457 = vst [vmem:[#allocation15 + $0x8] sm:$0xff] %v8383_v48 }
0x15db   :  { %8456 = vst [vmem:[#allocation15] sm:$0xff] %v8378_v18  ;;  %v11202_v60 = vpop.f32.mrb[82].mxu1 }
0x15dc   :  { %v8393_v4 = vadd.f32 %v11202_v60, %v8590_v47  ;;  %v8387_v42 = vpop.f32.mrb[83].mxu1 }
0x15dd   :  { %v8388_v11 = vadd.f32 %v8590_v47, %v8387_v42 }
0x15de   :  { %8459 = vst [vmem:[#allocation15 + $0x18] sm:$0xff] %v8393_v4 }
0x15df   :  { %8458 = vst [vmem:[#allocation15 + $0x10] sm:$0xff] %v8388_v11  ;;  %v11205_v33 = vpop.f32.mrb[84].mxu1 }
0x15e0   :  { %v8403_v0 = vadd.f32 %v11205_v33, %v8590_v47  ;;  %v8397_v25 = vpop.f32.mrb[85].mxu1 }
0x15e1   :  { %v8398_v13 = vadd.f32 %v8590_v47, %v8397_v25 }
0x15e2   :  { %v14408_v50 = vpop.eup %14407  ;;  %8461 = vst [vmem:[#allocation15 + $0x28] sm:$0xff] %v8403_v0 }
0x15e3   :  { %8460 = vst [vmem:[#allocation15 + $0x20] sm:$0xff] %v8398_v13  ;;  %v11208_v27 = vpop.f32.mrb[86].mxu1  ;;  %v8267_v37 = vsub.f32 %v16987_v40, %v14408_v50  ;;  %v14410_v20 = vpop.eup %14409 }
0x15e4   :  { %v8413_v46 = vadd.f32 %v11208_v27, %v8590_v47  ;;  %v8407_v2 = vpop.f32.mrb[87].mxu1 }
0x15e5   :  { %v8408_v35 = vadd.f32 %v8590_v47, %v8407_v2  ;;  %v8268_v55 = vmul.f32 %v14410_v20, %v8267_v37 }
0x15e6   :  { %8463 = vst [vmem:[#allocation15 + $0x38] sm:$0xff] %v8413_v46 }
0x15e7   :  { %8462 = vst [vmem:[#allocation15 + $0x30] sm:$0xff] %v8408_v35  ;;  %v11211_v51 = vpop.f32.mrb[88].mxu1  ;;  %v8269_v8 = vadd.f32 %v14408_v50, %v8268_v55 }
0x15e8   :  { %v8423_v6 = vadd.f32 %v11211_v51, %v8590_v47  ;;  %v8417_v39 = vpop.f32.mrb[89].mxu1 }
0x15e9   :  { %v8418_v59 = vadd.f32 %v8590_v47, %v8417_v39  ;;  %11219 = vmatmul.mubr.f32.gmra.mrb[94].mxu1 %v8269_v8 }
0x15ea   :  { %8465 = vst [vmem:[#allocation15 + $0x48] sm:$0xff] %v8423_v6 }
0x15eb   :  { %8464 = vst [vmem:[#allocation15 + $0x40] sm:$0xff] %v8418_v59  ;;  %v11214_v3 = vpop.f32.mrb[90].mxu1 }
0x15ec   :  { %v8433_v9 = vadd.f32 %v11214_v3, %v8590_v47  ;;  %v8427_v24 = vpop.f32.mrb[91].mxu1 }
0x15ed   :  { %v8428_v53 = vadd.f32 %v8590_v47, %v8427_v24 }
0x15ee   :  { %8467 = vst [vmem:[#allocation15 + $0x58] sm:$0xff] %v8433_v9 }
0x15ef   :  { %8466 = vst [vmem:[#allocation15 + $0x50] sm:$0xff] %v8428_v53  ;;  %v11217_v40 = vpop.f32.mrb[92].mxu1 }
0x15f0   :  { %v8443_v32 = vadd.f32 %v11217_v40, %v8590_v47  ;;  %v8437_v41 = vpop.f32.mrb[93].mxu1 }
0x15f1   :  { %v8438_v45 = vadd.f32 %v8590_v47, %v8437_v41 }
0x15f2   :  { %8469 = vst [vmem:[#allocation15 + $0x68] sm:$0xff] %v8443_v32 }
0x15f3   :  { %8468 = vst [vmem:[#allocation15 + $0x60] sm:$0xff] %v8438_v45 }
0x16bc   :  { %v11220_v1 = vpop.f32.mrb[94].mxu1 }
0x16bd   :  { %v8453_v62 = vadd.f32 %v11220_v1, %v8590_v47  ;;  %v8447_v56 = vpop.f32.mrb[95].mxu1 }
0x16be   :  { %v8448_v43 = vadd.f32 %v8590_v47, %v8447_v56 }
0x16bf   :  { %8471 = vst [vmem:[#allocation15 + $0x78] sm:$0xff] %v8453_v62 }
0x16c0   :  { %8470 = vst [vmem:[#allocation15 + $0x70] sm:$0xff] %v8448_v43 }
0x16c1   :  { %14561 = shalt.err (!%p14558_p10)
}
0x16c2   :  { %s14562_s28 = scalar_lea.hbm %s17078_s11, 2048 }
0x16c3   :  { %p14563_p11 = scmp.ne.s32.totalorder %s17078_s11, %s14562_s28  ;;  %p14566_p12 = scmp.lt.u32.totalorder %s14562_s28, %s17078_s11 }
0x16c5   :  { %p14568_p13 = pnand %p14566_p12, %p14563_p11 }
0x16c7   :  { %14571 = shalt.err (!%p14568_p13)
}
0x16c8   :  { %8483 = dma.vmem_to_hbm [thread:$0]  %s8478_s17, 2048, %s17078_s11, [#allocation6], %s14587_s5, %s14587_s5, %s14588_s13  }
0x16c9   :  { %14580 = dma.done.wait [#allocation6], 2048  }
0x16ca   :  { %14581 = vsyncadd [#allocation6], 4294965248 }
0x16cb   :  { %8487 = vsyncpa [#allocation5], 1 }
0x16cc   :  { %8488 = vsyncpa [#allocation8], 1 }
0x16cd   :  { %8489 = vsyncpa [#allocation11], 1 }
0x16ce   :  { %8490 = vsyncpa [#allocation14], 1 }
0x16cf   :  { %8491 = vsyncpa [#allocation6], 1 }

</bundles_post_ra>
